<compile_context>
chip_gen: v5e
topology: v5e:2x2
jax: 0.10.0
libtpu: 0.0.40
codegen_flags: <defaults>
</compile_context>

<pallas_src>
import functools

import jax
import jax.numpy as jnp
from jax.experimental import pallas as pl
from jax.experimental.pallas import tpu as pltpu

NEG_SLOPE = 0.01        # F.leaky_relu default negative_slope
LOG_STD_MIN = -20.0
LOG_STD_MAX = 20.0      # torch.clamp(log_stdev, -20, 20)


def _leaky_relu(x):
    return jnp.where(x >= 0, x, NEG_SLOPE * x)


# --------------------------------------------------------------------------
# Pallas kernels (each call is one full-array block: grid=(1,))
# --------------------------------------------------------------------------
def _gemm_bias_act_kernel(a_ref, w_ref, b_ref, o_ref, *, act):
    """o = act(A @ W + b); A cast to W's dtype (bf16) for the MXU, f32 accum."""
    a = a_ref[...]
    w = w_ref[...]
    if a.dtype != w.dtype:
        a = a.astype(w.dtype)
    acc = jnp.dot(a, w, preferred_element_type=jnp.float32) + b_ref[...]
    if act == "leaky_relu":
        acc = _leaky_relu(acc)
    o_ref[...] = acc.astype(o_ref.dtype)


def _encode_sample_develop_kernel(flat_ref, wz_ref, bz_ref, noise_ref,
                                  wd_ref, bd_ref,
                                  mean_ref, logvar_ref, dev_ref, *, latent):
    """Fused: [z_mean|z_log_var] GEMM -> z = noise*exp(.5*logvar)+mean ->
    z_develop GEMM + leaky_relu.  Saves a kernel launch and the HBM round trip
    of z; the z_develop weight DMA overlaps the z-head matmul."""
    flat = flat_ref[...]
    wz = wz_ref[...]
    if flat.dtype != wz.dtype:
        flat = flat.astype(wz.dtype)
    acc = jnp.dot(flat, wz, preferred_element_type=jnp.float32) + bz_ref[...]
    mean = acc[:, :latent]
    logvar = acc[:, latent:]
    mean_ref[...] = mean
    logvar_ref[...] = logvar
    z = noise_ref[...] * jnp.exp(0.5 * logvar) + mean
    wd = wd_ref[...]
    dev = jnp.dot(z.astype(wd.dtype), wd,
                  preferred_element_type=jnp.float32) + bd_ref[...]
    dev_ref[...] = _leaky_relu(dev).astype(dev_ref.dtype)


def _dual_convt_head_kernel(a_ref, wm_ref, bm_ref, ws_ref, bs_ref, m_ref, s_ref):
    """convT1_mean (identity) + convT1_logstdev (clamp+exp) heads on one A pass.
    Separate weight blocks keep exp off the mean head (no iota/select)."""
    a = a_ref[...]
    wm = wm_ref[...]
    if a.dtype != wm.dtype:
        a = a.astype(wm.dtype)
    m = jnp.dot(a, wm, preferred_element_type=jnp.float32) + bm_ref[...]
    m_ref[...] = m.astype(m_ref.dtype)
    ls = jnp.dot(a, ws_ref[...], preferred_element_type=jnp.float32) + bs_ref[...]
    s_ref[...] = jnp.exp(jnp.clip(ls, LOG_STD_MIN, LOG_STD_MAX)).astype(s_ref.dtype)


# --------------------------------------------------------------------------
# pallas_call wrappers
# --------------------------------------------------------------------------
def _single_block_call(kernel_fn, inputs, out_shape, *, fuse_a=False, cost=None):
    """One pallas_call, single grid step, full-array blocks.

    All GEMMs here are tiny (<=1 MiB weights, <=0.5 MiB activations), so a
    single block minimizes per-step pipeline overhead and dispatches.  v5e/v6e
    have one TensorCore (the old 2-block M split was pure overhead); on v7x
    the per-block work is too small to pay for megacore sharding.
    `fuse_a=True` lets XLA fuse the pad/reshape/transpose patch-extraction
    producer into operand 0 instead of materializing it in HBM.
    """
    zero2 = lambda i: (0, 0)
    in_specs = [pl.BlockSpec(x.shape, zero2) for x in inputs]
    if isinstance(out_shape, tuple):
        out_specs = tuple(pl.BlockSpec(s.shape, zero2) for s in out_shape)
    else:
        out_specs = pl.BlockSpec(out_shape.shape, zero2)
    allow = [True] + [False] * (len(inputs) - 1) if fuse_a else None
    return pl.pallas_call(
        kernel_fn,
        out_shape=out_shape,
        grid=(1,),
        in_specs=in_specs,
        out_specs=out_specs,
        compiler_params=pltpu.CompilerParams(
            dimension_semantics=("arbitrary",),
            allow_input_fusion=allow,
        ),
        cost_estimate=cost,
    )(*inputs)


def gemm_bias_act(a, w, bias, *, act, out_dtype, fuse_a=False):
    """out = act(a @ w + bias);  a:(M,K)  w:(K,N) bf16  bias:(1,N) f32."""
    M, K = a.shape
    N = w.shape[1]
    cost = pl.CostEstimate(
        flops=2 * M * K * N,
        transcendentals=0,
        bytes_accessed=int(a.size * a.dtype.itemsize + w.size * w.dtype.itemsize
                           + bias.size * 4 + M * N * jnp.dtype(out_dtype).itemsize),
    )
    return _single_block_call(
        functools.partial(_gemm_bias_act_kernel, act=act),
        [a, w, bias],
        jax.ShapeDtypeStruct((M, N), out_dtype),
        fuse_a=fuse_a, cost=cost)


def encode_sample_develop(flat, wz, bz, noise, wd, bd, latent):
    M, K = flat.shape
    two_l = wz.shape[1]
    D = wd.shape[1]
    cost = pl.CostEstimate(
        flops=2 * M * K * two_l + 2 * M * latent * D,
        transcendentals=M * latent,
        bytes_accessed=int(flat.size * flat.dtype.itemsize
                           + wz.size * wz.dtype.itemsize
                           + wd.size * wd.dtype.itemsize
                           + 4 * M * (2 * latent + latent) + 2 * M * D),
    )
    out_shape = (jax.ShapeDtypeStruct((M, latent), jnp.float32),   # mean
                 jax.ShapeDtypeStruct((M, latent), jnp.float32),   # logvar
                 jax.ShapeDtypeStruct((M, D), jnp.bfloat16))       # dev (leaky_relu'd)
    return _single_block_call(
        functools.partial(_encode_sample_develop_kernel, latent=latent),
        [flat, wz, bz, noise, wd, bd], out_shape, fuse_a=True, cost=cost)


def convt_dual_head(a, wm, bm, ws, bs, *, fuse_a=False):
    M, K = a.shape
    N = wm.shape[1]
    cost = pl.CostEstimate(
        flops=4 * M * K * N,
        transcendentals=M * N,                       # exp only on the logstdev head
        bytes_accessed=int(a.size * a.dtype.itemsize
                           + (wm.size + ws.size) * wm.dtype.itemsize + 8 * M * N),
    )
    out_shape = (jax.ShapeDtypeStruct((M, N), jnp.float32),
                 jax.ShapeDtypeStruct((M, N), jnp.float32))
    return _single_block_call(
        _dual_convt_head_kernel, [a, wm, bm, ws, bs], out_shape,
        fuse_a=fuse_a, cost=cost)


# --------------------------------------------------------------------------
# ConvVAE forward (mode='continuous').  Convs lower to patch-GEMMs: kernel=3,
# stride=3, padding=1 => non-overlapping 3x3 patches; patch glue stays in XLA
# but is allowed to fuse into the pallas_call A operand.
# --------------------------------------------------------------------------
def conv_vae_forward(prep, x, noise):
    n, C, H, W = x.shape
    latent = noise.shape[1]
    assert (H + 2) % 3 == 0 and (W + 2) % 3 == 0
    h1s, w1s = (H + 2) // 3, (W + 2) // 3            # 22, 22
    h2s, w2s = (h1s + 2) // 3, (w1s + 2) // 3        # 8, 8
    c1 = prep["conv1_wm"].shape[1]                   # 16
    c2 = prep["conv2_wm"].shape[1]                   # 128
    ct2 = prep["convT2_wm"].shape[1] // 9            # 16

    # ---- encoder ----
    # conv1 patch-GEMM straight from NCHW input; columns ordered (cin,kh,kw).
    xp = jnp.pad(x, ((0, 0), (0, 0), (1, 1), (1, 1)))
    a1 = xp.reshape(n, C, h1s, 3, w1s, 3).transpose(0, 2, 4, 1, 3, 5)
    a1 = a1.reshape(n * h1s * w1s, C * 9)
    y1 = gemm_bias_act(a1, prep["conv1_wm"], prep["conv1_b"],
                       act="leaky_relu", out_dtype=jnp.bfloat16, fuse_a=True)

    # conv2 patch-GEMM on the NHWC conv1 output; columns ordered (kh,kw,cin).
    h1 = y1.reshape(n, h1s, w1s, c1)
    xp2 = jnp.pad(h1, ((0, 0), (1, 1), (1, 1), (0, 0)))
    a2 = xp2.reshape(n, h2s, 3, w2s, 3, c1).transpose(0, 1, 3, 2, 4, 5)
    a2 = a2.reshape(n * h2s * w2s, 9 * c1)
    y2 = gemm_bias_act(a2, prep["conv2_wm"], prep["conv2_b"],
                       act="leaky_relu", out_dtype=jnp.bfloat16, fuse_a=True)

    # ---- fused z heads + reparameterize + z_develop ----
    # zhead_w rows were permuted offline to NHWC order -> plain reshape here.
    flat = y2.reshape(n, h2s * w2s * c2)
    mean, logvar, dev = encode_sample_develop(
        flat, prep["zhead_w"], prep["zhead_b"], noise,
        prep["z_develop_w"], prep["z_develop_b"], latent)

    # ---- decoder ----
    # z_develop_w columns were permuted offline so `dev` is already NHWC-flat.
    a3 = dev.reshape(n * h2s * w2s, c2)
    y3 = gemm_bias_act(a3, prep["convT2_wm"], prep["convT2_b"],
                       act="leaky_relu", out_dtype=jnp.bfloat16, fuse_a=True)

    # scatter convT2 output (cols ordered (kh,kw,cout)) and crop padding=1
    d3 = y3.reshape(n, h2s, w2s, 3, 3, ct2).transpose(0, 1, 3, 2, 4, 5)
    d3 = d3.reshape(n, 3 * h2s, 3 * w2s, ct2)[:, 1:-1, 1:-1, :]     # (n,22,22,16)
    a4 = d3.reshape(n * h1s * w1s, ct2)

    m, stdev = convt_dual_head(a4, prep["head_mean_w"], prep["head_mean_b"],
                               prep["head_logstd_w"], prep["head_logstd_b"],
                               fuse_a=True)                          # (968,27) f32

    # head columns are ordered (cout,kh,kw) so the scatter lands directly in NCHW
    def scatter_nchw(y):
        y = y.reshape(n, h1s, w1s, C, 3, 3).transpose(0, 3, 1, 4, 2, 5)
        y = y.reshape(n, C, 3 * h1s, 3 * w1s)
        return y[:, :, 1:-1, 1:-1]

    return (scatter_nchw(m), scatter_nchw(stdev)), mean, logvar


# --------------------------------------------------------------------------
# Parameter init (torch layout) + one-time prep into GEMM-ready tensors
# --------------------------------------------------------------------------
def init_params(key, C, latent_dim):
    ks = jax.random.split(key, 16)

    def u(k, shape, bound):
        return jax.random.uniform(k, shape, jnp.float32, -bound, bound)

    p = {}
    p["conv1_w"] = u(ks[0], (16, C, 3, 3), 1.0 / (C * 9) ** 0.5)
    p["conv1_b"] = u(ks[1], (16,), 1.0 / (C * 9) ** 0.5)
    p["conv2_w"] = u(ks[2], (128, 16, 3, 3), 1.0 / (16 * 9) ** 0.5)
    p["conv2_b"] = u(ks[3], (128,), 1.0 / (16 * 9) ** 0.5)
    p["z_mean_w"] = u(ks[4], (8192, latent_dim), 1.0 / 8192 ** 0.5)      # (in,out)
    p["z_mean_b"] = u(ks[5], (latent_dim,), 1.0 / 8192 ** 0.5)
    p["z_log_var_w"] = u(ks[6], (8192, latent_dim), 1.0 / 8192 ** 0.5)
    p["z_log_var_b"] = u(ks[7], (latent_dim,), 1.0 / 8192 ** 0.5)
    p["z_develop_w"] = u(ks[8], (latent_dim, 8192), 1.0 / latent_dim ** 0.5)
    p["z_develop_b"] = u(ks[9], (8192,), 1.0 / latent_dim ** 0.5)
    p["convT2_w"] = u(ks[10], (128, 16, 3, 3), 1.0 / (128 * 9) ** 0.5)   # (Cin,Cout,3,3)
    p["convT2_b"] = u(ks[11], (16,), 1.0 / (128 * 9) ** 0.5)
    p["convT1_mean_w"] = u(ks[12], (16, C, 3, 3), 0.003)                 # uniform_(-.003,.003)
    p["convT1_mean_b"] = u(ks[13], (C,), 1.0 / (16 * 9) ** 0.5)
    p["convT1_logstdev_w"] = u(ks[14], (16, C, 3, 3), 0.003)
    p["convT1_logstdev_b"] = u(ks[15], (C,), 1.0 / (16 * 9) ** 0.5)
    return p


def prepare_params(p):
    """Torch-layout params -> GEMM-ready tensors (done once, outside the jit).

    bf16 weights (f32 MXU accumulation in-kernel): ~1e-2 relative deviation vs
    the f32 PyTorch reference -- a deliberate numerics choice, not bit-matching.
    """
    C = p["conv1_w"].shape[1]
    latent = p["z_mean_w"].shape[1]
    prep = {}

    # conv1: (Cout,Cin,3,3) -> rows (cin,kh,kw); A is built straight from NCHW.
    prep["conv1_wm"] = p["conv1_w"].transpose(1, 2, 3, 0).reshape(C * 9, 16).astype(jnp.bfloat16)
    prep["conv1_b"] = p["conv1_b"].reshape(1, 16)
    # conv2: rows (kh,kw,cin); A is NHWC patches of conv1's output.
    prep["conv2_wm"] = p["conv2_w"].transpose(2, 3, 1, 0).reshape(144, 128).astype(jnp.bfloat16)
    prep["conv2_b"] = p["conv2_b"].reshape(1, 128)

    # z heads: concat mean|logvar; permute rows (c,h,w)->(h,w,c) so the NHWC
    # flatten of conv2's output multiplies it with no transpose.
    wz = jnp.concatenate([p["z_mean_w"], p["z_log_var_w"]], axis=1)      # (8192, 2L)
    wz = wz.reshape(128, 8, 8, 2 * latent).transpose(1, 2, 0, 3).reshape(8192, 2 * latent)
    prep["zhead_w"] = wz.astype(jnp.bfloat16)
    prep["zhead_b"] = jnp.concatenate([p["z_mean_b"], p["z_log_var_b"]]).reshape(1, 2 * latent)
    # TODO(synk): on v7x these two 8192-wide weights could be fp8 with per-column
    # scales to halve the weight-streaming bytes; kept bf16 for all generations.

    # z_develop: permute columns (c,h,w)->(h,w,c) so the output is NHWC-flat.
    wd = p["z_develop_w"].reshape(latent, 128, 8, 8).transpose(0, 2, 3, 1).reshape(latent, 8192)
    prep["z_develop_w"] = wd.astype(jnp.bfloat16)
    prep["z_develop_b"] = p["z_develop_b"].reshape(128, 8, 8).transpose(1, 2, 0).reshape(1, 8192)

    # convT2: (Cin,Cout,3,3) -> cols (kh,kw,cout); bias tiled per (kh,kw).
    prep["convT2_wm"] = p["convT2_w"].transpose(0, 2, 3, 1).reshape(128, 144).astype(jnp.bfloat16)
    prep["convT2_b"] = jnp.tile(p["convT2_b"], 9).reshape(1, 144)

    # output heads: (Cin=16,Cout,3,3) -> cols (cout,kh,kw) so the final scatter
    # lands directly in NCHW; bias repeated per cout.
    prep["head_mean_w"] = p["convT1_mean_w"].reshape(16, C * 9).astype(jnp.bfloat16)
    prep["head_mean_b"] = jnp.repeat(p["convT1_mean_b"], 9).reshape(1, C * 9)
    prep["head_logstd_w"] = p["convT1_logstdev_w"].reshape(16, C * 9).astype(jnp.bfloat16)
    prep["head_logstd_b"] = jnp.repeat(p["convT1_logstdev_b"], 9).reshape(1, C * 9)
    return prep


if __name__ == "__main__":
    # The hard-coded 8192-wide linears (128 ch * 8 * 8) plus the two stride-3
    # convs force a 64x64 input, so the spatial size is fixed at 64.
    batch, C, latent_dim, H = 2, 3, 32, 64

    key = jax.random.PRNGKey(0)
    kp, kx, kn = jax.random.split(key, 3)
    params = init_params(kp, C, latent_dim)
    prep = prepare_params(params)
    x = jax.random.normal(kx, (batch, C, H, H), jnp.float32)
    # TODO(synk): torch.randn noise uses torch's PRNG stream; here the gaussian
    # noise is an input drawn from JAX's PRNG (same distribution, different stream).
    noise = jax.random.normal(kn, (batch, latent_dim), jnp.float32)

    fwd = jax.jit(conv_vae_forward)
    (m, stdev), mean, logvar = fwd(prep, x, noise)
    jax.block_until_ready((m, stdev, mean, logvar))

    assert m.shape == (batch, C, H, H) and stdev.shape == (batch, C, H, H)
    assert mean.shape == (batch, latent_dim) and logvar.shape == (batch, latent_dim)
    assert bool(jnp.all(stdev > 0)) and bool(jnp.all(jnp.isfinite(m)))
    assert bool(jnp.all(jnp.isfinite(mean))) and bool(jnp.all(jnp.isfinite(logvar)))
    print("KERNEL_OK")
</pallas_src>

<mosaic_0001>
module attributes {stable_mosaic.version = 11 : i64} {
  func.func @_gemm_bias_act_kernel(%arg0: i32, %arg1: memref<968x27xf32, #tpu.memory_space<vmem>>, %arg2: memref<27x16xbf16, #tpu.memory_space<vmem>>, %arg3: memref<1x16xf32, #tpu.memory_space<vmem>>, %arg4: memref<968x16xbf16, #tpu.memory_space<vmem>>) attributes {dimension_semantics = [#tpu.dimension_semantics<arbitrary>], iteration_bounds = array<i64: 1>, scalar_prefetch = 0 : i64, scratch_operands = 0 : i64, tpu.core_type = #tpu.core_type<tc>, window_params = [{pipeline_mode = #tpu.pipeline_mode<synchronous>, transform_indices = @transform_0, window_bounds = array<i64: 968, 27>}, {pipeline_mode = #tpu.pipeline_mode<synchronous>, transform_indices = @transform_1, window_bounds = array<i64: 27, 16>}, {pipeline_mode = #tpu.pipeline_mode<synchronous>, transform_indices = @transform_2, window_bounds = array<i64: 1, 16>}, {pipeline_mode = #tpu.pipeline_mode<synchronous>, transform_indices = @transform_3, window_bounds = array<i64: 968, 16>}]} {
    %c0 = arith.constant 0 : index
    %c0_0 = arith.constant 0 : index
    %0 = vector.load %arg1[%c0, %c0_0] : memref<968x27xf32, #tpu.memory_space<vmem>>, vector<968x27xf32>
    %c0_1 = arith.constant 0 : index
    %c0_2 = arith.constant 0 : index
    %1 = vector.load %arg2[%c0_1, %c0_2] : memref<27x16xbf16, #tpu.memory_space<vmem>>, vector<27x16xbf16>
    %2 = arith.truncf %0 : vector<968x27xf32> to vector<968x27xbf16>
    %cst = arith.constant dense<0.000000e+00> : vector<968x16xf32>
    %3 = tpu.matmul %2, %1, %cst {dimension_numbers = #tpu.dot_dimension_numbers<[1], [0], [0], [1], [0, 0, 1, 1], [], []>} : vector<968x27xbf16>, vector<27x16xbf16>, vector<968x16xf32> -> vector<968x16xf32>
    %c0_3 = arith.constant 0 : index
    %c0_4 = arith.constant 0 : index
    %4 = vector.load %arg3[%c0_3, %c0_4] : memref<1x16xf32, #tpu.memory_space<vmem>>, vector<1x16xf32>
    %5 = vector.broadcast %4 : vector<1x16xf32> to vector<968x16xf32>
    %6 = arith.addf %3, %5 : vector<968x16xf32>
    %cst_5 = arith.constant 0.000000e+00 : f32
    %7 = vector.broadcast %cst_5 : f32 to vector<968x16xf32>
    %8 = arith.cmpf oge, %6, %7 : vector<968x16xf32>
    %cst_6 = arith.constant 0.00999999977 : f32
    %9 = vector.broadcast %cst_6 : f32 to vector<968x16xf32>
    %10 = arith.mulf %9, %6 : vector<968x16xf32>
    %11 = arith.select %8, %6, %10 : vector<968x16xi1>, vector<968x16xf32>
    %12 = arith.truncf %11 : vector<968x16xf32> to vector<968x16xbf16>
    %c0_7 = arith.constant 0 : index
    %c0_8 = arith.constant 0 : index
    %13 = vector.load %arg4[%c0_7, %c0_8] : memref<968x16xbf16, #tpu.memory_space<vmem>>, vector<968x16xbf16>
    tpu.vector_store %arg4[%c0_7, %c0_8], %12 {strides = array<i32>} : memref<968x16xbf16, #tpu.memory_space<vmem>>, vector<968x16xbf16>,
    return
  }
  func.func @transform_0(%arg0: i32) -> (i32, i32) {
    %c0_i32 = arith.constant 0 : i32
    %c0_i32_0 = arith.constant 0 : i32
    %c0_i32_1 = arith.constant 0 : i32
    return %c0_i32, %c0_i32_0 : i32, i32
  }
  func.func @transform_1(%arg0: i32) -> (i32, i32) {
    %c0_i32 = arith.constant 0 : i32
    %c0_i32_0 = arith.constant 0 : i32
    %c0_i32_1 = arith.constant 0 : i32
    return %c0_i32, %c0_i32_0 : i32, i32
  }
  func.func @transform_2(%arg0: i32) -> (i32, i32) {
    %c0_i32 = arith.constant 0 : i32
    %c0_i32_0 = arith.constant 0 : i32
    %c0_i32_1 = arith.constant 0 : i32
    return %c0_i32, %c0_i32_0 : i32, i32
  }
  func.func @transform_3(%arg0: i32) -> (i32, i32) {
    %c0_i32 = arith.constant 0 : i32
    %c0_i32_0 = arith.constant 0 : i32
    %c0_i32_1 = arith.constant 0 : i32
    return %c0_i32, %c0_i32_0 : i32, i32
  }
}

module attributes {stable_mosaic.version = 11 : i64} {
  func.func @_gemm_bias_act_kernel(%arg0: i32, %arg1: memref<128x144xbf16, #tpu.memory_space<vmem>>, %arg2: memref<144x128xbf16, #tpu.memory_space<vmem>>, %arg3: memref<1x128xf32, #tpu.memory_space<vmem>>, %arg4: memref<128x128xbf16, #tpu.memory_space<vmem>>) attributes {dimension_semantics = [#tpu.dimension_semantics<arbitrary>], iteration_bounds = array<i64: 1>, scalar_prefetch = 0 : i64, scratch_operands = 0 : i64, tpu.core_type = #tpu.core_type<tc>, window_params = [{pipeline_mode = #tpu.pipeline_mode<synchronous>, transform_indices = @transform_0, window_bounds = array<i64: 128, 144>}, {pipeline_mode = #tpu.pipeline_mode<synchronous>, transform_indices = @transform_1, window_bounds = array<i64: 144, 128>}, {pipeline_mode = #tpu.pipeline_mode<synchronous>, transform_indices = @transform_2, window_bounds = array<i64: 1, 128>}, {pipeline_mode = #tpu.pipeline_mode<synchronous>, transform_indices = @transform_3, window_bounds = array<i64: 128, 128>}]} {
    %c0 = arith.constant 0 : index
    %c0_0 = arith.constant 0 : index
    %0 = vector.load %arg1[%c0, %c0_0] : memref<128x144xbf16, #tpu.memory_space<vmem>>, vector<128x144xbf16>
    %c0_1 = arith.constant 0 : index
    %c0_2 = arith.constant 0 : index
    %1 = vector.load %arg2[%c0_1, %c0_2] : memref<144x128xbf16, #tpu.memory_space<vmem>>, vector<144x128xbf16>
    %cst = arith.constant dense<0.000000e+00> : vector<128x128xf32>
    %2 = tpu.matmul %0, %1, %cst {dimension_numbers = #tpu.dot_dimension_numbers<[1], [0], [0], [1], [0, 0, 1, 1], [], []>} : vector<128x144xbf16>, vector<144x128xbf16>, vector<128x128xf32> -> vector<128x128xf32>
    %c0_3 = arith.constant 0 : index
    %c0_4 = arith.constant 0 : index
    %3 = vector.load %arg3[%c0_3, %c0_4] : memref<1x128xf32, #tpu.memory_space<vmem>>, vector<1x128xf32>
    %4 = vector.broadcast %3 : vector<1x128xf32> to vector<128x128xf32>
    %5 = arith.addf %2, %4 : vector<128x128xf32>
    %cst_5 = arith.constant 0.000000e+00 : f32
    %6 = vector.broadcast %cst_5 : f32 to vector<128x128xf32>
    %7 = arith.cmpf oge, %5, %6 : vector<128x128xf32>
    %cst_6 = arith.constant 0.00999999977 : f32
    %8 = vector.broadcast %cst_6 : f32 to vector<128x128xf32>
    %9 = arith.mulf %8, %5 : vector<128x128xf32>
    %10 = arith.select %7, %5, %9 : vector<128x128xi1>, vector<128x128xf32>
    %11 = arith.truncf %10 : vector<128x128xf32> to vector<128x128xbf16>
    %c0_7 = arith.constant 0 : index
    %c0_8 = arith.constant 0 : index
    %12 = vector.load %arg4[%c0_7, %c0_8] : memref<128x128xbf16, #tpu.memory_space<vmem>>, vector<128x128xbf16>
    tpu.vector_store %arg4[%c0_7, %c0_8], %11 {strides = array<i32>} : memref<128x128xbf16, #tpu.memory_space<vmem>>, vector<128x128xbf16>,
    return
  }
  func.func @transform_0(%arg0: i32) -> (i32, i32) {
    %c0_i32 = arith.constant 0 : i32
    %c0_i32_0 = arith.constant 0 : i32
    %c0_i32_1 = arith.constant 0 : i32
    return %c0_i32, %c0_i32_0 : i32, i32
  }
  func.func @transform_1(%arg0: i32) -> (i32, i32) {
    %c0_i32 = arith.constant 0 : i32
    %c0_i32_0 = arith.constant 0 : i32
    %c0_i32_1 = arith.constant 0 : i32
    return %c0_i32, %c0_i32_0 : i32, i32
  }
  func.func @transform_2(%arg0: i32) -> (i32, i32) {
    %c0_i32 = arith.constant 0 : i32
    %c0_i32_0 = arith.constant 0 : i32
    %c0_i32_1 = arith.constant 0 : i32
    return %c0_i32, %c0_i32_0 : i32, i32
  }
  func.func @transform_3(%arg0: i32) -> (i32, i32) {
    %c0_i32 = arith.constant 0 : i32
    %c0_i32_0 = arith.constant 0 : i32
    %c0_i32_1 = arith.constant 0 : i32
    return %c0_i32, %c0_i32_0 : i32, i32
  }
}

module attributes {stable_mosaic.version = 11 : i64} {
  func.func @_encode_sample_develop_kernel(%arg0: i32, %arg1: memref<2x8192xbf16, #tpu.memory_space<vmem>>, %arg2: memref<8192x64xbf16, #tpu.memory_space<vmem>>, %arg3: memref<1x64xf32, #tpu.memory_space<vmem>>, %arg4: memref<2x32xf32, #tpu.memory_space<vmem>>, %arg5: memref<32x8192xbf16, #tpu.memory_space<vmem>>, %arg6: memref<1x8192xf32, #tpu.memory_space<vmem>>, %arg7: memref<2x32xf32, #tpu.memory_space<vmem>>, %arg8: memref<2x32xf32, #tpu.memory_space<vmem>>, %arg9: memref<2x8192xbf16, #tpu.memory_space<vmem>>) attributes {dimension_semantics = [#tpu.dimension_semantics<arbitrary>], iteration_bounds = array<i64: 1>, scalar_prefetch = 0 : i64, scratch_operands = 0 : i64, tpu.core_type = #tpu.core_type<tc>, window_params = [{pipeline_mode = #tpu.pipeline_mode<synchronous>, transform_indices = @transform_0, window_bounds = array<i64: 2, 8192>}, {pipeline_mode = #tpu.pipeline_mode<synchronous>, transform_indices = @transform_1, window_bounds = array<i64: 8192, 64>}, {pipeline_mode = #tpu.pipeline_mode<synchronous>, transform_indices = @transform_2, window_bounds = array<i64: 1, 64>}, {pipeline_mode = #tpu.pipeline_mode<synchronous>, transform_indices = @transform_3, window_bounds = array<i64: 2, 32>}, {pipeline_mode = #tpu.pipeline_mode<synchronous>, transform_indices = @transform_4, window_bounds = array<i64: 32, 8192>}, {pipeline_mode = #tpu.pipeline_mode<synchronous>, transform_indices = @transform_5, window_bounds = array<i64: 1, 8192>}, {pipeline_mode = #tpu.pipeline_mode<synchronous>, transform_indices = @transform_6, window_bounds = array<i64: 2, 32>}, {pipeline_mode = #tpu.pipeline_mode<synchronous>, transform_indices = @transform_7, window_bounds = array<i64: 2, 32>}, {pipeline_mode = #tpu.pipeline_mode<synchronous>, transform_indices = @transform_8, window_bounds = array<i64: 2, 8192>}]} {
    %c0 = arith.constant 0 : index
    %c0_0 = arith.constant 0 : index
    %0 = vector.load %arg1[%c0, %c0_0] : memref<2x8192xbf16, #tpu.memory_space<vmem>>, vector<2x8192xbf16>
    %c0_1 = arith.constant 0 : index
    %c0_2 = arith.constant 0 : index
    %1 = vector.load %arg2[%c0_1, %c0_2] : memref<8192x64xbf16, #tpu.memory_space<vmem>>, vector<8192x64xbf16>
    %cst = arith.constant dense<0.000000e+00> : vector<2x64xf32>
    %2 = tpu.matmul %0, %1, %cst {dimension_numbers = #tpu.dot_dimension_numbers<[1], [0], [0], [1], [0, 0, 1, 1], [], []>} : vector<2x8192xbf16>, vector<8192x64xbf16>, vector<2x64xf32> -> vector<2x64xf32>
    %c0_3 = arith.constant 0 : index
    %c0_4 = arith.constant 0 : index
    %3 = vector.load %arg3[%c0_3, %c0_4] : memref<1x64xf32, #tpu.memory_space<vmem>>, vector<1x64xf32>
    %4 = vector.broadcast %3 : vector<1x64xf32> to vector<2x64xf32>
    %5 = arith.addf %2, %4 : vector<2x64xf32>
    %6 = vector.extract_strided_slice %5 {offsets = [0, 0], sizes = [2, 32], strides = [1, 1]} : vector<2x64xf32> to vector<2x32xf32>
    %7 = vector.extract_strided_slice %5 {offsets = [0, 32], sizes = [2, 32], strides = [1, 1]} : vector<2x64xf32> to vector<2x32xf32>
    %c0_5 = arith.constant 0 : index
    %c0_6 = arith.constant 0 : index
    %8 = vector.load %arg7[%c0_5, %c0_6] : memref<2x32xf32, #tpu.memory_space<vmem>>, vector<2x32xf32>
    tpu.vector_store %arg7[%c0_5, %c0_6], %6 {strides = array<i32>} : memref<2x32xf32, #tpu.memory_space<vmem>>, vector<2x32xf32>,
    %c0_7 = arith.constant 0 : index
    %c0_8 = arith.constant 0 : index
    %9 = vector.load %arg8[%c0_7, %c0_8] : memref<2x32xf32, #tpu.memory_space<vmem>>, vector<2x32xf32>
    tpu.vector_store %arg8[%c0_7, %c0_8], %7 {strides = array<i32>} : memref<2x32xf32, #tpu.memory_space<vmem>>, vector<2x32xf32>,
    %c0_9 = arith.constant 0 : index
    %c0_10 = arith.constant 0 : index
    %10 = vector.load %arg4[%c0_9, %c0_10] : memref<2x32xf32, #tpu.memory_space<vmem>>, vector<2x32xf32>
    %cst_11 = arith.constant 5.000000e-01 : f32
    %11 = vector.broadcast %cst_11 : f32 to vector<2x32xf32>
    %12 = arith.mulf %11, %7 : vector<2x32xf32>
    %13 = math.exp %12 : vector<2x32xf32>
    %14 = arith.mulf %10, %13 : vector<2x32xf32>
    %15 = arith.addf %14, %6 : vector<2x32xf32>
    %c0_12 = arith.constant 0 : index
    %c0_13 = arith.constant 0 : index
    %16 = vector.load %arg5[%c0_12, %c0_13] : memref<32x8192xbf16, #tpu.memory_space<vmem>>, vector<32x8192xbf16>
    %17 = arith.truncf %15 : vector<2x32xf32> to vector<2x32xbf16>
    %cst_14 = arith.constant dense<0.000000e+00> : vector<2x8192xf32>
    %18 = tpu.matmul %17, %16, %cst_14 {dimension_numbers = #tpu.dot_dimension_numbers<[1], [0], [0], [1], [0, 0, 1, 1], [], []>} : vector<2x32xbf16>, vector<32x8192xbf16>, vector<2x8192xf32> -> vector<2x8192xf32>
    %c0_15 = arith.constant 0 : index
    %c0_16 = arith.constant 0 : index
    %19 = vector.load %arg6[%c0_15, %c0_16] : memref<1x8192xf32, #tpu.memory_space<vmem>>, vector<1x8192xf32>
    %20 = vector.broadcast %19 : vector<1x8192xf32> to vector<2x8192xf32>
    %21 = arith.addf %18, %20 : vector<2x8192xf32>
    %cst_17 = arith.constant 0.000000e+00 : f32
    %22 = vector.broadcast %cst_17 : f32 to vector<2x8192xf32>
    %23 = arith.cmpf oge, %21, %22 : vector<2x8192xf32>
    %cst_18 = arith.constant 0.00999999977 : f32
    %24 = vector.broadcast %cst_18 : f32 to vector<2x8192xf32>
    %25 = arith.mulf %24, %21 : vector<2x8192xf32>
    %26 = arith.select %23, %21, %25 : vector<2x8192xi1>, vector<2x8192xf32>
    %27 = arith.truncf %26 : vector<2x8192xf32> to vector<2x8192xbf16>
    %c0_19 = arith.constant 0 : index
    %c0_20 = arith.constant 0 : index
    %28 = vector.load %arg9[%c0_19, %c0_20] : memref<2x8192xbf16, #tpu.memory_space<vmem>>, vector<2x8192xbf16>
    tpu.vector_store %arg9[%c0_19, %c0_20], %27 {strides = array<i32>} : memref<2x8192xbf16, #tpu.memory_space<vmem>>, vector<2x8192xbf16>,
    return
  }
  func.func @transform_0(%arg0: i32) -> (i32, i32) {
    %c0_i32 = arith.constant 0 : i32
    %c0_i32_0 = arith.constant 0 : i32
    %c0_i32_1 = arith.constant 0 : i32
    return %c0_i32, %c0_i32_0 : i32, i32
  }
  func.func @transform_1(%arg0: i32) -> (i32, i32) {
    %c0_i32 = arith.constant 0 : i32
    %c0_i32_0 = arith.constant 0 : i32
    %c0_i32_1 = arith.constant 0 : i32
    return %c0_i32, %c0_i32_0 : i32, i32
  }
  func.func @transform_2(%arg0: i32) -> (i32, i32) {
    %c0_i32 = arith.constant 0 : i32
    %c0_i32_0 = arith.constant 0 : i32
    %c0_i32_1 = arith.constant 0 : i32
    return %c0_i32, %c0_i32_0 : i32, i32
  }
  func.func @transform_3(%arg0: i32) -> (i32, i32) {
    %c0_i32 = arith.constant 0 : i32
    %c0_i32_0 = arith.constant 0 : i32
    %c0_i32_1 = arith.constant 0 : i32
    return %c0_i32, %c0_i32_0 : i32, i32
  }
  func.func @transform_4(%arg0: i32) -> (i32, i32) {
    %c0_i32 = arith.constant 0 : i32
    %c0_i32_0 = arith.constant 0 : i32
    %c0_i32_1 = arith.constant 0 : i32
    return %c0_i32, %c0_i32_0 : i32, i32
  }
  func.func @transform_5(%arg0: i32) -> (i32, i32) {
    %c0_i32 = arith.constant 0 : i32
    %c0_i32_0 = arith.constant 0 : i32
    %c0_i32_1 = arith.constant 0 : i32
    return %c0_i32, %c0_i32_0 : i32, i32
  }
  func.func @transform_6(%arg0: i32) -> (i32, i32) {
    %c0_i32 = arith.constant 0 : i32
    %c0_i32_0 = arith.constant 0 : i32
    %c0_i32_1 = arith.constant 0 : i32
    return %c0_i32, %c0_i32_0 : i32, i32
  }
  func.func @transform_7(%arg0: i32) -> (i32, i32) {
    %c0_i32 = arith.constant 0 : i32
    %c0_i32_0 = arith.constant 0 : i32
    %c0_i32_1 = arith.constant 0 : i32
    return %c0_i32, %c0_i32_0 : i32, i32
  }
  func.func @transform_8(%arg0: i32) -> (i32, i32) {
    %c0_i32 = arith.constant 0 : i32
    %c0_i32_0 = arith.constant 0 : i32
    %c0_i32_1 = arith.constant 0 : i32
    return %c0_i32, %c0_i32_0 : i32, i32
  }
}

module attributes {stable_mosaic.version = 11 : i64} {
  func.func @_gemm_bias_act_kernel(%arg0: i32, %arg1: memref<128x128xbf16, #tpu.memory_space<vmem>>, %arg2: memref<128x144xbf16, #tpu.memory_space<vmem>>, %arg3: memref<1x144xf32, #tpu.memory_space<vmem>>, %arg4: memref<128x144xbf16, #tpu.memory_space<vmem>>) attributes {dimension_semantics = [#tpu.dimension_semantics<arbitrary>], iteration_bounds = array<i64: 1>, scalar_prefetch = 0 : i64, scratch_operands = 0 : i64, tpu.core_type = #tpu.core_type<tc>, window_params = [{pipeline_mode = #tpu.pipeline_mode<synchronous>, transform_indices = @transform_0, window_bounds = array<i64: 128, 128>}, {pipeline_mode = #tpu.pipeline_mode<synchronous>, transform_indices = @transform_1, window_bounds = array<i64: 128, 144>}, {pipeline_mode = #tpu.pipeline_mode<synchronous>, transform_indices = @transform_2, window_bounds = array<i64: 1, 144>}, {pipeline_mode = #tpu.pipeline_mode<synchronous>, transform_indices = @transform_3, window_bounds = array<i64: 128, 144>}]} {
    %c0 = arith.constant 0 : index
    %c0_0 = arith.constant 0 : index
    %0 = vector.load %arg1[%c0, %c0_0] : memref<128x128xbf16, #tpu.memory_space<vmem>>, vector<128x128xbf16>
    %c0_1 = arith.constant 0 : index
    %c0_2 = arith.constant 0 : index
    %1 = vector.load %arg2[%c0_1, %c0_2] : memref<128x144xbf16, #tpu.memory_space<vmem>>, vector<128x144xbf16>
    %cst = arith.constant dense<0.000000e+00> : vector<128x144xf32>
    %2 = tpu.matmul %0, %1, %cst {dimension_numbers = #tpu.dot_dimension_numbers<[1], [0], [0], [1], [0, 0, 1, 1], [], []>} : vector<128x128xbf16>, vector<128x144xbf16>, vector<128x144xf32> -> vector<128x144xf32>
    %c0_3 = arith.constant 0 : index
    %c0_4 = arith.constant 0 : index
    %3 = vector.load %arg3[%c0_3, %c0_4] : memref<1x144xf32, #tpu.memory_space<vmem>>, vector<1x144xf32>
    %4 = vector.broadcast %3 : vector<1x144xf32> to vector<128x144xf32>
    %5 = arith.addf %2, %4 : vector<128x144xf32>
    %cst_5 = arith.constant 0.000000e+00 : f32
    %6 = vector.broadcast %cst_5 : f32 to vector<128x144xf32>
    %7 = arith.cmpf oge, %5, %6 : vector<128x144xf32>
    %cst_6 = arith.constant 0.00999999977 : f32
    %8 = vector.broadcast %cst_6 : f32 to vector<128x144xf32>
    %9 = arith.mulf %8, %5 : vector<128x144xf32>
    %10 = arith.select %7, %5, %9 : vector<128x144xi1>, vector<128x144xf32>
    %11 = arith.truncf %10 : vector<128x144xf32> to vector<128x144xbf16>
    %c0_7 = arith.constant 0 : index
    %c0_8 = arith.constant 0 : index
    %12 = vector.load %arg4[%c0_7, %c0_8] : memref<128x144xbf16, #tpu.memory_space<vmem>>, vector<128x144xbf16>
    tpu.vector_store %arg4[%c0_7, %c0_8], %11 {strides = array<i32>} : memref<128x144xbf16, #tpu.memory_space<vmem>>, vector<128x144xbf16>,
    return
  }
  func.func @transform_0(%arg0: i32) -> (i32, i32) {
    %c0_i32 = arith.constant 0 : i32
    %c0_i32_0 = arith.constant 0 : i32
    %c0_i32_1 = arith.constant 0 : i32
    return %c0_i32, %c0_i32_0 : i32, i32
  }
  func.func @transform_1(%arg0: i32) -> (i32, i32) {
    %c0_i32 = arith.constant 0 : i32
    %c0_i32_0 = arith.constant 0 : i32
    %c0_i32_1 = arith.constant 0 : i32
    return %c0_i32, %c0_i32_0 : i32, i32
  }
  func.func @transform_2(%arg0: i32) -> (i32, i32) {
    %c0_i32 = arith.constant 0 : i32
    %c0_i32_0 = arith.constant 0 : i32
    %c0_i32_1 = arith.constant 0 : i32
    return %c0_i32, %c0_i32_0 : i32, i32
  }
  func.func @transform_3(%arg0: i32) -> (i32, i32) {
    %c0_i32 = arith.constant 0 : i32
    %c0_i32_0 = arith.constant 0 : i32
    %c0_i32_1 = arith.constant 0 : i32
    return %c0_i32, %c0_i32_0 : i32, i32
  }
}

module attributes {stable_mosaic.version = 11 : i64} {
  func.func @_dual_convt_head_kernel(%arg0: i32, %arg1: memref<968x16xbf16, #tpu.memory_space<vmem>>, %arg2: memref<16x27xbf16, #tpu.memory_space<vmem>>, %arg3: memref<1x27xf32, #tpu.memory_space<vmem>>, %arg4: memref<16x27xbf16, #tpu.memory_space<vmem>>, %arg5: memref<1x27xf32, #tpu.memory_space<vmem>>, %arg6: memref<968x27xf32, #tpu.memory_space<vmem>>, %arg7: memref<968x27xf32, #tpu.memory_space<vmem>>) attributes {dimension_semantics = [#tpu.dimension_semantics<arbitrary>], iteration_bounds = array<i64: 1>, scalar_prefetch = 0 : i64, scratch_operands = 0 : i64, tpu.core_type = #tpu.core_type<tc>, window_params = [{pipeline_mode = #tpu.pipeline_mode<synchronous>, transform_indices = @transform_0, window_bounds = array<i64: 968, 16>}, {pipeline_mode = #tpu.pipeline_mode<synchronous>, transform_indices = @transform_1, window_bounds = array<i64: 16, 27>}, {pipeline_mode = #tpu.pipeline_mode<synchronous>, transform_indices = @transform_2, window_bounds = array<i64: 1, 27>}, {pipeline_mode = #tpu.pipeline_mode<synchronous>, transform_indices = @transform_3, window_bounds = array<i64: 16, 27>}, {pipeline_mode = #tpu.pipeline_mode<synchronous>, transform_indices = @transform_4, window_bounds = array<i64: 1, 27>}, {pipeline_mode = #tpu.pipeline_mode<synchronous>, transform_indices = @transform_5, window_bounds = array<i64: 968, 27>}, {pipeline_mode = #tpu.pipeline_mode<synchronous>, transform_indices = @transform_6, window_bounds = array<i64: 968, 27>}]} {
    %c0 = arith.constant 0 : index
    %c0_0 = arith.constant 0 : index
    %0 = vector.load %arg1[%c0, %c0_0] : memref<968x16xbf16, #tpu.memory_space<vmem>>, vector<968x16xbf16>
    %c0_1 = arith.constant 0 : index
    %c0_2 = arith.constant 0 : index
    %1 = vector.load %arg2[%c0_1, %c0_2] : memref<16x27xbf16, #tpu.memory_space<vmem>>, vector<16x27xbf16>
    %cst = arith.constant dense<0.000000e+00> : vector<968x27xf32>
    %2 = tpu.matmul %0, %1, %cst {dimension_numbers = #tpu.dot_dimension_numbers<[1], [0], [0], [1], [0, 0, 1, 1], [], []>} : vector<968x16xbf16>, vector<16x27xbf16>, vector<968x27xf32> -> vector<968x27xf32>
    %c0_3 = arith.constant 0 : index
    %c0_4 = arith.constant 0 : index
    %3 = vector.load %arg3[%c0_3, %c0_4] : memref<1x27xf32, #tpu.memory_space<vmem>>, vector<1x27xf32>
    %4 = vector.broadcast %3 : vector<1x27xf32> to vector<968x27xf32>
    %5 = arith.addf %2, %4 : vector<968x27xf32>
    %c0_5 = arith.constant 0 : index
    %c0_6 = arith.constant 0 : index
    %6 = vector.load %arg6[%c0_5, %c0_6] : memref<968x27xf32, #tpu.memory_space<vmem>>, vector<968x27xf32>
    tpu.vector_store %arg6[%c0_5, %c0_6], %5 {strides = array<i32>} : memref<968x27xf32, #tpu.memory_space<vmem>>, vector<968x27xf32>,
    %c0_7 = arith.constant 0 : index
    %c0_8 = arith.constant 0 : index
    %7 = vector.load %arg4[%c0_7, %c0_8] : memref<16x27xbf16, #tpu.memory_space<vmem>>, vector<16x27xbf16>
    %cst_9 = arith.constant dense<0.000000e+00> : vector<968x27xf32>
    %8 = tpu.matmul %0, %7, %cst_9 {dimension_numbers = #tpu.dot_dimension_numbers<[1], [0], [0], [1], [0, 0, 1, 1], [], []>} : vector<968x16xbf16>, vector<16x27xbf16>, vector<968x27xf32> -> vector<968x27xf32>
    %c0_10 = arith.constant 0 : index
    %c0_11 = arith.constant 0 : index
    %9 = vector.load %arg5[%c0_10, %c0_11] : memref<1x27xf32, #tpu.memory_space<vmem>>, vector<1x27xf32>
    %10 = vector.broadcast %9 : vector<1x27xf32> to vector<968x27xf32>
    %11 = arith.addf %8, %10 : vector<968x27xf32>
    %cst_12 = arith.constant -2.000000e+01 : f32
    %cst_13 = arith.constant 2.000000e+01 : f32
    %12 = vector.broadcast %cst_12 : f32 to vector<968x27xf32>
    %13 = arith.maximumf %12, %11 : vector<968x27xf32>
    %14 = vector.broadcast %cst_13 : f32 to vector<968x27xf32>
    %15 = arith.minimumf %14, %13 : vector<968x27xf32>
    %16 = math.exp %15 : vector<968x27xf32>
    %c0_14 = arith.constant 0 : index
    %c0_15 = arith.constant 0 : index
    %17 = vector.load %arg7[%c0_14, %c0_15] : memref<968x27xf32, #tpu.memory_space<vmem>>, vector<968x27xf32>
    tpu.vector_store %arg7[%c0_14, %c0_15], %16 {strides = array<i32>} : memref<968x27xf32, #tpu.memory_space<vmem>>, vector<968x27xf32>,
    return
  }
  func.func @transform_0(%arg0: i32) -> (i32, i32) {
    %c0_i32 = arith.constant 0 : i32
    %c0_i32_0 = arith.constant 0 : i32
    %c0_i32_1 = arith.constant 0 : i32
    return %c0_i32, %c0_i32_0 : i32, i32
  }
  func.func @transform_1(%arg0: i32) -> (i32, i32) {
    %c0_i32 = arith.constant 0 : i32
    %c0_i32_0 = arith.constant 0 : i32
    %c0_i32_1 = arith.constant 0 : i32
    return %c0_i32, %c0_i32_0 : i32, i32
  }
  func.func @transform_2(%arg0: i32) -> (i32, i32) {
    %c0_i32 = arith.constant 0 : i32
    %c0_i32_0 = arith.constant 0 : i32
    %c0_i32_1 = arith.constant 0 : i32
    return %c0_i32, %c0_i32_0 : i32, i32
  }
  func.func @transform_3(%arg0: i32) -> (i32, i32) {
    %c0_i32 = arith.constant 0 : i32
    %c0_i32_0 = arith.constant 0 : i32
    %c0_i32_1 = arith.constant 0 : i32
    return %c0_i32, %c0_i32_0 : i32, i32
  }
  func.func @transform_4(%arg0: i32) -> (i32, i32) {
    %c0_i32 = arith.constant 0 : i32
    %c0_i32_0 = arith.constant 0 : i32
    %c0_i32_1 = arith.constant 0 : i32
    return %c0_i32, %c0_i32_0 : i32, i32
  }
  func.func @transform_5(%arg0: i32) -> (i32, i32) {
    %c0_i32 = arith.constant 0 : i32
    %c0_i32_0 = arith.constant 0 : i32
    %c0_i32_1 = arith.constant 0 : i32
    return %c0_i32, %c0_i32_0 : i32, i32
  }
  func.func @transform_6(%arg0: i32) -> (i32, i32) {
    %c0_i32 = arith.constant 0 : i32
    %c0_i32_0 = arith.constant 0 : i32
    %c0_i32_1 = arith.constant 0 : i32
    return %c0_i32, %c0_i32_0 : i32, i32
  }
}

</mosaic_0001>

<bundles_post_ra>
// kernel: conv_vae_forward.5
= control target key start
LH: loop header
LB: loop body
LE: loop exit
PB: predicated region body
PF: predicated region fallthrough
CT: control target
= control target key end

     0   :  { %vm400_vm0 = vcmask 1044480   ;;  %vm401_vm1 = vcmask 1045504   ;;  %v1410_v2 = vmov 65535   ;;  %vm216_vm2 = vcmask 220160   ;;  %s2479_s1 = inlined_call_operand.vmem [shape: bf16[27,16], index: 1, kind: input, shape index: {}]   ;;  %s2480_s0 = inlined_call_operand.vmem [shape: f32[968,27], index: 0, kind: input, shape index: {}]   ;;  %s2481_s2 = inlined_call_operand.vmem [shape: f32[1,16], index: 2, kind: input, shape index: {}]   ;;  %s2482_s3 = inlined_call_operand.vmem [shape: bf16[968,16], index: 3, kind: output, shape index: {}]  }
   0x1   :  { %v1336_v0 = vld [vmem:[%s2479_s1 + $0x8] sm:$0xf]  ;;  %v1400_v1 = vld [vmem:[%s2479_s1 + $0x8] sm:$0x30]  ;;  %v402_v3 = vsel %vm400_vm0, 4294967295, %v1410_v2  ;;  %v1399_v7 = vld [vmem:[%s2479_s1] sm:$0xff] }
   0x2   :  { %v1337_v4 = vor.u32 %v1400_v1, %v1336_v0  ;;  %v403_v5 = vsel %vm401_vm1, %v402_v3, 0  ;;  %v45_v8 = vld [vmem:[%s2480_s0 + $0xf0] sm:$0xff]  ;;  %v46_v9 = vld [vmem:[%s2480_s0 + $0xf8] sm:$0xff]  ;;  %v15_v12 = vld [vmem:[%s2480_s0] sm:$0xff]  ;;  %vm1204_vm5 = vcmask 125952  }
   0x3   :  { %v77_v10 = vld [vmem:[%s2480_s0 + $0x1f0] sm:$0xff]  ;;  %v78_v11 = vld [vmem:[%s2480_s0 + $0x1f8] sm:$0xff]  ;;  %v16_v13 = vld [vmem:[%s2480_s0 + $0x8] sm:$0xff]  ;;  %v155_v16 = vpack.c.bf16 %v46_v9, %v45_v8 }
   0x4   :  { %v405_v6 = vand.u32 %v1337_v4, %v403_v5  ;;  %v109_v14 = vld [vmem:[%s2480_s0 + $0x2f0] sm:$0xff]  ;;  %v110_v15 = vld [vmem:[%s2480_s0 + $0x2f8] sm:$0xff]  ;;  %v171_v17 = vpack.c.bf16 %v78_v11, %v77_v10  ;;  %v140_v18 = vpack.c.bf16 %v16_v13, %v15_v12  ;;  %v47_v20 = vld [vmem:[%s2480_s0 + $0x100] sm:$0xff] }
   0x5   :  { %v187_v19 = vpack.c.bf16 %v110_v15, %v109_v14  ;;  %v48_v21 = vld [vmem:[%s2480_s0 + $0x108] sm:$0xff]  ;;  %v79_v22 = vld [vmem:[%s2480_s0 + $0x200] sm:$0xff]  ;;  %v17_v24 = vld [vmem:[%s2480_s0 + $0x10] sm:$0xff] }
   0x6   :  { %1401 = vmatpush.bf16.msra.mxu1 %v405_v6  ;;  %1402 = vmatpush.bf16.msra.mxu2 %v405_v6  ;;  %v80_v23 = vld [vmem:[%s2480_s0 + $0x208] sm:$0xff]  ;;  %v18_v25 = vld [vmem:[%s2480_s0 + $0x18] sm:$0xff]  ;;  %v111_v26 = vld [vmem:[%s2480_s0 + $0x300] sm:$0xff]  ;;  %v156_v28 = vpack.c.bf16 %v48_v21, %v47_v20 }
   0x7   :  { %413 = vmatpush.bf16.msra.mxu0 %v405_v6  ;;  %1403 = vmatpush.bf16.msra.mxu3 %v405_v6  ;;  %v112_v27 = vld [vmem:[%s2480_s0 + $0x308] sm:$0xff]  ;;  %v172_v29 = vpack.c.bf16 %v80_v23, %v79_v22  ;;  %v141_v30 = vpack.c.bf16 %v18_v25, %v17_v24  ;;  %v49_v32 = vld [vmem:[%s2480_s0 + $0x110] sm:$0xff]  ;;  %v50_v33 = vld [vmem:[%s2480_s0 + $0x118] sm:$0xff] }
   0x8   :  { %v188_v31 = vpack.c.bf16 %v112_v27, %v111_v26  ;;  %v81_v34 = vld [vmem:[%s2480_s0 + $0x210] sm:$0xff]  ;;  %v82_v35 = vld [vmem:[%s2480_s0 + $0x218] sm:$0xff]  ;;  %v19_v36 = vld [vmem:[%s2480_s0 + $0x20] sm:$0xff]  ;;  %v157_v40 = vpack.c.bf16 %v50_v33, %v49_v32 }
   0x9   :  { %v20_v37 = vld [vmem:[%s2480_s0 + $0x28] sm:$0xff]  ;;  %v113_v38 = vld [vmem:[%s2480_s0 + $0x310] sm:$0xff]  ;;  %v114_v39 = vld [vmem:[%s2480_s0 + $0x318] sm:$0xff]  ;;  %v173_v41 = vpack.c.bf16 %v82_v35, %v81_v34 }
   0xa   :  { %1404 = vmatpush.bf16.msra.mxu1 %v1399_v7  ;;  %1405 = vmatpush.bf16.msra.mxu2 %v1399_v7  ;;  %v142_v42 = vpack.c.bf16 %v20_v37, %v19_v36  ;;  %v189_v43 = vpack.c.bf16 %v114_v39, %v113_v38  ;;  %v51_v44 = vld [vmem:[%s2480_s0 + $0x120] sm:$0xff]  ;;  %v52_v45 = vld [vmem:[%s2480_s0 + $0x128] sm:$0xff]  ;;  %v21_v48 = vld [vmem:[%s2480_s0 + $0x30] sm:$0xff] }
   0xb   :  { %414 = vmatpush.bf16.msra.mxu0 %v1399_v7  ;;  %1406 = vmatpush.bf16.msra.mxu3 %v1399_v7  ;;  %v83_v46 = vld [vmem:[%s2480_s0 + $0x220] sm:$0xff]  ;;  %v84_v47 = vld [vmem:[%s2480_s0 + $0x228] sm:$0xff]  ;;  %v22_v49 = vld [vmem:[%s2480_s0 + $0x38] sm:$0xff]  ;;  %v158_v52 = vpack.c.bf16 %v52_v45, %v51_v44 }
   0xc   :  { %v115_v50 = vld [vmem:[%s2480_s0 + $0x320] sm:$0xff]  ;;  %v116_v51 = vld [vmem:[%s2480_s0 + $0x328] sm:$0xff]  ;;  %v174_v53 = vpack.c.bf16 %v84_v47, %v83_v46  ;;  %v143_v54 = vpack.c.bf16 %v22_v49, %v21_v48  ;;  %v53_v56 = vld [vmem:[%s2480_s0 + $0x130] sm:$0xff] }
   0xd   :  { %1353 = vmatmul.msk.bf16.vlgmr.msra.gmra.mxu1 %vm216_vm2, %v155_v16  ;;  %1369 = vmatmul.msk.bf16.vlgmr.msra.gmra.mxu2 %vm216_vm2, %v171_v17  ;;  %v190_v55 = vpack.c.bf16 %v116_v51, %v115_v50  ;;  %v54_v57 = vld [vmem:[%s2480_s0 + $0x138] sm:$0xff]  ;;  %v85_v58 = vld [vmem:[%s2480_s0 + $0x230] sm:$0xff]  ;;  %v23_v60 = vld [vmem:[%s2480_s0 + $0x40] sm:$0xff] }
   0xe   :  { %1338 = vmatmul.msk.bf16.vlgmr.msra.gmra.mxu0 %vm216_vm2, %v140_v18  ;;  %1385 = vmatmul.msk.bf16.vlgmr.msra.gmra.mxu3 %vm216_vm2, %v187_v19  ;;  %v86_v59 = vld [vmem:[%s2480_s0 + $0x238] sm:$0xff]  ;;  %v24_v61 = vld [vmem:[%s2480_s0 + $0x48] sm:$0xff]  ;;  %v117_v62 = vld [vmem:[%s2480_s0 + $0x330] sm:$0xff]  ;;  %v159_v0 = vpack.c.bf16 %v54_v57, %v53_v56 }
   0xf   :  { %v118_v63 = vld [vmem:[%s2480_s0 + $0x338] sm:$0xff]  ;;  %v175_v1 = vpack.c.bf16 %v86_v59, %v85_v58  ;;  %v144_v2 = vpack.c.bf16 %v24_v61, %v23_v60  ;;  %v55_v4 = vld [vmem:[%s2480_s0 + $0x140] sm:$0xff]  ;;  %v56_v5 = vld [vmem:[%s2480_s0 + $0x148] sm:$0xff] }
  0x10   :  { %v191_v3 = vpack.c.bf16 %v118_v63, %v117_v62  ;;  %v87_v6 = vld [vmem:[%s2480_s0 + $0x240] sm:$0xff]  ;;  %v88_v7 = vld [vmem:[%s2480_s0 + $0x248] sm:$0xff]  ;;  %v25_v8 = vld [vmem:[%s2480_s0 + $0x50] sm:$0xff]  ;;  %v160_v12 = vpack.c.bf16 %v56_v5, %v55_v4 }
  0x11   :  { %v26_v9 = vld [vmem:[%s2480_s0 + $0x58] sm:$0xff]  ;;  %v119_v10 = vld [vmem:[%s2480_s0 + $0x340] sm:$0xff]  ;;  %v120_v11 = vld [vmem:[%s2480_s0 + $0x348] sm:$0xff]  ;;  %v176_v13 = vpack.c.bf16 %v88_v7, %v87_v6 }
  0x12   :  { %v145_v14 = vpack.c.bf16 %v26_v9, %v25_v8  ;;  %v192_v15 = vpack.c.bf16 %v120_v11, %v119_v10  ;;  %v57_v16 = vld [vmem:[%s2480_s0 + $0x150] sm:$0xff]  ;;  %v58_v17 = vld [vmem:[%s2480_s0 + $0x158] sm:$0xff]  ;;  %v27_v20 = vld [vmem:[%s2480_s0 + $0x60] sm:$0xff] }
  0x13   :  { %v89_v18 = vld [vmem:[%s2480_s0 + $0x250] sm:$0xff]  ;;  %v90_v19 = vld [vmem:[%s2480_s0 + $0x258] sm:$0xff]  ;;  %v28_v21 = vld [vmem:[%s2480_s0 + $0x68] sm:$0xff]  ;;  %v161_v24 = vpack.c.bf16 %v58_v17, %v57_v16 }
  0x14   :  { %v121_v22 = vld [vmem:[%s2480_s0 + $0x350] sm:$0xff]  ;;  %v122_v23 = vld [vmem:[%s2480_s0 + $0x358] sm:$0xff]  ;;  %v177_v25 = vpack.c.bf16 %v90_v19, %v89_v18  ;;  %v146_v26 = vpack.c.bf16 %v28_v21, %v27_v20  ;;  %v123_v34 = vld [vmem:[%s2480_s0 + $0x360] sm:$0xff] }
  0x15   :  { %v193_v27 = vpack.c.bf16 %v122_v23, %v121_v22  ;;  %v29_v32 = vld [vmem:[%s2480_s0 + $0x70] sm:$0xff]  ;;  %v30_v33 = vld [vmem:[%s2480_s0 + $0x78] sm:$0xff]  ;;  %v124_v35 = vld [vmem:[%s2480_s0 + $0x368] sm:$0xff] }
  0x16   :  { %v147_v38 = vpack.c.bf16 %v30_v33, %v29_v32  ;;  %v194_v39 = vpack.c.bf16 %v124_v35, %v123_v34  ;;  %v1679_v44 = vld [vmem:[%s2481_s2] ss:$0 sm:$0xff]  ;;  %v32_v46 = vld [vmem:[%s2480_s0 + $0x88] sm:$0xff]  ;;  %v125_v47 = vld [vmem:[%s2480_s0 + $0x370] sm:$0xff] }
  0x17   :  { %v31_v45 = vld [vmem:[%s2480_s0 + $0x80] sm:$0xff]  ;;  %v126_v48 = vld [vmem:[%s2480_s0 + $0x378] sm:$0xff]  ;;  %v33_v19 = vld [vmem:[%s2480_s0 + $0x90] sm:$0xff] }
  0x18   :  { %v63_v11 = vld [vmem:[%s2480_s0 + $0x180] sm:$0xff]  ;;  %v34_v20 = vld [vmem:[%s2480_s0 + $0x98] sm:$0xff] }
  0x19   :  { %v149_v33 = vpack.c.bf16 %v34_v20, %v33_v19 }
  0x1d   :  { %1354 = vmatmul.msk.bf16.gmra.mxu1 %vm216_vm2, %v156_v28  ;;  %1370 = vmatmul.msk.bf16.gmra.mxu2 %vm216_vm2, %v172_v29  ;;  %v59_v28 = vld [vmem:[%s2480_s0 + $0x160] sm:$0xff]  ;;  %v60_v29 = vld [vmem:[%s2480_s0 + $0x168] sm:$0xff] }
  0x1e   :  { %1339 = vmatmul.msk.bf16.gmra.mxu0 %vm216_vm2, %v141_v30  ;;  %1386 = vmatmul.msk.bf16.gmra.mxu3 %vm216_vm2, %v188_v31  ;;  %v91_v30 = vld [vmem:[%s2480_s0 + $0x260] sm:$0xff]  ;;  %v92_v31 = vld [vmem:[%s2480_s0 + $0x268] sm:$0xff]  ;;  %v162_v36 = vpack.c.bf16 %v60_v29, %v59_v28 }
  0x1f   :  { %v178_v37 = vpack.c.bf16 %v92_v31, %v91_v30 }
  0x2d   :  { %1355 = vmatmul.msk.bf16.gmra.mxu1 %vm216_vm2, %v157_v40  ;;  %1371 = vmatmul.msk.bf16.gmra.mxu2 %vm216_vm2, %v173_v41  ;;  %v61_v40 = vld [vmem:[%s2480_s0 + $0x170] sm:$0xff]  ;;  %v62_v41 = vld [vmem:[%s2480_s0 + $0x178] sm:$0xff] }
  0x2e   :  { %1340 = vmatmul.msk.bf16.gmra.mxu0 %vm216_vm2, %v142_v42  ;;  %1387 = vmatmul.msk.bf16.gmra.mxu3 %vm216_vm2, %v189_v43  ;;  %v93_v42 = vld [vmem:[%s2480_s0 + $0x270] sm:$0xff]  ;;  %v94_v43 = vld [vmem:[%s2480_s0 + $0x278] sm:$0xff]  ;;  %v163_v49 = vpack.c.bf16 %v62_v41, %v61_v40 }
  0x2f   :  { %v179_v50 = vpack.c.bf16 %v94_v43, %v93_v42 }
  0x3d   :  { %1356 = vmatmul.msk.bf16.gmra.mxu1 %vm216_vm2, %v158_v52  ;;  %1372 = vmatmul.msk.bf16.gmra.mxu2 %vm216_vm2, %v174_v53  ;;  %v148_v52 = vpack.c.bf16 %v32_v46, %v31_v45  ;;  %v195_v53 = vpack.c.bf16 %v126_v48, %v125_v47 }
  0x3e   :  { %1341 = vmatmul.msk.bf16.gmra.mxu0 %vm216_vm2, %v143_v54  ;;  %1388 = vmatmul.msk.bf16.gmra.mxu3 %vm216_vm2, %v190_v55 }
  0x4d   :  { %1357 = vmatmul.msk.bf16.gmra.mxu1 %vm216_vm2, %v159_v0  ;;  %1373 = vmatmul.msk.bf16.gmra.mxu2 %vm216_vm2, %v175_v1 }
  0x4e   :  { %1342 = vmatmul.msk.bf16.gmra.mxu0 %vm216_vm2, %v144_v2  ;;  %1389 = vmatmul.msk.bf16.gmra.mxu3 %vm216_vm2, %v191_v3 }
  0x5d   :  { %1358 = vmatmul.msk.bf16.gmra.mxu1 %vm216_vm2, %v160_v12  ;;  %1374 = vmatmul.msk.bf16.gmra.mxu2 %vm216_vm2, %v176_v13  ;;  %v64_v13 = vld [vmem:[%s2480_s0 + $0x188] sm:$0xff] }
  0x5e   :  { %1343 = vmatmul.msk.bf16.gmra.mxu0 %vm216_vm2, %v145_v14  ;;  %1390 = vmatmul.msk.bf16.gmra.mxu3 %vm216_vm2, %v192_v15  ;;  %v95_v14 = vld [vmem:[%s2480_s0 + $0x280] sm:$0xff]  ;;  %v96_v15 = vld [vmem:[%s2480_s0 + $0x288] sm:$0xff]  ;;  %v164_v28 = vpack.c.bf16 %v64_v13, %v63_v11 }
  0x5f   :  { %v180_v29 = vpack.c.bf16 %v96_v15, %v95_v14  ;;  %v129_v14 = vld [vmem:[%s2480_s0 + $0x390] sm:$0xff]  ;;  %v130_v15 = vld [vmem:[%s2480_s0 + $0x398] sm:$0xff] }
  0x6d   :  { %1359 = vmatmul.msk.bf16.gmra.mxu1 %vm216_vm2, %v161_v24  ;;  %1375 = vmatmul.msk.bf16.gmra.mxu2 %vm216_vm2, %v177_v25  ;;  %v127_v25 = vld [vmem:[%s2480_s0 + $0x380] sm:$0xff] }
  0x6e   :  { %1344 = vmatmul.msk.bf16.gmra.mxu0 %vm216_vm2, %v146_v26  ;;  %1391 = vmatmul.msk.bf16.gmra.mxu3 %vm216_vm2, %v193_v27  ;;  %v128_v26 = vld [vmem:[%s2480_s0 + $0x388] sm:$0xff] }
  0x6f   :  { %v196_v35 = vpack.c.bf16 %v128_v26, %v127_v25 }
  0x7d   :  { %1360 = vmatmul.msk.bf16.gmra.mxu1 %vm216_vm2, %v162_v36  ;;  %1376 = vmatmul.msk.bf16.gmra.mxu2 %vm216_vm2, %v178_v37 }
  0x7e   :  { %1345 = vmatmul.msk.bf16.gmra.mxu0 %vm216_vm2, %v147_v38  ;;  %1392 = vmatmul.msk.bf16.gmra.mxu3 %vm216_vm2, %v194_v39 }
  0x8a   :  { %v491_v51 = vpop.f32.mrf.mxu1 }
  0x8b   :  { %v492_v54 = vadd.f32 %v1679_v44, %v491_v51  ;;  %v416_v55 = vpop.f32.mrf.mxu0 }
  0x8c   :  { %v417_v56 = vadd.f32 %v1679_v44, %v416_v55 }
  0x8d   :  { %vm750_vm3 = vcmp.ge.f32.partialorder %v492_v54, 0.0  ;;  %v871_v57 = vmul.f32 0.01, %v492_v54  ;;  %1361 = vmatmul.msk.bf16.gmra.mxu1 %vm216_vm2, %v163_v49  ;;  %1377 = vmatmul.msk.bf16.gmra.mxu2 %vm216_vm2, %v179_v50 }
  0x8e   :  { %vm720_vm4 = vcmp.ge.f32.partialorder %v417_v56, 0.0  ;;  %v841_v58 = vmul.f32 0.01, %v417_v56  ;;  %1346 = vmatmul.msk.bf16.gmra.mxu0 %vm216_vm2, %v148_v52  ;;  %1393 = vmatmul.msk.bf16.gmra.mxu3 %vm216_vm2, %v195_v53 }
  0x8f   :  { %v992_v59 = vsel %vm750_vm3, %v492_v54, %v871_v57 }
  0x90   :  { %v1113_v60 = vpack.c.bf16 %v992_v59, %v992_v59  ;;  %v571_v61 = vpop.f32.mrf.mxu2  ;;  %v962_v62 = vsel %vm720_vm4, %v417_v56, %v841_v58 }
  0x91   :  { %v572_v63 = vadd.f32 %v1679_v44, %v571_v61  ;;  %v1083_v0 = vpack.c.bf16 %v962_v62, %v962_v62  ;;  %v651_v1 = vpop.f32.mrf.mxu3 }
  0x92   :  { %1235 = vst.msk [vmem:[%s2482_s3 + $0x78] sm:$0xf] %vm1204_vm5, %v1113_v60  ;;  %v493_v2 = vpop.f32.mrf.mxu1  ;;  %v652_v3 = vadd.f32 %v1679_v44, %v651_v1 }
  0x93   :  { %vm782_vm6 = vcmp.ge.f32.partialorder %v572_v63, 0.0  ;;  %v903_v4 = vmul.f32 0.01, %v572_v63  ;;  %v494_v5 = vadd.f32 %v1679_v44, %v493_v2  ;;  %1205 = vst.msk [vmem:[%s2482_s3] sm:$0xf] %vm1204_vm5, %v1083_v0  ;;  %v418_v6 = vpop.f32.mrf.mxu0  ;;  %v65_v0 = vld [vmem:[%s2480_s0 + $0x190] sm:$0xff] }
  0x94   :  { %v419_v7 = vadd.f32 %v1679_v44, %v418_v6  ;;  %vm814_vm7 = vcmp.ge.f32.partialorder %v652_v3, 0.0  ;;  %v935_v8 = vmul.f32 0.01, %v652_v3  ;;  %v66_v2 = vld [vmem:[%s2480_s0 + $0x198] sm:$0xff] }
  0x95   :  { %v1024_v9 = vsel %vm782_vm6, %v572_v63, %v903_v4  ;;  %vm751_vm8 = vcmp.ge.f32.partialorder %v494_v5, 0.0  ;;  %v872_v10 = vmul.f32 0.01, %v494_v5  ;;  %v98_v4 = vld [vmem:[%s2480_s0 + $0x298] sm:$0xff] }
  0x96   :  { %v1145_v12 = vpack.c.bf16 %v1024_v9, %v1024_v9  ;;  %vm721_vm9 = vcmp.ge.f32.partialorder %v419_v7, 0.0  ;;  %v842_v16 = vmul.f32 0.01, %v419_v7  ;;  %v1056_v17 = vsel %vm814_vm7, %v652_v3, %v935_v8  ;;  %v97_v3 = vld [vmem:[%s2480_s0 + $0x290] sm:$0xff]  ;;  %v35_v8 = vld [vmem:[%s2480_s0 + $0xa0] sm:$0xff]  ;;  %v36_v9 = vld [vmem:[%s2480_s0 + $0xa8] sm:$0xff] }
  0x97   :  { %v993_v18 = vsel %vm751_vm8, %v494_v5, %v872_v10  ;;  %v1177_v21 = vpack.c.bf16 %v1056_v17, %v1056_v17  ;;  %v165_v17 = vpack.c.bf16 %v66_v2, %v65_v0 }
  0x98   :  { %1267 = vst.msk [vmem:[%s2482_s3 + $0xf8] sm:$0xf] %vm1204_vm5, %v1145_v12  ;;  %v1114_v22 = vpack.c.bf16 %v993_v18, %v993_v18  ;;  %v573_v23 = vpop.f32.mrf.mxu2  ;;  %v963_v24 = vsel %vm721_vm9, %v419_v7, %v842_v16  ;;  %v181_v18 = vpack.c.bf16 %v98_v4, %v97_v3  ;;  %v131_v3 = vld [vmem:[%s2480_s0 + $0x3a0] sm:$0xff]  ;;  %v132_v4 = vld [vmem:[%s2480_s0 + $0x3a8] sm:$0xff] }
  0x99   :  { %v574_v27 = vadd.f32 %v1679_v44, %v573_v23  ;;  %v1084_v30 = vpack.c.bf16 %v963_v24, %v963_v24  ;;  %1299 = vst.msk [vmem:[%s2482_s3 + $0x178] sm:$0xf] %vm1204_vm5, %v1177_v21  ;;  %v653_v31 = vpop.f32.mrf.mxu3  ;;  %v197_v24 = vpack.c.bf16 %v130_v15, %v129_v14 }
  0x9a   :  { %1236 = vst.msk [vmem:[%s2482_s3 + $0x7c] sm:$0xf] %vm1204_vm5, %v1114_v22  ;;  %v496_v32 = vpop.f32.mrf.mxu1  ;;  %v654_v34 = vadd.f32 %v1679_v44, %v653_v31  ;;  %v150_v22 = vpack.c.bf16 %v36_v9, %v35_v8 }
  0x9b   :  { %vm783_vm10 = vcmp.ge.f32.partialorder %v574_v27, 0.0  ;;  %v904_v36 = vmul.f32 0.01, %v574_v27  ;;  %v497_v37 = vadd.f32 %v1679_v44, %v496_v32  ;;  %1206 = vst.msk [vmem:[%s2482_s3 + $0x4] sm:$0xf] %vm1204_vm5, %v1084_v30  ;;  %v421_v38 = vpop.f32.mrf.mxu0 }
  0x9c   :  { %v422_v39 = vadd.f32 %v1679_v44, %v421_v38  ;;  %vm815_vm11 = vcmp.ge.f32.partialorder %v654_v34, 0.0  ;;  %v936_v40 = vmul.f32 0.01, %v654_v34 }
  0x9d   :  { %v1025_v41 = vsel %vm783_vm10, %v574_v27, %v904_v36  ;;  %vm752_vm12 = vcmp.ge.f32.partialorder %v497_v37, 0.0  ;;  %v873_v42 = vmul.f32 0.01, %v497_v37  ;;  %1362 = vmatmul.msk.bf16.gmra.mxu1 %vm216_vm2, %v164_v28  ;;  %1378 = vmatmul.msk.bf16.gmra.mxu2 %vm216_vm2, %v180_v29 }
  0x9e   :  { %v1146_v43 = vpack.c.bf16 %v1025_v41, %v1025_v41  ;;  %vm722_vm13 = vcmp.ge.f32.partialorder %v422_v39, 0.0  ;;  %v843_v45 = vmul.f32 0.01, %v422_v39  ;;  %1347 = vmatmul.msk.bf16.gmra.mxu0 %vm216_vm2, %v149_v33  ;;  %v1057_v46 = vsel %vm815_vm11, %v654_v34, %v936_v40  ;;  %1394 = vmatmul.msk.bf16.gmra.mxu3 %vm216_vm2, %v196_v35 }
  0x9f   :  { %v994_v47 = vsel %vm752_vm12, %v497_v37, %v873_v42  ;;  %v1178_v48 = vpack.c.bf16 %v1057_v46, %v1057_v46 }
  0xa0   :  { %1268 = vst.msk [vmem:[%s2482_s3 + $0xfc] sm:$0xf] %vm1204_vm5, %v1146_v43  ;;  %v1115_v49 = vpack.c.bf16 %v994_v47, %v994_v47  ;;  %v576_v50 = vpop.f32.mrf.mxu2  ;;  %v964_v51 = vsel %vm722_vm13, %v422_v39, %v843_v45 }
  0xa1   :  { %v577_v52 = vadd.f32 %v1679_v44, %v576_v50  ;;  %v1085_v53 = vpack.c.bf16 %v964_v51, %v964_v51  ;;  %1300 = vst.msk [vmem:[%s2482_s3 + $0x17c] sm:$0xf] %vm1204_vm5, %v1178_v48  ;;  %v656_v54 = vpop.f32.mrf.mxu3 }
  0xa2   :  { %1237 = vst.msk [vmem:[%s2482_s3 + $0x80] sm:$0xf] %vm1204_vm5, %v1115_v49  ;;  %v498_v55 = vpop.f32.mrf.mxu1  ;;  %v657_v56 = vadd.f32 %v1679_v44, %v656_v54 }
  0xa3   :  { %vm784_vm14 = vcmp.ge.f32.partialorder %v577_v52, 0.0  ;;  %v905_v57 = vmul.f32 0.01, %v577_v52  ;;  %v499_v58 = vadd.f32 %v1679_v44, %v498_v55  ;;  %1207 = vst.msk [vmem:[%s2482_s3 + $0x8] sm:$0xf] %vm1204_vm5, %v1085_v53  ;;  %v423_v59 = vpop.f32.mrf.mxu0  ;;  %v67_v53 = vld [vmem:[%s2480_s0 + $0x1a0] sm:$0xff] }
  0xa4   :  { %v424_v60 = vadd.f32 %v1679_v44, %v423_v59  ;;  %vm816_vm15 = vcmp.ge.f32.partialorder %v657_v56, 0.0  ;;  %v937_v61 = vmul.f32 0.01, %v657_v56  ;;  %v68_v55 = vld [vmem:[%s2480_s0 + $0x1a8] sm:$0xff] }
  0xa5   :  { %v1026_v62 = vsel %vm784_vm14, %v577_v52, %v905_v57  ;;  %vm753_vm0 = vcmp.ge.f32.partialorder %v499_v58, 0.0  ;;  %v874_v63 = vmul.f32 0.01, %v499_v58  ;;  %v100_v57 = vld [vmem:[%s2480_s0 + $0x2a8] sm:$0xff] }
  0xa6   :  { %v1147_v1 = vpack.c.bf16 %v1026_v62, %v1026_v62  ;;  %vm723_vm1 = vcmp.ge.f32.partialorder %v424_v60, 0.0  ;;  %v844_v5 = vmul.f32 0.01, %v424_v60  ;;  %v1058_v6 = vsel %vm816_vm15, %v657_v56, %v937_v61  ;;  %v99_v56 = vld [vmem:[%s2480_s0 + $0x2a0] sm:$0xff]  ;;  %v37_v61 = vld [vmem:[%s2480_s0 + $0xb0] sm:$0xff]  ;;  %v38_v62 = vld [vmem:[%s2480_s0 + $0xb8] sm:$0xff] }
  0xa7   :  { %v995_v7 = vsel %vm753_vm0, %v499_v58, %v874_v63  ;;  %v1179_v10 = vpack.c.bf16 %v1058_v6, %v1058_v6  ;;  %v166_v6 = vpack.c.bf16 %v68_v55, %v67_v53 }
  0xa8   :  { %1269 = vst.msk [vmem:[%s2482_s3 + $0x100] sm:$0xf] %vm1204_vm5, %v1147_v1  ;;  %v1116_v11 = vpack.c.bf16 %v995_v7, %v995_v7  ;;  %v578_v12 = vpop.f32.mrf.mxu2  ;;  %v965_v13 = vsel %vm723_vm1, %v424_v60, %v844_v5  ;;  %v182_v7 = vpack.c.bf16 %v100_v57, %v99_v56  ;;  %v133_v56 = vld [vmem:[%s2480_s0 + $0x3b0] sm:$0xff]  ;;  %v134_v57 = vld [vmem:[%s2480_s0 + $0x3b8] sm:$0xff] }
  0xa9   :  { %v579_v16 = vadd.f32 %v1679_v44, %v578_v12  ;;  %v1086_v19 = vpack.c.bf16 %v965_v13, %v965_v13  ;;  %1301 = vst.msk [vmem:[%s2482_s3 + $0x180] sm:$0xf] %vm1204_vm5, %v1179_v10  ;;  %v658_v20 = vpop.f32.mrf.mxu3  ;;  %v198_v13 = vpack.c.bf16 %v132_v4, %v131_v3 }
  0xaa   :  { %1238 = vst.msk [vmem:[%s2482_s3 + $0x84] sm:$0xf] %vm1204_vm5, %v1116_v11  ;;  %v501_v21 = vpop.f32.mrf.mxu1  ;;  %v659_v23 = vadd.f32 %v1679_v44, %v658_v20  ;;  %v151_v11 = vpack.c.bf16 %v38_v62, %v37_v61 }
  0xab   :  { %vm785_vm3 = vcmp.ge.f32.partialorder %v579_v16, 0.0  ;;  %v906_v25 = vmul.f32 0.01, %v579_v16  ;;  %v502_v26 = vadd.f32 %v1679_v44, %v501_v21  ;;  %1208 = vst.msk [vmem:[%s2482_s3 + $0xc] sm:$0xf] %vm1204_vm5, %v1086_v19  ;;  %v426_v27 = vpop.f32.mrf.mxu0 }
  0xac   :  { %v427_v28 = vadd.f32 %v1679_v44, %v426_v27  ;;  %vm817_vm4 = vcmp.ge.f32.partialorder %v659_v23, 0.0  ;;  %v938_v29 = vmul.f32 0.01, %v659_v23 }
  0xad   :  { %v1027_v30 = vsel %vm785_vm3, %v579_v16, %v906_v25  ;;  %vm754_vm6 = vcmp.ge.f32.partialorder %v502_v26, 0.0  ;;  %v875_v31 = vmul.f32 0.01, %v502_v26  ;;  %1363 = vmatmul.msk.bf16.gmra.mxu1 %vm216_vm2, %v165_v17  ;;  %1379 = vmatmul.msk.bf16.gmra.mxu2 %vm216_vm2, %v181_v18 }
  0xae   :  { %v1148_v32 = vpack.c.bf16 %v1027_v30, %v1027_v30  ;;  %vm724_vm7 = vcmp.ge.f32.partialorder %v427_v28, 0.0  ;;  %v845_v33 = vmul.f32 0.01, %v427_v28  ;;  %1348 = vmatmul.msk.bf16.gmra.mxu0 %vm216_vm2, %v150_v22  ;;  %v1059_v34 = vsel %vm817_vm4, %v659_v23, %v938_v29  ;;  %1395 = vmatmul.msk.bf16.gmra.mxu3 %vm216_vm2, %v197_v24 }
  0xaf   :  { %v996_v35 = vsel %vm754_vm6, %v502_v26, %v875_v31  ;;  %v1180_v36 = vpack.c.bf16 %v1059_v34, %v1059_v34 }
  0xb0   :  { %1270 = vst.msk [vmem:[%s2482_s3 + $0x104] sm:$0xf] %vm1204_vm5, %v1148_v32  ;;  %v1117_v37 = vpack.c.bf16 %v996_v35, %v996_v35  ;;  %v581_v38 = vpop.f32.mrf.mxu2  ;;  %v966_v39 = vsel %vm724_vm7, %v427_v28, %v845_v33 }
  0xb1   :  { %v582_v40 = vadd.f32 %v1679_v44, %v581_v38  ;;  %v1087_v41 = vpack.c.bf16 %v966_v39, %v966_v39  ;;  %1302 = vst.msk [vmem:[%s2482_s3 + $0x184] sm:$0xf] %vm1204_vm5, %v1180_v36  ;;  %v661_v42 = vpop.f32.mrf.mxu3 }
  0xb2   :  { %1239 = vst.msk [vmem:[%s2482_s3 + $0x88] sm:$0xf] %vm1204_vm5, %v1117_v37  ;;  %v503_v43 = vpop.f32.mrf.mxu1  ;;  %v662_v45 = vadd.f32 %v1679_v44, %v661_v42 }
  0xb3   :  { %vm786_vm8 = vcmp.ge.f32.partialorder %v582_v40, 0.0  ;;  %v907_v46 = vmul.f32 0.01, %v582_v40  ;;  %v504_v47 = vadd.f32 %v1679_v44, %v503_v43  ;;  %1209 = vst.msk [vmem:[%s2482_s3 + $0x10] sm:$0xf] %vm1204_vm5, %v1087_v41  ;;  %v428_v48 = vpop.f32.mrf.mxu0  ;;  %v69_v41 = vld [vmem:[%s2480_s0 + $0x1b0] sm:$0xff] }
  0xb4   :  { %v429_v49 = vadd.f32 %v1679_v44, %v428_v48  ;;  %vm818_vm9 = vcmp.ge.f32.partialorder %v662_v45, 0.0  ;;  %v939_v50 = vmul.f32 0.01, %v662_v45  ;;  %v70_v43 = vld [vmem:[%s2480_s0 + $0x1b8] sm:$0xff] }
  0xb5   :  { %v1028_v51 = vsel %vm786_vm8, %v582_v40, %v907_v46  ;;  %vm755_vm10 = vcmp.ge.f32.partialorder %v504_v47, 0.0  ;;  %v876_v52 = vmul.f32 0.01, %v504_v47  ;;  %v102_v46 = vld [vmem:[%s2480_s0 + $0x2b8] sm:$0xff] }
  0xb6   :  { %v1149_v54 = vpack.c.bf16 %v1028_v51, %v1028_v51  ;;  %vm725_vm11 = vcmp.ge.f32.partialorder %v429_v49, 0.0  ;;  %v846_v58 = vmul.f32 0.01, %v429_v49  ;;  %v1060_v59 = vsel %vm818_vm9, %v662_v45, %v939_v50  ;;  %v101_v45 = vld [vmem:[%s2480_s0 + $0x2b0] sm:$0xff]  ;;  %v39_v50 = vld [vmem:[%s2480_s0 + $0xc0] sm:$0xff]  ;;  %v40_v51 = vld [vmem:[%s2480_s0 + $0xc8] sm:$0xff] }
  0xb7   :  { %v997_v60 = vsel %vm755_vm10, %v504_v47, %v876_v52  ;;  %v1181_v63 = vpack.c.bf16 %v1060_v59, %v1060_v59  ;;  %v167_v59 = vpack.c.bf16 %v70_v43, %v69_v41 }
  0xb8   :  { %1271 = vst.msk [vmem:[%s2482_s3 + $0x108] sm:$0xf] %vm1204_vm5, %v1149_v54  ;;  %v1118_v0 = vpack.c.bf16 %v997_v60, %v997_v60  ;;  %v583_v1 = vpop.f32.mrf.mxu2  ;;  %v967_v2 = vsel %vm725_vm11, %v429_v49, %v846_v58  ;;  %v183_v60 = vpack.c.bf16 %v102_v46, %v101_v45 }
  0xb9   :  { %v584_v5 = vadd.f32 %v1679_v44, %v583_v1  ;;  %v1088_v8 = vpack.c.bf16 %v967_v2, %v967_v2  ;;  %1303 = vst.msk [vmem:[%s2482_s3 + $0x188] sm:$0xf] %vm1204_vm5, %v1181_v63  ;;  %v663_v9 = vpop.f32.mrf.mxu3  ;;  %v199_v2 = vpack.c.bf16 %v134_v57, %v133_v56 }
  0xba   :  { %1240 = vst.msk [vmem:[%s2482_s3 + $0x8c] sm:$0xf] %vm1204_vm5, %v1118_v0  ;;  %v506_v10 = vpop.f32.mrf.mxu1  ;;  %v664_v12 = vadd.f32 %v1679_v44, %v663_v9  ;;  %v152_v0 = vpack.c.bf16 %v40_v51, %v39_v50 }
  0xbb   :  { %vm787_vm12 = vcmp.ge.f32.partialorder %v584_v5, 0.0  ;;  %v908_v14 = vmul.f32 0.01, %v584_v5  ;;  %v507_v15 = vadd.f32 %v1679_v44, %v506_v10  ;;  %1210 = vst.msk [vmem:[%s2482_s3 + $0x14] sm:$0xf] %vm1204_vm5, %v1088_v8  ;;  %v431_v16 = vpop.f32.mrf.mxu0 }
  0xbc   :  { %v432_v17 = vadd.f32 %v1679_v44, %v431_v16  ;;  %vm819_vm13 = vcmp.ge.f32.partialorder %v664_v12, 0.0  ;;  %v940_v18 = vmul.f32 0.01, %v664_v12 }
  0xbd   :  { %v1029_v19 = vsel %vm787_vm12, %v584_v5, %v908_v14  ;;  %vm756_vm14 = vcmp.ge.f32.partialorder %v507_v15, 0.0  ;;  %v877_v20 = vmul.f32 0.01, %v507_v15  ;;  %1364 = vmatmul.msk.bf16.gmra.mxu1 %vm216_vm2, %v166_v6  ;;  %1380 = vmatmul.msk.bf16.gmra.mxu2 %vm216_vm2, %v182_v7 }
  0xbe   :  { %v1150_v21 = vpack.c.bf16 %v1029_v19, %v1029_v19  ;;  %vm726_vm15 = vcmp.ge.f32.partialorder %v432_v17, 0.0  ;;  %v847_v22 = vmul.f32 0.01, %v432_v17  ;;  %1349 = vmatmul.msk.bf16.gmra.mxu0 %vm216_vm2, %v151_v11  ;;  %v1061_v23 = vsel %vm819_vm13, %v664_v12, %v940_v18  ;;  %1396 = vmatmul.msk.bf16.gmra.mxu3 %vm216_vm2, %v198_v13 }
  0xbf   :  { %v998_v24 = vsel %vm756_vm14, %v507_v15, %v877_v20  ;;  %v1182_v25 = vpack.c.bf16 %v1061_v23, %v1061_v23 }
  0xc0   :  { %1272 = vst.msk [vmem:[%s2482_s3 + $0x10c] sm:$0xf] %vm1204_vm5, %v1150_v21  ;;  %v1119_v26 = vpack.c.bf16 %v998_v24, %v998_v24  ;;  %v586_v27 = vpop.f32.mrf.mxu2  ;;  %v968_v28 = vsel %vm726_vm15, %v432_v17, %v847_v22 }
  0xc1   :  { %v587_v29 = vadd.f32 %v1679_v44, %v586_v27  ;;  %v1089_v30 = vpack.c.bf16 %v968_v28, %v968_v28  ;;  %1304 = vst.msk [vmem:[%s2482_s3 + $0x18c] sm:$0xf] %vm1204_vm5, %v1182_v25  ;;  %v666_v31 = vpop.f32.mrf.mxu3 }
  0xc2   :  { %1241 = vst.msk [vmem:[%s2482_s3 + $0x90] sm:$0xf] %vm1204_vm5, %v1119_v26  ;;  %v508_v32 = vpop.f32.mrf.mxu1  ;;  %v667_v33 = vadd.f32 %v1679_v44, %v666_v31 }
  0xc3   :  { %vm788_vm0 = vcmp.ge.f32.partialorder %v587_v29, 0.0  ;;  %v909_v34 = vmul.f32 0.01, %v587_v29  ;;  %v509_v35 = vadd.f32 %v1679_v44, %v508_v32  ;;  %1211 = vst.msk [vmem:[%s2482_s3 + $0x18] sm:$0xf] %vm1204_vm5, %v1089_v30  ;;  %v433_v36 = vpop.f32.mrf.mxu0  ;;  %v71_v30 = vld [vmem:[%s2480_s0 + $0x1c0] sm:$0xff] }
  0xc4   :  { %v434_v37 = vadd.f32 %v1679_v44, %v433_v36  ;;  %vm820_vm1 = vcmp.ge.f32.partialorder %v667_v33, 0.0  ;;  %v941_v38 = vmul.f32 0.01, %v667_v33  ;;  %v72_v32 = vld [vmem:[%s2480_s0 + $0x1c8] sm:$0xff] }
  0xc5   :  { %v1030_v39 = vsel %vm788_vm0, %v587_v29, %v909_v34  ;;  %vm757_vm3 = vcmp.ge.f32.partialorder %v509_v35, 0.0  ;;  %v878_v40 = vmul.f32 0.01, %v509_v35  ;;  %v104_v34 = vld [vmem:[%s2480_s0 + $0x2c8] sm:$0xff]  ;;  %v168_v46 = vpack.c.bf16 %v72_v32, %v71_v30 }
  0xc6   :  { %v1151_v42 = vpack.c.bf16 %v1030_v39, %v1030_v39  ;;  %vm727_vm4 = vcmp.ge.f32.partialorder %v434_v37, 0.0  ;;  %v848_v47 = vmul.f32 0.01, %v434_v37  ;;  %v1062_v48 = vsel %vm820_vm1, %v667_v33, %v941_v38  ;;  %v103_v33 = vld [vmem:[%s2480_s0 + $0x2c0] sm:$0xff]  ;;  %v41_v38 = vld [vmem:[%s2480_s0 + $0xd0] sm:$0xff]  ;;  %v42_v39 = vld [vmem:[%s2480_s0 + $0xd8] sm:$0xff] }
  0xc7   :  { %v999_v49 = vsel %vm757_vm3, %v509_v35, %v878_v40  ;;  %v1183_v52 = vpack.c.bf16 %v1062_v48, %v1062_v48  ;;  %v153_v51 = vpack.c.bf16 %v42_v39, %v41_v38 }
  0xc8   :  { %1273 = vst.msk [vmem:[%s2482_s3 + $0x110] sm:$0xf] %vm1204_vm5, %v1151_v42  ;;  %v1120_v53 = vpack.c.bf16 %v999_v49, %v999_v49  ;;  %v588_v54 = vpop.f32.mrf.mxu2  ;;  %v969_v55 = vsel %vm727_vm4, %v434_v37, %v848_v47  ;;  %v184_v47 = vpack.c.bf16 %v104_v34, %v103_v33 }
  0xc9   :  { %v589_v58 = vadd.f32 %v1679_v44, %v588_v54  ;;  %v1090_v61 = vpack.c.bf16 %v969_v55, %v969_v55  ;;  %1305 = vst.msk [vmem:[%s2482_s3 + $0x190] sm:$0xf] %vm1204_vm5, %v1183_v52  ;;  %v668_v62 = vpop.f32.mrf.mxu3 }
  0xca   :  { %1242 = vst.msk [vmem:[%s2482_s3 + $0x94] sm:$0xf] %vm1204_vm5, %v1120_v53  ;;  %v511_v63 = vpop.f32.mrf.mxu1  ;;  %v669_v1 = vadd.f32 %v1679_v44, %v668_v62 }
  0xcb   :  { %vm789_vm6 = vcmp.ge.f32.partialorder %v589_v58, 0.0  ;;  %v910_v3 = vmul.f32 0.01, %v589_v58  ;;  %v512_v4 = vadd.f32 %v1679_v44, %v511_v63  ;;  %1212 = vst.msk [vmem:[%s2482_s3 + $0x1c] sm:$0xf] %vm1204_vm5, %v1090_v61  ;;  %v436_v5 = vpop.f32.mrf.mxu0 }
  0xcc   :  { %v437_v6 = vadd.f32 %v1679_v44, %v436_v5  ;;  %vm821_vm7 = vcmp.ge.f32.partialorder %v669_v1, 0.0  ;;  %v942_v7 = vmul.f32 0.01, %v669_v1 }
  0xcd   :  { %v1031_v8 = vsel %vm789_vm6, %v589_v58, %v910_v3  ;;  %vm758_vm8 = vcmp.ge.f32.partialorder %v512_v4, 0.0  ;;  %v879_v9 = vmul.f32 0.01, %v512_v4  ;;  %1365 = vmatmul.msk.bf16.gmra.mxu1 %vm216_vm2, %v167_v59  ;;  %1381 = vmatmul.msk.bf16.gmra.mxu2 %vm216_vm2, %v183_v60  ;;  %v135_v58 = vld [vmem:[%s2480_s0 + $0x3c0] sm:$0xff] }
  0xce   :  { %v1152_v10 = vpack.c.bf16 %v1031_v8, %v1031_v8  ;;  %vm728_vm9 = vcmp.ge.f32.partialorder %v437_v6, 0.0  ;;  %v849_v11 = vmul.f32 0.01, %v437_v6  ;;  %1350 = vmatmul.msk.bf16.gmra.mxu0 %vm216_vm2, %v152_v0  ;;  %v1063_v12 = vsel %vm821_vm7, %v669_v1, %v942_v7  ;;  %1397 = vmatmul.msk.bf16.gmra.mxu3 %vm216_vm2, %v199_v2 }
  0xcf   :  { %v1000_v13 = vsel %vm758_vm8, %v512_v4, %v879_v9  ;;  %v1184_v14 = vpack.c.bf16 %v1063_v12, %v1063_v12  ;;  %v200_v61 = vpack.c.bf16 %v135_v58, %v135_v58 }
  0xd0   :  { %1274 = vst.msk [vmem:[%s2482_s3 + $0x114] sm:$0xf] %vm1204_vm5, %v1152_v10  ;;  %v1121_v15 = vpack.c.bf16 %v1000_v13, %v1000_v13  ;;  %v591_v16 = vpop.f32.mrf.mxu2  ;;  %v970_v17 = vsel %vm728_vm9, %v437_v6, %v849_v11 }
  0xd1   :  { %v592_v18 = vadd.f32 %v1679_v44, %v591_v16  ;;  %v1091_v19 = vpack.c.bf16 %v970_v17, %v970_v17  ;;  %1306 = vst.msk [vmem:[%s2482_s3 + $0x194] sm:$0xf] %vm1204_vm5, %v1184_v14  ;;  %v671_v20 = vpop.f32.mrf.mxu3 }
  0xd2   :  { %1243 = vst.msk [vmem:[%s2482_s3 + $0x98] sm:$0xf] %vm1204_vm5, %v1121_v15  ;;  %v513_v21 = vpop.f32.mrf.mxu1  ;;  %v672_v22 = vadd.f32 %v1679_v44, %v671_v20  ;;  %v74_v20 = vld [vmem:[%s2480_s0 + $0x1d8] sm:$0xff] }
  0xd3   :  { %vm790_vm10 = vcmp.ge.f32.partialorder %v592_v18, 0.0  ;;  %v911_v23 = vmul.f32 0.01, %v592_v18  ;;  %v514_v24 = vadd.f32 %v1679_v44, %v513_v21  ;;  %1213 = vst.msk [vmem:[%s2482_s3 + $0x20] sm:$0xf] %vm1204_vm5, %v1091_v19  ;;  %v438_v25 = vpop.f32.mrf.mxu0  ;;  %v105_v21 = vld [vmem:[%s2480_s0 + $0x2d0] sm:$0xff] }
  0xd4   :  { %v439_v26 = vadd.f32 %v1679_v44, %v438_v25  ;;  %vm822_vm11 = vcmp.ge.f32.partialorder %v672_v22, 0.0  ;;  %v943_v27 = vmul.f32 0.01, %v672_v22 }
  0xd5   :  { %v1032_v28 = vsel %vm790_vm10, %v592_v18, %v911_v23  ;;  %vm759_vm12 = vcmp.ge.f32.partialorder %v514_v24, 0.0  ;;  %v880_v29 = vmul.f32 0.01, %v514_v24  ;;  %v73_v18 = vld [vmem:[%s2480_s0 + $0x1d0] sm:$0xff] }
  0xd6   :  { %v1153_v31 = vpack.c.bf16 %v1032_v28, %v1032_v28  ;;  %vm729_vm13 = vcmp.ge.f32.partialorder %v439_v26, 0.0  ;;  %v850_v35 = vmul.f32 0.01, %v439_v26  ;;  %v1064_v36 = vsel %vm822_vm11, %v672_v22, %v943_v27  ;;  %v106_v22 = vld [vmem:[%s2480_s0 + $0x2d8] sm:$0xff]  ;;  %v44_v27 = vld [vmem:[%s2480_s0 + $0xe8] sm:$0xff] }
  0xd7   :  { %v1001_v37 = vsel %vm759_vm12, %v514_v24, %v880_v29  ;;  %v1185_v40 = vpack.c.bf16 %v1064_v36, %v1064_v36  ;;  %v169_v33 = vpack.c.bf16 %v74_v20, %v73_v18  ;;  %v185_v34 = vpack.c.bf16 %v106_v22, %v105_v21 }
  0xd8   :  { %1275 = vst.msk [vmem:[%s2482_s3 + $0x118] sm:$0xf] %vm1204_vm5, %v1153_v31  ;;  %v1122_v41 = vpack.c.bf16 %v1001_v37, %v1001_v37  ;;  %v593_v42 = vpop.f32.mrf.mxu2  ;;  %v971_v43 = vsel %vm729_vm13, %v439_v26, %v850_v35  ;;  %v43_v26 = vld [vmem:[%s2480_s0 + $0xe0] sm:$0xff] }
  0xd9   :  { %v594_v45 = vadd.f32 %v1679_v44, %v593_v42  ;;  %v1092_v48 = vpack.c.bf16 %v971_v43, %v971_v43  ;;  %1307 = vst.msk [vmem:[%s2482_s3 + $0x198] sm:$0xf] %vm1204_vm5, %v1185_v40  ;;  %v673_v49 = vpop.f32.mrf.mxu3  ;;  %v154_v38 = vpack.c.bf16 %v44_v27, %v43_v26 }
  0xda   :  { %1244 = vst.msk [vmem:[%s2482_s3 + $0x9c] sm:$0xf] %vm1204_vm5, %v1122_v41  ;;  %v516_v50 = vpop.f32.mrf.mxu1  ;;  %v674_v52 = vadd.f32 %v1679_v44, %v673_v49 }
  0xdb   :  { %vm791_vm14 = vcmp.ge.f32.partialorder %v594_v45, 0.0  ;;  %v912_v53 = vmul.f32 0.01, %v594_v45  ;;  %v517_v54 = vadd.f32 %v1679_v44, %v516_v50  ;;  %1214 = vst.msk [vmem:[%s2482_s3 + $0x24] sm:$0xf] %vm1204_vm5, %v1092_v48  ;;  %v441_v55 = vpop.f32.mrf.mxu0 }
  0xdc   :  { %v442_v56 = vadd.f32 %v1679_v44, %v441_v55  ;;  %vm823_vm15 = vcmp.ge.f32.partialorder %v674_v52, 0.0  ;;  %v944_v57 = vmul.f32 0.01, %v674_v52 }
  0xdd   :  { %v1033_v59 = vsel %vm791_vm14, %v594_v45, %v912_v53  ;;  %vm760_vm0 = vcmp.ge.f32.partialorder %v517_v54, 0.0  ;;  %v881_v60 = vmul.f32 0.01, %v517_v54  ;;  %1366 = vmatmul.msk.bf16.gmra.mxu1 %vm216_vm2, %v168_v46  ;;  %1382 = vmatmul.msk.bf16.gmra.mxu2 %vm216_vm2, %v184_v47 }
  0xde   :  { %v1154_v62 = vpack.c.bf16 %v1033_v59, %v1033_v59  ;;  %vm730_vm1 = vcmp.ge.f32.partialorder %v442_v56, 0.0  ;;  %v851_v63 = vmul.f32 0.01, %v442_v56  ;;  %1351 = vmatmul.msk.bf16.gmra.mxu0 %vm216_vm2, %v153_v51  ;;  %v1065_v0 = vsel %vm823_vm15, %v674_v52, %v944_v57  ;;  %1398 = vmatmul.msk.bf16.gmra.mxu3 %vm216_vm2, %v200_v61 }
  0xdf   :  { %v1002_v1 = vsel %vm760_vm0, %v517_v54, %v881_v60  ;;  %v1186_v2 = vpack.c.bf16 %v1065_v0, %v1065_v0 }
  0xe0   :  { %1276 = vst.msk [vmem:[%s2482_s3 + $0x11c] sm:$0xf] %vm1204_vm5, %v1154_v62  ;;  %v1123_v3 = vpack.c.bf16 %v1002_v1, %v1002_v1  ;;  %v596_v4 = vpop.f32.mrf.mxu2  ;;  %v972_v5 = vsel %vm730_vm1, %v442_v56, %v851_v63 }
  0xe1   :  { %v597_v6 = vadd.f32 %v1679_v44, %v596_v4  ;;  %v1093_v7 = vpack.c.bf16 %v972_v5, %v972_v5  ;;  %1308 = vst.msk [vmem:[%s2482_s3 + $0x19c] sm:$0xf] %vm1204_vm5, %v1186_v2  ;;  %v676_v8 = vpop.f32.mrf.mxu3  ;;  %v75_v4 = vld [vmem:[%s2480_s0 + $0x1e0] sm:$0xff] }
  0xe2   :  { %1245 = vst.msk [vmem:[%s2482_s3 + $0xa0] sm:$0xf] %vm1204_vm5, %v1123_v3  ;;  %v518_v9 = vpop.f32.mrf.mxu1  ;;  %v677_v10 = vadd.f32 %v1679_v44, %v676_v8  ;;  %v108_v8 = vld [vmem:[%s2480_s0 + $0x2e8] sm:$0xff] }
  0xe3   :  { %vm792_vm3 = vcmp.ge.f32.partialorder %v597_v6, 0.0  ;;  %v913_v11 = vmul.f32 0.01, %v597_v6  ;;  %v519_v12 = vadd.f32 %v1679_v44, %v518_v9  ;;  %1215 = vst.msk [vmem:[%s2482_s3 + $0x28] sm:$0xf] %vm1204_vm5, %v1093_v7  ;;  %v443_v13 = vpop.f32.mrf.mxu0  ;;  %v107_v7 = vld [vmem:[%s2480_s0 + $0x2e0] sm:$0xff] }
  0xe4   :  { %v444_v14 = vadd.f32 %v1679_v44, %v443_v13  ;;  %vm824_vm4 = vcmp.ge.f32.partialorder %v677_v10, 0.0  ;;  %v945_v15 = vmul.f32 0.01, %v677_v10  ;;  %v186_v18 = vpack.c.bf16 %v108_v8, %v107_v7 }
  0xe5   :  { %v1034_v16 = vsel %vm792_vm3, %v597_v6, %v913_v11  ;;  %vm761_vm6 = vcmp.ge.f32.partialorder %v519_v12, 0.0  ;;  %v882_v17 = vmul.f32 0.01, %v519_v12  ;;  %v76_v6 = vld [vmem:[%s2480_s0 + $0x1e8] sm:$0xff] }
  0xe6   :  { %v1155_v19 = vpack.c.bf16 %v1034_v16, %v1034_v16  ;;  %vm731_vm7 = vcmp.ge.f32.partialorder %v444_v14, 0.0  ;;  %v852_v23 = vmul.f32 0.01, %v444_v14  ;;  %v1066_v24 = vsel %vm824_vm4, %v677_v10, %v945_v15 }
  0xe7   :  { %v1003_v25 = vsel %vm761_vm6, %v519_v12, %v882_v17  ;;  %v1187_v28 = vpack.c.bf16 %v1066_v24, %v1066_v24  ;;  %v170_v17 = vpack.c.bf16 %v76_v6, %v75_v4 }
  0xe8   :  { %1277 = vst.msk [vmem:[%s2482_s3 + $0x120] sm:$0xf] %vm1204_vm5, %v1155_v19  ;;  %v1124_v29 = vpack.c.bf16 %v1003_v25, %v1003_v25  ;;  %v598_v30 = vpop.f32.mrf.mxu2  ;;  %v973_v31 = vsel %vm731_vm7, %v444_v14, %v852_v23 }
  0xe9   :  { %v599_v32 = vadd.f32 %v1679_v44, %v598_v30  ;;  %v1094_v35 = vpack.c.bf16 %v973_v31, %v973_v31  ;;  %1309 = vst.msk [vmem:[%s2482_s3 + $0x1a0] sm:$0xf] %vm1204_vm5, %v1187_v28  ;;  %v678_v36 = vpop.f32.mrf.mxu3 }
  0xea   :  { %1246 = vst.msk [vmem:[%s2482_s3 + $0xa4] sm:$0xf] %vm1204_vm5, %v1124_v29  ;;  %v521_v37 = vpop.f32.mrf.mxu1  ;;  %v679_v39 = vadd.f32 %v1679_v44, %v678_v36 }
  0xeb   :  { %vm793_vm8 = vcmp.ge.f32.partialorder %v599_v32, 0.0  ;;  %v914_v40 = vmul.f32 0.01, %v599_v32  ;;  %v522_v41 = vadd.f32 %v1679_v44, %v521_v37  ;;  %1216 = vst.msk [vmem:[%s2482_s3 + $0x2c] sm:$0xf] %vm1204_vm5, %v1094_v35  ;;  %v446_v42 = vpop.f32.mrf.mxu0 }
  0xec   :  { %v447_v43 = vadd.f32 %v1679_v44, %v446_v42  ;;  %vm825_vm9 = vcmp.ge.f32.partialorder %v679_v39, 0.0  ;;  %v946_v45 = vmul.f32 0.01, %v679_v39  ;;  %v2150_v37 = vld [vmem:[%s2481_s2] ss:$0 sm:$0xff] }
  0xed   :  { %v1035_v46 = vsel %vm793_vm8, %v599_v32, %v914_v40  ;;  %vm762_vm10 = vcmp.ge.f32.partialorder %v522_v41, 0.0  ;;  %v883_v47 = vmul.f32 0.01, %v522_v41  ;;  %1367 = vmatmul.msk.bf16.gmra.mxu1 %vm216_vm2, %v169_v33  ;;  %1383 = vmatmul.msk.bf16.gmra.mxu2 %vm216_vm2, %v185_v34 }
  0xee   :  { %v1156_v48 = vpack.c.bf16 %v1035_v46, %v1035_v46  ;;  %vm732_vm11 = vcmp.ge.f32.partialorder %v447_v43, 0.0  ;;  %v853_v49 = vmul.f32 0.01, %v447_v43  ;;  %1352 = vmatmul.msk.bf16.gmra.mxu0 %vm216_vm2, %v154_v38  ;;  %v1067_v50 = vsel %vm825_vm9, %v679_v39, %v946_v45 }
  0xef   :  { %v1004_v51 = vsel %vm762_vm10, %v522_v41, %v883_v47  ;;  %v1188_v52 = vpack.c.bf16 %v1067_v50, %v1067_v50 }
  0xf0   :  { %1278 = vst.msk [vmem:[%s2482_s3 + $0x124] sm:$0xf] %vm1204_vm5, %v1156_v48  ;;  %v1125_v53 = vpack.c.bf16 %v1004_v51, %v1004_v51  ;;  %v601_v54 = vpop.f32.mrf.mxu2  ;;  %v974_v55 = vsel %vm732_vm11, %v447_v43, %v853_v49 }
  0xf1   :  { %v602_v56 = vadd.f32 %v1679_v44, %v601_v54  ;;  %v1095_v57 = vpack.c.bf16 %v974_v55, %v974_v55  ;;  %1310 = vst.msk [vmem:[%s2482_s3 + $0x1a4] sm:$0xf] %vm1204_vm5, %v1188_v52  ;;  %v681_v58 = vpop.f32.mrf.mxu3 }
  0xf2   :  { %1247 = vst.msk [vmem:[%s2482_s3 + $0xa8] sm:$0xf] %vm1204_vm5, %v1125_v53  ;;  %v523_v59 = vpop.f32.mrf.mxu1  ;;  %v682_v60 = vadd.f32 %v1679_v44, %v681_v58 }
  0xf3   :  { %vm794_vm12 = vcmp.ge.f32.partialorder %v602_v56, 0.0  ;;  %v915_v61 = vmul.f32 0.01, %v602_v56  ;;  %v524_v62 = vadd.f32 %v1679_v44, %v523_v59  ;;  %1217 = vst.msk [vmem:[%s2482_s3 + $0x30] sm:$0xf] %vm1204_vm5, %v1095_v57  ;;  %v448_v63 = vpop.f32.mrf.mxu0 }
  0xf4   :  { %v449_v0 = vadd.f32 %v1679_v44, %v448_v63  ;;  %vm826_vm13 = vcmp.ge.f32.partialorder %v682_v60, 0.0  ;;  %v947_v1 = vmul.f32 0.01, %v682_v60 }
  0xf5   :  { %v1036_v2 = vsel %vm794_vm12, %v602_v56, %v915_v61  ;;  %vm763_vm14 = vcmp.ge.f32.partialorder %v524_v62, 0.0  ;;  %v884_v3 = vmul.f32 0.01, %v524_v62 }
  0xf6   :  { %v1157_v5 = vpack.c.bf16 %v1036_v2, %v1036_v2  ;;  %vm733_vm15 = vcmp.ge.f32.partialorder %v449_v0, 0.0  ;;  %v854_v9 = vmul.f32 0.01, %v449_v0  ;;  %v1068_v10 = vsel %vm826_vm13, %v682_v60, %v947_v1 }
  0xf7   :  { %v1005_v11 = vsel %vm763_vm14, %v524_v62, %v884_v3  ;;  %v1189_v12 = vpack.c.bf16 %v1068_v10, %v1068_v10 }
  0xf8   :  { %1279 = vst.msk [vmem:[%s2482_s3 + $0x128] sm:$0xf] %vm1204_vm5, %v1157_v5  ;;  %v1126_v13 = vpack.c.bf16 %v1005_v11, %v1005_v11  ;;  %v603_v14 = vpop.f32.mrf.mxu2  ;;  %v975_v15 = vsel %vm733_vm15, %v449_v0, %v854_v9 }
  0xf9   :  { %v604_v16 = vadd.f32 %v1679_v44, %v603_v14  ;;  %v1096_v19 = vpack.c.bf16 %v975_v15, %v975_v15  ;;  %1311 = vst.msk [vmem:[%s2482_s3 + $0x1a8] sm:$0xf] %vm1204_vm5, %v1189_v12  ;;  %v683_v20 = vpop.f32.mrf.mxu3 }
  0xfa   :  { %1248 = vst.msk [vmem:[%s2482_s3 + $0xac] sm:$0xf] %vm1204_vm5, %v1126_v13  ;;  %v526_v21 = vpop.f32.mrf.mxu1  ;;  %v684_v22 = vadd.f32 %v1679_v44, %v683_v20 }
  0xfb   :  { %vm795_vm0 = vcmp.ge.f32.partialorder %v604_v16, 0.0  ;;  %v916_v23 = vmul.f32 0.01, %v604_v16  ;;  %v527_v24 = vadd.f32 %v1679_v44, %v526_v21  ;;  %1218 = vst.msk [vmem:[%s2482_s3 + $0x34] sm:$0xf] %vm1204_vm5, %v1096_v19  ;;  %v451_v25 = vpop.f32.mrf.mxu0 }
  0xfc   :  { %v452_v26 = vadd.f32 %v1679_v44, %v451_v25  ;;  %vm827_vm1 = vcmp.ge.f32.partialorder %v684_v22, 0.0  ;;  %v948_v27 = vmul.f32 0.01, %v684_v22 }
  0xfd   :  { %v1037_v28 = vsel %vm795_vm0, %v604_v16, %v916_v23  ;;  %vm764_vm3 = vcmp.ge.f32.partialorder %v527_v24, 0.0  ;;  %v885_v29 = vmul.f32 0.01, %v527_v24  ;;  %1368 = vmatmul.msk.bf16.gmra.mxu1 %vm216_vm2, %v170_v17  ;;  %1384 = vmatmul.msk.bf16.gmra.mxu2 %vm216_vm2, %v186_v18 }
  0xfe   :  { %v1158_v30 = vpack.c.bf16 %v1037_v28, %v1037_v28  ;;  %vm734_vm4 = vcmp.ge.f32.partialorder %v452_v26, 0.0  ;;  %v855_v31 = vmul.f32 0.01, %v452_v26  ;;  %v1069_v32 = vsel %vm827_vm1, %v684_v22, %v948_v27 }
  0xff   :  { %v1006_v33 = vsel %vm764_vm3, %v527_v24, %v885_v29  ;;  %v1190_v34 = vpack.c.bf16 %v1069_v32, %v1069_v32 }
 0x100   :  { %1280 = vst.msk [vmem:[%s2482_s3 + $0x12c] sm:$0xf] %vm1204_vm5, %v1158_v30  ;;  %v1127_v44 = vpack.c.bf16 %v1006_v33, %v1006_v33  ;;  %v606_v35 = vpop.f32.mrf.mxu2  ;;  %v976_v36 = vsel %vm734_vm4, %v452_v26, %v855_v31 }
 0x101   :  { %v607_v38 = vadd.f32 %v2150_v37, %v606_v35  ;;  %v1097_v39 = vpack.c.bf16 %v976_v36, %v976_v36  ;;  %1312 = vst.msk [vmem:[%s2482_s3 + $0x1ac] sm:$0xf] %vm1204_vm5, %v1190_v34  ;;  %v686_v40 = vpop.f32.mrf.mxu3 }
 0x102   :  { %1249 = vst.msk [vmem:[%s2482_s3 + $0xb0] sm:$0xf] %vm1204_vm5, %v1127_v44  ;;  %v528_v41 = vpop.f32.mrf.mxu1  ;;  %v687_v42 = vadd.f32 %v2150_v37, %v686_v40 }
 0x103   :  { %vm796_vm2 = vcmp.ge.f32.partialorder %v607_v38, 0.0  ;;  %v917_v43 = vmul.f32 0.01, %v607_v38  ;;  %v529_v45 = vadd.f32 %v2150_v37, %v528_v41  ;;  %1219 = vst.msk [vmem:[%s2482_s3 + $0x38] sm:$0xf] %vm1204_vm5, %v1097_v39  ;;  %v453_v46 = vpop.f32.mrf.mxu0 }
 0x104   :  { %v454_v47 = vadd.f32 %v2150_v37, %v453_v46  ;;  %vm828_vm6 = vcmp.ge.f32.partialorder %v687_v42, 0.0  ;;  %v949_v48 = vmul.f32 0.01, %v687_v42 }
 0x105   :  { %v1038_v49 = vsel %vm796_vm2, %v607_v38, %v917_v43  ;;  %vm765_vm7 = vcmp.ge.f32.partialorder %v529_v45, 0.0  ;;  %v886_v50 = vmul.f32 0.01, %v529_v45 }
 0x106   :  { %v1159_v51 = vpack.c.bf16 %v1038_v49, %v1038_v49  ;;  %vm735_vm8 = vcmp.ge.f32.partialorder %v454_v47, 0.0  ;;  %v856_v52 = vmul.f32 0.01, %v454_v47  ;;  %v1070_v53 = vsel %vm828_vm6, %v687_v42, %v949_v48 }
 0x107   :  { %v1007_v54 = vsel %vm765_vm7, %v529_v45, %v886_v50  ;;  %v1191_v55 = vpack.c.bf16 %v1070_v53, %v1070_v53 }
 0x108   :  { %1281 = vst.msk [vmem:[%s2482_s3 + $0x130] sm:$0xf] %vm1204_vm5, %v1159_v51  ;;  %v1128_v56 = vpack.c.bf16 %v1007_v54, %v1007_v54  ;;  %v608_v57 = vpop.f32.mrf.mxu2  ;;  %v977_v58 = vsel %vm735_vm8, %v454_v47, %v856_v52 }
 0x109   :  { %v609_v59 = vadd.f32 %v2150_v37, %v608_v57  ;;  %v1098_v60 = vpack.c.bf16 %v977_v58, %v977_v58  ;;  %1313 = vst.msk [vmem:[%s2482_s3 + $0x1b0] sm:$0xf] %vm1204_vm5, %v1191_v55  ;;  %v688_v61 = vpop.f32.mrf.mxu3 }
 0x10a   :  { %1250 = vst.msk [vmem:[%s2482_s3 + $0xb4] sm:$0xf] %vm1204_vm5, %v1128_v56  ;;  %v531_v62 = vpop.f32.mrf.mxu1  ;;  %v689_v63 = vadd.f32 %v2150_v37, %v688_v61 }
 0x10b   :  { %vm797_vm9 = vcmp.ge.f32.partialorder %v609_v59, 0.0  ;;  %v918_v0 = vmul.f32 0.01, %v609_v59  ;;  %v532_v1 = vadd.f32 %v2150_v37, %v531_v62  ;;  %1220 = vst.msk [vmem:[%s2482_s3 + $0x3c] sm:$0xf] %vm1204_vm5, %v1098_v60  ;;  %v456_v2 = vpop.f32.mrf.mxu0 }
 0x10c   :  { %v457_v3 = vadd.f32 %v2150_v37, %v456_v2  ;;  %vm829_vm10 = vcmp.ge.f32.partialorder %v689_v63, 0.0  ;;  %v950_v4 = vmul.f32 0.01, %v689_v63 }
 0x10d   :  { %v1039_v5 = vsel %vm797_vm9, %v609_v59, %v918_v0  ;;  %vm766_vm11 = vcmp.ge.f32.partialorder %v532_v1, 0.0  ;;  %v887_v6 = vmul.f32 0.01, %v532_v1 }
 0x10e   :  { %v1160_v7 = vpack.c.bf16 %v1039_v5, %v1039_v5  ;;  %vm736_vm12 = vcmp.ge.f32.partialorder %v457_v3, 0.0  ;;  %v857_v8 = vmul.f32 0.01, %v457_v3  ;;  %v1071_v9 = vsel %vm829_vm10, %v689_v63, %v950_v4 }
 0x10f   :  { %v1008_v10 = vsel %vm766_vm11, %v532_v1, %v887_v6  ;;  %v1192_v11 = vpack.c.bf16 %v1071_v9, %v1071_v9 }
 0x110   :  { %1282 = vst.msk [vmem:[%s2482_s3 + $0x134] sm:$0xf] %vm1204_vm5, %v1160_v7  ;;  %v1129_v12 = vpack.c.bf16 %v1008_v10, %v1008_v10  ;;  %v611_v13 = vpop.f32.mrf.mxu2  ;;  %v978_v14 = vsel %vm736_vm12, %v457_v3, %v857_v8 }
 0x111   :  { %v612_v15 = vadd.f32 %v2150_v37, %v611_v13  ;;  %v1099_v16 = vpack.c.bf16 %v978_v14, %v978_v14  ;;  %1314 = vst.msk [vmem:[%s2482_s3 + $0x1b4] sm:$0xf] %vm1204_vm5, %v1192_v11  ;;  %v691_v17 = vpop.f32.mrf.mxu3 }
 0x112   :  { %1251 = vst.msk [vmem:[%s2482_s3 + $0xb8] sm:$0xf] %vm1204_vm5, %v1129_v12  ;;  %v533_v18 = vpop.f32.mrf.mxu1  ;;  %v692_v19 = vadd.f32 %v2150_v37, %v691_v17 }
 0x113   :  { %vm798_vm13 = vcmp.ge.f32.partialorder %v612_v15, 0.0  ;;  %v919_v20 = vmul.f32 0.01, %v612_v15  ;;  %v534_v21 = vadd.f32 %v2150_v37, %v533_v18  ;;  %1221 = vst.msk [vmem:[%s2482_s3 + $0x40] sm:$0xf] %vm1204_vm5, %v1099_v16  ;;  %v458_v22 = vpop.f32.mrf.mxu0 }
 0x114   :  { %v459_v23 = vadd.f32 %v2150_v37, %v458_v22  ;;  %vm830_vm14 = vcmp.ge.f32.partialorder %v692_v19, 0.0  ;;  %v951_v24 = vmul.f32 0.01, %v692_v19 }
 0x115   :  { %v1040_v25 = vsel %vm798_vm13, %v612_v15, %v919_v20  ;;  %vm767_vm15 = vcmp.ge.f32.partialorder %v534_v21, 0.0  ;;  %v888_v26 = vmul.f32 0.01, %v534_v21 }
 0x116   :  { %v1161_v27 = vpack.c.bf16 %v1040_v25, %v1040_v25  ;;  %vm737_vm0 = vcmp.ge.f32.partialorder %v459_v23, 0.0  ;;  %v858_v28 = vmul.f32 0.01, %v459_v23  ;;  %v1072_v29 = vsel %vm830_vm14, %v692_v19, %v951_v24 }
 0x117   :  { %v1009_v30 = vsel %vm767_vm15, %v534_v21, %v888_v26  ;;  %v1193_v31 = vpack.c.bf16 %v1072_v29, %v1072_v29 }
 0x118   :  { %1283 = vst.msk [vmem:[%s2482_s3 + $0x138] sm:$0xf] %vm1204_vm5, %v1161_v27  ;;  %v1130_v32 = vpack.c.bf16 %v1009_v30, %v1009_v30  ;;  %v613_v33 = vpop.f32.mrf.mxu2  ;;  %v979_v34 = vsel %vm737_vm0, %v459_v23, %v858_v28 }
 0x119   :  { %v614_v44 = vadd.f32 %v2150_v37, %v613_v33  ;;  %v1100_v35 = vpack.c.bf16 %v979_v34, %v979_v34  ;;  %1315 = vst.msk [vmem:[%s2482_s3 + $0x1b8] sm:$0xf] %vm1204_vm5, %v1193_v31  ;;  %v693_v36 = vpop.f32.mrf.mxu3 }
 0x11a   :  { %1252 = vst.msk [vmem:[%s2482_s3 + $0xbc] sm:$0xf] %vm1204_vm5, %v1130_v32  ;;  %v536_v38 = vpop.f32.mrf.mxu1  ;;  %v694_v39 = vadd.f32 %v2150_v37, %v693_v36 }
 0x11b   :  { %vm799_vm1 = vcmp.ge.f32.partialorder %v614_v44, 0.0  ;;  %v920_v40 = vmul.f32 0.01, %v614_v44  ;;  %v537_v41 = vadd.f32 %v2150_v37, %v536_v38  ;;  %1222 = vst.msk [vmem:[%s2482_s3 + $0x44] sm:$0xf] %vm1204_vm5, %v1100_v35  ;;  %v461_v42 = vpop.f32.mrf.mxu0 }
 0x11c   :  { %v462_v43 = vadd.f32 %v2150_v37, %v461_v42  ;;  %vm831_vm3 = vcmp.ge.f32.partialorder %v694_v39, 0.0  ;;  %v952_v45 = vmul.f32 0.01, %v694_v39 }
 0x11d   :  { %v1041_v46 = vsel %vm799_vm1, %v614_v44, %v920_v40  ;;  %vm768_vm4 = vcmp.ge.f32.partialorder %v537_v41, 0.0  ;;  %v889_v47 = vmul.f32 0.01, %v537_v41 }
 0x11e   :  { %v1162_v48 = vpack.c.bf16 %v1041_v46, %v1041_v46  ;;  %vm738_vm2 = vcmp.ge.f32.partialorder %v462_v43, 0.0  ;;  %v859_v49 = vmul.f32 0.01, %v462_v43  ;;  %v1073_v50 = vsel %vm831_vm3, %v694_v39, %v952_v45 }
 0x11f   :  { %v1010_v51 = vsel %vm768_vm4, %v537_v41, %v889_v47  ;;  %v1194_v52 = vpack.c.bf16 %v1073_v50, %v1073_v50 }
 0x120   :  { %1284 = vst.msk [vmem:[%s2482_s3 + $0x13c] sm:$0xf] %vm1204_vm5, %v1162_v48  ;;  %v1131_v53 = vpack.c.bf16 %v1010_v51, %v1010_v51  ;;  %v616_v54 = vpop.f32.mrf.mxu2  ;;  %v980_v55 = vsel %vm738_vm2, %v462_v43, %v859_v49 }
 0x121   :  { %v617_v56 = vadd.f32 %v2150_v37, %v616_v54  ;;  %v1101_v57 = vpack.c.bf16 %v980_v55, %v980_v55  ;;  %1316 = vst.msk [vmem:[%s2482_s3 + $0x1bc] sm:$0xf] %vm1204_vm5, %v1194_v52  ;;  %v696_v58 = vpop.f32.mrf.mxu3 }
 0x122   :  { %1253 = vst.msk [vmem:[%s2482_s3 + $0xc0] sm:$0xf] %vm1204_vm5, %v1131_v53  ;;  %v538_v59 = vpop.f32.mrf.mxu1  ;;  %v697_v60 = vadd.f32 %v2150_v37, %v696_v58 }
 0x123   :  { %vm800_vm6 = vcmp.ge.f32.partialorder %v617_v56, 0.0  ;;  %v921_v61 = vmul.f32 0.01, %v617_v56  ;;  %v539_v62 = vadd.f32 %v2150_v37, %v538_v59  ;;  %1223 = vst.msk [vmem:[%s2482_s3 + $0x48] sm:$0xf] %vm1204_vm5, %v1101_v57  ;;  %v463_v63 = vpop.f32.mrf.mxu0 }
 0x124   :  { %v464_v0 = vadd.f32 %v2150_v37, %v463_v63  ;;  %vm832_vm7 = vcmp.ge.f32.partialorder %v697_v60, 0.0  ;;  %v953_v1 = vmul.f32 0.01, %v697_v60 }
 0x125   :  { %v1042_v2 = vsel %vm800_vm6, %v617_v56, %v921_v61  ;;  %vm769_vm8 = vcmp.ge.f32.partialorder %v539_v62, 0.0  ;;  %v890_v3 = vmul.f32 0.01, %v539_v62 }
 0x126   :  { %v1163_v4 = vpack.c.bf16 %v1042_v2, %v1042_v2  ;;  %vm739_vm9 = vcmp.ge.f32.partialorder %v464_v0, 0.0  ;;  %v860_v5 = vmul.f32 0.01, %v464_v0  ;;  %v1074_v6 = vsel %vm832_vm7, %v697_v60, %v953_v1 }
 0x127   :  { %v1011_v7 = vsel %vm769_vm8, %v539_v62, %v890_v3  ;;  %v1195_v8 = vpack.c.bf16 %v1074_v6, %v1074_v6 }
 0x128   :  { %1285 = vst.msk [vmem:[%s2482_s3 + $0x140] sm:$0xf] %vm1204_vm5, %v1163_v4  ;;  %v1132_v9 = vpack.c.bf16 %v1011_v7, %v1011_v7  ;;  %v618_v10 = vpop.f32.mrf.mxu2  ;;  %v981_v11 = vsel %vm739_vm9, %v464_v0, %v860_v5 }
 0x129   :  { %v619_v12 = vadd.f32 %v2150_v37, %v618_v10  ;;  %v1102_v13 = vpack.c.bf16 %v981_v11, %v981_v11  ;;  %1317 = vst.msk [vmem:[%s2482_s3 + $0x1c0] sm:$0xf] %vm1204_vm5, %v1195_v8  ;;  %v698_v14 = vpop.f32.mrf.mxu3 }
 0x12a   :  { %1254 = vst.msk [vmem:[%s2482_s3 + $0xc4] sm:$0xf] %vm1204_vm5, %v1132_v9  ;;  %v541_v15 = vpop.f32.mrf.mxu1  ;;  %v699_v16 = vadd.f32 %v2150_v37, %v698_v14 }
 0x12b   :  { %vm801_vm10 = vcmp.ge.f32.partialorder %v619_v12, 0.0  ;;  %v922_v17 = vmul.f32 0.01, %v619_v12  ;;  %v542_v18 = vadd.f32 %v2150_v37, %v541_v15  ;;  %1224 = vst.msk [vmem:[%s2482_s3 + $0x4c] sm:$0xf] %vm1204_vm5, %v1102_v13  ;;  %v466_v19 = vpop.f32.mrf.mxu0 }
 0x12c   :  { %v467_v20 = vadd.f32 %v2150_v37, %v466_v19  ;;  %vm833_vm11 = vcmp.ge.f32.partialorder %v699_v16, 0.0  ;;  %v954_v21 = vmul.f32 0.01, %v699_v16 }
 0x12d   :  { %v1043_v22 = vsel %vm801_vm10, %v619_v12, %v922_v17  ;;  %vm770_vm12 = vcmp.ge.f32.partialorder %v542_v18, 0.0  ;;  %v891_v23 = vmul.f32 0.01, %v542_v18 }
 0x12e   :  { %v1164_v24 = vpack.c.bf16 %v1043_v22, %v1043_v22  ;;  %vm740_vm13 = vcmp.ge.f32.partialorder %v467_v20, 0.0  ;;  %v861_v25 = vmul.f32 0.01, %v467_v20  ;;  %v1075_v26 = vsel %vm833_vm11, %v699_v16, %v954_v21 }
 0x12f   :  { %v1012_v27 = vsel %vm770_vm12, %v542_v18, %v891_v23  ;;  %v1196_v28 = vpack.c.bf16 %v1075_v26, %v1075_v26 }
 0x130   :  { %1286 = vst.msk [vmem:[%s2482_s3 + $0x144] sm:$0xf] %vm1204_vm5, %v1164_v24  ;;  %v1133_v29 = vpack.c.bf16 %v1012_v27, %v1012_v27  ;;  %v621_v30 = vpop.f32.mrf.mxu2  ;;  %v982_v31 = vsel %vm740_vm13, %v467_v20, %v861_v25 }
 0x131   :  { %v622_v32 = vadd.f32 %v2150_v37, %v621_v30  ;;  %v1103_v33 = vpack.c.bf16 %v982_v31, %v982_v31  ;;  %1318 = vst.msk [vmem:[%s2482_s3 + $0x1c4] sm:$0xf] %vm1204_vm5, %v1196_v28  ;;  %v701_v34 = vpop.f32.mrf.mxu3 }
 0x132   :  { %1255 = vst.msk [vmem:[%s2482_s3 + $0xc8] sm:$0xf] %vm1204_vm5, %v1133_v29  ;;  %v543_v44 = vpop.f32.mrf.mxu1  ;;  %v702_v35 = vadd.f32 %v2150_v37, %v701_v34 }
 0x133   :  { %vm802_vm14 = vcmp.ge.f32.partialorder %v622_v32, 0.0  ;;  %v923_v36 = vmul.f32 0.01, %v622_v32  ;;  %v544_v38 = vadd.f32 %v2150_v37, %v543_v44  ;;  %1225 = vst.msk [vmem:[%s2482_s3 + $0x50] sm:$0xf] %vm1204_vm5, %v1103_v33  ;;  %v468_v39 = vpop.f32.mrf.mxu0 }
 0x134   :  { %v469_v40 = vadd.f32 %v2150_v37, %v468_v39  ;;  %vm834_vm15 = vcmp.ge.f32.partialorder %v702_v35, 0.0  ;;  %v955_v41 = vmul.f32 0.01, %v702_v35 }
 0x135   :  { %v1044_v42 = vsel %vm802_vm14, %v622_v32, %v923_v36  ;;  %vm771_vm0 = vcmp.ge.f32.partialorder %v544_v38, 0.0  ;;  %v892_v43 = vmul.f32 0.01, %v544_v38 }
 0x136   :  { %v1165_v45 = vpack.c.bf16 %v1044_v42, %v1044_v42  ;;  %vm741_vm1 = vcmp.ge.f32.partialorder %v469_v40, 0.0  ;;  %v862_v46 = vmul.f32 0.01, %v469_v40  ;;  %v1076_v47 = vsel %vm834_vm15, %v702_v35, %v955_v41 }
 0x137   :  { %v1013_v48 = vsel %vm771_vm0, %v544_v38, %v892_v43  ;;  %v1197_v49 = vpack.c.bf16 %v1076_v47, %v1076_v47 }
 0x138   :  { %1287 = vst.msk [vmem:[%s2482_s3 + $0x148] sm:$0xf] %vm1204_vm5, %v1165_v45  ;;  %v1134_v50 = vpack.c.bf16 %v1013_v48, %v1013_v48  ;;  %v623_v51 = vpop.f32.mrf.mxu2  ;;  %v983_v52 = vsel %vm741_vm1, %v469_v40, %v862_v46 }
 0x139   :  { %v624_v53 = vadd.f32 %v2150_v37, %v623_v51  ;;  %v1104_v54 = vpack.c.bf16 %v983_v52, %v983_v52  ;;  %1319 = vst.msk [vmem:[%s2482_s3 + $0x1c8] sm:$0xf] %vm1204_vm5, %v1197_v49  ;;  %v703_v55 = vpop.f32.mrf.mxu3 }
 0x13a   :  { %1256 = vst.msk [vmem:[%s2482_s3 + $0xcc] sm:$0xf] %vm1204_vm5, %v1134_v50  ;;  %v546_v56 = vpop.f32.mrf.mxu1  ;;  %v704_v57 = vadd.f32 %v2150_v37, %v703_v55 }
 0x13b   :  { %vm803_vm3 = vcmp.ge.f32.partialorder %v624_v53, 0.0  ;;  %v924_v58 = vmul.f32 0.01, %v624_v53  ;;  %v547_v59 = vadd.f32 %v2150_v37, %v546_v56  ;;  %1226 = vst.msk [vmem:[%s2482_s3 + $0x54] sm:$0xf] %vm1204_vm5, %v1104_v54  ;;  %v471_v60 = vpop.f32.mrf.mxu0 }
 0x13c   :  { %v472_v61 = vadd.f32 %v2150_v37, %v471_v60  ;;  %vm835_vm4 = vcmp.ge.f32.partialorder %v704_v57, 0.0  ;;  %v956_v62 = vmul.f32 0.01, %v704_v57 }
 0x13d   :  { %v1045_v63 = vsel %vm803_vm3, %v624_v53, %v924_v58  ;;  %vm772_vm2 = vcmp.ge.f32.partialorder %v547_v59, 0.0  ;;  %v893_v0 = vmul.f32 0.01, %v547_v59 }
 0x13e   :  { %v1166_v1 = vpack.c.bf16 %v1045_v63, %v1045_v63  ;;  %vm742_vm6 = vcmp.ge.f32.partialorder %v472_v61, 0.0  ;;  %v863_v2 = vmul.f32 0.01, %v472_v61  ;;  %v1077_v3 = vsel %vm835_vm4, %v704_v57, %v956_v62 }
 0x13f   :  { %v1014_v4 = vsel %vm772_vm2, %v547_v59, %v893_v0  ;;  %v1198_v5 = vpack.c.bf16 %v1077_v3, %v1077_v3 }
 0x140   :  { %1288 = vst.msk [vmem:[%s2482_s3 + $0x14c] sm:$0xf] %vm1204_vm5, %v1166_v1  ;;  %v1135_v6 = vpack.c.bf16 %v1014_v4, %v1014_v4  ;;  %v626_v7 = vpop.f32.mrf.mxu2  ;;  %v984_v8 = vsel %vm742_vm6, %v472_v61, %v863_v2 }
 0x141   :  { %v627_v9 = vadd.f32 %v2150_v37, %v626_v7  ;;  %v1105_v10 = vpack.c.bf16 %v984_v8, %v984_v8  ;;  %1320 = vst.msk [vmem:[%s2482_s3 + $0x1cc] sm:$0xf] %vm1204_vm5, %v1198_v5  ;;  %v706_v11 = vpop.f32.mrf.mxu3 }
 0x142   :  { %1257 = vst.msk [vmem:[%s2482_s3 + $0xd0] sm:$0xf] %vm1204_vm5, %v1135_v6  ;;  %v548_v12 = vpop.f32.mrf.mxu1  ;;  %v707_v13 = vadd.f32 %v2150_v37, %v706_v11 }
 0x143   :  { %vm804_vm7 = vcmp.ge.f32.partialorder %v627_v9, 0.0  ;;  %v925_v14 = vmul.f32 0.01, %v627_v9  ;;  %v549_v15 = vadd.f32 %v2150_v37, %v548_v12  ;;  %1227 = vst.msk [vmem:[%s2482_s3 + $0x58] sm:$0xf] %vm1204_vm5, %v1105_v10  ;;  %v473_v16 = vpop.f32.mrf.mxu0 }
 0x144   :  { %v474_v17 = vadd.f32 %v2150_v37, %v473_v16  ;;  %vm836_vm8 = vcmp.ge.f32.partialorder %v707_v13, 0.0  ;;  %v957_v18 = vmul.f32 0.01, %v707_v13 }
 0x145   :  { %v1046_v19 = vsel %vm804_vm7, %v627_v9, %v925_v14  ;;  %vm773_vm9 = vcmp.ge.f32.partialorder %v549_v15, 0.0  ;;  %v894_v20 = vmul.f32 0.01, %v549_v15 }
 0x146   :  { %v1167_v21 = vpack.c.bf16 %v1046_v19, %v1046_v19  ;;  %vm743_vm10 = vcmp.ge.f32.partialorder %v474_v17, 0.0  ;;  %v864_v22 = vmul.f32 0.01, %v474_v17  ;;  %v1078_v23 = vsel %vm836_vm8, %v707_v13, %v957_v18 }
 0x147   :  { %v1015_v24 = vsel %vm773_vm9, %v549_v15, %v894_v20  ;;  %v1199_v25 = vpack.c.bf16 %v1078_v23, %v1078_v23 }
 0x148   :  { %1289 = vst.msk [vmem:[%s2482_s3 + $0x150] sm:$0xf] %vm1204_vm5, %v1167_v21  ;;  %v1136_v26 = vpack.c.bf16 %v1015_v24, %v1015_v24  ;;  %v628_v27 = vpop.f32.mrf.mxu2  ;;  %v985_v28 = vsel %vm743_vm10, %v474_v17, %v864_v22 }
 0x149   :  { %v629_v29 = vadd.f32 %v2150_v37, %v628_v27  ;;  %v1106_v30 = vpack.c.bf16 %v985_v28, %v985_v28  ;;  %1321 = vst.msk [vmem:[%s2482_s3 + $0x1d0] sm:$0xf] %vm1204_vm5, %v1199_v25  ;;  %v708_v31 = vpop.f32.mrf.mxu3 }
 0x14a   :  { %1258 = vst.msk [vmem:[%s2482_s3 + $0xd4] sm:$0xf] %vm1204_vm5, %v1136_v26  ;;  %v551_v32 = vpop.f32.mrf.mxu1  ;;  %v709_v33 = vadd.f32 %v2150_v37, %v708_v31 }
 0x14b   :  { %vm805_vm11 = vcmp.ge.f32.partialorder %v629_v29, 0.0  ;;  %v926_v34 = vmul.f32 0.01, %v629_v29  ;;  %v552_v44 = vadd.f32 %v2150_v37, %v551_v32  ;;  %1228 = vst.msk [vmem:[%s2482_s3 + $0x5c] sm:$0xf] %vm1204_vm5, %v1106_v30  ;;  %v476_v35 = vpop.f32.mrf.mxu0 }
 0x14c   :  { %v477_v36 = vadd.f32 %v2150_v37, %v476_v35  ;;  %vm837_vm12 = vcmp.ge.f32.partialorder %v709_v33, 0.0  ;;  %v958_v38 = vmul.f32 0.01, %v709_v33 }
 0x14d   :  { %v1047_v39 = vsel %vm805_vm11, %v629_v29, %v926_v34  ;;  %vm774_vm13 = vcmp.ge.f32.partialorder %v552_v44, 0.0  ;;  %v895_v40 = vmul.f32 0.01, %v552_v44 }
 0x14e   :  { %v1168_v41 = vpack.c.bf16 %v1047_v39, %v1047_v39  ;;  %vm744_vm14 = vcmp.ge.f32.partialorder %v477_v36, 0.0  ;;  %v865_v42 = vmul.f32 0.01, %v477_v36  ;;  %v1079_v43 = vsel %vm837_vm12, %v709_v33, %v958_v38 }
 0x14f   :  { %v1016_v45 = vsel %vm774_vm13, %v552_v44, %v895_v40  ;;  %v1200_v46 = vpack.c.bf16 %v1079_v43, %v1079_v43 }
 0x150   :  { %1290 = vst.msk [vmem:[%s2482_s3 + $0x154] sm:$0xf] %vm1204_vm5, %v1168_v41  ;;  %v1137_v47 = vpack.c.bf16 %v1016_v45, %v1016_v45  ;;  %v631_v48 = vpop.f32.mrf.mxu2  ;;  %v986_v49 = vsel %vm744_vm14, %v477_v36, %v865_v42 }
 0x151   :  { %v632_v50 = vadd.f32 %v2150_v37, %v631_v48  ;;  %v1107_v51 = vpack.c.bf16 %v986_v49, %v986_v49  ;;  %1322 = vst.msk [vmem:[%s2482_s3 + $0x1d4] sm:$0xf] %vm1204_vm5, %v1200_v46  ;;  %v711_v52 = vpop.f32.mrf.mxu3 }
 0x152   :  { %1259 = vst.msk [vmem:[%s2482_s3 + $0xd8] sm:$0xf] %vm1204_vm5, %v1137_v47  ;;  %v553_v53 = vpop.f32.mrf.mxu1  ;;  %v712_v54 = vadd.f32 %v2150_v37, %v711_v52 }
 0x153   :  { %vm806_vm15 = vcmp.ge.f32.partialorder %v632_v50, 0.0  ;;  %v927_v55 = vmul.f32 0.01, %v632_v50  ;;  %v554_v56 = vadd.f32 %v2150_v37, %v553_v53  ;;  %1229 = vst.msk [vmem:[%s2482_s3 + $0x60] sm:$0xf] %vm1204_vm5, %v1107_v51  ;;  %v478_v57 = vpop.f32.mrf.mxu0 }
 0x154   :  { %v479_v58 = vadd.f32 %v2150_v37, %v478_v57  ;;  %vm838_vm0 = vcmp.ge.f32.partialorder %v712_v54, 0.0  ;;  %v959_v59 = vmul.f32 0.01, %v712_v54 }
 0x155   :  { %v1048_v60 = vsel %vm806_vm15, %v632_v50, %v927_v55  ;;  %vm775_vm1 = vcmp.ge.f32.partialorder %v554_v56, 0.0  ;;  %v896_v61 = vmul.f32 0.01, %v554_v56 }
 0x156   :  { %v1169_v62 = vpack.c.bf16 %v1048_v60, %v1048_v60  ;;  %vm745_vm3 = vcmp.ge.f32.partialorder %v479_v58, 0.0  ;;  %v866_v63 = vmul.f32 0.01, %v479_v58  ;;  %v1080_v0 = vsel %vm838_vm0, %v712_v54, %v959_v59 }
 0x157   :  { %v1017_v1 = vsel %vm775_vm1, %v554_v56, %v896_v61  ;;  %v1201_v2 = vpack.c.bf16 %v1080_v0, %v1080_v0 }
 0x158   :  { %1291 = vst.msk [vmem:[%s2482_s3 + $0x158] sm:$0xf] %vm1204_vm5, %v1169_v62  ;;  %v1138_v3 = vpack.c.bf16 %v1017_v1, %v1017_v1  ;;  %v633_v4 = vpop.f32.mrf.mxu2  ;;  %v987_v5 = vsel %vm745_vm3, %v479_v58, %v866_v63 }
 0x159   :  { %v634_v6 = vadd.f32 %v2150_v37, %v633_v4  ;;  %v1108_v7 = vpack.c.bf16 %v987_v5, %v987_v5  ;;  %1323 = vst.msk [vmem:[%s2482_s3 + $0x1d8] sm:$0xf] %vm1204_vm5, %v1201_v2  ;;  %v713_v8 = vpop.f32.mrf.mxu3 }
 0x15a   :  { %1260 = vst.msk [vmem:[%s2482_s3 + $0xdc] sm:$0xf] %vm1204_vm5, %v1138_v3  ;;  %v556_v9 = vpop.f32.mrf.mxu1  ;;  %v714_v10 = vadd.f32 %v2150_v37, %v713_v8 }
 0x15b   :  { %vm807_vm4 = vcmp.ge.f32.partialorder %v634_v6, 0.0  ;;  %v928_v11 = vmul.f32 0.01, %v634_v6  ;;  %v557_v12 = vadd.f32 %v2150_v37, %v556_v9  ;;  %1230 = vst.msk [vmem:[%s2482_s3 + $0x64] sm:$0xf] %vm1204_vm5, %v1108_v7  ;;  %v481_v13 = vpop.f32.mrf.mxu0 }
 0x15c   :  { %v482_v14 = vadd.f32 %v2150_v37, %v481_v13  ;;  %vm839_vm2 = vcmp.ge.f32.partialorder %v714_v10, 0.0  ;;  %v960_v15 = vmul.f32 0.01, %v714_v10 }
 0x15d   :  { %v1049_v16 = vsel %vm807_vm4, %v634_v6, %v928_v11  ;;  %vm776_vm6 = vcmp.ge.f32.partialorder %v557_v12, 0.0  ;;  %v897_v17 = vmul.f32 0.01, %v557_v12 }
 0x15e   :  { %v1170_v18 = vpack.c.bf16 %v1049_v16, %v1049_v16  ;;  %vm746_vm7 = vcmp.ge.f32.partialorder %v482_v14, 0.0  ;;  %v867_v19 = vmul.f32 0.01, %v482_v14  ;;  %v1081_v20 = vsel %vm839_vm2, %v714_v10, %v960_v15 }
 0x15f   :  { %v1018_v21 = vsel %vm776_vm6, %v557_v12, %v897_v17  ;;  %v1202_v22 = vpack.c.bf16 %v1081_v20, %v1081_v20 }
 0x160   :  { %1292 = vst.msk [vmem:[%s2482_s3 + $0x15c] sm:$0xf] %vm1204_vm5, %v1170_v18  ;;  %v1139_v23 = vpack.c.bf16 %v1018_v21, %v1018_v21  ;;  %v636_v24 = vpop.f32.mrf.mxu2  ;;  %v988_v25 = vsel %vm746_vm7, %v482_v14, %v867_v19 }
 0x161   :  { %v637_v26 = vadd.f32 %v2150_v37, %v636_v24  ;;  %v1109_v27 = vpack.c.bf16 %v988_v25, %v988_v25  ;;  %1324 = vst.msk [vmem:[%s2482_s3 + $0x1dc] sm:$0xf] %vm1204_vm5, %v1202_v22  ;;  %v716_v29 = vpop.f32.mrf.mxu3 }
 0x162   :  { %1261 = vst.msk [vmem:[%s2482_s3 + $0xe0] sm:$0xf] %vm1204_vm5, %v1139_v23  ;;  %v558_v28 = vpop.f32.mrf.mxu1  ;;  %v717_v39 = vadd.f32 %v2150_v37, %v716_v29 }
 0x163   :  { %vm808_vm8 = vcmp.ge.f32.partialorder %v637_v26, 0.0  ;;  %v929_v30 = vmul.f32 0.01, %v637_v26  ;;  %v559_v31 = vadd.f32 %v2150_v37, %v558_v28  ;;  %1231 = vst.msk [vmem:[%s2482_s3 + $0x68] sm:$0xf] %vm1204_vm5, %v1109_v27  ;;  %v483_v32 = vpop.f32.mrf.mxu0 }
 0x164   :  { %v484_v33 = vadd.f32 %v2150_v37, %v483_v32  ;;  %vm840_vm11 = vcmp.ge.f32.partialorder %v717_v39, 0.0  ;;  %v961_v46 = vmul.f32 0.01, %v717_v39 }
 0x165   :  { %v1050_v34 = vsel %vm808_vm8, %v637_v26, %v929_v30  ;;  %vm777_vm9 = vcmp.ge.f32.partialorder %v559_v31, 0.0  ;;  %v898_v44 = vmul.f32 0.01, %v559_v31 }
 0x166   :  { %v1171_v35 = vpack.c.bf16 %v1050_v34, %v1050_v34  ;;  %vm747_vm10 = vcmp.ge.f32.partialorder %v484_v33, 0.0  ;;  %v868_v36 = vmul.f32 0.01, %v484_v33  ;;  %v1082_v52 = vsel %vm840_vm11, %v717_v39, %v961_v46 }
 0x167   :  { %v1019_v38 = vsel %vm777_vm9, %v559_v31, %v898_v44  ;;  %v1203_v54 = vpack.c.bf16 %v1082_v52, %v1082_v52 }
 0x168   :  { %1293 = vst.msk [vmem:[%s2482_s3 + $0x160] sm:$0xf] %vm1204_vm5, %v1171_v35  ;;  %v1140_v40 = vpack.c.bf16 %v1019_v38, %v1019_v38  ;;  %v638_v41 = vpop.f32.mrf.mxu2  ;;  %v989_v42 = vsel %vm747_vm10, %v484_v33, %v868_v36 }
 0x169   :  { %v639_v43 = vadd.f32 %v2150_v37, %v638_v41  ;;  %v1110_v45 = vpack.c.bf16 %v989_v42, %v989_v42  ;;  %v718_v48 = vpop.f32.mrf.mxu3  ;;  %1325 = vst.msk [vmem:[%s2482_s3 + $0x1e0] sm:$0xf] %vm1204_vm5, %v1203_v54 }
 0x16a   :  { %1262 = vst.msk [vmem:[%s2482_s3 + $0xe4] sm:$0xf] %vm1204_vm5, %v1140_v40  ;;  %v561_v47 = vpop.f32.mrf.mxu1 }
 0x16b   :  { %vm809_vm12 = vcmp.ge.f32.partialorder %v639_v43, 0.0  ;;  %v930_v49 = vmul.f32 0.01, %v639_v43  ;;  %v562_v50 = vadd.f32 %v2150_v37, %v561_v47  ;;  %1232 = vst.msk [vmem:[%s2482_s3 + $0x6c] sm:$0xf] %vm1204_vm5, %v1110_v45  ;;  %v486_v51 = vpop.f32.mrf.mxu0 }
 0x16c   :  { %v487_v53 = vadd.f32 %v2150_v37, %v486_v51 }
 0x16d   :  { %v1051_v55 = vsel %vm809_vm12, %v639_v43, %v930_v49  ;;  %vm778_vm13 = vcmp.ge.f32.partialorder %v562_v50, 0.0  ;;  %v899_v56 = vmul.f32 0.01, %v562_v50 }
 0x16e   :  { %v1172_v57 = vpack.c.bf16 %v1051_v55, %v1051_v55  ;;  %vm748_vm14 = vcmp.ge.f32.partialorder %v487_v53, 0.0  ;;  %v869_v58 = vmul.f32 0.01, %v487_v53 }
 0x16f   :  { %v1020_v59 = vsel %vm778_vm13, %v562_v50, %v899_v56 }
 0x170   :  { %1294 = vst.msk [vmem:[%s2482_s3 + $0x164] sm:$0xf] %vm1204_vm5, %v1172_v57  ;;  %v1141_v60 = vpack.c.bf16 %v1020_v59, %v1020_v59  ;;  %v641_v61 = vpop.f32.mrf.mxu2  ;;  %v990_v62 = vsel %vm748_vm14, %v487_v53, %v869_v58 }
 0x171   :  { %v642_v63 = vadd.f32 %v2150_v37, %v641_v61  ;;  %v1111_v0 = vpack.c.bf16 %v990_v62, %v990_v62 }
 0x172   :  { %1263 = vst.msk [vmem:[%s2482_s3 + $0xe8] sm:$0xf] %vm1204_vm5, %v1141_v60  ;;  %v563_v1 = vpop.f32.mrf.mxu1 }
 0x173   :  { %vm810_vm15 = vcmp.ge.f32.partialorder %v642_v63, 0.0  ;;  %v931_v2 = vmul.f32 0.01, %v642_v63  ;;  %v564_v3 = vadd.f32 %v2150_v37, %v563_v1  ;;  %1233 = vst.msk [vmem:[%s2482_s3 + $0x70] sm:$0xf] %vm1204_vm5, %v1111_v0  ;;  %v488_v4 = vpop.f32.mrf.mxu0 }
 0x174   :  { %v489_v5 = vadd.f32 %v2150_v37, %v488_v4 }
 0x175   :  { %v1052_v6 = vsel %vm810_vm15, %v642_v63, %v931_v2  ;;  %vm779_vm0 = vcmp.ge.f32.partialorder %v564_v3, 0.0  ;;  %v900_v7 = vmul.f32 0.01, %v564_v3 }
 0x176   :  { %v1173_v8 = vpack.c.bf16 %v1052_v6, %v1052_v6  ;;  %vm749_vm1 = vcmp.ge.f32.partialorder %v489_v5, 0.0  ;;  %v870_v9 = vmul.f32 0.01, %v489_v5 }
 0x177   :  { %v1021_v10 = vsel %vm779_vm0, %v564_v3, %v900_v7 }
 0x178   :  { %1295 = vst.msk [vmem:[%s2482_s3 + $0x168] sm:$0xf] %vm1204_vm5, %v1173_v8  ;;  %v1142_v11 = vpack.c.bf16 %v1021_v10, %v1021_v10  ;;  %v643_v12 = vpop.f32.mrf.mxu2  ;;  %v991_v13 = vsel %vm749_vm1, %v489_v5, %v870_v9 }
 0x179   :  { %v644_v14 = vadd.f32 %v2150_v37, %v643_v12  ;;  %v1112_v15 = vpack.c.bf16 %v991_v13, %v991_v13 }
 0x17a   :  { %1264 = vst.msk [vmem:[%s2482_s3 + $0xec] sm:$0xf] %vm1204_vm5, %v1142_v11  ;;  %v566_v16 = vpop.f32.mrf.mxu1 }
 0x17b   :  { %vm811_vm3 = vcmp.ge.f32.partialorder %v644_v14, 0.0  ;;  %v932_v17 = vmul.f32 0.01, %v644_v14  ;;  %v567_v18 = vadd.f32 %v2150_v37, %v566_v16  ;;  %1234 = vst.msk [vmem:[%s2482_s3 + $0x74] sm:$0xf] %vm1204_vm5, %v1112_v15 }
 0x17d   :  { %v1053_v19 = vsel %vm811_vm3, %v644_v14, %v932_v17  ;;  %vm780_vm4 = vcmp.ge.f32.partialorder %v567_v18, 0.0  ;;  %v901_v20 = vmul.f32 0.01, %v567_v18 }
 0x17e   :  { %v1174_v21 = vpack.c.bf16 %v1053_v19, %v1053_v19 }
 0x17f   :  { %v1022_v22 = vsel %vm780_vm4, %v567_v18, %v901_v20 }
 0x180   :  { %1296 = vst.msk [vmem:[%s2482_s3 + $0x16c] sm:$0xf] %vm1204_vm5, %v1174_v21  ;;  %v1143_v23 = vpack.c.bf16 %v1022_v22, %v1022_v22  ;;  %v646_v24 = vpop.f32.mrf.mxu2 }
 0x181   :  { %v647_v25 = vadd.f32 %v2150_v37, %v646_v24 }
 0x182   :  { %1265 = vst.msk [vmem:[%s2482_s3 + $0xf0] sm:$0xf] %vm1204_vm5, %v1143_v23  ;;  %v568_v26 = vpop.f32.mrf.mxu1 }
 0x183   :  { %vm812_vm2 = vcmp.ge.f32.partialorder %v647_v25, 0.0  ;;  %v933_v27 = vmul.f32 0.01, %v647_v25  ;;  %v569_v28 = vadd.f32 %v2150_v37, %v568_v26 }
 0x185   :  { %v1054_v29 = vsel %vm812_vm2, %v647_v25, %v933_v27  ;;  %vm781_vm6 = vcmp.ge.f32.partialorder %v569_v28, 0.0  ;;  %v902_v30 = vmul.f32 0.01, %v569_v28 }
 0x186   :  { %v1175_v31 = vpack.c.bf16 %v1054_v29, %v1054_v29 }
 0x187   :  { %v1023_v32 = vsel %vm781_vm6, %v569_v28, %v902_v30 }
 0x188   :  { %1297 = vst.msk [vmem:[%s2482_s3 + $0x170] sm:$0xf] %vm1204_vm5, %v1175_v31  ;;  %v1144_v33 = vpack.c.bf16 %v1023_v32, %v1023_v32  ;;  %v648_v34 = vpop.f32.mrf.mxu2 }
 0x189   :  { %v649_v44 = vadd.f32 %v2150_v37, %v648_v34 }
 0x18a   :  { %1266 = vst.msk [vmem:[%s2482_s3 + $0xf4] sm:$0xf] %vm1204_vm5, %v1144_v33 }
 0x18b   :  { %vm813_vm7 = vcmp.ge.f32.partialorder %v649_v44, 0.0  ;;  %v934_v35 = vmul.f32 0.01, %v649_v44 }
 0x18d   :  { %v1055_v36 = vsel %vm813_vm7, %v649_v44, %v934_v35 }
 0x18e   :  { %v1176_v38 = vpack.c.bf16 %v1055_v36, %v1055_v36 }
 0x190   :  { %1298 = vst.msk [vmem:[%s2482_s3 + $0x174] sm:$0xf] %vm1204_vm5, %v1176_v38 }

// kernel: conv_vae_forward.6
= control target key start
LH: loop header
LB: loop body
LE: loop exit
PB: predicated region body
PF: predicated region fallthrough
CT: control target
= control target key end

     0   :  { %vm179_vm0 = vcmask 130048   ;;  %s778_s1 = inlined_call_operand.vmem [shape: bf16[144,128], index: 1, kind: input, shape index: {}]   ;;  %s779_s0 = inlined_call_operand.vmem [shape: bf16[128,144], index: 0, kind: input, shape index: {}]   ;;  %s780_s2 = inlined_call_operand.vmem [shape: f32[1,128], index: 2, kind: input, shape index: {}]   ;;  %s781_s3 = inlined_call_operand.vmem [shape: bf16[128,128], index: 3, kind: output, shape index: {}]  }
   0x1   :  { %v517_v0 = vld [vmem:[%s778_s1 + $0x38] sm:$0xff]  ;;  %v518_v1 = vld [vmem:[%s778_s1 + $0x40] sm:$0xff]  ;;  %v390_v3 = vld [vmem:[%s779_s0 + $0x8] sm:$0xf0] }
   0x2   :  { %v494_v2 = vld [vmem:[%s779_s0 + $0x4] sm:$0xf]  ;;  %204 = vmatpush.bf16.msra.mxu0 %v517_v0  ;;  %566 = vmatpush.bf16.msra.mxu2 %v517_v0  ;;  %v516_v5 = vld [vmem:[%s778_s1 + $0x30] sm:$0xff]  ;;  %v515_v6 = vld [vmem:[%s778_s1 + $0x28] sm:$0xff] }
   0x3   :  { %v393_v4 = vor.u32 %v494_v2, %v390_v3  ;;  %260 = vmatpush.bf16.msra.mxu1 %v518_v1  ;;  %574 = vmatpush.bf16.msra.mxu3 %v518_v1  ;;  %v504_v7 = vld [vmem:[%s779_s0 + $0x54] sm:$0xf]  ;;  %v430_v8 = vld [vmem:[%s779_s0 + $0x58] sm:$0xf0]  ;;  %v514_v10 = vld [vmem:[%s778_s1 + $0x20] sm:$0xff] }
   0x4   :  { %v433_v9 = vor.u32 %v504_v7, %v430_v8  ;;  %v513_v11 = vld [vmem:[%s778_s1 + $0x18] sm:$0xff]  ;;  %v496_v12 = vld [vmem:[%s779_s0 + $0x14] sm:$0xf]  ;;  %v511_v16 = vld [vmem:[%s778_s1 + $0x8] sm:$0xff] }
   0x5   :  { %v398_v13 = vld [vmem:[%s779_s0 + $0x18] sm:$0xf0]  ;;  %v512_v15 = vld [vmem:[%s778_s1 + $0x10] sm:$0xff]  ;;  %v506_v17 = vld [vmem:[%s779_s0 + $0x64] sm:$0xf] }
   0x6   :  { %486 = vmatmul.msk.bf16.vlgmr.msra.gmra.mxu1 %vm179_vm0, %v393_v4  ;;  %205 = vmatpush.bf16.msra.mxu0 %v516_v5  ;;  %v401_v14 = vor.u32 %v496_v12, %v398_v13  ;;  %v438_v18 = vld [vmem:[%s779_s0 + $0x68] sm:$0xf0]  ;;  %v510_v20 = vld [vmem:[%s778_s1] sm:$0xff]  ;;  %v495_v22 = vld [vmem:[%s779_s0 + $0x4] sm:$0xf0] }
   0x7   :  { %567 = vmatpush.bf16.msra.mxu2 %v516_v5  ;;  %491 = vmatmul.msk.bf16.vlgmr.msra.gmra.mxu3 %vm179_vm0, %v433_v9  ;;  %v441_v19 = vor.u32 %v506_v17, %v438_v18  ;;  %v388_v21 = vld [vmem:[%s779_s0] sm:$0xf]  ;;  %v503_v24 = vld [vmem:[%s779_s0 + $0x44] sm:$0xf0]  ;;  %v498_v27 = vld [vmem:[%s779_s0 + $0x24] sm:$0xf] }
   0x8   :  { %v420_v23 = vld [vmem:[%s779_s0 + $0x40] sm:$0xf]  ;;  %v389_v25 = vor.u32 %v495_v22, %v388_v21  ;;  %v406_v28 = vld [vmem:[%s779_s0 + $0x28] sm:$0xf0]  ;;  %v508_v30 = vld [vmem:[%s779_s0 + $0x74] sm:$0xf] }
   0x9   :  { %v421_v26 = vor.u32 %v503_v24, %v420_v23  ;;  %v409_v29 = vor.u32 %v498_v27, %v406_v28  ;;  %v446_v31 = vld [vmem:[%s779_s0 + $0x78] sm:$0xf0]  ;;  %v396_v33 = vld [vmem:[%s779_s0 + $0x10] sm:$0xf]  ;;  %v497_v34 = vld [vmem:[%s779_s0 + $0x14] sm:$0xf0] }
   0xa   :  { %206 = vmatpush.bf16.msra.mxu0 %v515_v6  ;;  %v449_v32 = vor.u32 %v508_v30, %v446_v31  ;;  %v428_v35 = vld [vmem:[%s779_s0 + $0x50] sm:$0xf]  ;;  %v505_v36 = vld [vmem:[%s779_s0 + $0x54] sm:$0xf0]  ;;  %v397_v37 = vor.u32 %v497_v34, %v396_v33  ;;  %v500_v39 = vld [vmem:[%s779_s0 + $0x34] sm:$0xf] }
   0xb   :  { %568 = vmatpush.bf16.msra.mxu2 %v515_v6  ;;  %v429_v38 = vor.u32 %v505_v36, %v428_v35  ;;  %v414_v40 = vld [vmem:[%s779_s0 + $0x38] sm:$0xf0]  ;;  %v404_v42 = vld [vmem:[%s779_s0 + $0x20] sm:$0xf]  ;;  %v499_v43 = vld [vmem:[%s779_s0 + $0x24] sm:$0xf0] }
   0xc   :  { %v417_v41 = vor.u32 %v500_v39, %v414_v40  ;;  %v436_v44 = vld [vmem:[%s779_s0 + $0x60] sm:$0xf]  ;;  %v507_v45 = vld [vmem:[%s779_s0 + $0x64] sm:$0xf0]  ;;  %v405_v46 = vor.u32 %v499_v43, %v404_v42  ;;  %v502_v48 = vld [vmem:[%s779_s0 + $0x44] sm:$0xf] }
   0xd   :  { %v437_v47 = vor.u32 %v507_v45, %v436_v44  ;;  %v422_v49 = vld [vmem:[%s779_s0 + $0x48] sm:$0xf0]  ;;  %v412_v51 = vld [vmem:[%s779_s0 + $0x30] sm:$0xf]  ;;  %v501_v52 = vld [vmem:[%s779_s0 + $0x34] sm:$0xf0] }
   0xe   :  { %207 = vmatpush.bf16.msra.mxu0 %v514_v10  ;;  %v425_v50 = vor.u32 %v502_v48, %v422_v49  ;;  %v444_v53 = vld [vmem:[%s779_s0 + $0x70] sm:$0xf]  ;;  %v509_v54 = vld [vmem:[%s779_s0 + $0x74] sm:$0xf0]  ;;  %v413_v55 = vor.u32 %v501_v52, %v412_v51  ;;  %v730_v61 = vld [vmem:[%s780_s2] ss:$0 sm:$0xff] }
   0xf   :  { %569 = vmatpush.bf16.msra.mxu2 %v514_v10  ;;  %v445_v56 = vor.u32 %v509_v54, %v444_v53 }
  0x12   :  { %208 = vmatpush.bf16.msra.mxu0 %v513_v11 }
  0x13   :  { %570 = vmatpush.bf16.msra.mxu2 %v513_v11 }
  0x16   :  { %487 = vmatmul.msk.bf16.gmra.mxu1 %vm179_vm0, %v401_v14  ;;  %209 = vmatpush.bf16.msra.mxu0 %v512_v15 }
  0x17   :  { %571 = vmatpush.bf16.msra.mxu2 %v512_v15  ;;  %492 = vmatmul.msk.bf16.gmra.mxu3 %vm179_vm0, %v441_v19 }
  0x1a   :  { %210 = vmatpush.bf16.msra.mxu0 %v511_v16 }
  0x1b   :  { %572 = vmatpush.bf16.msra.mxu2 %v511_v16 }
  0x1e   :  { %211 = vmatpush.bf16.msra.mxu0 %v510_v20 }
  0x1f   :  { %573 = vmatpush.bf16.msra.mxu2 %v510_v20 }
  0x21   :  { %212 = vmatmul.bf16.vlgmr.msra.gmra.mxu0 %v389_v25 }
  0x22   :  { %232 = vmatmul.bf16.vlgmr.msra.gmra.mxu2 %v421_v26 }
  0x26   :  { %488 = vmatmul.msk.bf16.gmra.mxu1 %vm179_vm0, %v409_v29 }
  0x27   :  { %493 = vmatmul.msk.bf16.gmra.mxu3 %vm179_vm0, %v449_v32 }
  0x31   :  { %217 = vmatmul.bf16.gmra.mxu0 %v397_v37 }
  0x32   :  { %237 = vmatmul.bf16.gmra.mxu2 %v429_v38 }
  0x36   :  { %489 = vmatmul.msk.bf16.gmra.mxu1 %vm179_vm0, %v417_v41 }
  0x41   :  { %222 = vmatmul.bf16.gmra.mxu0 %v405_v46 }
  0x42   :  { %242 = vmatmul.bf16.gmra.mxu2 %v437_v47 }
  0x46   :  { %490 = vmatmul.msk.bf16.gmra.mxu1 %vm179_vm0, %v425_v50 }
  0x51   :  { %227 = vmatmul.bf16.gmra.mxu0 %v413_v55 }
  0x52   :  { %247 = vmatmul.bf16.gmra.mxu2 %v445_v56 }
  0x83   :  { %v262_v57 = vpop.f32.mrf.mxu1 }
  0x8a   :  { %v287_v12 = vpop.f32.mrf.mxu3 }
  0x8b   :  { %v264_v58 = vpop.f32.mrf.mxu1 }
  0x92   :  { %v289_v21 = vpop.f32.mrf.mxu3 }
  0x93   :  { %v267_v59 = vpop.f32.mrf.mxu1 }
  0x9a   :  { %v292_v37 = vpop.f32.mrf.mxu3 }
  0x9b   :  { %v269_v60 = vpop.f32.mrf.mxu1 }
  0x9e   :  { %v213_v62 = vpop.f32.mrf.mxu0 }
  0x9f   :  { %v214_v63 = vadd.f32 %v730_v61, %v213_v62 }
  0xa1   :  { %v263_v1 = vadd.f32 %v262_v57, %v214_v63 }
  0xa2   :  { %v294_v54 = vpop.f32.mrf.mxu3 }
  0xa3   :  { %v272_v0 = vpop.f32.mrf.mxu1  ;;  %v318_v5 = vmul.f32 0.01, %v263_v1  ;;  %vm302_vm1 = vcmp.ge.f32.partialorder %v263_v1, 0.0 }
  0xa5   :  { %v233_v2 = vpop.f32.mrf.mxu2  ;;  %v334_v9 = vsel %vm302_vm1, %v263_v1, %v318_v5 }
  0xa6   :  { %v215_v3 = vpop.f32.mrf.mxu0  ;;  %v234_v45 = vadd.f32 %v730_v61, %v233_v2 }
  0xa7   :  { %v216_v4 = vadd.f32 %v730_v61, %v215_v3 }
  0xa9   :  { %v265_v6 = vadd.f32 %v264_v58, %v216_v4 }
  0xab   :  { %vm303_vm2 = vcmp.ge.f32.partialorder %v265_v6, 0.0  ;;  %v319_v7 = vmul.f32 0.01, %v265_v6  ;;  %v274_v8 = vpop.f32.mrf.mxu1 }
  0xad   :  { %v335_v10 = vsel %vm303_vm2, %v265_v6, %v319_v7  ;;  %v235_v11 = vpop.f32.mrf.mxu2 }
  0xae   :  { %v522_v13 = vpack.c.bf16 %v335_v10, %v334_v9  ;;  %v218_v14 = vpop.f32.mrf.mxu0  ;;  %v236_v52 = vadd.f32 %v730_v61, %v235_v11 }
  0xaf   :  { %v219_v15 = vadd.f32 %v730_v61, %v218_v14  ;;  %v297_v14 = vpop.f32.mrf.mxu3 }
  0xb0   :  { %523 = vst [vmem:[%s781_s3] sm:$0xff] %v522_v13  }
  0xb1   :  { %v268_v17 = vadd.f32 %v267_v59, %v219_v15 }
  0xb3   :  { %v738_v16 = vpop.f32.mrf.mxu1  ;;  %v320_v23 = vmul.f32 0.01, %v268_v17  ;;  %vm304_vm3 = vcmp.ge.f32.partialorder %v268_v17, 0.0 }
  0xb5   :  { %v238_v18 = vpop.f32.mrf.mxu2  ;;  %v336_v28 = vsel %vm304_vm3, %v268_v17, %v320_v23 }
  0xb6   :  { %v220_v19 = vpop.f32.mrf.mxu0  ;;  %v239_v22 = vadd.f32 %v730_v61, %v238_v18 }
  0xb7   :  { %v221_v20 = vadd.f32 %v730_v61, %v220_v19 }
  0xb8   :  { %v288_v27 = vadd.f32 %v287_v12, %v239_v22 }
  0xb9   :  { %v270_v24 = vadd.f32 %v269_v60, %v221_v20 }
  0xba   :  { %v328_v34 = vmul.f32 0.01, %v288_v27  ;;  %vm312_vm5 = vcmp.ge.f32.partialorder %v288_v27, 0.0 }
  0xbb   :  { %vm305_vm4 = vcmp.ge.f32.partialorder %v270_v24, 0.0  ;;  %v321_v25 = vmul.f32 0.01, %v270_v24  ;;  %v742_v26 = vpop.f32.mrf.mxu1 }
  0xbc   :  { %v344_v40 = vsel %vm312_vm5, %v288_v27, %v328_v34 }
  0xbd   :  { %v337_v29 = vsel %vm305_vm4, %v270_v24, %v321_v25  ;;  %v240_v30 = vpop.f32.mrf.mxu2 }
  0xbe   :  { %v527_v31 = vpack.c.bf16 %v337_v29, %v336_v28  ;;  %v241_v32 = vadd.f32 %v730_v61, %v240_v30  ;;  %v223_v33 = vpop.f32.mrf.mxu0  ;;  %v299_v29 = vpop.f32.mrf.mxu3 }
  0xbf   :  { %v224_v36 = vadd.f32 %v730_v61, %v223_v33 }
  0xc0   :  { %559 = vst [vmem:[%s781_s3 + $0x8] sm:$0xff] %v527_v31   ;;  %v290_v35 = vadd.f32 %v289_v21, %v241_v32 }
  0xc1   :  { %v273_v43 = vadd.f32 %v272_v0, %v224_v36 }
  0xc2   :  { %vm313_vm6 = vcmp.ge.f32.partialorder %v290_v35, 0.0  ;;  %v329_v38 = vmul.f32 0.01, %v290_v35 }
  0xc3   :  { %v282_v39 = vpop.f32.mrf.mxu1  ;;  %v322_v50 = vmul.f32 0.01, %v273_v43  ;;  %vm306_vm7 = vcmp.ge.f32.partialorder %v273_v43, 0.0 }
  0xc4   :  { %v345_v41 = vsel %vm313_vm6, %v290_v35, %v329_v38  ;;  %v283_v48 = vadd.f32 %v282_v39, %v234_v45 }
  0xc5   :  { %v547_v42 = vpack.c.bf16 %v345_v41, %v344_v40  ;;  %v243_v44 = vpop.f32.mrf.mxu2  ;;  %v338_v59 = vsel %vm306_vm7, %v273_v43, %v322_v50 }
  0xc6   :  { %v225_v46 = vpop.f32.mrf.mxu0  ;;  %v244_v49 = vadd.f32 %v730_v61, %v243_v44  ;;  %v326_v56 = vmul.f32 0.01, %v283_v48  ;;  %vm310_vm9 = vcmp.ge.f32.partialorder %v283_v48, 0.0 }
  0xc7   :  { %563 = vst [vmem:[%s781_s3 + $0x28] sm:$0xff] %v547_v42   ;;  %v226_v47 = vadd.f32 %v730_v61, %v225_v46 }
  0xc8   :  { %v293_v57 = vadd.f32 %v292_v37, %v244_v49  ;;  %v342_v3 = vsel %vm310_vm9, %v283_v48, %v326_v56 }
  0xc9   :  { %v275_v51 = vadd.f32 %v274_v8, %v226_v47 }
  0xca   :  { %v330_v4 = vmul.f32 0.01, %v293_v57  ;;  %vm314_vm11 = vcmp.ge.f32.partialorder %v293_v57, 0.0 }
  0xcb   :  { %vm307_vm8 = vcmp.ge.f32.partialorder %v275_v51, 0.0  ;;  %v323_v53 = vmul.f32 0.01, %v275_v51  ;;  %v284_v55 = vpop.f32.mrf.mxu1 }
  0xcc   :  { %v285_v58 = vadd.f32 %v284_v55, %v236_v52  ;;  %v346_v10 = vsel %vm314_vm11, %v293_v57, %v330_v4 }
  0xcd   :  { %v339_v60 = vsel %vm307_vm8, %v275_v51, %v323_v53  ;;  %v245_v62 = vpop.f32.mrf.mxu2 }
  0xce   :  { %v532_v63 = vpack.c.bf16 %v339_v60, %v338_v59  ;;  %vm311_vm10 = vcmp.ge.f32.partialorder %v285_v58, 0.0  ;;  %v327_v0 = vmul.f32 0.01, %v285_v58  ;;  %v246_v1 = vadd.f32 %v730_v61, %v245_v62  ;;  %v228_v2 = vpop.f32.mrf.mxu0 }
  0xcf   :  { %v229_v8 = vadd.f32 %v730_v61, %v228_v2 }
  0xd0   :  { %560 = vst [vmem:[%s781_s3 + $0x10] sm:$0xff] %v532_v63   ;;  %v343_v5 = vsel %vm311_vm10, %v285_v58, %v327_v0  ;;  %v295_v6 = vadd.f32 %v294_v54, %v246_v1 }
  0xd1   :  { %v542_v7 = vpack.c.bf16 %v343_v5, %v342_v3  ;;  %v278_v13 = vadd.f32 %v738_v16, %v229_v8 }
  0xd2   :  { %vm315_vm12 = vcmp.ge.f32.partialorder %v295_v6, 0.0  ;;  %v331_v9 = vmul.f32 0.01, %v295_v6 }
  0xd3   :  { %562 = vst [vmem:[%s781_s3 + $0x20] sm:$0xff] %v542_v7   ;;  %v324_v20 = vmul.f32 0.01, %v278_v13  ;;  %vm308_vm13 = vcmp.ge.f32.partialorder %v278_v13, 0.0 }
  0xd4   :  { %v347_v11 = vsel %vm315_vm12, %v295_v6, %v331_v9 }
  0xd5   :  { %v552_v12 = vpack.c.bf16 %v347_v11, %v346_v10  ;;  %v248_v15 = vpop.f32.mrf.mxu2  ;;  %v340_v24 = vsel %vm308_vm13, %v278_v13, %v324_v20 }
  0xd6   :  { %v230_v17 = vpop.f32.mrf.mxu0  ;;  %v249_v19 = vadd.f32 %v730_v61, %v248_v15 }
  0xd7   :  { %564 = vst [vmem:[%s781_s3 + $0x30] sm:$0xff] %v552_v12   ;;  %v231_v18 = vadd.f32 %v730_v61, %v230_v17 }
  0xd8   :  { %v298_v23 = vadd.f32 %v297_v14, %v249_v19 }
  0xd9   :  { %v280_v21 = vadd.f32 %v742_v26, %v231_v18 }
  0xda   :  { %v332_v30 = vmul.f32 0.01, %v298_v23  ;;  %vm316_vm15 = vcmp.ge.f32.partialorder %v298_v23, 0.0 }
  0xdb   :  { %vm309_vm14 = vcmp.ge.f32.partialorder %v280_v21, 0.0  ;;  %v325_v22 = vmul.f32 0.01, %v280_v21 }
  0xdc   :  { %v348_v32 = vsel %vm316_vm15, %v298_v23, %v332_v30 }
  0xdd   :  { %v341_v16 = vsel %vm309_vm14, %v280_v21, %v325_v22  ;;  %v250_v25 = vpop.f32.mrf.mxu2 }
  0xde   :  { %v537_v27 = vpack.c.bf16 %v341_v16, %v340_v24  ;;  %v251_v28 = vadd.f32 %v730_v61, %v250_v25 }
  0xe0   :  { %561 = vst [vmem:[%s781_s3 + $0x18] sm:$0xff] %v537_v27   ;;  %v300_v31 = vadd.f32 %v299_v29, %v251_v28 }
  0xe2   :  { %vm317_vm0 = vcmp.ge.f32.partialorder %v300_v31, 0.0  ;;  %v333_v26 = vmul.f32 0.01, %v300_v31 }
  0xe4   :  { %v349_v33 = vsel %vm317_vm0, %v300_v31, %v333_v26 }
  0xe5   :  { %v557_v34 = vpack.c.bf16 %v349_v33, %v348_v32 }
  0xe7   :  { %565 = vst [vmem:[%s781_s3 + $0x38] sm:$0xff] %v557_v34  }

// kernel: conv_vae_forward.8
= control target key start
LH: loop header
LB: loop body
LE: loop exit
PB: predicated region body
PF: predicated region fallthrough
CT: control target
= control target key end

     0   :  { %vm390_vm1 = vcmask 1043456   ;;  %vm391_vm2 = vcmask 130052   ;;  %s812_s1 = inlined_call_operand.vmem [shape: bf16[128,144], index: 1, kind: input, shape index: {}]   ;;  %s813_s0 = inlined_call_operand.vmem [shape: bf16[128,128], index: 0, kind: input, shape index: {}]   ;;  %s814_s2 = inlined_call_operand.vmem [shape: f32[1,144], index: 2, kind: input, shape index: {}]   ;;  %s815_s3 = inlined_call_operand.vmem [shape: bf16[128,144], index: 3, kind: output, shape index: {}]  }
   0x1   :  { %v503_v0 = vld [vmem:[%s812_s1 + $0x70] sm:$0xf]  ;;  %v532_v1 = vld [vmem:[%s812_s1 + $0x74] sm:$0xf0]  ;;  %v531_v2 = vld [vmem:[%s812_s1 + $0x74] sm:$0xf] }
   0x2   :  { %v504_v3 = vor.u32 %v532_v1, %v503_v0  ;;  %v505_v4 = vld [vmem:[%s812_s1 + $0x78] sm:$0xf0]  ;;  %v495_v5 = vld [vmem:[%s812_s1 + $0x60] sm:$0xf]  ;;  %v530_v6 = vld [vmem:[%s812_s1 + $0x64] sm:$0xf0] }
   0x3   :  { %v508_v7 = vor.u32 %v531_v2, %v505_v4  ;;  %v529_v8 = vld [vmem:[%s812_s1 + $0x64] sm:$0xf]  ;;  %v497_v9 = vld [vmem:[%s812_s1 + $0x68] sm:$0xf0]  ;;  %v496_v10 = vor.u32 %v530_v6, %v495_v5  ;;  %v487_v12 = vld [vmem:[%s812_s1 + $0x50] sm:$0xf] }
   0x4   :  { %180 = vmatpush.bf16.msra.mxu0 %v504_v3  ;;  %533 = vmatpush.bf16.msra.mxu2 %v504_v3  ;;  %v500_v11 = vor.u32 %v529_v8, %v497_v9  ;;  %v528_v13 = vld [vmem:[%s812_s1 + $0x54] sm:$0xf0]  ;;  %v527_v14 = vld [vmem:[%s812_s1 + $0x54] sm:$0xf]  ;;  %v489_v15 = vld [vmem:[%s812_s1 + $0x58] sm:$0xf0] }
   0x5   :  { %229 = vmatpush.bf16.msra.mxu1 %v508_v7  ;;  %541 = vmatpush.bf16.msra.mxu3 %v508_v7  ;;  %v488_v16 = vor.u32 %v528_v13, %v487_v12  ;;  %v492_v17 = vor.u32 %v527_v14, %v489_v15  ;;  %v479_v18 = vld [vmem:[%s812_s1 + $0x40] sm:$0xf]  ;;  %v526_v19 = vld [vmem:[%s812_s1 + $0x44] sm:$0xf0]  ;;  %v525_v20 = vld [vmem:[%s812_s1 + $0x44] sm:$0xf] }
   0x6   :  { %v481_v21 = vld [vmem:[%s812_s1 + $0x48] sm:$0xf0]  ;;  %v480_v22 = vor.u32 %v526_v19, %v479_v18  ;;  %v471_v24 = vld [vmem:[%s812_s1 + $0x30] sm:$0xf]  ;;  %v524_v25 = vld [vmem:[%s812_s1 + $0x34] sm:$0xf0] }
   0x7   :  { %v484_v23 = vor.u32 %v525_v20, %v481_v21  ;;  %v523_v26 = vld [vmem:[%s812_s1 + $0x34] sm:$0xf]  ;;  %v473_v27 = vld [vmem:[%s812_s1 + $0x38] sm:$0xf0]  ;;  %v472_v28 = vor.u32 %v524_v25, %v471_v24  ;;  %v463_v30 = vld [vmem:[%s812_s1 + $0x20] sm:$0xf] }
   0x8   :  { %181 = vmatpush.bf16.msra.mxu0 %v496_v10  ;;  %534 = vmatpush.bf16.msra.mxu2 %v496_v10  ;;  %v476_v29 = vor.u32 %v523_v26, %v473_v27  ;;  %v522_v31 = vld [vmem:[%s812_s1 + $0x24] sm:$0xf0]  ;;  %v521_v32 = vld [vmem:[%s812_s1 + $0x24] sm:$0xf]  ;;  %v465_v33 = vld [vmem:[%s812_s1 + $0x28] sm:$0xf0] }
   0x9   :  { %230 = vmatpush.bf16.msra.mxu1 %v500_v11  ;;  %542 = vmatpush.bf16.msra.mxu3 %v500_v11  ;;  %v464_v34 = vor.u32 %v522_v31, %v463_v30  ;;  %v468_v35 = vor.u32 %v521_v32, %v465_v33  ;;  %v455_v36 = vld [vmem:[%s812_s1 + $0x10] sm:$0xf]  ;;  %v520_v37 = vld [vmem:[%s812_s1 + $0x14] sm:$0xf0]  ;;  %v519_v38 = vld [vmem:[%s812_s1 + $0x14] sm:$0xf] }
   0xa   :  { %v457_v39 = vld [vmem:[%s812_s1 + $0x18] sm:$0xf0]  ;;  %v456_v40 = vor.u32 %v520_v37, %v455_v36  ;;  %v447_v42 = vld [vmem:[%s812_s1] sm:$0xf]  ;;  %v518_v43 = vld [vmem:[%s812_s1 + $0x4] sm:$0xf0] }
   0xb   :  { %v460_v41 = vor.u32 %v519_v38, %v457_v39  ;;  %v517_v44 = vld [vmem:[%s812_s1 + $0x4] sm:$0xf]  ;;  %v449_v45 = vld [vmem:[%s812_s1 + $0x8] sm:$0xf0]  ;;  %v448_v46 = vor.u32 %v518_v43, %v447_v42  ;;  %v511_v52 = vld [vmem:[%s813_s0 + $0x10] sm:$0xff] }
   0xc   :  { %182 = vmatpush.bf16.msra.mxu0 %v488_v16  ;;  %535 = vmatpush.bf16.msra.mxu2 %v488_v16  ;;  %v452_v47 = vor.u32 %v517_v44, %v449_v45  ;;  %v509_v48 = vld [vmem:[%s813_s0] sm:$0xff]  ;;  %v510_v50 = vld [vmem:[%s813_s0 + $0x8] sm:$0xff]  ;;  %v515_v53 = vld [vmem:[%s813_s0 + $0x30] sm:$0xff] }
   0xd   :  { %231 = vmatpush.bf16.msra.mxu1 %v492_v17  ;;  %543 = vmatpush.bf16.msra.mxu3 %v492_v17  ;;  %v513_v49 = vld [vmem:[%s813_s0 + $0x20] sm:$0xff]  ;;  %v514_v51 = vld [vmem:[%s813_s0 + $0x28] sm:$0xff]  ;;  %v512_v54 = vld [vmem:[%s813_s0 + $0x18] sm:$0xff] }
   0xe   :  { %v516_v55 = vld [vmem:[%s813_s0 + $0x38] sm:$0xff]  ;;  %v46_v56 = vld [vmem:[%s814_s2] sm:$0x3]  ;;  %vm698_vm4 = vmor %vm391_vm2, %vm390_vm1 }
   0xf   :  { %v692_v57 = vperm.slane %v46_v56, 0  ;;  %v694_v58 = vperm.slane %v46_v56, 1 }
  0x10   :  { %183 = vmatpush.bf16.msra.mxu0 %v480_v22  ;;  %536 = vmatpush.bf16.msra.mxu2 %v480_v22 }
  0x11   :  { %232 = vmatpush.bf16.msra.mxu1 %v484_v23  ;;  %544 = vmatpush.bf16.msra.mxu3 %v484_v23 }
  0x14   :  { %184 = vmatpush.bf16.msra.mxu0 %v472_v28  ;;  %537 = vmatpush.bf16.msra.mxu2 %v472_v28 }
  0x15   :  { %233 = vmatpush.bf16.msra.mxu1 %v476_v29  ;;  %545 = vmatpush.bf16.msra.mxu3 %v476_v29 }
  0x18   :  { %185 = vmatpush.bf16.msra.mxu0 %v464_v34  ;;  %538 = vmatpush.bf16.msra.mxu2 %v464_v34 }
  0x19   :  { %234 = vmatpush.bf16.msra.mxu1 %v468_v35  ;;  %546 = vmatpush.bf16.msra.mxu3 %v468_v35 }
  0x1c   :  { %186 = vmatpush.bf16.msra.mxu0 %v456_v40  ;;  %539 = vmatpush.bf16.msra.mxu2 %v456_v40 }
  0x1d   :  { %235 = vmatpush.bf16.msra.mxu1 %v460_v41  ;;  %547 = vmatpush.bf16.msra.mxu3 %v460_v41 }
  0x20   :  { %187 = vmatpush.bf16.msra.mxu0 %v448_v46  ;;  %540 = vmatpush.bf16.msra.mxu2 %v448_v46 }
  0x21   :  { %236 = vmatpush.bf16.msra.mxu1 %v452_v47  ;;  %548 = vmatpush.bf16.msra.mxu3 %v452_v47 }
  0x23   :  { %188 = vmatmul.bf16.vlgmr.msra.gmra.mxu0 %v509_v48  ;;  %208 = vmatmul.bf16.vlgmr.msra.gmra.mxu2 %v513_v49 }
  0x24   :  { %237 = vmatmul.bf16.vlgmr.msra.gmra.mxu1 %v509_v48  ;;  %257 = vmatmul.bf16.vlgmr.msra.gmra.mxu3 %v513_v49 }
  0x33   :  { %193 = vmatmul.bf16.gmra.mxu0 %v510_v50  ;;  %213 = vmatmul.bf16.gmra.mxu2 %v514_v51 }
  0x34   :  { %242 = vmatmul.bf16.gmra.mxu1 %v510_v50  ;;  %262 = vmatmul.bf16.gmra.mxu3 %v514_v51 }
  0x43   :  { %198 = vmatmul.bf16.gmra.mxu0 %v511_v52  ;;  %218 = vmatmul.bf16.gmra.mxu2 %v515_v53 }
  0x44   :  { %247 = vmatmul.bf16.gmra.mxu1 %v511_v52  ;;  %267 = vmatmul.bf16.gmra.mxu3 %v515_v53 }
  0x53   :  { %203 = vmatmul.bf16.gmra.mxu0 %v512_v54  ;;  %223 = vmatmul.bf16.gmra.mxu2 %v516_v55 }
  0x54   :  { %252 = vmatmul.bf16.gmra.mxu1 %v512_v54  ;;  %272 = vmatmul.bf16.gmra.mxu3 %v516_v55 }
  0xa0   :  { %v189_v59 = vpop.f32.mrf.mxu0 }
  0xa1   :  { %v190_v60 = vadd.f32 %v189_v59, %v692_v57  ;;  %v238_v61 = vpop.f32.mrf.mxu1 }
  0xa2   :  { %v239_v62 = vadd.f32 %v238_v61, %v694_v58 }
  0xa3   :  { %vm278_vm0 = vcmp.ge.f32.partialorder %v190_v60, 0.0  ;;  %v310_v63 = vmul.f32 0.01, %v190_v60 }
  0xa4   :  { %vm279_vm3 = vcmp.ge.f32.partialorder %v239_v62, 0.0  ;;  %v311_v0 = vmul.f32 0.01, %v239_v62 }
  0xa5   :  { %v342_v1 = vsel %vm278_vm0, %v190_v60, %v310_v63 }
  0xa6   :  { %v343_v2 = vsel %vm279_vm3, %v239_v62, %v311_v0  ;;  %v209_v4 = vpop.f32.mrf.mxu2 }
  0xa7   :  { %v374_v5 = vpack.c.bf16 %v343_v2, %v342_v1  ;;  %v210_v6 = vadd.f32 %v209_v4, %v692_v57  ;;  %v258_v7 = vpop.f32.mrf.mxu3 }
  0xa8   :  { %v259_v8 = vadd.f32 %v258_v7, %v694_v58  ;;  %v191_v9 = vpop.f32.mrf.mxu0 }
  0xa9   :  { %393 = vst.msk [vmem:[%s815_s3] sm:$0xff] %vm698_vm4, %v374_v5  ;;  %vm294_vm5 = vcmp.ge.f32.partialorder %v210_v6, 0.0  ;;  %v326_v10 = vmul.f32 0.01, %v210_v6  ;;  %v192_v11 = vadd.f32 %v191_v9, %v692_v57  ;;  %v240_v12 = vpop.f32.mrf.mxu1 }
  0xaa   :  { %vm295_vm6 = vcmp.ge.f32.partialorder %v259_v8, 0.0  ;;  %v327_v13 = vmul.f32 0.01, %v259_v8  ;;  %v241_v14 = vadd.f32 %v240_v12, %v694_v58 }
  0xab   :  { %v358_v15 = vsel %vm294_vm5, %v210_v6, %v326_v10  ;;  %vm280_vm7 = vcmp.ge.f32.partialorder %v192_v11, 0.0  ;;  %v312_v16 = vmul.f32 0.01, %v192_v11 }
  0xac   :  { %v359_v17 = vsel %vm295_vm6, %v259_v8, %v327_v13  ;;  %vm281_vm8 = vcmp.ge.f32.partialorder %v241_v14, 0.0  ;;  %v313_v18 = vmul.f32 0.01, %v241_v14 }
  0xad   :  { %v382_v19 = vpack.c.bf16 %v359_v17, %v358_v15  ;;  %v344_v20 = vsel %vm280_vm7, %v192_v11, %v312_v16 }
  0xae   :  { %v345_v21 = vsel %vm281_vm8, %v241_v14, %v313_v18  ;;  %v211_v22 = vpop.f32.mrf.mxu2 }
  0xaf   :  { %401 = vst.msk [vmem:[%s815_s3 + $0x40] sm:$0xff] %vm698_vm4, %v382_v19  ;;  %v375_v23 = vpack.c.bf16 %v345_v21, %v344_v20  ;;  %v212_v24 = vadd.f32 %v211_v22, %v692_v57  ;;  %v260_v25 = vpop.f32.mrf.mxu3 }
  0xb0   :  { %v261_v26 = vadd.f32 %v260_v25, %v694_v58  ;;  %v194_v27 = vpop.f32.mrf.mxu0 }
  0xb1   :  { %394 = vst.msk [vmem:[%s815_s3 + $0x8] sm:$0xff] %vm698_vm4, %v375_v23  ;;  %vm296_vm9 = vcmp.ge.f32.partialorder %v212_v24, 0.0  ;;  %v328_v28 = vmul.f32 0.01, %v212_v24  ;;  %v195_v29 = vadd.f32 %v194_v27, %v692_v57  ;;  %v243_v30 = vpop.f32.mrf.mxu1 }
  0xb2   :  { %vm297_vm10 = vcmp.ge.f32.partialorder %v261_v26, 0.0  ;;  %v329_v31 = vmul.f32 0.01, %v261_v26  ;;  %v244_v32 = vadd.f32 %v243_v30, %v694_v58 }
  0xb3   :  { %v360_v33 = vsel %vm296_vm9, %v212_v24, %v328_v28  ;;  %vm282_vm11 = vcmp.ge.f32.partialorder %v195_v29, 0.0  ;;  %v314_v34 = vmul.f32 0.01, %v195_v29 }
  0xb4   :  { %v361_v35 = vsel %vm297_vm10, %v261_v26, %v329_v31  ;;  %vm283_vm12 = vcmp.ge.f32.partialorder %v244_v32, 0.0  ;;  %v315_v36 = vmul.f32 0.01, %v244_v32 }
  0xb5   :  { %v383_v37 = vpack.c.bf16 %v361_v35, %v360_v33  ;;  %v346_v38 = vsel %vm282_vm11, %v195_v29, %v314_v34 }
  0xb6   :  { %v347_v39 = vsel %vm283_vm12, %v244_v32, %v315_v36  ;;  %v214_v40 = vpop.f32.mrf.mxu2 }
  0xb7   :  { %402 = vst.msk [vmem:[%s815_s3 + $0x48] sm:$0xff] %vm698_vm4, %v383_v37  ;;  %v376_v41 = vpack.c.bf16 %v347_v39, %v346_v38  ;;  %v215_v42 = vadd.f32 %v214_v40, %v692_v57  ;;  %v263_v43 = vpop.f32.mrf.mxu3 }
  0xb8   :  { %v264_v44 = vadd.f32 %v263_v43, %v694_v58  ;;  %v196_v45 = vpop.f32.mrf.mxu0 }
  0xb9   :  { %395 = vst.msk [vmem:[%s815_s3 + $0x10] sm:$0xff] %vm698_vm4, %v376_v41  ;;  %vm298_vm13 = vcmp.ge.f32.partialorder %v215_v42, 0.0  ;;  %v330_v46 = vmul.f32 0.01, %v215_v42  ;;  %v197_v47 = vadd.f32 %v196_v45, %v692_v57  ;;  %v245_v48 = vpop.f32.mrf.mxu1 }
  0xba   :  { %vm299_vm14 = vcmp.ge.f32.partialorder %v264_v44, 0.0  ;;  %v331_v49 = vmul.f32 0.01, %v264_v44  ;;  %v246_v50 = vadd.f32 %v245_v48, %v694_v58 }
  0xbb   :  { %v362_v51 = vsel %vm298_vm13, %v215_v42, %v330_v46  ;;  %vm284_vm15 = vcmp.ge.f32.partialorder %v197_v47, 0.0  ;;  %v316_v52 = vmul.f32 0.01, %v197_v47 }
  0xbc   :  { %v363_v53 = vsel %vm299_vm14, %v264_v44, %v331_v49  ;;  %vm285_vm0 = vcmp.ge.f32.partialorder %v246_v50, 0.0  ;;  %v317_v54 = vmul.f32 0.01, %v246_v50 }
  0xbd   :  { %v384_v55 = vpack.c.bf16 %v363_v53, %v362_v51  ;;  %v348_v56 = vsel %vm284_vm15, %v197_v47, %v316_v52 }
  0xbe   :  { %v349_v59 = vsel %vm285_vm0, %v246_v50, %v317_v54  ;;  %v216_v60 = vpop.f32.mrf.mxu2 }
  0xbf   :  { %403 = vst.msk [vmem:[%s815_s3 + $0x50] sm:$0xff] %vm698_vm4, %v384_v55  ;;  %v377_v61 = vpack.c.bf16 %v349_v59, %v348_v56  ;;  %v217_v62 = vadd.f32 %v216_v60, %v692_v57  ;;  %v265_v63 = vpop.f32.mrf.mxu3 }
  0xc0   :  { %v266_v0 = vadd.f32 %v265_v63, %v694_v58  ;;  %v199_v1 = vpop.f32.mrf.mxu0 }
  0xc1   :  { %396 = vst.msk [vmem:[%s815_s3 + $0x18] sm:$0xff] %vm698_vm4, %v377_v61  ;;  %vm300_vm1 = vcmp.ge.f32.partialorder %v217_v62, 0.0  ;;  %v332_v2 = vmul.f32 0.01, %v217_v62  ;;  %v200_v4 = vadd.f32 %v199_v1, %v692_v57  ;;  %v248_v5 = vpop.f32.mrf.mxu1 }
  0xc2   :  { %vm301_vm2 = vcmp.ge.f32.partialorder %v266_v0, 0.0  ;;  %v333_v6 = vmul.f32 0.01, %v266_v0  ;;  %v249_v7 = vadd.f32 %v248_v5, %v694_v58 }
  0xc3   :  { %v364_v8 = vsel %vm300_vm1, %v217_v62, %v332_v2  ;;  %vm286_vm3 = vcmp.ge.f32.partialorder %v200_v4, 0.0  ;;  %v318_v9 = vmul.f32 0.01, %v200_v4 }
  0xc4   :  { %v365_v10 = vsel %vm301_vm2, %v266_v0, %v333_v6  ;;  %vm287_vm5 = vcmp.ge.f32.partialorder %v249_v7, 0.0  ;;  %v319_v11 = vmul.f32 0.01, %v249_v7 }
  0xc5   :  { %v385_v12 = vpack.c.bf16 %v365_v10, %v364_v8  ;;  %v350_v13 = vsel %vm286_vm3, %v200_v4, %v318_v9 }
  0xc6   :  { %v351_v14 = vsel %vm287_vm5, %v249_v7, %v319_v11  ;;  %v219_v15 = vpop.f32.mrf.mxu2 }
  0xc7   :  { %404 = vst.msk [vmem:[%s815_s3 + $0x58] sm:$0xff] %vm698_vm4, %v385_v12  ;;  %v378_v16 = vpack.c.bf16 %v351_v14, %v350_v13  ;;  %v220_v17 = vadd.f32 %v219_v15, %v692_v57  ;;  %v268_v18 = vpop.f32.mrf.mxu3 }
  0xc8   :  { %v269_v19 = vadd.f32 %v268_v18, %v694_v58  ;;  %v201_v20 = vpop.f32.mrf.mxu0 }
  0xc9   :  { %397 = vst.msk [vmem:[%s815_s3 + $0x20] sm:$0xff] %vm698_vm4, %v378_v16  ;;  %vm302_vm6 = vcmp.ge.f32.partialorder %v220_v17, 0.0  ;;  %v334_v21 = vmul.f32 0.01, %v220_v17  ;;  %v202_v22 = vadd.f32 %v201_v20, %v692_v57  ;;  %v250_v23 = vpop.f32.mrf.mxu1 }
  0xca   :  { %vm303_vm7 = vcmp.ge.f32.partialorder %v269_v19, 0.0  ;;  %v335_v24 = vmul.f32 0.01, %v269_v19  ;;  %v251_v25 = vadd.f32 %v250_v23, %v694_v58 }
  0xcb   :  { %v366_v26 = vsel %vm302_vm6, %v220_v17, %v334_v21  ;;  %vm288_vm8 = vcmp.ge.f32.partialorder %v202_v22, 0.0  ;;  %v320_v27 = vmul.f32 0.01, %v202_v22 }
  0xcc   :  { %v367_v28 = vsel %vm303_vm7, %v269_v19, %v335_v24  ;;  %vm289_vm9 = vcmp.ge.f32.partialorder %v251_v25, 0.0  ;;  %v321_v29 = vmul.f32 0.01, %v251_v25 }
  0xcd   :  { %v386_v30 = vpack.c.bf16 %v367_v28, %v366_v26  ;;  %v352_v31 = vsel %vm288_vm8, %v202_v22, %v320_v27 }
  0xce   :  { %v353_v32 = vsel %vm289_vm9, %v251_v25, %v321_v29  ;;  %v221_v33 = vpop.f32.mrf.mxu2 }
  0xcf   :  { %405 = vst.msk [vmem:[%s815_s3 + $0x60] sm:$0xff] %vm698_vm4, %v386_v30  ;;  %v379_v34 = vpack.c.bf16 %v353_v32, %v352_v31  ;;  %v222_v35 = vadd.f32 %v221_v33, %v692_v57  ;;  %v270_v36 = vpop.f32.mrf.mxu3 }
  0xd0   :  { %v271_v37 = vadd.f32 %v270_v36, %v694_v58  ;;  %v204_v38 = vpop.f32.mrf.mxu0 }
  0xd1   :  { %398 = vst.msk [vmem:[%s815_s3 + $0x28] sm:$0xff] %vm698_vm4, %v379_v34  ;;  %vm304_vm10 = vcmp.ge.f32.partialorder %v222_v35, 0.0  ;;  %v336_v39 = vmul.f32 0.01, %v222_v35  ;;  %v205_v40 = vadd.f32 %v204_v38, %v692_v57  ;;  %v253_v41 = vpop.f32.mrf.mxu1 }
  0xd2   :  { %vm305_vm11 = vcmp.ge.f32.partialorder %v271_v37, 0.0  ;;  %v337_v42 = vmul.f32 0.01, %v271_v37  ;;  %v254_v43 = vadd.f32 %v253_v41, %v694_v58 }
  0xd3   :  { %v368_v44 = vsel %vm304_vm10, %v222_v35, %v336_v39  ;;  %vm290_vm12 = vcmp.ge.f32.partialorder %v205_v40, 0.0  ;;  %v322_v45 = vmul.f32 0.01, %v205_v40 }
  0xd4   :  { %v369_v46 = vsel %vm305_vm11, %v271_v37, %v337_v42  ;;  %vm291_vm13 = vcmp.ge.f32.partialorder %v254_v43, 0.0  ;;  %v323_v47 = vmul.f32 0.01, %v254_v43 }
  0xd5   :  { %v387_v48 = vpack.c.bf16 %v369_v46, %v368_v44  ;;  %v354_v49 = vsel %vm290_vm12, %v205_v40, %v322_v45 }
  0xd6   :  { %v355_v50 = vsel %vm291_vm13, %v254_v43, %v323_v47  ;;  %v224_v51 = vpop.f32.mrf.mxu2 }
  0xd7   :  { %406 = vst.msk [vmem:[%s815_s3 + $0x68] sm:$0xff] %vm698_vm4, %v387_v48  ;;  %v380_v52 = vpack.c.bf16 %v355_v50, %v354_v49  ;;  %v225_v53 = vadd.f32 %v224_v51, %v692_v57  ;;  %v273_v54 = vpop.f32.mrf.mxu3 }
  0xd8   :  { %v274_v55 = vadd.f32 %v273_v54, %v694_v58  ;;  %v206_v56 = vpop.f32.mrf.mxu0 }
  0xd9   :  { %399 = vst.msk [vmem:[%s815_s3 + $0x30] sm:$0xff] %vm698_vm4, %v380_v52  ;;  %vm306_vm14 = vcmp.ge.f32.partialorder %v225_v53, 0.0  ;;  %v338_v59 = vmul.f32 0.01, %v225_v53  ;;  %v207_v60 = vadd.f32 %v206_v56, %v692_v57  ;;  %v255_v61 = vpop.f32.mrf.mxu1 }
  0xda   :  { %vm307_vm15 = vcmp.ge.f32.partialorder %v274_v55, 0.0  ;;  %v339_v62 = vmul.f32 0.01, %v274_v55  ;;  %v256_v63 = vadd.f32 %v255_v61, %v694_v58 }
  0xdb   :  { %v370_v0 = vsel %vm306_vm14, %v225_v53, %v338_v59  ;;  %vm292_vm0 = vcmp.ge.f32.partialorder %v207_v60, 0.0  ;;  %v324_v1 = vmul.f32 0.01, %v207_v60 }
  0xdc   :  { %v371_v2 = vsel %vm307_vm15, %v274_v55, %v339_v62  ;;  %vm293_vm1 = vcmp.ge.f32.partialorder %v256_v63, 0.0  ;;  %v325_v4 = vmul.f32 0.01, %v256_v63 }
  0xdd   :  { %v388_v5 = vpack.c.bf16 %v371_v2, %v370_v0  ;;  %v356_v6 = vsel %vm292_vm0, %v207_v60, %v324_v1 }
  0xde   :  { %v357_v7 = vsel %vm293_vm1, %v256_v63, %v325_v4  ;;  %v226_v8 = vpop.f32.mrf.mxu2 }
  0xdf   :  { %407 = vst.msk [vmem:[%s815_s3 + $0x70] sm:$0xff] %vm698_vm4, %v388_v5  ;;  %v381_v9 = vpack.c.bf16 %v357_v7, %v356_v6  ;;  %v227_v10 = vadd.f32 %v226_v8, %v692_v57  ;;  %v275_v11 = vpop.f32.mrf.mxu3 }
  0xe0   :  { %v276_v12 = vadd.f32 %v275_v11, %v694_v58 }
  0xe1   :  { %400 = vst.msk [vmem:[%s815_s3 + $0x38] sm:$0xff] %vm698_vm4, %v381_v9  ;;  %vm308_vm2 = vcmp.ge.f32.partialorder %v227_v10, 0.0  ;;  %v340_v13 = vmul.f32 0.01, %v227_v10 }
  0xe2   :  { %vm309_vm3 = vcmp.ge.f32.partialorder %v276_v12, 0.0  ;;  %v341_v14 = vmul.f32 0.01, %v276_v12 }
  0xe3   :  { %v372_v15 = vsel %vm308_vm2, %v227_v10, %v340_v13 }
  0xe4   :  { %v373_v16 = vsel %vm309_vm3, %v276_v12, %v341_v14 }
  0xe5   :  { %v389_v17 = vpack.c.bf16 %v373_v16, %v372_v15 }
  0xe7   :  { %408 = vst.msk [vmem:[%s815_s3 + $0x78] sm:$0xff] %vm698_vm4, %v389_v17 }

// kernel: conv_vae_forward.9
= control target key start
LH: loop header
LB: loop body
LE: loop exit
PB: predicated region body
PF: predicated region fallthrough
CT: control target
= control target key end

     0   :  { %vm459_vm0 = vcmask 130048   ;;  %vm956_vm1 = vcmask 220160   ;;  %s4405_s3 = inlined_call_operand.vmem [shape: bf16[16,27], index: 3, kind: input, shape index: {}]   ;;  %s4406_s1 = inlined_call_operand.vmem [shape: bf16[16,27], index: 1, kind: input, shape index: {}]   ;;  %s4407_s0 = inlined_call_operand.vmem [shape: bf16[968,16], index: 0, kind: input, shape index: {}]   ;;  %s4408_s4 = inlined_call_operand.vmem [shape: f32[1,27], index: 4, kind: input, shape index: {}]   ;;  %s4409_s2 = inlined_call_operand.vmem [shape: f32[1,27], index: 2, kind: input, shape index: {}]   ;;  %s4410_s5 = inlined_call_operand.vmem [shape: f32[968,27], index: 5, kind: output, shape index: {0}]   ;;  %s4411_s6 = inlined_call_operand.vmem [shape: f32[968,27], index: 6, kind: output, shape index: {1}]  }
   0x1   :  { %v2568_v0 = vld [vmem:[%s4405_s3] sm:$0xff]  ;;  %v2538_v3 = vld [vmem:[%s4407_s0 + $0xf8] sm:$0xff]  ;;  %v2508_v4 = vld [vmem:[%s4407_s0 + $0x8] sm:$0xff] }
   0x2   :  { %v2567_v1 = vld [vmem:[%s4406_s1] sm:$0xff]  ;;  %1097 = vmatpush.bf16.msra.mxu1 %v2568_v0  ;;  %2570 = vmatpush.bf16.msra.mxu3 %v2568_v0  ;;  %v2509_v6 = vld [vmem:[%s4407_s0 + $0x10] sm:$0xff]  ;;  %v2540_v7 = vld [vmem:[%s4407_s0 + $0x108] sm:$0xff] }
   0x3   :  { %v2507_v2 = vld [vmem:[%s4407_s0] sm:$0xff]  ;;  %650 = vmatpush.bf16.msra.mxu0 %v2567_v1  ;;  %2569 = vmatpush.bf16.msra.mxu2 %v2567_v1  ;;  %v2510_v8 = vld [vmem:[%s4407_s0 + $0x18] sm:$0xff]  ;;  %v2541_v9 = vld [vmem:[%s4407_s0 + $0x110] sm:$0xff] }
   0x4   :  { %v2539_v5 = vld [vmem:[%s4407_s0 + $0x100] sm:$0xff]  ;;  %v2542_v11 = vld [vmem:[%s4407_s0 + $0x118] sm:$0xff]  ;;  %v2512_v12 = vld [vmem:[%s4407_s0 + $0x28] sm:$0xff] }
   0x5   :  { %2325 = vmatmul.msk.bf16.vlgmr.msra.gmra.mxu1 %vm459_vm0, %v2507_v2  ;;  %2356 = vmatmul.msk.bf16.vlgmr.msra.gmra.mxu3 %vm459_vm0, %v2538_v3  ;;  %v2511_v10 = vld [vmem:[%s4407_s0 + $0x20] sm:$0xff]  ;;  %v2513_v14 = vld [vmem:[%s4407_s0 + $0x30] sm:$0xff]  ;;  %v2544_v15 = vld [vmem:[%s4407_s0 + $0x128] sm:$0xff] }
   0x6   :  { %2260 = vmatmul.msk.bf16.vlgmr.msra.gmra.mxu0 %vm459_vm0, %v2507_v2  ;;  %2291 = vmatmul.msk.bf16.vlgmr.msra.gmra.mxu2 %vm459_vm0, %v2538_v3  ;;  %v2543_v13 = vld [vmem:[%s4407_s0 + $0x120] sm:$0xff]  ;;  %v2514_v16 = vld [vmem:[%s4407_s0 + $0x38] sm:$0xff]  ;;  %v2545_v17 = vld [vmem:[%s4407_s0 + $0x130] sm:$0xff] }
   0x7   :  { %v2943_v18 = vld [vmem:[%s4408_s4] ss:$0 sm:$0xff]  ;;  %v2546_v23 = vld [vmem:[%s4407_s0 + $0x138] sm:$0xff]  ;;  %v2516_v41 = vld [vmem:[%s4407_s0 + $0x48] sm:$0xff] }
   0x8   :  { %v2948_v19 = vld [vmem:[%s4409_s2] ss:$0 sm:$0xff] }
   0x9   :  { %v2515_v20 = vld [vmem:[%s4407_s0 + $0x40] sm:$0xff] }
   0xa   :  { %v2547_v47 = vld [vmem:[%s4407_s0 + $0x140] sm:$0xff] }
  0x15   :  { %2326 = vmatmul.msk.bf16.gmra.mxu1 %vm459_vm0, %v2508_v4  ;;  %2357 = vmatmul.msk.bf16.gmra.mxu3 %vm459_vm0, %v2539_v5 }
  0x16   :  { %2261 = vmatmul.msk.bf16.gmra.mxu0 %vm459_vm0, %v2508_v4  ;;  %2292 = vmatmul.msk.bf16.gmra.mxu2 %vm459_vm0, %v2539_v5 }
  0x25   :  { %2327 = vmatmul.msk.bf16.gmra.mxu1 %vm459_vm0, %v2509_v6  ;;  %2358 = vmatmul.msk.bf16.gmra.mxu3 %vm459_vm0, %v2540_v7 }
  0x26   :  { %2262 = vmatmul.msk.bf16.gmra.mxu0 %vm459_vm0, %v2509_v6  ;;  %2293 = vmatmul.msk.bf16.gmra.mxu2 %vm459_vm0, %v2540_v7  ;;  %v2517_v7 = vld [vmem:[%s4407_s0 + $0x50] sm:$0xff] }
  0x35   :  { %2328 = vmatmul.msk.bf16.gmra.mxu1 %vm459_vm0, %v2510_v8  ;;  %2359 = vmatmul.msk.bf16.gmra.mxu3 %vm459_vm0, %v2541_v9 }
  0x36   :  { %2263 = vmatmul.msk.bf16.gmra.mxu0 %vm459_vm0, %v2510_v8  ;;  %2294 = vmatmul.msk.bf16.gmra.mxu2 %vm459_vm0, %v2541_v9 }
  0x45   :  { %2329 = vmatmul.msk.bf16.gmra.mxu1 %vm459_vm0, %v2511_v10  ;;  %2360 = vmatmul.msk.bf16.gmra.mxu3 %vm459_vm0, %v2542_v11 }
  0x46   :  { %2264 = vmatmul.msk.bf16.gmra.mxu0 %vm459_vm0, %v2511_v10  ;;  %2295 = vmatmul.msk.bf16.gmra.mxu2 %vm459_vm0, %v2542_v11 }
  0x55   :  { %2330 = vmatmul.msk.bf16.gmra.mxu1 %vm459_vm0, %v2512_v12  ;;  %2361 = vmatmul.msk.bf16.gmra.mxu3 %vm459_vm0, %v2543_v13 }
  0x56   :  { %2265 = vmatmul.msk.bf16.gmra.mxu0 %vm459_vm0, %v2512_v12  ;;  %2296 = vmatmul.msk.bf16.gmra.mxu2 %vm459_vm0, %v2543_v13  ;;  %v2548_v13 = vld [vmem:[%s4407_s0 + $0x148] sm:$0xff] }
  0x65   :  { %2331 = vmatmul.msk.bf16.gmra.mxu1 %vm459_vm0, %v2513_v14  ;;  %2362 = vmatmul.msk.bf16.gmra.mxu3 %vm459_vm0, %v2544_v15 }
  0x66   :  { %2266 = vmatmul.msk.bf16.gmra.mxu0 %vm459_vm0, %v2513_v14  ;;  %2297 = vmatmul.msk.bf16.gmra.mxu2 %vm459_vm0, %v2544_v15 }
  0x75   :  { %2332 = vmatmul.msk.bf16.gmra.mxu1 %vm459_vm0, %v2514_v16  ;;  %2363 = vmatmul.msk.bf16.gmra.mxu3 %vm459_vm0, %v2545_v17 }
  0x76   :  { %2267 = vmatmul.msk.bf16.gmra.mxu0 %vm459_vm0, %v2514_v16  ;;  %2298 = vmatmul.msk.bf16.gmra.mxu2 %vm459_vm0, %v2545_v17 }
  0x82   :  { %v1099_v21 = vpop.f32.mrf.mxu1 }
  0x83   :  { %v652_v22 = vpop.f32.mrf.mxu0  ;;  %v1100_v24 = vadd.f32 %v2943_v18, %v1099_v21 }
  0x84   :  { %v653_v25 = vadd.f32 %v2948_v19, %v652_v22 }
  0x85   :  { %v2386_v26 = vclamps-f32 %v1100_v24, 20.0  ;;  %2333 = vmatmul.msk.bf16.gmra.mxu1 %vm459_vm0, %v2515_v20  ;;  %2364 = vmatmul.msk.bf16.gmra.mxu3 %vm459_vm0, %v2546_v23 }
  0x86   :  { %957 = vst.msk [vmem:[%s4410_s5] sm:$0xff] %vm956_vm1, %v653_v25  ;;  %2268 = vmatmul.msk.bf16.gmra.mxu0 %vm459_vm0, %v2515_v20  ;;  %2299 = vmatmul.msk.bf16.gmra.mxu2 %vm459_vm0, %v2546_v23 }
  0x87   :  { %v1645_v27 = vmul.f32 1.442695, %v2386_v26 }
  0x88   :  { %v1254_v28 = vpop.f32.mrf.mxu3 }
  0x89   :  { %2573 = vpow2.f32 %v1645_v27  ;;  %v807_v29 = vpop.f32.mrf.mxu2  ;;  %v1255_v32 = vadd.f32 %v2943_v18, %v1254_v28 }
  0x8a   :  { %v1101_v30 = vpop.f32.mrf.mxu1  ;;  %v808_v33 = vadd.f32 %v2948_v19, %v807_v29 }
  0x8b   :  { %v654_v31 = vpop.f32.mrf.mxu0  ;;  %v1102_v34 = vadd.f32 %v2943_v18, %v1101_v30  ;;  %v2448_v36 = vclamps-f32 %v1255_v32, 20.0 }
  0x8c   :  { %v655_v35 = vadd.f32 %v2948_v19, %v654_v31  ;;  %1019 = vst.msk [vmem:[%s4410_s5 + $0x1f0] sm:$0xff] %vm956_vm1, %v808_v33 }
  0x8d   :  { %v2387_v37 = vclamps-f32 %v1102_v34, 20.0  ;;  %v1769_v38 = vmul.f32 1.442695, %v2448_v36 }
  0x8e   :  { %958 = vst.msk [vmem:[%s4410_s5 + $0x8] sm:$0xff] %vm956_vm1, %v655_v35 }
  0x8f   :  { %v2574_v39 = vpop.eup %2573  ;;  %v1647_v40 = vmul.f32 1.442695, %v2387_v37  ;;  %2575 = vpow2.f32 %v1769_v38 }
  0x90   :  { %1887 = vst.msk [vmem:[%s4411_s6] sm:$0xff] %vm956_vm1, %v2574_v39  ;;  %v1256_v42 = vpop.f32.mrf.mxu3  ;;  %v2518_v39 = vld [vmem:[%s4407_s0 + $0x58] sm:$0xff] }
  0x91   :  { %2577 = vpow2.f32 %v1647_v40  ;;  %v809_v43 = vpop.f32.mrf.mxu2  ;;  %v1257_v46 = vadd.f32 %v2943_v18, %v1256_v42 }
  0x92   :  { %v1104_v44 = vpop.f32.mrf.mxu1  ;;  %v810_v48 = vadd.f32 %v2948_v19, %v809_v43 }
  0x93   :  { %v657_v45 = vpop.f32.mrf.mxu0  ;;  %v1105_v49 = vadd.f32 %v2943_v18, %v1104_v44  ;;  %v2449_v51 = vclamps-f32 %v1257_v46, 20.0 }
  0x94   :  { %v658_v50 = vadd.f32 %v2948_v19, %v657_v45  ;;  %1020 = vst.msk [vmem:[%s4410_s5 + $0x1f8] sm:$0xff] %vm956_vm1, %v810_v48  ;;  %v2549_v45 = vld [vmem:[%s4407_s0 + $0x150] sm:$0xff] }
  0x95   :  { %v2388_v52 = vclamps-f32 %v1105_v49, 20.0  ;;  %2334 = vmatmul.msk.bf16.gmra.mxu1 %vm459_vm0, %v2516_v41  ;;  %v2576_v53 = vpop.eup %2575  ;;  %v1771_v54 = vmul.f32 1.442695, %v2449_v51  ;;  %2365 = vmatmul.msk.bf16.gmra.mxu3 %vm459_vm0, %v2547_v47 }
  0x96   :  { %959 = vst.msk [vmem:[%s4410_s5 + $0x10] sm:$0xff] %vm956_vm1, %v658_v50  ;;  %2269 = vmatmul.msk.bf16.gmra.mxu0 %vm459_vm0, %v2516_v41  ;;  %2300 = vmatmul.msk.bf16.gmra.mxu2 %vm459_vm0, %v2547_v47 }
  0x97   :  { %v2578_v55 = vpop.eup %2577  ;;  %v1649_v56 = vmul.f32 1.442695, %v2388_v52  ;;  %1949 = vst.msk [vmem:[%s4411_s6 + $0x1f0] sm:$0xff] %vm956_vm1, %v2576_v53  ;;  %2579 = vpow2.f32 %v1771_v54 }
  0x98   :  { %1888 = vst.msk [vmem:[%s4411_s6 + $0x8] sm:$0xff] %vm956_vm1, %v2578_v55  ;;  %v1259_v57 = vpop.f32.mrf.mxu3 }
  0x99   :  { %2581 = vpow2.f32 %v1649_v56  ;;  %v812_v58 = vpop.f32.mrf.mxu2  ;;  %v1260_v61 = vadd.f32 %v2943_v18, %v1259_v57 }
  0x9a   :  { %v1106_v59 = vpop.f32.mrf.mxu1  ;;  %v813_v62 = vadd.f32 %v2948_v19, %v812_v58 }
  0x9b   :  { %v659_v60 = vpop.f32.mrf.mxu0  ;;  %v1107_v63 = vadd.f32 %v2943_v18, %v1106_v59  ;;  %v2450_v1 = vclamps-f32 %v1260_v61, 20.0 }
  0x9c   :  { %v660_v0 = vadd.f32 %v2948_v19, %v659_v60  ;;  %1021 = vst.msk [vmem:[%s4410_s5 + $0x200] sm:$0xff] %vm956_vm1, %v813_v62 }
  0x9d   :  { %v2389_v2 = vclamps-f32 %v1107_v63, 20.0  ;;  %v2580_v3 = vpop.eup %2579  ;;  %v1773_v4 = vmul.f32 1.442695, %v2450_v1 }
  0x9e   :  { %960 = vst.msk [vmem:[%s4410_s5 + $0x18] sm:$0xff] %vm956_vm1, %v660_v0 }
  0x9f   :  { %v2582_v5 = vpop.eup %2581  ;;  %v1651_v6 = vmul.f32 1.442695, %v2389_v2  ;;  %1950 = vst.msk [vmem:[%s4411_s6 + $0x1f8] sm:$0xff] %vm956_vm1, %v2580_v3  ;;  %2583 = vpow2.f32 %v1773_v4 }
  0xa0   :  { %1889 = vst.msk [vmem:[%s4411_s6 + $0x10] sm:$0xff] %vm956_vm1, %v2582_v5  ;;  %v1261_v8 = vpop.f32.mrf.mxu3  ;;  %v2519_v5 = vld [vmem:[%s4407_s0 + $0x60] sm:$0xff] }
  0xa1   :  { %2585 = vpow2.f32 %v1651_v6  ;;  %v814_v9 = vpop.f32.mrf.mxu2  ;;  %v1262_v12 = vadd.f32 %v2943_v18, %v1261_v8 }
  0xa2   :  { %v1109_v10 = vpop.f32.mrf.mxu1  ;;  %v815_v14 = vadd.f32 %v2948_v19, %v814_v9 }
  0xa3   :  { %v662_v11 = vpop.f32.mrf.mxu0  ;;  %v1110_v15 = vadd.f32 %v2943_v18, %v1109_v10  ;;  %v2451_v17 = vclamps-f32 %v1262_v12, 20.0 }
  0xa4   :  { %v663_v16 = vadd.f32 %v2948_v19, %v662_v11  ;;  %1022 = vst.msk [vmem:[%s4410_s5 + $0x208] sm:$0xff] %vm956_vm1, %v815_v14  ;;  %v2550_v11 = vld [vmem:[%s4407_s0 + $0x158] sm:$0xff] }
  0xa5   :  { %v2390_v20 = vclamps-f32 %v1110_v15, 20.0  ;;  %2335 = vmatmul.msk.bf16.gmra.mxu1 %vm459_vm0, %v2517_v7  ;;  %v2584_v21 = vpop.eup %2583  ;;  %v1775_v22 = vmul.f32 1.442695, %v2451_v17  ;;  %2366 = vmatmul.msk.bf16.gmra.mxu3 %vm459_vm0, %v2548_v13 }
  0xa6   :  { %961 = vst.msk [vmem:[%s4410_s5 + $0x20] sm:$0xff] %vm956_vm1, %v663_v16  ;;  %2270 = vmatmul.msk.bf16.gmra.mxu0 %vm459_vm0, %v2517_v7  ;;  %2301 = vmatmul.msk.bf16.gmra.mxu2 %vm459_vm0, %v2548_v13 }
  0xa7   :  { %v2586_v23 = vpop.eup %2585  ;;  %v1653_v24 = vmul.f32 1.442695, %v2390_v20  ;;  %1951 = vst.msk [vmem:[%s4411_s6 + $0x200] sm:$0xff] %vm956_vm1, %v2584_v21  ;;  %2587 = vpow2.f32 %v1775_v22 }
  0xa8   :  { %1890 = vst.msk [vmem:[%s4411_s6 + $0x18] sm:$0xff] %vm956_vm1, %v2586_v23  ;;  %v1264_v25 = vpop.f32.mrf.mxu3 }
  0xa9   :  { %2589 = vpow2.f32 %v1653_v24  ;;  %v817_v26 = vpop.f32.mrf.mxu2  ;;  %v1265_v29 = vadd.f32 %v2943_v18, %v1264_v25 }
  0xaa   :  { %v1111_v27 = vpop.f32.mrf.mxu1  ;;  %v818_v30 = vadd.f32 %v2948_v19, %v817_v26 }
  0xab   :  { %v664_v28 = vpop.f32.mrf.mxu0  ;;  %v1112_v31 = vadd.f32 %v2943_v18, %v1111_v27  ;;  %v2452_v33 = vclamps-f32 %v1265_v29, 20.0 }
  0xac   :  { %v665_v32 = vadd.f32 %v2948_v19, %v664_v28  ;;  %1023 = vst.msk [vmem:[%s4410_s5 + $0x210] sm:$0xff] %vm956_vm1, %v818_v30 }
  0xad   :  { %v2391_v34 = vclamps-f32 %v1112_v31, 20.0  ;;  %v2588_v35 = vpop.eup %2587  ;;  %v1777_v36 = vmul.f32 1.442695, %v2452_v33 }
  0xae   :  { %962 = vst.msk [vmem:[%s4410_s5 + $0x28] sm:$0xff] %vm956_vm1, %v665_v32 }
  0xaf   :  { %v2590_v37 = vpop.eup %2589  ;;  %v1655_v38 = vmul.f32 1.442695, %v2391_v34  ;;  %1952 = vst.msk [vmem:[%s4411_s6 + $0x208] sm:$0xff] %vm956_vm1, %v2588_v35  ;;  %2591 = vpow2.f32 %v1777_v36 }
  0xb0   :  { %1891 = vst.msk [vmem:[%s4411_s6 + $0x20] sm:$0xff] %vm956_vm1, %v2590_v37  ;;  %v1266_v40 = vpop.f32.mrf.mxu3  ;;  %v2520_v37 = vld [vmem:[%s4407_s0 + $0x68] sm:$0xff] }
  0xb1   :  { %2593 = vpow2.f32 %v1655_v38  ;;  %v819_v41 = vpop.f32.mrf.mxu2  ;;  %v1267_v44 = vadd.f32 %v2943_v18, %v1266_v40 }
  0xb2   :  { %v1114_v42 = vpop.f32.mrf.mxu1  ;;  %v820_v46 = vadd.f32 %v2948_v19, %v819_v41 }
  0xb3   :  { %v667_v43 = vpop.f32.mrf.mxu0  ;;  %v1115_v47 = vadd.f32 %v2943_v18, %v1114_v42  ;;  %v2453_v49 = vclamps-f32 %v1267_v44, 20.0 }
  0xb4   :  { %v668_v48 = vadd.f32 %v2948_v19, %v667_v43  ;;  %1024 = vst.msk [vmem:[%s4410_s5 + $0x218] sm:$0xff] %vm956_vm1, %v820_v46  ;;  %v2551_v43 = vld [vmem:[%s4407_s0 + $0x160] sm:$0xff] }
  0xb5   :  { %v2392_v50 = vclamps-f32 %v1115_v47, 20.0  ;;  %2336 = vmatmul.msk.bf16.gmra.mxu1 %vm459_vm0, %v2518_v39  ;;  %v2592_v51 = vpop.eup %2591  ;;  %v1779_v52 = vmul.f32 1.442695, %v2453_v49  ;;  %2367 = vmatmul.msk.bf16.gmra.mxu3 %vm459_vm0, %v2549_v45 }
  0xb6   :  { %963 = vst.msk [vmem:[%s4410_s5 + $0x30] sm:$0xff] %vm956_vm1, %v668_v48  ;;  %2271 = vmatmul.msk.bf16.gmra.mxu0 %vm459_vm0, %v2518_v39  ;;  %2302 = vmatmul.msk.bf16.gmra.mxu2 %vm459_vm0, %v2549_v45 }
  0xb7   :  { %v2594_v53 = vpop.eup %2593  ;;  %v1657_v54 = vmul.f32 1.442695, %v2392_v50  ;;  %1953 = vst.msk [vmem:[%s4411_s6 + $0x210] sm:$0xff] %vm956_vm1, %v2592_v51  ;;  %2595 = vpow2.f32 %v1779_v52 }
  0xb8   :  { %1892 = vst.msk [vmem:[%s4411_s6 + $0x28] sm:$0xff] %vm956_vm1, %v2594_v53  ;;  %v1269_v55 = vpop.f32.mrf.mxu3 }
  0xb9   :  { %2597 = vpow2.f32 %v1657_v54  ;;  %v822_v56 = vpop.f32.mrf.mxu2  ;;  %v1270_v59 = vadd.f32 %v2943_v18, %v1269_v55 }
  0xba   :  { %v1116_v57 = vpop.f32.mrf.mxu1  ;;  %v823_v60 = vadd.f32 %v2948_v19, %v822_v56 }
  0xbb   :  { %v669_v58 = vpop.f32.mrf.mxu0  ;;  %v1117_v61 = vadd.f32 %v2943_v18, %v1116_v57  ;;  %v2454_v63 = vclamps-f32 %v1270_v59, 20.0 }
  0xbc   :  { %v670_v62 = vadd.f32 %v2948_v19, %v669_v58  ;;  %1025 = vst.msk [vmem:[%s4410_s5 + $0x220] sm:$0xff] %vm956_vm1, %v823_v60 }
  0xbd   :  { %v2393_v0 = vclamps-f32 %v1117_v61, 20.0  ;;  %v2596_v1 = vpop.eup %2595  ;;  %v1781_v2 = vmul.f32 1.442695, %v2454_v63 }
  0xbe   :  { %964 = vst.msk [vmem:[%s4410_s5 + $0x38] sm:$0xff] %vm956_vm1, %v670_v62 }
  0xbf   :  { %v2598_v3 = vpop.eup %2597  ;;  %v1659_v4 = vmul.f32 1.442695, %v2393_v0  ;;  %1954 = vst.msk [vmem:[%s4411_s6 + $0x218] sm:$0xff] %vm956_vm1, %v2596_v1  ;;  %2599 = vpow2.f32 %v1781_v2 }
  0xc0   :  { %1893 = vst.msk [vmem:[%s4411_s6 + $0x30] sm:$0xff] %vm956_vm1, %v2598_v3  ;;  %v1271_v6 = vpop.f32.mrf.mxu3  ;;  %v2521_v3 = vld [vmem:[%s4407_s0 + $0x70] sm:$0xff] }
  0xc1   :  { %2601 = vpow2.f32 %v1659_v4  ;;  %v824_v7 = vpop.f32.mrf.mxu2  ;;  %v1272_v10 = vadd.f32 %v2943_v18, %v1271_v6 }
  0xc2   :  { %v1119_v8 = vpop.f32.mrf.mxu1  ;;  %v825_v12 = vadd.f32 %v2948_v19, %v824_v7 }
  0xc3   :  { %v672_v9 = vpop.f32.mrf.mxu0  ;;  %v1120_v13 = vadd.f32 %v2943_v18, %v1119_v8  ;;  %v2455_v15 = vclamps-f32 %v1272_v10, 20.0 }
  0xc4   :  { %v673_v14 = vadd.f32 %v2948_v19, %v672_v9  ;;  %1026 = vst.msk [vmem:[%s4410_s5 + $0x228] sm:$0xff] %vm956_vm1, %v825_v12  ;;  %v2552_v9 = vld [vmem:[%s4407_s0 + $0x168] sm:$0xff] }
  0xc5   :  { %v2394_v16 = vclamps-f32 %v1120_v13, 20.0  ;;  %2337 = vmatmul.msk.bf16.gmra.mxu1 %vm459_vm0, %v2519_v5  ;;  %v2600_v17 = vpop.eup %2599  ;;  %v1783_v20 = vmul.f32 1.442695, %v2455_v15  ;;  %2368 = vmatmul.msk.bf16.gmra.mxu3 %vm459_vm0, %v2550_v11 }
  0xc6   :  { %965 = vst.msk [vmem:[%s4410_s5 + $0x40] sm:$0xff] %vm956_vm1, %v673_v14  ;;  %2272 = vmatmul.msk.bf16.gmra.mxu0 %vm459_vm0, %v2519_v5  ;;  %2303 = vmatmul.msk.bf16.gmra.mxu2 %vm459_vm0, %v2550_v11 }
  0xc7   :  { %v2602_v21 = vpop.eup %2601  ;;  %v1661_v22 = vmul.f32 1.442695, %v2394_v16  ;;  %1955 = vst.msk [vmem:[%s4411_s6 + $0x220] sm:$0xff] %vm956_vm1, %v2600_v17  ;;  %2603 = vpow2.f32 %v1783_v20 }
  0xc8   :  { %1894 = vst.msk [vmem:[%s4411_s6 + $0x38] sm:$0xff] %vm956_vm1, %v2602_v21  ;;  %v1274_v23 = vpop.f32.mrf.mxu3 }
  0xc9   :  { %2605 = vpow2.f32 %v1661_v22  ;;  %v827_v24 = vpop.f32.mrf.mxu2  ;;  %v1275_v27 = vadd.f32 %v2943_v18, %v1274_v23 }
  0xca   :  { %v1121_v25 = vpop.f32.mrf.mxu1  ;;  %v828_v28 = vadd.f32 %v2948_v19, %v827_v24 }
  0xcb   :  { %v674_v26 = vpop.f32.mrf.mxu0  ;;  %v1122_v29 = vadd.f32 %v2943_v18, %v1121_v25  ;;  %v2456_v31 = vclamps-f32 %v1275_v27, 20.0 }
  0xcc   :  { %v675_v30 = vadd.f32 %v2948_v19, %v674_v26  ;;  %1027 = vst.msk [vmem:[%s4410_s5 + $0x230] sm:$0xff] %vm956_vm1, %v828_v28 }
  0xcd   :  { %v2395_v32 = vclamps-f32 %v1122_v29, 20.0  ;;  %v2604_v33 = vpop.eup %2603  ;;  %v1785_v34 = vmul.f32 1.442695, %v2456_v31 }
  0xce   :  { %966 = vst.msk [vmem:[%s4410_s5 + $0x48] sm:$0xff] %vm956_vm1, %v675_v30 }
  0xcf   :  { %v2606_v35 = vpop.eup %2605  ;;  %v1663_v36 = vmul.f32 1.442695, %v2395_v32  ;;  %1956 = vst.msk [vmem:[%s4411_s6 + $0x228] sm:$0xff] %vm956_vm1, %v2604_v33  ;;  %2607 = vpow2.f32 %v1785_v34 }
  0xd0   :  { %1895 = vst.msk [vmem:[%s4411_s6 + $0x40] sm:$0xff] %vm956_vm1, %v2606_v35  ;;  %v1276_v38 = vpop.f32.mrf.mxu3  ;;  %v2522_v35 = vld [vmem:[%s4407_s0 + $0x78] sm:$0xff] }
  0xd1   :  { %2609 = vpow2.f32 %v1663_v36  ;;  %v829_v39 = vpop.f32.mrf.mxu2  ;;  %v1277_v42 = vadd.f32 %v2943_v18, %v1276_v38 }
  0xd2   :  { %v1124_v40 = vpop.f32.mrf.mxu1  ;;  %v830_v44 = vadd.f32 %v2948_v19, %v829_v39 }
  0xd3   :  { %v677_v41 = vpop.f32.mrf.mxu0  ;;  %v1125_v45 = vadd.f32 %v2943_v18, %v1124_v40  ;;  %v2457_v47 = vclamps-f32 %v1277_v42, 20.0 }
  0xd4   :  { %v678_v46 = vadd.f32 %v2948_v19, %v677_v41  ;;  %1028 = vst.msk [vmem:[%s4410_s5 + $0x238] sm:$0xff] %vm956_vm1, %v830_v44  ;;  %v2553_v41 = vld [vmem:[%s4407_s0 + $0x170] sm:$0xff] }
  0xd5   :  { %v2396_v48 = vclamps-f32 %v1125_v45, 20.0  ;;  %2338 = vmatmul.msk.bf16.gmra.mxu1 %vm459_vm0, %v2520_v37  ;;  %v2608_v49 = vpop.eup %2607  ;;  %v1787_v50 = vmul.f32 1.442695, %v2457_v47  ;;  %2369 = vmatmul.msk.bf16.gmra.mxu3 %vm459_vm0, %v2551_v43 }
  0xd6   :  { %967 = vst.msk [vmem:[%s4410_s5 + $0x50] sm:$0xff] %vm956_vm1, %v678_v46  ;;  %2273 = vmatmul.msk.bf16.gmra.mxu0 %vm459_vm0, %v2520_v37  ;;  %2304 = vmatmul.msk.bf16.gmra.mxu2 %vm459_vm0, %v2551_v43 }
  0xd7   :  { %v2610_v51 = vpop.eup %2609  ;;  %v1665_v52 = vmul.f32 1.442695, %v2396_v48  ;;  %1957 = vst.msk [vmem:[%s4411_s6 + $0x230] sm:$0xff] %vm956_vm1, %v2608_v49  ;;  %2611 = vpow2.f32 %v1787_v50 }
  0xd8   :  { %1896 = vst.msk [vmem:[%s4411_s6 + $0x48] sm:$0xff] %vm956_vm1, %v2610_v51  ;;  %v1279_v53 = vpop.f32.mrf.mxu3 }
  0xd9   :  { %2613 = vpow2.f32 %v1665_v52  ;;  %v832_v54 = vpop.f32.mrf.mxu2  ;;  %v1280_v57 = vadd.f32 %v2943_v18, %v1279_v53 }
  0xda   :  { %v1126_v55 = vpop.f32.mrf.mxu1  ;;  %v833_v58 = vadd.f32 %v2948_v19, %v832_v54 }
  0xdb   :  { %v679_v56 = vpop.f32.mrf.mxu0  ;;  %v1127_v59 = vadd.f32 %v2943_v18, %v1126_v55  ;;  %v2458_v61 = vclamps-f32 %v1280_v57, 20.0 }
  0xdc   :  { %v680_v60 = vadd.f32 %v2948_v19, %v679_v56  ;;  %1029 = vst.msk [vmem:[%s4410_s5 + $0x240] sm:$0xff] %vm956_vm1, %v833_v58 }
  0xdd   :  { %v2397_v62 = vclamps-f32 %v1127_v59, 20.0  ;;  %v2612_v63 = vpop.eup %2611  ;;  %v1789_v0 = vmul.f32 1.442695, %v2458_v61 }
  0xde   :  { %968 = vst.msk [vmem:[%s4410_s5 + $0x58] sm:$0xff] %vm956_vm1, %v680_v60 }
  0xdf   :  { %v2614_v1 = vpop.eup %2613  ;;  %v1667_v2 = vmul.f32 1.442695, %v2397_v62  ;;  %1958 = vst.msk [vmem:[%s4411_s6 + $0x238] sm:$0xff] %vm956_vm1, %v2612_v63  ;;  %2615 = vpow2.f32 %v1789_v0 }
  0xe0   :  { %1897 = vst.msk [vmem:[%s4411_s6 + $0x50] sm:$0xff] %vm956_vm1, %v2614_v1  ;;  %v1281_v4 = vpop.f32.mrf.mxu3  ;;  %v2523_v1 = vld [vmem:[%s4407_s0 + $0x80] sm:$0xff] }
  0xe1   :  { %2617 = vpow2.f32 %v1667_v2  ;;  %v834_v5 = vpop.f32.mrf.mxu2  ;;  %v1282_v8 = vadd.f32 %v2943_v18, %v1281_v4 }
  0xe2   :  { %v1129_v6 = vpop.f32.mrf.mxu1  ;;  %v835_v10 = vadd.f32 %v2948_v19, %v834_v5 }
  0xe3   :  { %v682_v7 = vpop.f32.mrf.mxu0  ;;  %v1130_v11 = vadd.f32 %v2943_v18, %v1129_v6  ;;  %v2459_v13 = vclamps-f32 %v1282_v8, 20.0 }
  0xe4   :  { %v683_v12 = vadd.f32 %v2948_v19, %v682_v7  ;;  %1030 = vst.msk [vmem:[%s4410_s5 + $0x248] sm:$0xff] %vm956_vm1, %v835_v10  ;;  %v2554_v7 = vld [vmem:[%s4407_s0 + $0x178] sm:$0xff] }
  0xe5   :  { %v2398_v14 = vclamps-f32 %v1130_v11, 20.0  ;;  %2339 = vmatmul.msk.bf16.gmra.mxu1 %vm459_vm0, %v2521_v3  ;;  %v2616_v15 = vpop.eup %2615  ;;  %v1791_v16 = vmul.f32 1.442695, %v2459_v13  ;;  %2370 = vmatmul.msk.bf16.gmra.mxu3 %vm459_vm0, %v2552_v9 }
  0xe6   :  { %969 = vst.msk [vmem:[%s4410_s5 + $0x60] sm:$0xff] %vm956_vm1, %v683_v12  ;;  %2274 = vmatmul.msk.bf16.gmra.mxu0 %vm459_vm0, %v2521_v3  ;;  %2305 = vmatmul.msk.bf16.gmra.mxu2 %vm459_vm0, %v2552_v9 }
  0xe7   :  { %v2618_v17 = vpop.eup %2617  ;;  %v1669_v20 = vmul.f32 1.442695, %v2398_v14  ;;  %1959 = vst.msk [vmem:[%s4411_s6 + $0x240] sm:$0xff] %vm956_vm1, %v2616_v15  ;;  %2619 = vpow2.f32 %v1791_v16 }
  0xe8   :  { %1898 = vst.msk [vmem:[%s4411_s6 + $0x58] sm:$0xff] %vm956_vm1, %v2618_v17  ;;  %v1284_v21 = vpop.f32.mrf.mxu3 }
  0xe9   :  { %2621 = vpow2.f32 %v1669_v20  ;;  %v837_v22 = vpop.f32.mrf.mxu2  ;;  %v1285_v25 = vadd.f32 %v2943_v18, %v1284_v21 }
  0xea   :  { %v1131_v23 = vpop.f32.mrf.mxu1  ;;  %v838_v26 = vadd.f32 %v2948_v19, %v837_v22 }
  0xeb   :  { %v684_v24 = vpop.f32.mrf.mxu0  ;;  %v1132_v27 = vadd.f32 %v2943_v18, %v1131_v23  ;;  %v2460_v29 = vclamps-f32 %v1285_v25, 20.0 }
  0xec   :  { %v685_v28 = vadd.f32 %v2948_v19, %v684_v24  ;;  %1031 = vst.msk [vmem:[%s4410_s5 + $0x250] sm:$0xff] %vm956_vm1, %v838_v26 }
  0xed   :  { %v2399_v30 = vclamps-f32 %v1132_v27, 20.0  ;;  %v2620_v31 = vpop.eup %2619  ;;  %v1793_v32 = vmul.f32 1.442695, %v2460_v29 }
  0xee   :  { %970 = vst.msk [vmem:[%s4410_s5 + $0x68] sm:$0xff] %vm956_vm1, %v685_v28 }
  0xef   :  { %v2622_v33 = vpop.eup %2621  ;;  %v1671_v34 = vmul.f32 1.442695, %v2399_v30  ;;  %1960 = vst.msk [vmem:[%s4411_s6 + $0x248] sm:$0xff] %vm956_vm1, %v2620_v31  ;;  %2623 = vpow2.f32 %v1793_v32 }
  0xf0   :  { %1899 = vst.msk [vmem:[%s4411_s6 + $0x60] sm:$0xff] %vm956_vm1, %v2622_v33  ;;  %v1286_v36 = vpop.f32.mrf.mxu3  ;;  %v2524_v33 = vld [vmem:[%s4407_s0 + $0x88] sm:$0xff] }
  0xf1   :  { %2625 = vpow2.f32 %v1671_v34  ;;  %v839_v37 = vpop.f32.mrf.mxu2  ;;  %v1287_v40 = vadd.f32 %v2943_v18, %v1286_v36 }
  0xf2   :  { %v1134_v38 = vpop.f32.mrf.mxu1  ;;  %v840_v42 = vadd.f32 %v2948_v19, %v839_v37 }
  0xf3   :  { %v687_v39 = vpop.f32.mrf.mxu0  ;;  %v1135_v43 = vadd.f32 %v2943_v18, %v1134_v38  ;;  %v2461_v45 = vclamps-f32 %v1287_v40, 20.0 }
  0xf4   :  { %v688_v44 = vadd.f32 %v2948_v19, %v687_v39  ;;  %1032 = vst.msk [vmem:[%s4410_s5 + $0x258] sm:$0xff] %vm956_vm1, %v840_v42  ;;  %v2555_v39 = vld [vmem:[%s4407_s0 + $0x180] sm:$0xff] }
  0xf5   :  { %v2400_v46 = vclamps-f32 %v1135_v43, 20.0  ;;  %2340 = vmatmul.msk.bf16.gmra.mxu1 %vm459_vm0, %v2522_v35  ;;  %v2624_v47 = vpop.eup %2623  ;;  %v1795_v48 = vmul.f32 1.442695, %v2461_v45  ;;  %2371 = vmatmul.msk.bf16.gmra.mxu3 %vm459_vm0, %v2553_v41 }
  0xf6   :  { %971 = vst.msk [vmem:[%s4410_s5 + $0x70] sm:$0xff] %vm956_vm1, %v688_v44  ;;  %2275 = vmatmul.msk.bf16.gmra.mxu0 %vm459_vm0, %v2522_v35  ;;  %2306 = vmatmul.msk.bf16.gmra.mxu2 %vm459_vm0, %v2553_v41 }
  0xf7   :  { %v2626_v49 = vpop.eup %2625  ;;  %v1673_v50 = vmul.f32 1.442695, %v2400_v46  ;;  %1961 = vst.msk [vmem:[%s4411_s6 + $0x250] sm:$0xff] %vm956_vm1, %v2624_v47  ;;  %2627 = vpow2.f32 %v1795_v48 }
  0xf8   :  { %1900 = vst.msk [vmem:[%s4411_s6 + $0x68] sm:$0xff] %vm956_vm1, %v2626_v49  ;;  %v1289_v51 = vpop.f32.mrf.mxu3 }
  0xf9   :  { %2629 = vpow2.f32 %v1673_v50  ;;  %v842_v52 = vpop.f32.mrf.mxu2  ;;  %v1290_v55 = vadd.f32 %v2943_v18, %v1289_v51 }
  0xfa   :  { %v1136_v53 = vpop.f32.mrf.mxu1  ;;  %v843_v56 = vadd.f32 %v2948_v19, %v842_v52 }
  0xfb   :  { %v689_v54 = vpop.f32.mrf.mxu0  ;;  %v1137_v57 = vadd.f32 %v2943_v18, %v1136_v53  ;;  %v2462_v59 = vclamps-f32 %v1290_v55, 20.0 }
  0xfc   :  { %v690_v58 = vadd.f32 %v2948_v19, %v689_v54  ;;  %1033 = vst.msk [vmem:[%s4410_s5 + $0x260] sm:$0xff] %vm956_vm1, %v843_v56 }
  0xfd   :  { %v2401_v60 = vclamps-f32 %v1137_v57, 20.0  ;;  %v2628_v61 = vpop.eup %2627  ;;  %v1797_v62 = vmul.f32 1.442695, %v2462_v59 }
  0xfe   :  { %972 = vst.msk [vmem:[%s4410_s5 + $0x78] sm:$0xff] %vm956_vm1, %v690_v58 }
  0xff   :  { %v2630_v63 = vpop.eup %2629  ;;  %v1675_v0 = vmul.f32 1.442695, %v2401_v60  ;;  %1962 = vst.msk [vmem:[%s4411_s6 + $0x258] sm:$0xff] %vm956_vm1, %v2628_v61  ;;  %2631 = vpow2.f32 %v1797_v62 }
 0x100   :  { %1901 = vst.msk [vmem:[%s4411_s6 + $0x70] sm:$0xff] %vm956_vm1, %v2630_v63  ;;  %v1291_v2 = vpop.f32.mrf.mxu3  ;;  %v2525_v63 = vld [vmem:[%s4407_s0 + $0x90] sm:$0xff] }
 0x101   :  { %2633 = vpow2.f32 %v1675_v0  ;;  %v844_v3 = vpop.f32.mrf.mxu2  ;;  %v1292_v6 = vadd.f32 %v2943_v18, %v1291_v2 }
 0x102   :  { %v1139_v4 = vpop.f32.mrf.mxu1  ;;  %v845_v8 = vadd.f32 %v2948_v19, %v844_v3 }
 0x103   :  { %v692_v5 = vpop.f32.mrf.mxu0  ;;  %v1140_v9 = vadd.f32 %v2943_v18, %v1139_v4  ;;  %v2463_v11 = vclamps-f32 %v1292_v6, 20.0 }
 0x104   :  { %v693_v10 = vadd.f32 %v2948_v19, %v692_v5  ;;  %1034 = vst.msk [vmem:[%s4410_s5 + $0x268] sm:$0xff] %vm956_vm1, %v845_v8  ;;  %v2556_v5 = vld [vmem:[%s4407_s0 + $0x188] sm:$0xff] }
 0x105   :  { %v2402_v12 = vclamps-f32 %v1140_v9, 20.0  ;;  %2341 = vmatmul.msk.bf16.gmra.mxu1 %vm459_vm0, %v2523_v1  ;;  %v2632_v13 = vpop.eup %2631  ;;  %v1799_v14 = vmul.f32 1.442695, %v2463_v11  ;;  %2372 = vmatmul.msk.bf16.gmra.mxu3 %vm459_vm0, %v2554_v7 }
 0x106   :  { %973 = vst.msk [vmem:[%s4410_s5 + $0x80] sm:$0xff] %vm956_vm1, %v693_v10  ;;  %2276 = vmatmul.msk.bf16.gmra.mxu0 %vm459_vm0, %v2523_v1  ;;  %2307 = vmatmul.msk.bf16.gmra.mxu2 %vm459_vm0, %v2554_v7 }
 0x107   :  { %v2634_v15 = vpop.eup %2633  ;;  %v1677_v16 = vmul.f32 1.442695, %v2402_v12  ;;  %1963 = vst.msk [vmem:[%s4411_s6 + $0x260] sm:$0xff] %vm956_vm1, %v2632_v13  ;;  %2635 = vpow2.f32 %v1799_v14 }
 0x108   :  { %1902 = vst.msk [vmem:[%s4411_s6 + $0x78] sm:$0xff] %vm956_vm1, %v2634_v15  ;;  %v1294_v17 = vpop.f32.mrf.mxu3 }
 0x109   :  { %2637 = vpow2.f32 %v1677_v16  ;;  %v847_v20 = vpop.f32.mrf.mxu2  ;;  %v1295_v23 = vadd.f32 %v2943_v18, %v1294_v17 }
 0x10a   :  { %v1141_v21 = vpop.f32.mrf.mxu1  ;;  %v848_v24 = vadd.f32 %v2948_v19, %v847_v20 }
 0x10b   :  { %v694_v22 = vpop.f32.mrf.mxu0  ;;  %v1142_v25 = vadd.f32 %v2943_v18, %v1141_v21  ;;  %v2464_v27 = vclamps-f32 %v1295_v23, 20.0 }
 0x10c   :  { %v695_v26 = vadd.f32 %v2948_v19, %v694_v22  ;;  %1035 = vst.msk [vmem:[%s4410_s5 + $0x270] sm:$0xff] %vm956_vm1, %v848_v24 }
 0x10d   :  { %v2403_v28 = vclamps-f32 %v1142_v25, 20.0  ;;  %v2636_v29 = vpop.eup %2635  ;;  %v1801_v30 = vmul.f32 1.442695, %v2464_v27 }
 0x10e   :  { %974 = vst.msk [vmem:[%s4410_s5 + $0x88] sm:$0xff] %vm956_vm1, %v695_v26 }
 0x10f   :  { %v2638_v31 = vpop.eup %2637  ;;  %v1679_v32 = vmul.f32 1.442695, %v2403_v28  ;;  %1964 = vst.msk [vmem:[%s4411_s6 + $0x268] sm:$0xff] %vm956_vm1, %v2636_v29  ;;  %2639 = vpow2.f32 %v1801_v30 }
 0x110   :  { %1903 = vst.msk [vmem:[%s4411_s6 + $0x80] sm:$0xff] %vm956_vm1, %v2638_v31  ;;  %v1296_v34 = vpop.f32.mrf.mxu3  ;;  %v2526_v31 = vld [vmem:[%s4407_s0 + $0x98] sm:$0xff] }
 0x111   :  { %2641 = vpow2.f32 %v1679_v32  ;;  %v849_v35 = vpop.f32.mrf.mxu2  ;;  %v1297_v38 = vadd.f32 %v2943_v18, %v1296_v34 }
 0x112   :  { %v1144_v36 = vpop.f32.mrf.mxu1  ;;  %v850_v40 = vadd.f32 %v2948_v19, %v849_v35 }
 0x113   :  { %v697_v37 = vpop.f32.mrf.mxu0  ;;  %v1145_v41 = vadd.f32 %v2943_v18, %v1144_v36  ;;  %v2465_v43 = vclamps-f32 %v1297_v38, 20.0 }
 0x114   :  { %v698_v42 = vadd.f32 %v2948_v19, %v697_v37  ;;  %1036 = vst.msk [vmem:[%s4410_s5 + $0x278] sm:$0xff] %vm956_vm1, %v850_v40  ;;  %v2557_v37 = vld [vmem:[%s4407_s0 + $0x190] sm:$0xff] }
 0x115   :  { %v2404_v44 = vclamps-f32 %v1145_v41, 20.0  ;;  %2342 = vmatmul.msk.bf16.gmra.mxu1 %vm459_vm0, %v2524_v33  ;;  %v2640_v45 = vpop.eup %2639  ;;  %v1803_v46 = vmul.f32 1.442695, %v2465_v43  ;;  %2373 = vmatmul.msk.bf16.gmra.mxu3 %vm459_vm0, %v2555_v39 }
 0x116   :  { %975 = vst.msk [vmem:[%s4410_s5 + $0x90] sm:$0xff] %vm956_vm1, %v698_v42  ;;  %2277 = vmatmul.msk.bf16.gmra.mxu0 %vm459_vm0, %v2524_v33  ;;  %2308 = vmatmul.msk.bf16.gmra.mxu2 %vm459_vm0, %v2555_v39 }
 0x117   :  { %v2642_v47 = vpop.eup %2641  ;;  %v1681_v48 = vmul.f32 1.442695, %v2404_v44  ;;  %1965 = vst.msk [vmem:[%s4411_s6 + $0x270] sm:$0xff] %vm956_vm1, %v2640_v45  ;;  %2643 = vpow2.f32 %v1803_v46 }
 0x118   :  { %1904 = vst.msk [vmem:[%s4411_s6 + $0x88] sm:$0xff] %vm956_vm1, %v2642_v47  ;;  %v1299_v49 = vpop.f32.mrf.mxu3 }
 0x119   :  { %2645 = vpow2.f32 %v1681_v48  ;;  %v852_v50 = vpop.f32.mrf.mxu2  ;;  %v1300_v53 = vadd.f32 %v2943_v18, %v1299_v49  ;;  %v3515_v49 = vld [vmem:[%s4408_s4] ss:$0 sm:$0xff] }
 0x11a   :  { %v1146_v51 = vpop.f32.mrf.mxu1  ;;  %v853_v54 = vadd.f32 %v2948_v19, %v852_v50 }
 0x11b   :  { %v699_v52 = vpop.f32.mrf.mxu0  ;;  %v1147_v55 = vadd.f32 %v2943_v18, %v1146_v51  ;;  %v2466_v57 = vclamps-f32 %v1300_v53, 20.0  ;;  %v3521_v51 = vld [vmem:[%s4409_s2] ss:$0 sm:$0xff] }
 0x11c   :  { %v700_v56 = vadd.f32 %v2948_v19, %v699_v52  ;;  %1037 = vst.msk [vmem:[%s4410_s5 + $0x280] sm:$0xff] %vm956_vm1, %v853_v54 }
 0x11d   :  { %v2405_v58 = vclamps-f32 %v1147_v55, 20.0  ;;  %v2644_v59 = vpop.eup %2643  ;;  %v1805_v60 = vmul.f32 1.442695, %v2466_v57 }
 0x11e   :  { %976 = vst.msk [vmem:[%s4410_s5 + $0x98] sm:$0xff] %vm956_vm1, %v700_v56 }
 0x11f   :  { %v2646_v61 = vpop.eup %2645  ;;  %v1683_v62 = vmul.f32 1.442695, %v2405_v58  ;;  %1966 = vst.msk [vmem:[%s4411_s6 + $0x278] sm:$0xff] %vm956_vm1, %v2644_v59  ;;  %2647 = vpow2.f32 %v1805_v60 }
 0x120   :  { %1905 = vst.msk [vmem:[%s4411_s6 + $0x90] sm:$0xff] %vm956_vm1, %v2646_v61  ;;  %v1301_v0 = vpop.f32.mrf.mxu3  ;;  %v2527_v61 = vld [vmem:[%s4407_s0 + $0xa0] sm:$0xff] }
 0x121   :  { %2649 = vpow2.f32 %v1683_v62  ;;  %v854_v1 = vpop.f32.mrf.mxu2  ;;  %v1302_v4 = vadd.f32 %v2943_v18, %v1301_v0 }
 0x122   :  { %v1149_v2 = vpop.f32.mrf.mxu1  ;;  %v855_v6 = vadd.f32 %v2948_v19, %v854_v1 }
 0x123   :  { %v702_v3 = vpop.f32.mrf.mxu0  ;;  %v1150_v7 = vadd.f32 %v2943_v18, %v1149_v2  ;;  %v2467_v9 = vclamps-f32 %v1302_v4, 20.0 }
 0x124   :  { %v703_v8 = vadd.f32 %v2948_v19, %v702_v3  ;;  %1038 = vst.msk [vmem:[%s4410_s5 + $0x288] sm:$0xff] %vm956_vm1, %v855_v6  ;;  %v2558_v3 = vld [vmem:[%s4407_s0 + $0x198] sm:$0xff] }
 0x125   :  { %v2406_v10 = vclamps-f32 %v1150_v7, 20.0  ;;  %2343 = vmatmul.msk.bf16.gmra.mxu1 %vm459_vm0, %v2525_v63  ;;  %v2648_v11 = vpop.eup %2647  ;;  %v1807_v12 = vmul.f32 1.442695, %v2467_v9  ;;  %2374 = vmatmul.msk.bf16.gmra.mxu3 %vm459_vm0, %v2556_v5 }
 0x126   :  { %977 = vst.msk [vmem:[%s4410_s5 + $0xa0] sm:$0xff] %vm956_vm1, %v703_v8  ;;  %2278 = vmatmul.msk.bf16.gmra.mxu0 %vm459_vm0, %v2525_v63  ;;  %2309 = vmatmul.msk.bf16.gmra.mxu2 %vm459_vm0, %v2556_v5 }
 0x127   :  { %v2650_v13 = vpop.eup %2649  ;;  %v1685_v14 = vmul.f32 1.442695, %v2406_v10  ;;  %1967 = vst.msk [vmem:[%s4411_s6 + $0x280] sm:$0xff] %vm956_vm1, %v2648_v11  ;;  %2651 = vpow2.f32 %v1807_v12 }
 0x128   :  { %1906 = vst.msk [vmem:[%s4411_s6 + $0x98] sm:$0xff] %vm956_vm1, %v2650_v13  ;;  %v1304_v15 = vpop.f32.mrf.mxu3 }
 0x129   :  { %2653 = vpow2.f32 %v1685_v14  ;;  %v857_v16 = vpop.f32.mrf.mxu2  ;;  %v1305_v21 = vadd.f32 %v2943_v18, %v1304_v15 }
 0x12a   :  { %v1151_v17 = vpop.f32.mrf.mxu1  ;;  %v858_v22 = vadd.f32 %v2948_v19, %v857_v16 }
 0x12b   :  { %v704_v20 = vpop.f32.mrf.mxu0  ;;  %v1152_v23 = vadd.f32 %v2943_v18, %v1151_v17  ;;  %v2468_v25 = vclamps-f32 %v1305_v21, 20.0 }
 0x12c   :  { %v705_v24 = vadd.f32 %v2948_v19, %v704_v20  ;;  %1039 = vst.msk [vmem:[%s4410_s5 + $0x290] sm:$0xff] %vm956_vm1, %v858_v22 }
 0x12d   :  { %v2407_v26 = vclamps-f32 %v1152_v23, 20.0  ;;  %v2652_v27 = vpop.eup %2651  ;;  %v1809_v28 = vmul.f32 1.442695, %v2468_v25 }
 0x12e   :  { %978 = vst.msk [vmem:[%s4410_s5 + $0xa8] sm:$0xff] %vm956_vm1, %v705_v24 }
 0x12f   :  { %v2654_v29 = vpop.eup %2653  ;;  %v1687_v30 = vmul.f32 1.442695, %v2407_v26  ;;  %1968 = vst.msk [vmem:[%s4411_s6 + $0x288] sm:$0xff] %vm956_vm1, %v2652_v27  ;;  %2655 = vpow2.f32 %v1809_v28 }
 0x130   :  { %1907 = vst.msk [vmem:[%s4411_s6 + $0xa0] sm:$0xff] %vm956_vm1, %v2654_v29  ;;  %v1306_v32 = vpop.f32.mrf.mxu3  ;;  %v2528_v29 = vld [vmem:[%s4407_s0 + $0xa8] sm:$0xff] }
 0x131   :  { %2657 = vpow2.f32 %v1687_v30  ;;  %v859_v33 = vpop.f32.mrf.mxu2  ;;  %v1307_v36 = vadd.f32 %v2943_v18, %v1306_v32 }
 0x132   :  { %v1154_v34 = vpop.f32.mrf.mxu1  ;;  %v860_v38 = vadd.f32 %v2948_v19, %v859_v33 }
 0x133   :  { %v707_v35 = vpop.f32.mrf.mxu0  ;;  %v1155_v39 = vadd.f32 %v2943_v18, %v1154_v34  ;;  %v2469_v41 = vclamps-f32 %v1307_v36, 20.0 }
 0x134   :  { %v708_v40 = vadd.f32 %v2948_v19, %v707_v35  ;;  %1040 = vst.msk [vmem:[%s4410_s5 + $0x298] sm:$0xff] %vm956_vm1, %v860_v38  ;;  %v2559_v35 = vld [vmem:[%s4407_s0 + $0x1a0] sm:$0xff] }
 0x135   :  { %v2408_v42 = vclamps-f32 %v1155_v39, 20.0  ;;  %2344 = vmatmul.msk.bf16.gmra.mxu1 %vm459_vm0, %v2526_v31  ;;  %v2656_v43 = vpop.eup %2655  ;;  %v1811_v18 = vmul.f32 1.442695, %v2469_v41  ;;  %2375 = vmatmul.msk.bf16.gmra.mxu3 %vm459_vm0, %v2557_v37 }
 0x136   :  { %979 = vst.msk [vmem:[%s4410_s5 + $0xb0] sm:$0xff] %vm956_vm1, %v708_v40  ;;  %2279 = vmatmul.msk.bf16.gmra.mxu0 %vm459_vm0, %v2526_v31  ;;  %2310 = vmatmul.msk.bf16.gmra.mxu2 %vm459_vm0, %v2557_v37 }
 0x137   :  { %v2658_v19 = vpop.eup %2657  ;;  %v1689_v44 = vmul.f32 1.442695, %v2408_v42  ;;  %1969 = vst.msk [vmem:[%s4411_s6 + $0x290] sm:$0xff] %vm956_vm1, %v2656_v43  ;;  %2659 = vpow2.f32 %v1811_v18 }
 0x138   :  { %1908 = vst.msk [vmem:[%s4411_s6 + $0xa8] sm:$0xff] %vm956_vm1, %v2658_v19  ;;  %v1309_v45 = vpop.f32.mrf.mxu3 }
 0x139   :  { %2661 = vpow2.f32 %v1689_v44  ;;  %v862_v46 = vpop.f32.mrf.mxu2  ;;  %v1310_v50 = vadd.f32 %v3515_v49, %v1309_v45 }
 0x13a   :  { %v1156_v47 = vpop.f32.mrf.mxu1  ;;  %v863_v52 = vadd.f32 %v3521_v51, %v862_v46 }
 0x13b   :  { %v709_v48 = vpop.f32.mrf.mxu0  ;;  %v1157_v53 = vadd.f32 %v3515_v49, %v1156_v47  ;;  %v2470_v55 = vclamps-f32 %v1310_v50, 20.0 }
 0x13c   :  { %v710_v54 = vadd.f32 %v3521_v51, %v709_v48  ;;  %1041 = vst.msk [vmem:[%s4410_s5 + $0x2a0] sm:$0xff] %vm956_vm1, %v863_v52 }
 0x13d   :  { %v2409_v56 = vclamps-f32 %v1157_v53, 20.0  ;;  %v2660_v57 = vpop.eup %2659  ;;  %v1813_v58 = vmul.f32 1.442695, %v2470_v55 }
 0x13e   :  { %980 = vst.msk [vmem:[%s4410_s5 + $0xb8] sm:$0xff] %vm956_vm1, %v710_v54 }
 0x13f   :  { %v2662_v59 = vpop.eup %2661  ;;  %v1691_v60 = vmul.f32 1.442695, %v2409_v56  ;;  %1970 = vst.msk [vmem:[%s4411_s6 + $0x298] sm:$0xff] %vm956_vm1, %v2660_v57  ;;  %2663 = vpow2.f32 %v1813_v58 }
 0x140   :  { %1909 = vst.msk [vmem:[%s4411_s6 + $0xb0] sm:$0xff] %vm956_vm1, %v2662_v59  ;;  %v1311_v62 = vpop.f32.mrf.mxu3  ;;  %v2529_v59 = vld [vmem:[%s4407_s0 + $0xb0] sm:$0xff] }
 0x141   :  { %2665 = vpow2.f32 %v1691_v60  ;;  %v864_v63 = vpop.f32.mrf.mxu2  ;;  %v1312_v2 = vadd.f32 %v3515_v49, %v1311_v62 }
 0x142   :  { %v1159_v0 = vpop.f32.mrf.mxu1  ;;  %v865_v4 = vadd.f32 %v3521_v51, %v864_v63 }
 0x143   :  { %v712_v1 = vpop.f32.mrf.mxu0  ;;  %v1160_v5 = vadd.f32 %v3515_v49, %v1159_v0  ;;  %v2471_v7 = vclamps-f32 %v1312_v2, 20.0 }
 0x144   :  { %v713_v6 = vadd.f32 %v3521_v51, %v712_v1  ;;  %1042 = vst.msk [vmem:[%s4410_s5 + $0x2a8] sm:$0xff] %vm956_vm1, %v865_v4  ;;  %v2560_v1 = vld [vmem:[%s4407_s0 + $0x1a8] sm:$0xff] }
 0x145   :  { %v2410_v8 = vclamps-f32 %v1160_v5, 20.0  ;;  %2345 = vmatmul.msk.bf16.gmra.mxu1 %vm459_vm0, %v2527_v61  ;;  %v2664_v9 = vpop.eup %2663  ;;  %v1815_v10 = vmul.f32 1.442695, %v2471_v7  ;;  %2376 = vmatmul.msk.bf16.gmra.mxu3 %vm459_vm0, %v2558_v3 }
 0x146   :  { %981 = vst.msk [vmem:[%s4410_s5 + $0xc0] sm:$0xff] %vm956_vm1, %v713_v6  ;;  %2280 = vmatmul.msk.bf16.gmra.mxu0 %vm459_vm0, %v2527_v61  ;;  %2311 = vmatmul.msk.bf16.gmra.mxu2 %vm459_vm0, %v2558_v3 }
 0x147   :  { %v2666_v11 = vpop.eup %2665  ;;  %v1693_v12 = vmul.f32 1.442695, %v2410_v8  ;;  %1971 = vst.msk [vmem:[%s4411_s6 + $0x2a0] sm:$0xff] %vm956_vm1, %v2664_v9  ;;  %2667 = vpow2.f32 %v1815_v10 }
 0x148   :  { %1910 = vst.msk [vmem:[%s4411_s6 + $0xb8] sm:$0xff] %vm956_vm1, %v2666_v11  ;;  %v1314_v13 = vpop.f32.mrf.mxu3 }
 0x149   :  { %2669 = vpow2.f32 %v1693_v12  ;;  %v867_v14 = vpop.f32.mrf.mxu2  ;;  %v1315_v17 = vadd.f32 %v3515_v49, %v1314_v13 }
 0x14a   :  { %v1161_v15 = vpop.f32.mrf.mxu1  ;;  %v868_v20 = vadd.f32 %v3521_v51, %v867_v14 }
 0x14b   :  { %v714_v16 = vpop.f32.mrf.mxu0  ;;  %v1162_v21 = vadd.f32 %v3515_v49, %v1161_v15  ;;  %v2472_v23 = vclamps-f32 %v1315_v17, 20.0 }
 0x14c   :  { %v715_v22 = vadd.f32 %v3521_v51, %v714_v16  ;;  %1043 = vst.msk [vmem:[%s4410_s5 + $0x2b0] sm:$0xff] %vm956_vm1, %v868_v20 }
 0x14d   :  { %v2411_v24 = vclamps-f32 %v1162_v21, 20.0  ;;  %v2668_v25 = vpop.eup %2667  ;;  %v1817_v26 = vmul.f32 1.442695, %v2472_v23 }
 0x14e   :  { %982 = vst.msk [vmem:[%s4410_s5 + $0xc8] sm:$0xff] %vm956_vm1, %v715_v22 }
 0x14f   :  { %v2670_v27 = vpop.eup %2669  ;;  %v1695_v28 = vmul.f32 1.442695, %v2411_v24  ;;  %1972 = vst.msk [vmem:[%s4411_s6 + $0x2a8] sm:$0xff] %vm956_vm1, %v2668_v25  ;;  %2671 = vpow2.f32 %v1817_v26 }
 0x150   :  { %1911 = vst.msk [vmem:[%s4411_s6 + $0xc0] sm:$0xff] %vm956_vm1, %v2670_v27  ;;  %v1316_v30 = vpop.f32.mrf.mxu3  ;;  %v2530_v27 = vld [vmem:[%s4407_s0 + $0xb8] sm:$0xff] }
 0x151   :  { %2673 = vpow2.f32 %v1695_v28  ;;  %v869_v31 = vpop.f32.mrf.mxu2  ;;  %v1317_v34 = vadd.f32 %v3515_v49, %v1316_v30 }
 0x152   :  { %v1164_v32 = vpop.f32.mrf.mxu1  ;;  %v870_v36 = vadd.f32 %v3521_v51, %v869_v31 }
 0x153   :  { %v717_v33 = vpop.f32.mrf.mxu0  ;;  %v1165_v37 = vadd.f32 %v3515_v49, %v1164_v32  ;;  %v2473_v39 = vclamps-f32 %v1317_v34, 20.0 }
 0x154   :  { %v718_v38 = vadd.f32 %v3521_v51, %v717_v33  ;;  %1044 = vst.msk [vmem:[%s4410_s5 + $0x2b8] sm:$0xff] %vm956_vm1, %v870_v36  ;;  %v2561_v33 = vld [vmem:[%s4407_s0 + $0x1b0] sm:$0xff] }
 0x155   :  { %v2412_v40 = vclamps-f32 %v1165_v37, 20.0  ;;  %2346 = vmatmul.msk.bf16.gmra.mxu1 %vm459_vm0, %v2528_v29  ;;  %v2672_v41 = vpop.eup %2671  ;;  %v1819_v42 = vmul.f32 1.442695, %v2473_v39  ;;  %2377 = vmatmul.msk.bf16.gmra.mxu3 %vm459_vm0, %v2559_v35 }
 0x156   :  { %983 = vst.msk [vmem:[%s4410_s5 + $0xd0] sm:$0xff] %vm956_vm1, %v718_v38  ;;  %2281 = vmatmul.msk.bf16.gmra.mxu0 %vm459_vm0, %v2528_v29  ;;  %2312 = vmatmul.msk.bf16.gmra.mxu2 %vm459_vm0, %v2559_v35 }
 0x157   :  { %v2674_v43 = vpop.eup %2673  ;;  %v1697_v18 = vmul.f32 1.442695, %v2412_v40  ;;  %1973 = vst.msk [vmem:[%s4411_s6 + $0x2b0] sm:$0xff] %vm956_vm1, %v2672_v41  ;;  %2675 = vpow2.f32 %v1819_v42 }
 0x158   :  { %1912 = vst.msk [vmem:[%s4411_s6 + $0xc8] sm:$0xff] %vm956_vm1, %v2674_v43  ;;  %v1319_v19 = vpop.f32.mrf.mxu3 }
 0x159   :  { %2677 = vpow2.f32 %v1697_v18  ;;  %v872_v44 = vpop.f32.mrf.mxu2  ;;  %v1320_v47 = vadd.f32 %v3515_v49, %v1319_v19 }
 0x15a   :  { %v1166_v45 = vpop.f32.mrf.mxu1  ;;  %v873_v48 = vadd.f32 %v3521_v51, %v872_v44 }
 0x15b   :  { %v719_v46 = vpop.f32.mrf.mxu0  ;;  %v1167_v50 = vadd.f32 %v3515_v49, %v1166_v45  ;;  %v2474_v53 = vclamps-f32 %v1320_v47, 20.0 }
 0x15c   :  { %v720_v52 = vadd.f32 %v3521_v51, %v719_v46  ;;  %1045 = vst.msk [vmem:[%s4410_s5 + $0x2c0] sm:$0xff] %vm956_vm1, %v873_v48 }
 0x15d   :  { %v2413_v54 = vclamps-f32 %v1167_v50, 20.0  ;;  %v2676_v55 = vpop.eup %2675  ;;  %v1821_v56 = vmul.f32 1.442695, %v2474_v53 }
 0x15e   :  { %984 = vst.msk [vmem:[%s4410_s5 + $0xd8] sm:$0xff] %vm956_vm1, %v720_v52 }
 0x15f   :  { %v2678_v57 = vpop.eup %2677  ;;  %v1699_v58 = vmul.f32 1.442695, %v2413_v54  ;;  %1974 = vst.msk [vmem:[%s4411_s6 + $0x2b8] sm:$0xff] %vm956_vm1, %v2676_v55  ;;  %2679 = vpow2.f32 %v1821_v56 }
 0x160   :  { %1913 = vst.msk [vmem:[%s4411_s6 + $0xd0] sm:$0xff] %vm956_vm1, %v2678_v57  ;;  %v1321_v60 = vpop.f32.mrf.mxu3  ;;  %v2531_v57 = vld [vmem:[%s4407_s0 + $0xc0] sm:$0xff] }
 0x161   :  { %2681 = vpow2.f32 %v1699_v58  ;;  %v874_v61 = vpop.f32.mrf.mxu2  ;;  %v1322_v0 = vadd.f32 %v3515_v49, %v1321_v60 }
 0x162   :  { %v1169_v62 = vpop.f32.mrf.mxu1  ;;  %v875_v2 = vadd.f32 %v3521_v51, %v874_v61 }
 0x163   :  { %v722_v63 = vpop.f32.mrf.mxu0  ;;  %v1170_v3 = vadd.f32 %v3515_v49, %v1169_v62  ;;  %v2475_v5 = vclamps-f32 %v1322_v0, 20.0 }
 0x164   :  { %v723_v4 = vadd.f32 %v3521_v51, %v722_v63  ;;  %1046 = vst.msk [vmem:[%s4410_s5 + $0x2c8] sm:$0xff] %vm956_vm1, %v875_v2  ;;  %v2562_v63 = vld [vmem:[%s4407_s0 + $0x1b8] sm:$0xff] }
 0x165   :  { %v2414_v6 = vclamps-f32 %v1170_v3, 20.0  ;;  %2347 = vmatmul.msk.bf16.gmra.mxu1 %vm459_vm0, %v2529_v59  ;;  %v2680_v7 = vpop.eup %2679  ;;  %v1823_v8 = vmul.f32 1.442695, %v2475_v5  ;;  %2378 = vmatmul.msk.bf16.gmra.mxu3 %vm459_vm0, %v2560_v1 }
 0x166   :  { %985 = vst.msk [vmem:[%s4410_s5 + $0xe0] sm:$0xff] %vm956_vm1, %v723_v4  ;;  %2282 = vmatmul.msk.bf16.gmra.mxu0 %vm459_vm0, %v2529_v59  ;;  %2313 = vmatmul.msk.bf16.gmra.mxu2 %vm459_vm0, %v2560_v1 }
 0x167   :  { %v2682_v9 = vpop.eup %2681  ;;  %v1701_v10 = vmul.f32 1.442695, %v2414_v6  ;;  %1975 = vst.msk [vmem:[%s4411_s6 + $0x2c0] sm:$0xff] %vm956_vm1, %v2680_v7  ;;  %2683 = vpow2.f32 %v1823_v8 }
 0x168   :  { %1914 = vst.msk [vmem:[%s4411_s6 + $0xd8] sm:$0xff] %vm956_vm1, %v2682_v9  ;;  %v1324_v11 = vpop.f32.mrf.mxu3 }
 0x169   :  { %2685 = vpow2.f32 %v1701_v10  ;;  %v877_v12 = vpop.f32.mrf.mxu2  ;;  %v1325_v15 = vadd.f32 %v3515_v49, %v1324_v11 }
 0x16a   :  { %v1171_v13 = vpop.f32.mrf.mxu1  ;;  %v878_v16 = vadd.f32 %v3521_v51, %v877_v12 }
 0x16b   :  { %v724_v14 = vpop.f32.mrf.mxu0  ;;  %v1172_v17 = vadd.f32 %v3515_v49, %v1171_v13  ;;  %v2476_v21 = vclamps-f32 %v1325_v15, 20.0 }
 0x16c   :  { %v725_v20 = vadd.f32 %v3521_v51, %v724_v14  ;;  %1047 = vst.msk [vmem:[%s4410_s5 + $0x2d0] sm:$0xff] %vm956_vm1, %v878_v16 }
 0x16d   :  { %v2415_v22 = vclamps-f32 %v1172_v17, 20.0  ;;  %v2684_v23 = vpop.eup %2683  ;;  %v1825_v24 = vmul.f32 1.442695, %v2476_v21 }
 0x16e   :  { %986 = vst.msk [vmem:[%s4410_s5 + $0xe8] sm:$0xff] %vm956_vm1, %v725_v20 }
 0x16f   :  { %v2686_v25 = vpop.eup %2685  ;;  %v1703_v26 = vmul.f32 1.442695, %v2415_v22  ;;  %1976 = vst.msk [vmem:[%s4411_s6 + $0x2c8] sm:$0xff] %vm956_vm1, %v2684_v23  ;;  %2687 = vpow2.f32 %v1825_v24 }
 0x170   :  { %1915 = vst.msk [vmem:[%s4411_s6 + $0xe0] sm:$0xff] %vm956_vm1, %v2686_v25  ;;  %v1326_v28 = vpop.f32.mrf.mxu3  ;;  %v2532_v25 = vld [vmem:[%s4407_s0 + $0xc8] sm:$0xff] }
 0x171   :  { %2689 = vpow2.f32 %v1703_v26  ;;  %v879_v29 = vpop.f32.mrf.mxu2  ;;  %v1327_v32 = vadd.f32 %v3515_v49, %v1326_v28 }
 0x172   :  { %v1174_v30 = vpop.f32.mrf.mxu1  ;;  %v880_v34 = vadd.f32 %v3521_v51, %v879_v29 }
 0x173   :  { %v727_v31 = vpop.f32.mrf.mxu0  ;;  %v1175_v35 = vadd.f32 %v3515_v49, %v1174_v30  ;;  %v2477_v37 = vclamps-f32 %v1327_v32, 20.0 }
 0x174   :  { %v728_v36 = vadd.f32 %v3521_v51, %v727_v31  ;;  %1048 = vst.msk [vmem:[%s4410_s5 + $0x2d8] sm:$0xff] %vm956_vm1, %v880_v34  ;;  %v2563_v31 = vld [vmem:[%s4407_s0 + $0x1c0] sm:$0xff] }
 0x175   :  { %v2416_v38 = vclamps-f32 %v1175_v35, 20.0  ;;  %2348 = vmatmul.msk.bf16.gmra.mxu1 %vm459_vm0, %v2530_v27  ;;  %v2688_v39 = vpop.eup %2687  ;;  %v1827_v40 = vmul.f32 1.442695, %v2477_v37  ;;  %2379 = vmatmul.msk.bf16.gmra.mxu3 %vm459_vm0, %v2561_v33 }
 0x176   :  { %987 = vst.msk [vmem:[%s4410_s5 + $0xf0] sm:$0xff] %vm956_vm1, %v728_v36  ;;  %2283 = vmatmul.msk.bf16.gmra.mxu0 %vm459_vm0, %v2530_v27  ;;  %2314 = vmatmul.msk.bf16.gmra.mxu2 %vm459_vm0, %v2561_v33 }
 0x177   :  { %v2690_v41 = vpop.eup %2689  ;;  %v1705_v42 = vmul.f32 1.442695, %v2416_v38  ;;  %1977 = vst.msk [vmem:[%s4411_s6 + $0x2d0] sm:$0xff] %vm956_vm1, %v2688_v39  ;;  %2691 = vpow2.f32 %v1827_v40 }
 0x178   :  { %1916 = vst.msk [vmem:[%s4411_s6 + $0xe8] sm:$0xff] %vm956_vm1, %v2690_v41  ;;  %v1329_v43 = vpop.f32.mrf.mxu3 }
 0x179   :  { %2693 = vpow2.f32 %v1705_v42  ;;  %v882_v18 = vpop.f32.mrf.mxu2  ;;  %v1330_v45 = vadd.f32 %v3515_v49, %v1329_v43 }
 0x17a   :  { %v1176_v19 = vpop.f32.mrf.mxu1  ;;  %v883_v46 = vadd.f32 %v3521_v51, %v882_v18 }
 0x17b   :  { %v729_v44 = vpop.f32.mrf.mxu0  ;;  %v1177_v47 = vadd.f32 %v3515_v49, %v1176_v19  ;;  %v2478_v50 = vclamps-f32 %v1330_v45, 20.0 }
 0x17c   :  { %v730_v48 = vadd.f32 %v3521_v51, %v729_v44  ;;  %1049 = vst.msk [vmem:[%s4410_s5 + $0x2e0] sm:$0xff] %vm956_vm1, %v883_v46 }
 0x17d   :  { %v2417_v52 = vclamps-f32 %v1177_v47, 20.0  ;;  %v2692_v53 = vpop.eup %2691  ;;  %v1829_v54 = vmul.f32 1.442695, %v2478_v50 }
 0x17e   :  { %988 = vst.msk [vmem:[%s4410_s5 + $0xf8] sm:$0xff] %vm956_vm1, %v730_v48 }
 0x17f   :  { %v2694_v55 = vpop.eup %2693  ;;  %v1707_v56 = vmul.f32 1.442695, %v2417_v52  ;;  %1978 = vst.msk [vmem:[%s4411_s6 + $0x2d8] sm:$0xff] %vm956_vm1, %v2692_v53  ;;  %2695 = vpow2.f32 %v1829_v54 }
 0x180   :  { %1917 = vst.msk [vmem:[%s4411_s6 + $0xf0] sm:$0xff] %vm956_vm1, %v2694_v55  ;;  %v1331_v58 = vpop.f32.mrf.mxu3  ;;  %v2533_v55 = vld [vmem:[%s4407_s0 + $0xd0] sm:$0xff] }
 0x181   :  { %2697 = vpow2.f32 %v1707_v56  ;;  %v884_v59 = vpop.f32.mrf.mxu2  ;;  %v1332_v62 = vadd.f32 %v3515_v49, %v1331_v58 }
 0x182   :  { %v1179_v60 = vpop.f32.mrf.mxu1  ;;  %v885_v0 = vadd.f32 %v3521_v51, %v884_v59 }
 0x183   :  { %v732_v61 = vpop.f32.mrf.mxu0  ;;  %v1180_v1 = vadd.f32 %v3515_v49, %v1179_v60  ;;  %v2479_v3 = vclamps-f32 %v1332_v62, 20.0 }
 0x184   :  { %v733_v2 = vadd.f32 %v3521_v51, %v732_v61  ;;  %1050 = vst.msk [vmem:[%s4410_s5 + $0x2e8] sm:$0xff] %vm956_vm1, %v885_v0  ;;  %v2564_v61 = vld [vmem:[%s4407_s0 + $0x1c8] sm:$0xff] }
 0x185   :  { %v2418_v4 = vclamps-f32 %v1180_v1, 20.0  ;;  %2349 = vmatmul.msk.bf16.gmra.mxu1 %vm459_vm0, %v2531_v57  ;;  %v2696_v5 = vpop.eup %2695  ;;  %v1831_v6 = vmul.f32 1.442695, %v2479_v3  ;;  %2380 = vmatmul.msk.bf16.gmra.mxu3 %vm459_vm0, %v2562_v63 }
 0x186   :  { %989 = vst.msk [vmem:[%s4410_s5 + $0x100] sm:$0xff] %vm956_vm1, %v733_v2  ;;  %2284 = vmatmul.msk.bf16.gmra.mxu0 %vm459_vm0, %v2531_v57  ;;  %2315 = vmatmul.msk.bf16.gmra.mxu2 %vm459_vm0, %v2562_v63 }
 0x187   :  { %v2698_v7 = vpop.eup %2697  ;;  %v1709_v8 = vmul.f32 1.442695, %v2418_v4  ;;  %1979 = vst.msk [vmem:[%s4411_s6 + $0x2e0] sm:$0xff] %vm956_vm1, %v2696_v5  ;;  %2699 = vpow2.f32 %v1831_v6 }
 0x188   :  { %1918 = vst.msk [vmem:[%s4411_s6 + $0xf8] sm:$0xff] %vm956_vm1, %v2698_v7  ;;  %v1334_v9 = vpop.f32.mrf.mxu3 }
 0x189   :  { %2701 = vpow2.f32 %v1709_v8  ;;  %v887_v10 = vpop.f32.mrf.mxu2  ;;  %v1335_v13 = vadd.f32 %v3515_v49, %v1334_v9 }
 0x18a   :  { %v1181_v11 = vpop.f32.mrf.mxu1  ;;  %v888_v14 = vadd.f32 %v3521_v51, %v887_v10 }
 0x18b   :  { %v734_v12 = vpop.f32.mrf.mxu0  ;;  %v1182_v15 = vadd.f32 %v3515_v49, %v1181_v11  ;;  %v2480_v17 = vclamps-f32 %v1335_v13, 20.0 }
 0x18c   :  { %v735_v16 = vadd.f32 %v3521_v51, %v734_v12  ;;  %1051 = vst.msk [vmem:[%s4410_s5 + $0x2f0] sm:$0xff] %vm956_vm1, %v888_v14 }
 0x18d   :  { %v2419_v20 = vclamps-f32 %v1182_v15, 20.0  ;;  %v2700_v21 = vpop.eup %2699  ;;  %v1833_v22 = vmul.f32 1.442695, %v2480_v17 }
 0x18e   :  { %990 = vst.msk [vmem:[%s4410_s5 + $0x108] sm:$0xff] %vm956_vm1, %v735_v16 }
 0x18f   :  { %v2702_v23 = vpop.eup %2701  ;;  %v1711_v24 = vmul.f32 1.442695, %v2419_v20  ;;  %1980 = vst.msk [vmem:[%s4411_s6 + $0x2e8] sm:$0xff] %vm956_vm1, %v2700_v21  ;;  %2703 = vpow2.f32 %v1833_v22 }
 0x190   :  { %1919 = vst.msk [vmem:[%s4411_s6 + $0x100] sm:$0xff] %vm956_vm1, %v2702_v23  ;;  %v1336_v26 = vpop.f32.mrf.mxu3  ;;  %v2534_v23 = vld [vmem:[%s4407_s0 + $0xd8] sm:$0xff] }
 0x191   :  { %2705 = vpow2.f32 %v1711_v24  ;;  %v889_v27 = vpop.f32.mrf.mxu2  ;;  %v1337_v30 = vadd.f32 %v3515_v49, %v1336_v26 }
 0x192   :  { %v1184_v28 = vpop.f32.mrf.mxu1  ;;  %v890_v32 = vadd.f32 %v3521_v51, %v889_v27 }
 0x193   :  { %v737_v29 = vpop.f32.mrf.mxu0  ;;  %v1185_v33 = vadd.f32 %v3515_v49, %v1184_v28  ;;  %v2481_v35 = vclamps-f32 %v1337_v30, 20.0 }
 0x194   :  { %v738_v34 = vadd.f32 %v3521_v51, %v737_v29  ;;  %1052 = vst.msk [vmem:[%s4410_s5 + $0x2f8] sm:$0xff] %vm956_vm1, %v890_v32  ;;  %v2565_v29 = vld [vmem:[%s4407_s0 + $0x1d0] sm:$0xff] }
 0x195   :  { %v2420_v36 = vclamps-f32 %v1185_v33, 20.0  ;;  %2350 = vmatmul.msk.bf16.gmra.mxu1 %vm459_vm0, %v2532_v25  ;;  %v2704_v37 = vpop.eup %2703  ;;  %v1835_v38 = vmul.f32 1.442695, %v2481_v35  ;;  %2381 = vmatmul.msk.bf16.gmra.mxu3 %vm459_vm0, %v2563_v31 }
 0x196   :  { %991 = vst.msk [vmem:[%s4410_s5 + $0x110] sm:$0xff] %vm956_vm1, %v738_v34  ;;  %2285 = vmatmul.msk.bf16.gmra.mxu0 %vm459_vm0, %v2532_v25  ;;  %2316 = vmatmul.msk.bf16.gmra.mxu2 %vm459_vm0, %v2563_v31 }
 0x197   :  { %v2706_v39 = vpop.eup %2705  ;;  %v1713_v40 = vmul.f32 1.442695, %v2420_v36  ;;  %1981 = vst.msk [vmem:[%s4411_s6 + $0x2f0] sm:$0xff] %vm956_vm1, %v2704_v37  ;;  %2707 = vpow2.f32 %v1835_v38 }
 0x198   :  { %1920 = vst.msk [vmem:[%s4411_s6 + $0x108] sm:$0xff] %vm956_vm1, %v2706_v39  ;;  %v1339_v41 = vpop.f32.mrf.mxu3 }
 0x199   :  { %2709 = vpow2.f32 %v1713_v40  ;;  %v892_v42 = vpop.f32.mrf.mxu2  ;;  %v1340_v19 = vadd.f32 %v3515_v49, %v1339_v41 }
 0x19a   :  { %v1186_v43 = vpop.f32.mrf.mxu1  ;;  %v893_v44 = vadd.f32 %v3521_v51, %v892_v42 }
 0x19b   :  { %v739_v18 = vpop.f32.mrf.mxu0  ;;  %v1187_v45 = vadd.f32 %v3515_v49, %v1186_v43  ;;  %v2482_v47 = vclamps-f32 %v1340_v19, 20.0 }
 0x19c   :  { %v740_v46 = vadd.f32 %v3521_v51, %v739_v18  ;;  %1053 = vst.msk [vmem:[%s4410_s5 + $0x300] sm:$0xff] %vm956_vm1, %v893_v44 }
 0x19d   :  { %v2421_v48 = vclamps-f32 %v1187_v45, 20.0  ;;  %v2708_v50 = vpop.eup %2707  ;;  %v1837_v52 = vmul.f32 1.442695, %v2482_v47 }
 0x19e   :  { %992 = vst.msk [vmem:[%s4410_s5 + $0x118] sm:$0xff] %vm956_vm1, %v740_v46 }
 0x19f   :  { %v2710_v53 = vpop.eup %2709  ;;  %v1715_v54 = vmul.f32 1.442695, %v2421_v48  ;;  %1982 = vst.msk [vmem:[%s4411_s6 + $0x2f8] sm:$0xff] %vm956_vm1, %v2708_v50  ;;  %2711 = vpow2.f32 %v1837_v52 }
 0x1a0   :  { %1921 = vst.msk [vmem:[%s4411_s6 + $0x110] sm:$0xff] %vm956_vm1, %v2710_v53  ;;  %v1341_v56 = vpop.f32.mrf.mxu3  ;;  %v2535_v53 = vld [vmem:[%s4407_s0 + $0xe0] sm:$0xff] }
 0x1a1   :  { %2713 = vpow2.f32 %v1715_v54  ;;  %v894_v57 = vpop.f32.mrf.mxu2  ;;  %v1342_v60 = vadd.f32 %v3515_v49, %v1341_v56 }
 0x1a2   :  { %v1189_v58 = vpop.f32.mrf.mxu1  ;;  %v895_v62 = vadd.f32 %v3521_v51, %v894_v57 }
 0x1a3   :  { %v742_v59 = vpop.f32.mrf.mxu0  ;;  %v1190_v63 = vadd.f32 %v3515_v49, %v1189_v58  ;;  %v2483_v1 = vclamps-f32 %v1342_v60, 20.0 }
 0x1a4   :  { %v743_v0 = vadd.f32 %v3521_v51, %v742_v59  ;;  %1054 = vst.msk [vmem:[%s4410_s5 + $0x308] sm:$0xff] %vm956_vm1, %v895_v62  ;;  %v2566_v59 = vld [vmem:[%s4407_s0 + $0x1d8] sm:$0xff] }
 0x1a5   :  { %v2422_v2 = vclamps-f32 %v1190_v63, 20.0  ;;  %2351 = vmatmul.msk.bf16.gmra.mxu1 %vm459_vm0, %v2533_v55  ;;  %v2712_v3 = vpop.eup %2711  ;;  %v1839_v4 = vmul.f32 1.442695, %v2483_v1  ;;  %2382 = vmatmul.msk.bf16.gmra.mxu3 %vm459_vm0, %v2564_v61 }
 0x1a6   :  { %993 = vst.msk [vmem:[%s4410_s5 + $0x120] sm:$0xff] %vm956_vm1, %v743_v0  ;;  %2286 = vmatmul.msk.bf16.gmra.mxu0 %vm459_vm0, %v2533_v55  ;;  %2317 = vmatmul.msk.bf16.gmra.mxu2 %vm459_vm0, %v2564_v61 }
 0x1a7   :  { %v2714_v5 = vpop.eup %2713  ;;  %v1717_v6 = vmul.f32 1.442695, %v2422_v2  ;;  %1983 = vst.msk [vmem:[%s4411_s6 + $0x300] sm:$0xff] %vm956_vm1, %v2712_v3  ;;  %2715 = vpow2.f32 %v1839_v4 }
 0x1a8   :  { %1922 = vst.msk [vmem:[%s4411_s6 + $0x118] sm:$0xff] %vm956_vm1, %v2714_v5  ;;  %v1344_v7 = vpop.f32.mrf.mxu3 }
 0x1a9   :  { %2717 = vpow2.f32 %v1717_v6  ;;  %v897_v8 = vpop.f32.mrf.mxu2  ;;  %v1345_v11 = vadd.f32 %v3515_v49, %v1344_v7 }
 0x1aa   :  { %v1191_v9 = vpop.f32.mrf.mxu1  ;;  %v898_v12 = vadd.f32 %v3521_v51, %v897_v8 }
 0x1ab   :  { %v744_v10 = vpop.f32.mrf.mxu0  ;;  %v1192_v13 = vadd.f32 %v3515_v49, %v1191_v9  ;;  %v2484_v15 = vclamps-f32 %v1345_v11, 20.0 }
 0x1ac   :  { %v745_v14 = vadd.f32 %v3521_v51, %v744_v10  ;;  %1055 = vst.msk [vmem:[%s4410_s5 + $0x310] sm:$0xff] %vm956_vm1, %v898_v12 }
 0x1ad   :  { %v2423_v16 = vclamps-f32 %v1192_v13, 20.0  ;;  %v2716_v17 = vpop.eup %2715  ;;  %v1841_v20 = vmul.f32 1.442695, %v2484_v15  ;;  %v143_v13 = vld [vmem:[%s4407_s0 + $0x1e0] sm:$0xf] }
 0x1ae   :  { %994 = vst.msk [vmem:[%s4410_s5 + $0x128] sm:$0xff] %vm956_vm1, %v745_v14 }
 0x1af   :  { %v2718_v21 = vpop.eup %2717  ;;  %v1719_v22 = vmul.f32 1.442695, %v2423_v16  ;;  %1984 = vst.msk [vmem:[%s4411_s6 + $0x308] sm:$0xff] %vm956_vm1, %v2716_v17  ;;  %2719 = vpow2.f32 %v1841_v20  ;;  %v391_v20 = vunpack.c.l.b16 %v143_v13 }
 0x1b0   :  { %1923 = vst.msk [vmem:[%s4411_s6 + $0x120] sm:$0xff] %vm956_vm1, %v2718_v21  ;;  %v1346_v24 = vpop.f32.mrf.mxu3 }
 0x1b1   :  { %2721 = vpow2.f32 %v1719_v22  ;;  %v899_v25 = vpop.f32.mrf.mxu2  ;;  %v1347_v28 = vadd.f32 %v3515_v49, %v1346_v24 }
 0x1b2   :  { %v1194_v26 = vpop.f32.mrf.mxu1  ;;  %v900_v30 = vadd.f32 %v3521_v51, %v899_v25 }
 0x1b3   :  { %v747_v27 = vpop.f32.mrf.mxu0  ;;  %v1195_v31 = vadd.f32 %v3515_v49, %v1194_v26  ;;  %v2485_v33 = vclamps-f32 %v1347_v28, 20.0 }
 0x1b4   :  { %v748_v32 = vadd.f32 %v3521_v51, %v747_v27  ;;  %1056 = vst.msk [vmem:[%s4410_s5 + $0x318] sm:$0xff] %vm956_vm1, %v900_v30 }
 0x1b5   :  { %v2424_v34 = vclamps-f32 %v1195_v31, 20.0  ;;  %2352 = vmatmul.msk.bf16.gmra.mxu1 %vm459_vm0, %v2534_v23  ;;  %v2720_v35 = vpop.eup %2719  ;;  %v1843_v36 = vmul.f32 1.442695, %v2485_v33  ;;  %2383 = vmatmul.msk.bf16.gmra.mxu3 %vm459_vm0, %v2565_v29 }
 0x1b6   :  { %995 = vst.msk [vmem:[%s4410_s5 + $0x130] sm:$0xff] %vm956_vm1, %v748_v32  ;;  %2287 = vmatmul.msk.bf16.gmra.mxu0 %vm459_vm0, %v2534_v23  ;;  %2318 = vmatmul.msk.bf16.gmra.mxu2 %vm459_vm0, %v2565_v29  ;;  %v2536_v23 = vld [vmem:[%s4407_s0 + $0xe8] sm:$0xff]  ;;  %v452_v29 = vpack.c.b16 %v391_v20, %v391_v20 }
 0x1b7   :  { %v2722_v37 = vpop.eup %2721  ;;  %v1721_v38 = vmul.f32 1.442695, %v2424_v34  ;;  %1985 = vst.msk [vmem:[%s4411_s6 + $0x310] sm:$0xff] %vm956_vm1, %v2720_v35  ;;  %2723 = vpow2.f32 %v1843_v36 }
 0x1b8   :  { %1924 = vst.msk [vmem:[%s4411_s6 + $0x128] sm:$0xff] %vm956_vm1, %v2722_v37  ;;  %v1349_v39 = vpop.f32.mrf.mxu3 }
 0x1b9   :  { %2725 = vpow2.f32 %v1721_v38  ;;  %v902_v40 = vpop.f32.mrf.mxu2  ;;  %v1350_v43 = vadd.f32 %v3515_v49, %v1349_v39 }
 0x1ba   :  { %v1196_v41 = vpop.f32.mrf.mxu1  ;;  %v903_v18 = vadd.f32 %v3521_v51, %v902_v40 }
 0x1bb   :  { %v749_v42 = vpop.f32.mrf.mxu0  ;;  %v1197_v19 = vadd.f32 %v3515_v49, %v1196_v41  ;;  %v2486_v45 = vclamps-f32 %v1350_v43, 20.0 }
 0x1bc   :  { %v750_v44 = vadd.f32 %v3521_v51, %v749_v42  ;;  %1057 = vst.msk [vmem:[%s4410_s5 + $0x320] sm:$0xff] %vm956_vm1, %v903_v18 }
 0x1bd   :  { %v2425_v46 = vclamps-f32 %v1197_v19, 20.0  ;;  %v2724_v47 = vpop.eup %2723  ;;  %v1845_v48 = vmul.f32 1.442695, %v2486_v45 }
 0x1be   :  { %996 = vst.msk [vmem:[%s4410_s5 + $0x138] sm:$0xff] %vm956_vm1, %v750_v44 }
 0x1bf   :  { %v2726_v50 = vpop.eup %2725  ;;  %v1723_v52 = vmul.f32 1.442695, %v2425_v46  ;;  %1986 = vst.msk [vmem:[%s4411_s6 + $0x318] sm:$0xff] %vm956_vm1, %v2724_v47  ;;  %2727 = vpow2.f32 %v1845_v48 }
 0x1c0   :  { %1925 = vst.msk [vmem:[%s4411_s6 + $0x130] sm:$0xff] %vm956_vm1, %v2726_v50  ;;  %v1351_v54 = vpop.f32.mrf.mxu3 }
 0x1c1   :  { %2729 = vpow2.f32 %v1723_v52  ;;  %v904_v55 = vpop.f32.mrf.mxu2  ;;  %v1352_v58 = vadd.f32 %v3515_v49, %v1351_v54 }
 0x1c2   :  { %v1199_v56 = vpop.f32.mrf.mxu1  ;;  %v905_v60 = vadd.f32 %v3521_v51, %v904_v55 }
 0x1c3   :  { %v752_v57 = vpop.f32.mrf.mxu0  ;;  %v1200_v61 = vadd.f32 %v3515_v49, %v1199_v56  ;;  %v2487_v63 = vclamps-f32 %v1352_v58, 20.0 }
 0x1c4   :  { %v753_v62 = vadd.f32 %v3521_v51, %v752_v57  ;;  %1058 = vst.msk [vmem:[%s4410_s5 + $0x328] sm:$0xff] %vm956_vm1, %v905_v60 }
 0x1c5   :  { %v2426_v0 = vclamps-f32 %v1200_v61, 20.0  ;;  %2353 = vmatmul.msk.bf16.gmra.mxu1 %vm459_vm0, %v2535_v53  ;;  %v2728_v1 = vpop.eup %2727  ;;  %v1847_v2 = vmul.f32 1.442695, %v2487_v63  ;;  %2384 = vmatmul.msk.bf16.gmra.mxu3 %vm459_vm0, %v2566_v59 }
 0x1c6   :  { %997 = vst.msk [vmem:[%s4410_s5 + $0x140] sm:$0xff] %vm956_vm1, %v753_v62  ;;  %2288 = vmatmul.msk.bf16.gmra.mxu0 %vm459_vm0, %v2535_v53  ;;  %2319 = vmatmul.msk.bf16.gmra.mxu2 %vm459_vm0, %v2566_v59  ;;  %v2537_v53 = vld [vmem:[%s4407_s0 + $0xf0] sm:$0xff] }
 0x1c7   :  { %v2730_v3 = vpop.eup %2729  ;;  %v1725_v4 = vmul.f32 1.442695, %v2426_v0  ;;  %1987 = vst.msk [vmem:[%s4411_s6 + $0x320] sm:$0xff] %vm956_vm1, %v2728_v1  ;;  %2731 = vpow2.f32 %v1847_v2 }
 0x1c8   :  { %1926 = vst.msk [vmem:[%s4411_s6 + $0x138] sm:$0xff] %vm956_vm1, %v2730_v3  ;;  %v1354_v5 = vpop.f32.mrf.mxu3 }
 0x1c9   :  { %2733 = vpow2.f32 %v1725_v4  ;;  %v907_v6 = vpop.f32.mrf.mxu2  ;;  %v1355_v9 = vadd.f32 %v3515_v49, %v1354_v5 }
 0x1ca   :  { %v1201_v7 = vpop.f32.mrf.mxu1  ;;  %v908_v10 = vadd.f32 %v3521_v51, %v907_v6 }
 0x1cb   :  { %v754_v8 = vpop.f32.mrf.mxu0  ;;  %v1202_v11 = vadd.f32 %v3515_v49, %v1201_v7  ;;  %v2488_v14 = vclamps-f32 %v1355_v9, 20.0 }
 0x1cc   :  { %v755_v12 = vadd.f32 %v3521_v51, %v754_v8  ;;  %1059 = vst.msk [vmem:[%s4410_s5 + $0x330] sm:$0xff] %vm956_vm1, %v908_v10 }
 0x1cd   :  { %v2427_v15 = vclamps-f32 %v1202_v11, 20.0  ;;  %v2732_v16 = vpop.eup %2731  ;;  %v1849_v17 = vmul.f32 1.442695, %v2488_v14 }
 0x1ce   :  { %998 = vst.msk [vmem:[%s4410_s5 + $0x148] sm:$0xff] %vm956_vm1, %v755_v12 }
 0x1cf   :  { %v2734_v21 = vpop.eup %2733  ;;  %v1727_v22 = vmul.f32 1.442695, %v2427_v15  ;;  %1988 = vst.msk [vmem:[%s4411_s6 + $0x328] sm:$0xff] %vm956_vm1, %v2732_v16  ;;  %2735 = vpow2.f32 %v1849_v17 }
 0x1d0   :  { %1927 = vst.msk [vmem:[%s4411_s6 + $0x140] sm:$0xff] %vm956_vm1, %v2734_v21  ;;  %v1356_v24 = vpop.f32.mrf.mxu3 }
 0x1d1   :  { %2737 = vpow2.f32 %v1727_v22  ;;  %v909_v25 = vpop.f32.mrf.mxu2  ;;  %v1357_v28 = vadd.f32 %v3515_v49, %v1356_v24  ;;  %v4090_v22 = vld [vmem:[%s4408_s4] ss:$0 sm:$0xff] }
 0x1d2   :  { %v1204_v26 = vpop.f32.mrf.mxu1  ;;  %v910_v30 = vadd.f32 %v3521_v51, %v909_v25  ;;  %v4096_v24 = vld [vmem:[%s4409_s2] ss:$0 sm:$0xff] }
 0x1d3   :  { %v757_v27 = vpop.f32.mrf.mxu0  ;;  %v1205_v31 = vadd.f32 %v3515_v49, %v1204_v26  ;;  %v2489_v33 = vclamps-f32 %v1357_v28, 20.0 }
 0x1d4   :  { %v758_v32 = vadd.f32 %v3521_v51, %v757_v27  ;;  %1060 = vst.msk [vmem:[%s4410_s5 + $0x338] sm:$0xff] %vm956_vm1, %v910_v30 }
 0x1d5   :  { %v2428_v34 = vclamps-f32 %v1205_v31, 20.0  ;;  %2354 = vmatmul.msk.bf16.gmra.mxu1 %vm459_vm0, %v2536_v23  ;;  %v2736_v35 = vpop.eup %2735  ;;  %v1851_v36 = vmul.f32 1.442695, %v2489_v33  ;;  %2385 = vmatmul.msk.bf16.gmra.mxu3 %vm459_vm0, %v452_v29 }
 0x1d6   :  { %999 = vst.msk [vmem:[%s4410_s5 + $0x150] sm:$0xff] %vm956_vm1, %v758_v32  ;;  %2289 = vmatmul.msk.bf16.gmra.mxu0 %vm459_vm0, %v2536_v23  ;;  %2320 = vmatmul.msk.bf16.gmra.mxu2 %vm459_vm0, %v452_v29 }
 0x1d7   :  { %v2738_v37 = vpop.eup %2737  ;;  %v1729_v38 = vmul.f32 1.442695, %v2428_v34  ;;  %1989 = vst.msk [vmem:[%s4411_s6 + $0x330] sm:$0xff] %vm956_vm1, %v2736_v35  ;;  %2739 = vpow2.f32 %v1851_v36 }
 0x1d8   :  { %1928 = vst.msk [vmem:[%s4411_s6 + $0x148] sm:$0xff] %vm956_vm1, %v2738_v37  ;;  %v1359_v39 = vpop.f32.mrf.mxu3 }
 0x1d9   :  { %2741 = vpow2.f32 %v1729_v38  ;;  %v912_v40 = vpop.f32.mrf.mxu2  ;;  %v1360_v43 = vadd.f32 %v3515_v49, %v1359_v39 }
 0x1da   :  { %v1206_v41 = vpop.f32.mrf.mxu1  ;;  %v913_v18 = vadd.f32 %v3521_v51, %v912_v40 }
 0x1db   :  { %v759_v42 = vpop.f32.mrf.mxu0  ;;  %v1207_v19 = vadd.f32 %v3515_v49, %v1206_v41  ;;  %v2490_v45 = vclamps-f32 %v1360_v43, 20.0 }
 0x1dc   :  { %v760_v44 = vadd.f32 %v3521_v51, %v759_v42  ;;  %1061 = vst.msk [vmem:[%s4410_s5 + $0x340] sm:$0xff] %vm956_vm1, %v913_v18 }
 0x1dd   :  { %v2429_v46 = vclamps-f32 %v1207_v19, 20.0  ;;  %v2740_v47 = vpop.eup %2739  ;;  %v1853_v48 = vmul.f32 1.442695, %v2490_v45 }
 0x1de   :  { %1000 = vst.msk [vmem:[%s4410_s5 + $0x158] sm:$0xff] %vm956_vm1, %v760_v44 }
 0x1df   :  { %v2742_v50 = vpop.eup %2741  ;;  %v1731_v52 = vmul.f32 1.442695, %v2429_v46  ;;  %1990 = vst.msk [vmem:[%s4411_s6 + $0x338] sm:$0xff] %vm956_vm1, %v2740_v47  ;;  %2743 = vpow2.f32 %v1853_v48 }
 0x1e0   :  { %1929 = vst.msk [vmem:[%s4411_s6 + $0x150] sm:$0xff] %vm956_vm1, %v2742_v50  ;;  %v1361_v54 = vpop.f32.mrf.mxu3 }
 0x1e1   :  { %2745 = vpow2.f32 %v1731_v52  ;;  %v914_v55 = vpop.f32.mrf.mxu2  ;;  %v1362_v58 = vadd.f32 %v3515_v49, %v1361_v54 }
 0x1e2   :  { %v1209_v56 = vpop.f32.mrf.mxu1  ;;  %v915_v59 = vadd.f32 %v3521_v51, %v914_v55 }
 0x1e3   :  { %v762_v57 = vpop.f32.mrf.mxu0  ;;  %v1210_v60 = vadd.f32 %v3515_v49, %v1209_v56  ;;  %v2491_v62 = vclamps-f32 %v1362_v58, 20.0 }
 0x1e4   :  { %v763_v61 = vadd.f32 %v3521_v51, %v762_v57  ;;  %1062 = vst.msk [vmem:[%s4410_s5 + $0x348] sm:$0xff] %vm956_vm1, %v915_v59 }
 0x1e5   :  { %v2430_v63 = vclamps-f32 %v1210_v60, 20.0  ;;  %2355 = vmatmul.msk.bf16.gmra.mxu1 %vm459_vm0, %v2537_v53  ;;  %v2744_v0 = vpop.eup %2743  ;;  %v1855_v1 = vmul.f32 1.442695, %v2491_v62 }
 0x1e6   :  { %1001 = vst.msk [vmem:[%s4410_s5 + $0x160] sm:$0xff] %vm956_vm1, %v763_v61  ;;  %2290 = vmatmul.msk.bf16.gmra.mxu0 %vm459_vm0, %v2537_v53 }
 0x1e7   :  { %v2746_v2 = vpop.eup %2745  ;;  %v1733_v3 = vmul.f32 1.442695, %v2430_v63  ;;  %1991 = vst.msk [vmem:[%s4411_s6 + $0x340] sm:$0xff] %vm956_vm1, %v2744_v0  ;;  %2747 = vpow2.f32 %v1855_v1 }
 0x1e8   :  { %1930 = vst.msk [vmem:[%s4411_s6 + $0x158] sm:$0xff] %vm956_vm1, %v2746_v2  ;;  %v1364_v4 = vpop.f32.mrf.mxu3 }
 0x1e9   :  { %2749 = vpow2.f32 %v1733_v3  ;;  %v917_v5 = vpop.f32.mrf.mxu2  ;;  %v1365_v8 = vadd.f32 %v3515_v49, %v1364_v4 }
 0x1ea   :  { %v1211_v6 = vpop.f32.mrf.mxu1  ;;  %v918_v9 = vadd.f32 %v3521_v51, %v917_v5 }
 0x1eb   :  { %v764_v7 = vpop.f32.mrf.mxu0  ;;  %v1212_v10 = vadd.f32 %v3515_v49, %v1211_v6  ;;  %v2492_v12 = vclamps-f32 %v1365_v8, 20.0 }
 0x1ec   :  { %v765_v11 = vadd.f32 %v3521_v51, %v764_v7  ;;  %1063 = vst.msk [vmem:[%s4410_s5 + $0x350] sm:$0xff] %vm956_vm1, %v918_v9 }
 0x1ed   :  { %v2431_v13 = vclamps-f32 %v1212_v10, 20.0  ;;  %v2748_v14 = vpop.eup %2747  ;;  %v1857_v15 = vmul.f32 1.442695, %v2492_v12 }
 0x1ee   :  { %1002 = vst.msk [vmem:[%s4410_s5 + $0x168] sm:$0xff] %vm956_vm1, %v765_v11 }
 0x1ef   :  { %v2750_v16 = vpop.eup %2749  ;;  %v1735_v17 = vmul.f32 1.442695, %v2431_v13  ;;  %1992 = vst.msk [vmem:[%s4411_s6 + $0x348] sm:$0xff] %vm956_vm1, %v2748_v14  ;;  %2751 = vpow2.f32 %v1857_v15 }
 0x1f0   :  { %1931 = vst.msk [vmem:[%s4411_s6 + $0x160] sm:$0xff] %vm956_vm1, %v2750_v16  ;;  %v1366_v49 = vpop.f32.mrf.mxu3 }
 0x1f1   :  { %2753 = vpow2.f32 %v1735_v17  ;;  %v919_v51 = vpop.f32.mrf.mxu2  ;;  %v1367_v23 = vadd.f32 %v4090_v22, %v1366_v49 }
 0x1f2   :  { %v1214_v20 = vpop.f32.mrf.mxu1  ;;  %v920_v25 = vadd.f32 %v4096_v24, %v919_v51 }
 0x1f3   :  { %v767_v21 = vpop.f32.mrf.mxu0  ;;  %v1215_v26 = vadd.f32 %v4090_v22, %v1214_v20  ;;  %v2493_v28 = vclamps-f32 %v1367_v23, 20.0 }
 0x1f4   :  { %v768_v27 = vadd.f32 %v4096_v24, %v767_v21  ;;  %1064 = vst.msk [vmem:[%s4410_s5 + $0x358] sm:$0xff] %vm956_vm1, %v920_v25 }
 0x1f5   :  { %v2432_v29 = vclamps-f32 %v1215_v26, 20.0  ;;  %v2752_v30 = vpop.eup %2751  ;;  %v1859_v31 = vmul.f32 1.442695, %v2493_v28 }
 0x1f6   :  { %1003 = vst.msk [vmem:[%s4410_s5 + $0x170] sm:$0xff] %vm956_vm1, %v768_v27 }
 0x1f7   :  { %v2754_v32 = vpop.eup %2753  ;;  %v1737_v33 = vmul.f32 1.442695, %v2432_v29  ;;  %1993 = vst.msk [vmem:[%s4411_s6 + $0x350] sm:$0xff] %vm956_vm1, %v2752_v30  ;;  %2755 = vpow2.f32 %v1859_v31 }
 0x1f8   :  { %1932 = vst.msk [vmem:[%s4411_s6 + $0x168] sm:$0xff] %vm956_vm1, %v2754_v32  ;;  %v1369_v34 = vpop.f32.mrf.mxu3 }
 0x1f9   :  { %2757 = vpow2.f32 %v1737_v33  ;;  %v922_v35 = vpop.f32.mrf.mxu2  ;;  %v1370_v38 = vadd.f32 %v4090_v22, %v1369_v34 }
 0x1fa   :  { %v1216_v36 = vpop.f32.mrf.mxu1  ;;  %v923_v39 = vadd.f32 %v4096_v24, %v922_v35 }
 0x1fb   :  { %v769_v37 = vpop.f32.mrf.mxu0  ;;  %v1217_v40 = vadd.f32 %v4090_v22, %v1216_v36  ;;  %v2494_v42 = vclamps-f32 %v1370_v38, 20.0 }
 0x1fc   :  { %v770_v41 = vadd.f32 %v4096_v24, %v769_v37  ;;  %1065 = vst.msk [vmem:[%s4410_s5 + $0x360] sm:$0xff] %vm956_vm1, %v923_v39 }
 0x1fd   :  { %v2433_v43 = vclamps-f32 %v1217_v40, 20.0  ;;  %v2756_v18 = vpop.eup %2755  ;;  %v1861_v19 = vmul.f32 1.442695, %v2494_v42 }
 0x1fe   :  { %1004 = vst.msk [vmem:[%s4410_s5 + $0x178] sm:$0xff] %vm956_vm1, %v770_v41 }
 0x1ff   :  { %v2758_v44 = vpop.eup %2757  ;;  %v1739_v45 = vmul.f32 1.442695, %v2433_v43  ;;  %1994 = vst.msk [vmem:[%s4411_s6 + $0x358] sm:$0xff] %vm956_vm1, %v2756_v18  ;;  %2759 = vpow2.f32 %v1861_v19 }
 0x200   :  { %1933 = vst.msk [vmem:[%s4411_s6 + $0x170] sm:$0xff] %vm956_vm1, %v2758_v44  ;;  %v1371_v46 = vpop.f32.mrf.mxu3 }
 0x201   :  { %2761 = vpow2.f32 %v1739_v45  ;;  %v924_v47 = vpop.f32.mrf.mxu2  ;;  %v1372_v52 = vadd.f32 %v4090_v22, %v1371_v46 }
 0x202   :  { %v1219_v48 = vpop.f32.mrf.mxu1  ;;  %v925_v53 = vadd.f32 %v4096_v24, %v924_v47 }
 0x203   :  { %v772_v50 = vpop.f32.mrf.mxu0  ;;  %v1220_v54 = vadd.f32 %v4090_v22, %v1219_v48  ;;  %v2495_v56 = vclamps-f32 %v1372_v52, 20.0 }
 0x204   :  { %v773_v55 = vadd.f32 %v4096_v24, %v772_v50  ;;  %1066 = vst.msk [vmem:[%s4410_s5 + $0x368] sm:$0xff] %vm956_vm1, %v925_v53 }
 0x205   :  { %v2434_v57 = vclamps-f32 %v1220_v54, 20.0  ;;  %v2760_v58 = vpop.eup %2759  ;;  %v1863_v59 = vmul.f32 1.442695, %v2495_v56 }
 0x206   :  { %1005 = vst.msk [vmem:[%s4410_s5 + $0x180] sm:$0xff] %vm956_vm1, %v773_v55 }
 0x207   :  { %v2762_v60 = vpop.eup %2761  ;;  %v1741_v61 = vmul.f32 1.442695, %v2434_v57  ;;  %1995 = vst.msk [vmem:[%s4411_s6 + $0x360] sm:$0xff] %vm956_vm1, %v2760_v58  ;;  %2763 = vpow2.f32 %v1863_v59 }
 0x208   :  { %1934 = vst.msk [vmem:[%s4411_s6 + $0x178] sm:$0xff] %vm956_vm1, %v2762_v60  ;;  %v1374_v62 = vpop.f32.mrf.mxu3 }
 0x209   :  { %2765 = vpow2.f32 %v1741_v61  ;;  %v927_v63 = vpop.f32.mrf.mxu2  ;;  %v1375_v2 = vadd.f32 %v4090_v22, %v1374_v62 }
 0x20a   :  { %v1221_v0 = vpop.f32.mrf.mxu1  ;;  %v928_v3 = vadd.f32 %v4096_v24, %v927_v63 }
 0x20b   :  { %v774_v1 = vpop.f32.mrf.mxu0  ;;  %v1222_v4 = vadd.f32 %v4090_v22, %v1221_v0  ;;  %v2496_v6 = vclamps-f32 %v1375_v2, 20.0 }
 0x20c   :  { %v775_v5 = vadd.f32 %v4096_v24, %v774_v1  ;;  %1067 = vst.msk [vmem:[%s4410_s5 + $0x370] sm:$0xff] %vm956_vm1, %v928_v3 }
 0x20d   :  { %v2435_v7 = vclamps-f32 %v1222_v4, 20.0  ;;  %v2764_v8 = vpop.eup %2763  ;;  %v1865_v9 = vmul.f32 1.442695, %v2496_v6 }
 0x20e   :  { %1006 = vst.msk [vmem:[%s4410_s5 + $0x188] sm:$0xff] %vm956_vm1, %v775_v5 }
 0x20f   :  { %v2766_v10 = vpop.eup %2765  ;;  %v1743_v11 = vmul.f32 1.442695, %v2435_v7  ;;  %1996 = vst.msk [vmem:[%s4411_s6 + $0x368] sm:$0xff] %vm956_vm1, %v2764_v8  ;;  %2767 = vpow2.f32 %v1865_v9 }
 0x210   :  { %1935 = vst.msk [vmem:[%s4411_s6 + $0x180] sm:$0xff] %vm956_vm1, %v2766_v10  ;;  %v1376_v12 = vpop.f32.mrf.mxu3 }
 0x211   :  { %2769 = vpow2.f32 %v1743_v11  ;;  %v929_v13 = vpop.f32.mrf.mxu2  ;;  %v1377_v16 = vadd.f32 %v4090_v22, %v1376_v12 }
 0x212   :  { %v1224_v14 = vpop.f32.mrf.mxu1  ;;  %v930_v17 = vadd.f32 %v4096_v24, %v929_v13 }
 0x213   :  { %v777_v15 = vpop.f32.mrf.mxu0  ;;  %v1225_v49 = vadd.f32 %v4090_v22, %v1224_v14  ;;  %v2497_v20 = vclamps-f32 %v1377_v16, 20.0 }
 0x214   :  { %v778_v51 = vadd.f32 %v4096_v24, %v777_v15  ;;  %1068 = vst.msk [vmem:[%s4410_s5 + $0x378] sm:$0xff] %vm956_vm1, %v930_v17 }
 0x215   :  { %v2436_v21 = vclamps-f32 %v1225_v49, 20.0  ;;  %v2768_v23 = vpop.eup %2767  ;;  %v1867_v25 = vmul.f32 1.442695, %v2497_v20 }
 0x216   :  { %1007 = vst.msk [vmem:[%s4410_s5 + $0x190] sm:$0xff] %vm956_vm1, %v778_v51 }
 0x217   :  { %v2770_v26 = vpop.eup %2769  ;;  %v1745_v27 = vmul.f32 1.442695, %v2436_v21  ;;  %1997 = vst.msk [vmem:[%s4411_s6 + $0x370] sm:$0xff] %vm956_vm1, %v2768_v23  ;;  %2771 = vpow2.f32 %v1867_v25 }
 0x218   :  { %1936 = vst.msk [vmem:[%s4411_s6 + $0x188] sm:$0xff] %vm956_vm1, %v2770_v26  ;;  %v1379_v28 = vpop.f32.mrf.mxu3 }
 0x219   :  { %2773 = vpow2.f32 %v1745_v27  ;;  %v932_v29 = vpop.f32.mrf.mxu2  ;;  %v1380_v32 = vadd.f32 %v4090_v22, %v1379_v28 }
 0x21a   :  { %v1226_v30 = vpop.f32.mrf.mxu1  ;;  %v933_v33 = vadd.f32 %v4096_v24, %v932_v29 }
 0x21b   :  { %v779_v31 = vpop.f32.mrf.mxu0  ;;  %v1227_v34 = vadd.f32 %v4090_v22, %v1226_v30  ;;  %v2498_v36 = vclamps-f32 %v1380_v32, 20.0 }
 0x21c   :  { %v780_v35 = vadd.f32 %v4096_v24, %v779_v31  ;;  %1069 = vst.msk [vmem:[%s4410_s5 + $0x380] sm:$0xff] %vm956_vm1, %v933_v33 }
 0x21d   :  { %v2437_v37 = vclamps-f32 %v1227_v34, 20.0  ;;  %v2772_v38 = vpop.eup %2771  ;;  %v1869_v39 = vmul.f32 1.442695, %v2498_v36 }
 0x21e   :  { %1008 = vst.msk [vmem:[%s4410_s5 + $0x198] sm:$0xff] %vm956_vm1, %v780_v35 }
 0x21f   :  { %v2774_v40 = vpop.eup %2773  ;;  %v1747_v41 = vmul.f32 1.442695, %v2437_v37  ;;  %1998 = vst.msk [vmem:[%s4411_s6 + $0x378] sm:$0xff] %vm956_vm1, %v2772_v38  ;;  %2775 = vpow2.f32 %v1869_v39 }
 0x220   :  { %1937 = vst.msk [vmem:[%s4411_s6 + $0x190] sm:$0xff] %vm956_vm1, %v2774_v40  ;;  %v1381_v42 = vpop.f32.mrf.mxu3 }
 0x221   :  { %2777 = vpow2.f32 %v1747_v41  ;;  %v934_v43 = vpop.f32.mrf.mxu2  ;;  %v1382_v44 = vadd.f32 %v4090_v22, %v1381_v42 }
 0x222   :  { %v1229_v18 = vpop.f32.mrf.mxu1  ;;  %v935_v45 = vadd.f32 %v4096_v24, %v934_v43 }
 0x223   :  { %v782_v19 = vpop.f32.mrf.mxu0  ;;  %v1230_v46 = vadd.f32 %v4090_v22, %v1229_v18  ;;  %v2499_v48 = vclamps-f32 %v1382_v44, 20.0 }
 0x224   :  { %v783_v47 = vadd.f32 %v4096_v24, %v782_v19  ;;  %1070 = vst.msk [vmem:[%s4410_s5 + $0x388] sm:$0xff] %vm956_vm1, %v935_v45 }
 0x225   :  { %v2438_v50 = vclamps-f32 %v1230_v46, 20.0  ;;  %v2776_v52 = vpop.eup %2775  ;;  %v1871_v53 = vmul.f32 1.442695, %v2499_v48 }
 0x226   :  { %1009 = vst.msk [vmem:[%s4410_s5 + $0x1a0] sm:$0xff] %vm956_vm1, %v783_v47 }
 0x227   :  { %v2778_v54 = vpop.eup %2777  ;;  %v1749_v55 = vmul.f32 1.442695, %v2438_v50  ;;  %1999 = vst.msk [vmem:[%s4411_s6 + $0x380] sm:$0xff] %vm956_vm1, %v2776_v52  ;;  %2779 = vpow2.f32 %v1871_v53 }
 0x228   :  { %1938 = vst.msk [vmem:[%s4411_s6 + $0x198] sm:$0xff] %vm956_vm1, %v2778_v54  ;;  %v1384_v56 = vpop.f32.mrf.mxu3 }
 0x229   :  { %2781 = vpow2.f32 %v1749_v55  ;;  %v937_v57 = vpop.f32.mrf.mxu2  ;;  %v1385_v60 = vadd.f32 %v4090_v22, %v1384_v56 }
 0x22a   :  { %v1231_v58 = vpop.f32.mrf.mxu1  ;;  %v938_v61 = vadd.f32 %v4096_v24, %v937_v57 }
 0x22b   :  { %v784_v59 = vpop.f32.mrf.mxu0  ;;  %v1232_v62 = vadd.f32 %v4090_v22, %v1231_v58  ;;  %v2500_v0 = vclamps-f32 %v1385_v60, 20.0 }
 0x22c   :  { %v785_v63 = vadd.f32 %v4096_v24, %v784_v59  ;;  %1071 = vst.msk [vmem:[%s4410_s5 + $0x390] sm:$0xff] %vm956_vm1, %v938_v61 }
 0x22d   :  { %v2439_v1 = vclamps-f32 %v1232_v62, 20.0  ;;  %v2780_v2 = vpop.eup %2779  ;;  %v1873_v3 = vmul.f32 1.442695, %v2500_v0 }
 0x22e   :  { %1010 = vst.msk [vmem:[%s4410_s5 + $0x1a8] sm:$0xff] %vm956_vm1, %v785_v63 }
 0x22f   :  { %v2782_v4 = vpop.eup %2781  ;;  %v1751_v5 = vmul.f32 1.442695, %v2439_v1  ;;  %2000 = vst.msk [vmem:[%s4411_s6 + $0x388] sm:$0xff] %vm956_vm1, %v2780_v2  ;;  %2783 = vpow2.f32 %v1873_v3 }
 0x230   :  { %1939 = vst.msk [vmem:[%s4411_s6 + $0x1a0] sm:$0xff] %vm956_vm1, %v2782_v4  ;;  %v1386_v6 = vpop.f32.mrf.mxu3 }
 0x231   :  { %2785 = vpow2.f32 %v1751_v5  ;;  %v939_v7 = vpop.f32.mrf.mxu2  ;;  %v1387_v10 = vadd.f32 %v4090_v22, %v1386_v6 }
 0x232   :  { %v1234_v8 = vpop.f32.mrf.mxu1  ;;  %v940_v11 = vadd.f32 %v4096_v24, %v939_v7 }
 0x233   :  { %v787_v9 = vpop.f32.mrf.mxu0  ;;  %v1235_v12 = vadd.f32 %v4090_v22, %v1234_v8  ;;  %v2501_v14 = vclamps-f32 %v1387_v10, 20.0 }
 0x234   :  { %v788_v13 = vadd.f32 %v4096_v24, %v787_v9  ;;  %1072 = vst.msk [vmem:[%s4410_s5 + $0x398] sm:$0xff] %vm956_vm1, %v940_v11 }
 0x235   :  { %v2440_v15 = vclamps-f32 %v1235_v12, 20.0  ;;  %v2784_v16 = vpop.eup %2783  ;;  %v1875_v17 = vmul.f32 1.442695, %v2501_v14 }
 0x236   :  { %1011 = vst.msk [vmem:[%s4410_s5 + $0x1b0] sm:$0xff] %vm956_vm1, %v788_v13 }
 0x237   :  { %v2786_v49 = vpop.eup %2785  ;;  %v1753_v51 = vmul.f32 1.442695, %v2440_v15  ;;  %2001 = vst.msk [vmem:[%s4411_s6 + $0x390] sm:$0xff] %vm956_vm1, %v2784_v16  ;;  %2787 = vpow2.f32 %v1875_v17 }
 0x238   :  { %1940 = vst.msk [vmem:[%s4411_s6 + $0x1a8] sm:$0xff] %vm956_vm1, %v2786_v49  ;;  %v1389_v20 = vpop.f32.mrf.mxu3 }
 0x239   :  { %2789 = vpow2.f32 %v1753_v51  ;;  %v942_v21 = vpop.f32.mrf.mxu2  ;;  %v1390_v26 = vadd.f32 %v4090_v22, %v1389_v20 }
 0x23a   :  { %v1236_v23 = vpop.f32.mrf.mxu1  ;;  %v943_v27 = vadd.f32 %v4096_v24, %v942_v21 }
 0x23b   :  { %v789_v25 = vpop.f32.mrf.mxu0  ;;  %v1237_v28 = vadd.f32 %v4090_v22, %v1236_v23  ;;  %v2502_v30 = vclamps-f32 %v1390_v26, 20.0 }
 0x23c   :  { %v790_v29 = vadd.f32 %v4096_v24, %v789_v25  ;;  %1073 = vst.msk [vmem:[%s4410_s5 + $0x3a0] sm:$0xff] %vm956_vm1, %v943_v27 }
 0x23d   :  { %v2441_v31 = vclamps-f32 %v1237_v28, 20.0  ;;  %v2788_v32 = vpop.eup %2787  ;;  %v1877_v33 = vmul.f32 1.442695, %v2502_v30 }
 0x23e   :  { %1012 = vst.msk [vmem:[%s4410_s5 + $0x1b8] sm:$0xff] %vm956_vm1, %v790_v29 }
 0x23f   :  { %v2790_v34 = vpop.eup %2789  ;;  %v1755_v35 = vmul.f32 1.442695, %v2441_v31  ;;  %2002 = vst.msk [vmem:[%s4411_s6 + $0x398] sm:$0xff] %vm956_vm1, %v2788_v32  ;;  %2791 = vpow2.f32 %v1877_v33 }
 0x240   :  { %1941 = vst.msk [vmem:[%s4411_s6 + $0x1b0] sm:$0xff] %vm956_vm1, %v2790_v34  ;;  %v1391_v36 = vpop.f32.mrf.mxu3 }
 0x241   :  { %2793 = vpow2.f32 %v1755_v35  ;;  %v944_v37 = vpop.f32.mrf.mxu2  ;;  %v1392_v40 = vadd.f32 %v4090_v22, %v1391_v36 }
 0x242   :  { %v1239_v38 = vpop.f32.mrf.mxu1  ;;  %v945_v41 = vadd.f32 %v4096_v24, %v944_v37 }
 0x243   :  { %v792_v39 = vpop.f32.mrf.mxu0  ;;  %v1240_v42 = vadd.f32 %v4090_v22, %v1239_v38  ;;  %v2503_v18 = vclamps-f32 %v1392_v40, 20.0 }
 0x244   :  { %v793_v43 = vadd.f32 %v4096_v24, %v792_v39  ;;  %1074 = vst.msk [vmem:[%s4410_s5 + $0x3a8] sm:$0xff] %vm956_vm1, %v945_v41 }
 0x245   :  { %v2442_v19 = vclamps-f32 %v1240_v42, 20.0  ;;  %v2792_v44 = vpop.eup %2791  ;;  %v1879_v45 = vmul.f32 1.442695, %v2503_v18 }
 0x246   :  { %1013 = vst.msk [vmem:[%s4410_s5 + $0x1c0] sm:$0xff] %vm956_vm1, %v793_v43 }
 0x247   :  { %v2794_v46 = vpop.eup %2793  ;;  %v1757_v47 = vmul.f32 1.442695, %v2442_v19  ;;  %2003 = vst.msk [vmem:[%s4411_s6 + $0x3a0] sm:$0xff] %vm956_vm1, %v2792_v44  ;;  %2795 = vpow2.f32 %v1879_v45 }
 0x248   :  { %1942 = vst.msk [vmem:[%s4411_s6 + $0x1b8] sm:$0xff] %vm956_vm1, %v2794_v46  ;;  %v1394_v48 = vpop.f32.mrf.mxu3 }
 0x249   :  { %2797 = vpow2.f32 %v1757_v47  ;;  %v947_v50 = vpop.f32.mrf.mxu2  ;;  %v1395_v54 = vadd.f32 %v4090_v22, %v1394_v48 }
 0x24a   :  { %v1241_v52 = vpop.f32.mrf.mxu1  ;;  %v948_v55 = vadd.f32 %v4096_v24, %v947_v50 }
 0x24b   :  { %v794_v53 = vpop.f32.mrf.mxu0  ;;  %v1242_v56 = vadd.f32 %v4090_v22, %v1241_v52  ;;  %v2504_v58 = vclamps-f32 %v1395_v54, 20.0 }
 0x24c   :  { %v795_v57 = vadd.f32 %v4096_v24, %v794_v53  ;;  %1075 = vst.msk [vmem:[%s4410_s5 + $0x3b0] sm:$0xff] %vm956_vm1, %v948_v55 }
 0x24d   :  { %v2443_v59 = vclamps-f32 %v1242_v56, 20.0  ;;  %v2796_v60 = vpop.eup %2795  ;;  %v1881_v61 = vmul.f32 1.442695, %v2504_v58 }
 0x24e   :  { %1014 = vst.msk [vmem:[%s4410_s5 + $0x1c8] sm:$0xff] %vm956_vm1, %v795_v57 }
 0x24f   :  { %v2798_v62 = vpop.eup %2797  ;;  %v1759_v63 = vmul.f32 1.442695, %v2443_v59  ;;  %2004 = vst.msk [vmem:[%s4411_s6 + $0x3a8] sm:$0xff] %vm956_vm1, %v2796_v60  ;;  %2799 = vpow2.f32 %v1881_v61 }
 0x250   :  { %1943 = vst.msk [vmem:[%s4411_s6 + $0x1c0] sm:$0xff] %vm956_vm1, %v2798_v62  ;;  %v1396_v0 = vpop.f32.mrf.mxu3 }
 0x251   :  { %2801 = vpow2.f32 %v1759_v63  ;;  %v949_v1 = vpop.f32.mrf.mxu2  ;;  %v1397_v4 = vadd.f32 %v4090_v22, %v1396_v0 }
 0x252   :  { %v1244_v2 = vpop.f32.mrf.mxu1  ;;  %v950_v5 = vadd.f32 %v4096_v24, %v949_v1 }
 0x253   :  { %v797_v3 = vpop.f32.mrf.mxu0  ;;  %v1245_v6 = vadd.f32 %v4090_v22, %v1244_v2  ;;  %v2505_v8 = vclamps-f32 %v1397_v4, 20.0 }
 0x254   :  { %v798_v7 = vadd.f32 %v4096_v24, %v797_v3  ;;  %1076 = vst.msk [vmem:[%s4410_s5 + $0x3b8] sm:$0xff] %vm956_vm1, %v950_v5 }
 0x255   :  { %v2444_v9 = vclamps-f32 %v1245_v6, 20.0  ;;  %v2800_v10 = vpop.eup %2799  ;;  %v1883_v11 = vmul.f32 1.442695, %v2505_v8 }
 0x256   :  { %1015 = vst.msk [vmem:[%s4410_s5 + $0x1d0] sm:$0xff] %vm956_vm1, %v798_v7 }
 0x257   :  { %v2802_v12 = vpop.eup %2801  ;;  %v1761_v13 = vmul.f32 1.442695, %v2444_v9  ;;  %2005 = vst.msk [vmem:[%s4411_s6 + $0x3b0] sm:$0xff] %vm956_vm1, %v2800_v10  ;;  %2803 = vpow2.f32 %v1883_v11 }
 0x258   :  { %1944 = vst.msk [vmem:[%s4411_s6 + $0x1c8] sm:$0xff] %vm956_vm1, %v2802_v12  ;;  %v1399_v14 = vpop.f32.mrf.mxu3 }
 0x259   :  { %2805 = vpow2.f32 %v1761_v13  ;;  %v952_v15 = vpop.f32.mrf.mxu2  ;;  %v1400_v49 = vadd.f32 %v4090_v22, %v1399_v14 }
 0x25a   :  { %v1246_v16 = vpop.f32.mrf.mxu1  ;;  %v953_v51 = vadd.f32 %v4096_v24, %v952_v15 }
 0x25b   :  { %v799_v17 = vpop.f32.mrf.mxu0  ;;  %v1247_v20 = vadd.f32 %v4090_v22, %v1246_v16  ;;  %v2506_v23 = vclamps-f32 %v1400_v49, 20.0 }
 0x25c   :  { %v800_v21 = vadd.f32 %v4096_v24, %v799_v17  ;;  %1077 = vst.msk [vmem:[%s4410_s5 + $0x3c0] sm:$0xff] %vm956_vm1, %v953_v51 }
 0x25d   :  { %v2445_v25 = vclamps-f32 %v1247_v20, 20.0  ;;  %v2804_v26 = vpop.eup %2803  ;;  %v1885_v27 = vmul.f32 1.442695, %v2506_v23 }
 0x25e   :  { %1016 = vst.msk [vmem:[%s4410_s5 + $0x1d8] sm:$0xff] %vm956_vm1, %v800_v21 }
 0x25f   :  { %v2806_v28 = vpop.eup %2805  ;;  %v1763_v29 = vmul.f32 1.442695, %v2445_v25  ;;  %2006 = vst.msk [vmem:[%s4411_s6 + $0x3b8] sm:$0xff] %vm956_vm1, %v2804_v26  ;;  %2807 = vpow2.f32 %v1885_v27 }
 0x260   :  { %1945 = vst.msk [vmem:[%s4411_s6 + $0x1d0] sm:$0xff] %vm956_vm1, %v2806_v28  ;;  %v1401_v30 = vpop.f32.mrf.mxu3 }
 0x261   :  { %2809 = vpow2.f32 %v1763_v29  ;;  %v954_v31 = vpop.f32.mrf.mxu2 }
 0x262   :  { %v1249_v32 = vpop.f32.mrf.mxu1 }
 0x263   :  { %v802_v33 = vpop.f32.mrf.mxu0  ;;  %v1250_v34 = vadd.f32 %v4090_v22, %v1249_v32 }
 0x264   :  { %v803_v35 = vadd.f32 %v4096_v24, %v802_v33 }
 0x265   :  { %v2446_v36 = vclamps-f32 %v1250_v34, 20.0  ;;  %v2808_v37 = vpop.eup %2807 }
 0x266   :  { %1017 = vst.msk [vmem:[%s4410_s5 + $0x1e0] sm:$0xff] %vm956_vm1, %v803_v35 }
 0x267   :  { %v2810_v38 = vpop.eup %2809  ;;  %v1765_v39 = vmul.f32 1.442695, %v2446_v36  ;;  %2007 = vst.msk [vmem:[%s4411_s6 + $0x3c0] sm:$0xff] %vm956_vm1, %v2808_v37 }
 0x268   :  { %1946 = vst.msk [vmem:[%s4411_s6 + $0x1d8] sm:$0xff] %vm956_vm1, %v2810_v38 }
 0x269   :  { %2811 = vpow2.f32 %v1765_v39 }
 0x26a   :  { %v1251_v40 = vpop.f32.mrf.mxu1 }
 0x26b   :  { %v804_v41 = vpop.f32.mrf.mxu0  ;;  %v1252_v42 = vadd.f32 %v4090_v22, %v1251_v40 }
 0x26c   :  { %v805_v43 = vadd.f32 %v4096_v24, %v804_v41 }
 0x26d   :  { %v2447_v18 = vclamps-f32 %v1252_v42, 20.0 }
 0x26e   :  { %1018 = vst.msk [vmem:[%s4410_s5 + $0x1e8] sm:$0xff] %vm956_vm1, %v805_v43 }
 0x26f   :  { %v2812_v19 = vpop.eup %2811  ;;  %v1767_v44 = vmul.f32 1.442695, %v2447_v18 }
 0x270   :  { %1947 = vst.msk [vmem:[%s4411_s6 + $0x1e0] sm:$0xff] %vm956_vm1, %v2812_v19 }
 0x271   :  { %2813 = vpow2.f32 %v1767_v44 }
 0x277   :  { %v2814_v45 = vpop.eup %2813 }
 0x278   :  { %1948 = vst.msk [vmem:[%s4411_s6 + $0x1e8] sm:$0xff] %vm956_vm1, %v2814_v45 }

// kernel: conv_vae_forward.7
= control target key start
LH: loop header
LB: loop body
LE: loop exit
PB: predicated region body
PF: predicated region fallthrough
CT: control target
= control target key end

     0   :  { %14 = vsyncpa [#allocation3], 0  ;;  %s13385_s0 = inlined_call_operand.vmem [shape: bf16[2,8192], index: 0, kind: input, shape index: {}]   ;;  %s13386_s1 = inlined_call_operand.vmem [shape: bf16[8192,64], index: 1, kind: input, shape index: {}]   ;;  %s13387_s2 = inlined_call_operand.vmem [shape: f32[1,64], index: 2, kind: input, shape index: {}]   ;;  %s13388_s3 = inlined_call_operand.vmem [shape: f32[2,32], index: 3, kind: input, shape index: {}]   ;;  %s13389_s4 = inlined_call_operand.vmem [shape: bf16[32,8192], index: 4, kind: input, shape index: {}]   ;;  %s13390_s5 = inlined_call_operand.vmem [shape: f32[1,8192], index: 5, kind: input, shape index: {}]   ;;  %s13391_s6 = inlined_call_operand.hbm [shape: f32[2,32], index: 6, kind: output, shape index: {0}]   ;;  %s13392_s7 = inlined_call_operand.hbm [shape: f32[2,32], index: 7, kind: output, shape index: {1}]   ;;  %s13393_s8 = inlined_call_operand.vmem [shape: bf16[2,8192], index: 8, kind: output, shape index: {2}]  }
   0x1   :  { %v10001_v0 = vld [vmem:[%s13386_s1 + $0x38] sm:$0xff]  ;;  %v10000_v4 = vld [vmem:[%s13386_s1 + $0x30] sm:$0xff]  ;;  %v9999_v8 = vld [vmem:[%s13386_s1 + $0x28] sm:$0xff] }
   0x2   :  { %v10009_v1 = vld [vmem:[%s13386_s1 + $0x78] sm:$0xff]  ;;  %4281 = vmatpush.bf16.msra.mxu0 %v10001_v0  ;;  %v10008_v5 = vld [vmem:[%s13386_s1 + $0x70] sm:$0xff]  ;;  %v10007_v9 = vld [vmem:[%s13386_s1 + $0x68] sm:$0xff] }
   0x3   :  { %v10017_v2 = vld [vmem:[%s13386_s1 + $0xb8] sm:$0xff]  ;;  %4294 = vmatpush.bf16.msra.mxu1 %v10009_v1  ;;  %v10016_v6 = vld [vmem:[%s13386_s1 + $0xb0] sm:$0xff]  ;;  %v10015_v10 = vld [vmem:[%s13386_s1 + $0xa8] sm:$0xff] }
   0x4   :  { %v10025_v3 = vld [vmem:[%s13386_s1 + $0xf8] sm:$0xff]  ;;  %4307 = vmatpush.bf16.msra.mxu2 %v10017_v2  ;;  %v10024_v7 = vld [vmem:[%s13386_s1 + $0xf0] sm:$0xff]  ;;  %v10023_v11 = vld [vmem:[%s13386_s1 + $0xe8] sm:$0xff] }
   0x5   :  { %4320 = vmatpush.bf16.msra.mxu3 %v10025_v3  ;;  %v9998_v12 = vld [vmem:[%s13386_s1 + $0x20] sm:$0xff]  ;;  %v9997_v16 = vld [vmem:[%s13386_s1 + $0x18] sm:$0xff]  ;;  %v9996_v20 = vld [vmem:[%s13386_s1 + $0x10] sm:$0xff] }
   0x6   :  { %4282 = vmatpush.bf16.msra.mxu0 %v10000_v4  ;;  %v10006_v13 = vld [vmem:[%s13386_s1 + $0x60] sm:$0xff]  ;;  %v10005_v17 = vld [vmem:[%s13386_s1 + $0x58] sm:$0xff]  ;;  %v10004_v21 = vld [vmem:[%s13386_s1 + $0x50] sm:$0xff] }
   0x7   :  { %4295 = vmatpush.bf16.msra.mxu1 %v10008_v5  ;;  %v10014_v14 = vld [vmem:[%s13386_s1 + $0xa0] sm:$0xff]  ;;  %v10013_v18 = vld [vmem:[%s13386_s1 + $0x98] sm:$0xff] }
   0x8   :  { %4308 = vmatpush.bf16.msra.mxu2 %v10016_v6  ;;  %v10022_v15 = vld [vmem:[%s13386_s1 + $0xe0] sm:$0xff]  ;;  %v10021_v19 = vld [vmem:[%s13386_s1 + $0xd8] sm:$0xff] }
   0x9   :  { %4321 = vmatpush.bf16.msra.mxu3 %v10024_v7  ;;  %v29_v22 = vld [vmem:[%s13385_s0] sm:$0xff] }
   0xa   :  { %4283 = vmatpush.bf16.msra.mxu0 %v9999_v8  ;;  %1066 = vst [vmem:[#allocation1] ss:$9 sm:$0xff] %v29_v22 }
   0xb   :  { %4296 = vmatpush.bf16.msra.mxu1 %v10007_v9 }
   0xc   :  { %4309 = vmatpush.bf16.msra.mxu2 %v10015_v10 }
   0xd   :  { %4322 = vmatpush.bf16.msra.mxu3 %v10023_v11 }
   0xe   :  { %4284 = vmatpush.bf16.msra.mxu0 %v9998_v12 }
   0xf   :  { %4297 = vmatpush.bf16.msra.mxu1 %v10006_v13 }
  0x10   :  { %4310 = vmatpush.bf16.msra.mxu2 %v10014_v14 }
  0x11   :  { %4323 = vmatpush.bf16.msra.mxu3 %v10022_v15 }
  0x12   :  { %4285 = vmatpush.bf16.msra.mxu0 %v9997_v16 }
  0x13   :  { %4298 = vmatpush.bf16.msra.mxu1 %v10005_v17 }
  0x14   :  { %15 = vsyncpa [#allocation5], 0  ;;  %4311 = vmatpush.bf16.msra.mxu2 %v10013_v18  ;;  %v10012_v23 = vld [vmem:[%s13386_s1 + $0x90] sm:$0xff]  ;;  %v9995_v25 = vld [vmem:[%s13386_s1 + $0x8] sm:$0xff]  ;;  %vm5113_vm0 = vcmask 254976   ;;  %s10692_s20 = smov 96  }
  0x15   :  { %4324 = vmatpush.bf16.msra.mxu3 %v10021_v19  ;;  %v10020_v24 = vld [vmem:[%s13386_s1 + $0xd0] sm:$0xff]  ;;  %v10003_v26 = vld [vmem:[%s13386_s1 + $0x48] sm:$0xff]  ;;  %v9994_v29 = vld [vmem:[%s13386_s1] sm:$0xff]  ;;  %vm6043_vm1 = vcmask 261120   ;;  %vm7191_vm8 = vcmask 1040384   ;;  %vm7195_vm9 = vcmask 1042434  }
  0x16   :  { %4286 = vmatpush.bf16.msra.mxu0 %v9996_v20  ;;  %v10011_v27 = vld [vmem:[%s13386_s1 + $0x88] sm:$0xff]  ;;  %v10002_v30 = vld [vmem:[%s13386_s1 + $0x40] sm:$0xff]  ;;  %v10033_v33 = vld [vmem:[%s13386_s1 + $0x138] sm:$0xff]  ;;  %vm7199_vm10 = vcmask 1041408   ;;  %vm7201_vm11 = vcmask 1044484   ;;  %vm7205_vm12 = vcmask 1046534  }
  0x17   :  { %4299 = vmatpush.bf16.msra.mxu1 %v10004_v21  ;;  %v10019_v28 = vld [vmem:[%s13386_s1 + $0xc8] sm:$0xff]  ;;  %v10010_v31 = vld [vmem:[%s13386_s1 + $0x80] sm:$0xff]  ;;  %v10041_v34 = vld [vmem:[%s13386_s1 + $0x178] sm:$0xff]  ;;  %vm7209_vm15 = vcmask 1045508   ;;  %s10693_s30 = smov [#allocation2]   ;;  %s7341_s11 = sshll.u32 %s13391_s6, 4  ;;  %s7342_s11 = int_to_ptr.hbm [resolvable:$true] %s7341_s11 }
  0x18   :  { %4312 = vmatpush.bf16.msra.mxu2 %v10012_v23  ;;  %v10018_v32 = vld [vmem:[%s13386_s1 + $0xc0] sm:$0xff]  ;;  %v10049_v35 = vld [vmem:[%s13386_s1 + $0x1b8] sm:$0xff]  ;;  %v10032_v37 = vld [vmem:[%s13386_s1 + $0x130] sm:$0xff]  ;;  %s7352_s17 = sshll.u32 %s13392_s7, 4  ;;  %s7353_s17 = int_to_ptr.hbm [resolvable:$true] %s7352_s17 }
  0x19   :  { %4325 = vmatpush.bf16.msra.mxu3 %v10020_v24  ;;  %v10057_v36 = vld [vmem:[%s13386_s1 + $0x1f8] sm:$0xff]  ;;  %v1067_v39 = vld [vmem:[#allocation1] sm:$0xff]  ;;  %v10040_v40 = vld [vmem:[%s13386_s1 + $0x170] sm:$0xff] }
  0x1a   :  { %4287 = vmatpush.bf16.msra.mxu0 %v9995_v25  ;;  %v1069_v38 = vld [vmem:[#allocation1 + $0x12] sm:$0xff]  ;;  %v1070_v41 = vld [vmem:[#allocation1 + $0x1b] sm:$0xff]  ;;  %v1068_v42 = vld [vmem:[#allocation1 + $0x9] sm:$0xff] }
  0x1b   :  { %4300 = vmatpush.bf16.msra.mxu1 %v10003_v26  ;;  %v10048_v43 = vld [vmem:[%s13386_s1 + $0x1b0] sm:$0xff]  ;;  %v10031_v45 = vld [vmem:[%s13386_s1 + $0x128] sm:$0xff]  ;;  %v10030_v49 = vld [vmem:[%s13386_s1 + $0x120] sm:$0xff] }
  0x1c   :  { %4313 = vmatpush.bf16.msra.mxu2 %v10011_v27  ;;  %v10056_v44 = vld [vmem:[%s13386_s1 + $0x1f0] sm:$0xff]  ;;  %v10039_v46 = vld [vmem:[%s13386_s1 + $0x168] sm:$0xff]  ;;  %v10038_v50 = vld [vmem:[%s13386_s1 + $0x160] sm:$0xff] }
  0x1d   :  { %4326 = vmatpush.bf16.msra.mxu3 %v10019_v28  ;;  %v10047_v47 = vld [vmem:[%s13386_s1 + $0x1a8] sm:$0xff]  ;;  %v1073_v51 = vld [vmem:[#allocation1 + $0x36] sm:$0xff]  ;;  %v1074_v54 = vld [vmem:[#allocation1 + $0x3f] sm:$0xff] }
  0x1e   :  { %4288 = vmatpush.bf16.msra.mxu0 %v9994_v29  ;;  %v10055_v48 = vld [vmem:[%s13386_s1 + $0x1e8] sm:$0xff]  ;;  %v10046_v56 = vld [vmem:[%s13386_s1 + $0x1a0] sm:$0xff]  ;;  %v10029_v58 = vld [vmem:[%s13386_s1 + $0x118] sm:$0xff] }
  0x1f   :  { %4301 = vmatpush.bf16.msra.mxu1 %v10002_v30  ;;  %v30_v52 = vld [vmem:[%s13385_s0 + $0x8] sm:$0xff]  ;;  %v10054_v57 = vld [vmem:[%s13386_s1 + $0x1e0] sm:$0xff]  ;;  %v10037_v59 = vld [vmem:[%s13386_s1 + $0x158] sm:$0xff] }
  0x20   :  { %4314 = vmatpush.bf16.msra.mxu2 %v10010_v31  ;;  %v1071_v53 = vld [vmem:[#allocation1 + $0x24] sm:$0xff]  ;;  %v1072_v55 = vld [vmem:[#allocation1 + $0x2d] sm:$0xff]  ;;  %v10045_v60 = vld [vmem:[%s13386_s1 + $0x198] sm:$0xff] }
  0x21   :  { %4327 = vmatpush.bf16.msra.mxu3 %v10018_v32  ;;  %4289 = vmatmul.bf16.vlgmr.msra.gmra.mxu0 %v1067_v39  ;;  %1076 = vst [vmem:[#allocation1] ss:$9 sm:$0xff] %v30_v52  ;;  %v10053_v61 = vld [vmem:[%s13386_s1 + $0x1d8] sm:$0xff]  ;;  %v10028_v62 = vld [vmem:[%s13386_s1 + $0x110] sm:$0xff]  ;;  %v10027_v2 = vld [vmem:[%s13386_s1 + $0x108] sm:$0xff] }
  0x22   :  { %4333 = vmatpush.bf16.msrb.mxu0 %v10033_v33  ;;  %4302 = vmatmul.bf16.vlgmr.msra.gmra.mxu1 %v1068_v42  ;;  %v10036_v63 = vld [vmem:[%s13386_s1 + $0x150] sm:$0xff]  ;;  %v10035_v3 = vld [vmem:[%s13386_s1 + $0x148] sm:$0xff]  ;;  %v10026_v6 = vld [vmem:[%s13386_s1 + $0x100] sm:$0xff] }
  0x23   :  { %4346 = vmatpush.bf16.msrb.mxu1 %v10041_v34  ;;  %4315 = vmatmul.bf16.vlgmr.msra.gmra.mxu2 %v1069_v38  ;;  %v10044_v0 = vld [vmem:[%s13386_s1 + $0x190] sm:$0xff]  ;;  %v10043_v4 = vld [vmem:[%s13386_s1 + $0x188] sm:$0xff]  ;;  %v10034_v7 = vld [vmem:[%s13386_s1 + $0x140] sm:$0xff] }
  0x24   :  { %4359 = vmatpush.bf16.msrb.mxu2 %v10049_v35  ;;  %4328 = vmatmul.bf16.vlgmr.msra.gmra.mxu3 %v1070_v41  ;;  %v10052_v1 = vld [vmem:[%s13386_s1 + $0x1d0] sm:$0xff]  ;;  %v10051_v5 = vld [vmem:[%s13386_s1 + $0x1c8] sm:$0xff]  ;;  %v10042_v8 = vld [vmem:[%s13386_s1 + $0x180] sm:$0xff] }
  0x25   :  { %4372 = vmatpush.bf16.msrb.mxu3 %v10057_v36  ;;  %v10050_v9 = vld [vmem:[%s13386_s1 + $0x1c0] sm:$0xff]  ;;  %v10065_v10 = vld [vmem:[%s13386_s1 + $0x238] sm:$0xff]  ;;  %v10064_v14 = vld [vmem:[%s13386_s1 + $0x230] sm:$0xff] }
  0x26   :  { %4334 = vmatpush.bf16.msrb.mxu0 %v10032_v37  ;;  %v10073_v11 = vld [vmem:[%s13386_s1 + $0x278] sm:$0xff]  ;;  %v10072_v15 = vld [vmem:[%s13386_s1 + $0x270] sm:$0xff]  ;;  %v10063_v18 = vld [vmem:[%s13386_s1 + $0x228] sm:$0xff] }
  0x27   :  { %4347 = vmatpush.bf16.msrb.mxu1 %v10040_v40  ;;  %v10081_v12 = vld [vmem:[%s13386_s1 + $0x2b8] sm:$0xff]  ;;  %v10080_v16 = vld [vmem:[%s13386_s1 + $0x2b0] sm:$0xff]  ;;  %v10071_v19 = vld [vmem:[%s13386_s1 + $0x268] sm:$0xff] }
  0x28   :  { %4360 = vmatpush.bf16.msrb.mxu2 %v10048_v43  ;;  %v10089_v13 = vld [vmem:[%s13386_s1 + $0x2f8] sm:$0xff]  ;;  %v10088_v17 = vld [vmem:[%s13386_s1 + $0x2f0] sm:$0xff]  ;;  %v10079_v20 = vld [vmem:[%s13386_s1 + $0x2a8] sm:$0xff] }
  0x29   :  { %4373 = vmatpush.bf16.msrb.mxu3 %v10056_v44  ;;  %v10087_v21 = vld [vmem:[%s13386_s1 + $0x2e8] sm:$0xff]  ;;  %v10062_v22 = vld [vmem:[%s13386_s1 + $0x220] sm:$0xff]  ;;  %v10061_v26 = vld [vmem:[%s13386_s1 + $0x218] sm:$0xff] }
  0x2a   :  { %4335 = vmatpush.bf16.msrb.mxu0 %v10031_v45  ;;  %v10070_v23 = vld [vmem:[%s13386_s1 + $0x260] sm:$0xff]  ;;  %v10069_v27 = vld [vmem:[%s13386_s1 + $0x258] sm:$0xff]  ;;  %v10060_v30 = vld [vmem:[%s13386_s1 + $0x210] sm:$0xff] }
  0x2b   :  { %4348 = vmatpush.bf16.msrb.mxu1 %v10039_v46  ;;  %v10078_v24 = vld [vmem:[%s13386_s1 + $0x2a0] sm:$0xff]  ;;  %v10077_v28 = vld [vmem:[%s13386_s1 + $0x298] sm:$0xff]  ;;  %v10068_v31 = vld [vmem:[%s13386_s1 + $0x250] sm:$0xff] }
  0x2c   :  { %4361 = vmatpush.bf16.msrb.mxu2 %v10047_v47  ;;  %v10086_v25 = vld [vmem:[%s13386_s1 + $0x2e0] sm:$0xff]  ;;  %v10085_v29 = vld [vmem:[%s13386_s1 + $0x2d8] sm:$0xff]  ;;  %v10076_v32 = vld [vmem:[%s13386_s1 + $0x290] sm:$0xff] }
  0x2d   :  { %4374 = vmatpush.bf16.msrb.mxu3 %v10055_v48  ;;  %v10084_v33 = vld [vmem:[%s13386_s1 + $0x2d0] sm:$0xff]  ;;  %v10059_v34 = vld [vmem:[%s13386_s1 + $0x208] sm:$0xff]  ;;  %v10058_v38 = vld [vmem:[%s13386_s1 + $0x200] sm:$0xff] }
  0x2e   :  { %4336 = vmatpush.bf16.msrb.mxu0 %v10030_v49  ;;  %v10067_v35 = vld [vmem:[%s13386_s1 + $0x248] sm:$0xff]  ;;  %v10066_v39 = vld [vmem:[%s13386_s1 + $0x240] sm:$0xff]  ;;  %v10097_v42 = vld [vmem:[%s13386_s1 + $0x338] sm:$0xff] }
  0x2f   :  { %4349 = vmatpush.bf16.msrb.mxu1 %v10038_v50  ;;  %v10075_v36 = vld [vmem:[%s13386_s1 + $0x288] sm:$0xff]  ;;  %v10074_v40 = vld [vmem:[%s13386_s1 + $0x280] sm:$0xff]  ;;  %v10105_v43 = vld [vmem:[%s13386_s1 + $0x378] sm:$0xff] }
  0x30   :  { %4362 = vmatpush.bf16.msrb.mxu2 %v10046_v56  ;;  %v10083_v37 = vld [vmem:[%s13386_s1 + $0x2c8] sm:$0xff]  ;;  %v10082_v41 = vld [vmem:[%s13386_s1 + $0x2c0] sm:$0xff]  ;;  %v10113_v44 = vld [vmem:[%s13386_s1 + $0x3b8] sm:$0xff] }
  0x31   :  { %4375 = vmatpush.bf16.msrb.mxu3 %v10054_v57  ;;  %v10121_v45 = vld [vmem:[%s13386_s1 + $0x3f8] sm:$0xff]  ;;  %v1077_v46 = vld [vmem:[#allocation1] sm:$0xff]  ;;  %v1078_v48 = vld [vmem:[#allocation1 + $0x9] sm:$0xff] }
  0x32   :  { %4337 = vmatpush.bf16.msrb.mxu0 %v10029_v58  ;;  %v1079_v47 = vld [vmem:[#allocation1 + $0x12] sm:$0xff]  ;;  %v1080_v49 = vld [vmem:[#allocation1 + $0x1b] sm:$0xff]  ;;  %v10111_v56 = vld [vmem:[%s13386_s1 + $0x3a8] sm:$0xff] }
  0x33   :  { %4350 = vmatpush.bf16.msrb.mxu1 %v10037_v59  ;;  %v10096_v50 = vld [vmem:[%s13386_s1 + $0x330] sm:$0xff]  ;;  %v10119_v57 = vld [vmem:[%s13386_s1 + $0x3e8] sm:$0xff]  ;;  %v10094_v58 = vld [vmem:[%s13386_s1 + $0x320] sm:$0xff] }
  0x34   :  { %4363 = vmatpush.bf16.msrb.mxu2 %v10045_v60  ;;  %v10112_v52 = vld [vmem:[%s13386_s1 + $0x3b0] sm:$0xff]  ;;  %v10102_v59 = vld [vmem:[%s13386_s1 + $0x360] sm:$0xff] }
  0x35   :  { %4376 = vmatpush.bf16.msrb.mxu3 %v10053_v61  ;;  %v10110_v60 = vld [vmem:[%s13386_s1 + $0x3a0] sm:$0xff] }
  0x36   :  { %4338 = vmatpush.bf16.msrb.mxu0 %v10028_v62  ;;  %v10118_v61 = vld [vmem:[%s13386_s1 + $0x3e0] sm:$0xff]  ;;  %v10093_v62 = vld [vmem:[%s13386_s1 + $0x318] sm:$0xff] }
  0x37   :  { %4351 = vmatpush.bf16.msrb.mxu1 %v10036_v63  ;;  %v10101_v63 = vld [vmem:[%s13386_s1 + $0x358] sm:$0xff] }
  0x38   :  { %4364 = vmatpush.bf16.msrb.mxu2 %v10044_v0  ;;  %v10109_v0 = vld [vmem:[%s13386_s1 + $0x398] sm:$0xff] }
  0x39   :  { %4377 = vmatpush.bf16.msrb.mxu3 %v10052_v1  ;;  %v10117_v1 = vld [vmem:[%s13386_s1 + $0x3d8] sm:$0xff] }
  0x3a   :  { %4339 = vmatpush.bf16.msrb.mxu0 %v10027_v2  ;;  %v10092_v2 = vld [vmem:[%s13386_s1 + $0x310] sm:$0xff] }
  0x3b   :  { %4352 = vmatpush.bf16.msrb.mxu1 %v10035_v3  ;;  %v10100_v3 = vld [vmem:[%s13386_s1 + $0x350] sm:$0xff] }
  0x3c   :  { %4365 = vmatpush.bf16.msrb.mxu2 %v10043_v4  ;;  %v10108_v4 = vld [vmem:[%s13386_s1 + $0x390] sm:$0xff] }
  0x3d   :  { %4378 = vmatpush.bf16.msrb.mxu3 %v10051_v5  ;;  %v10116_v5 = vld [vmem:[%s13386_s1 + $0x3d0] sm:$0xff] }
  0x3e   :  { %4340 = vmatpush.bf16.msrb.mxu0 %v10026_v6  ;;  %v10091_v6 = vld [vmem:[%s13386_s1 + $0x308] sm:$0xff] }
  0x3f   :  { %4353 = vmatpush.bf16.msrb.mxu1 %v10034_v7  ;;  %v10099_v7 = vld [vmem:[%s13386_s1 + $0x348] sm:$0xff] }
  0x40   :  { %4366 = vmatpush.bf16.msrb.mxu2 %v10042_v8  ;;  %v10107_v8 = vld [vmem:[%s13386_s1 + $0x388] sm:$0xff] }
  0x41   :  { %4379 = vmatpush.bf16.msrb.mxu3 %v10050_v9  ;;  %4341 = vmatmul.bf16.vlgmr.msrb.gmra.mxu0 %v1071_v53  ;;  %v10120_v53 = vld [vmem:[%s13386_s1 + $0x3f0] sm:$0xff]  ;;  %v10115_v9 = vld [vmem:[%s13386_s1 + $0x3c8] sm:$0xff] }
  0x42   :  { %4385 = vmatpush.bf16.msra.mxu0 %v10065_v10  ;;  %4354 = vmatmul.bf16.vlgmr.msrb.gmra.mxu1 %v1072_v55  ;;  %v10103_v55 = vld [vmem:[%s13386_s1 + $0x368] sm:$0xff] }
  0x43   :  { %4398 = vmatpush.bf16.msra.mxu1 %v10073_v11  ;;  %4367 = vmatmul.bf16.vlgmr.msrb.gmra.mxu2 %v1073_v51  ;;  %v10104_v51 = vld [vmem:[%s13386_s1 + $0x370] sm:$0xff]  ;;  %v1081_v10 = vld [vmem:[#allocation1 + $0x24] sm:$0xff] }
  0x44   :  { %4411 = vmatpush.bf16.msra.mxu2 %v10081_v12  ;;  %4380 = vmatmul.bf16.vlgmr.msrb.gmra.mxu3 %v1074_v54  ;;  %v10095_v54 = vld [vmem:[%s13386_s1 + $0x328] sm:$0xff]  ;;  %v1083_v11 = vld [vmem:[#allocation1 + $0x36] sm:$0xff] }
  0x45   :  { %4424 = vmatpush.bf16.msra.mxu3 %v10089_v13  ;;  %v1082_v12 = vld [vmem:[#allocation1 + $0x2d] sm:$0xff]  ;;  %v1084_v13 = vld [vmem:[#allocation1 + $0x3f] sm:$0xff] }
  0x46   :  { %4386 = vmatpush.bf16.msra.mxu0 %v10064_v14  ;;  %v31_v14 = vld [vmem:[%s13385_s0 + $0x10] sm:$0xff] }
  0x47   :  { %4399 = vmatpush.bf16.msra.mxu1 %v10072_v15  ;;  %1086 = vst [vmem:[#allocation1] ss:$9 sm:$0xff] %v31_v14  ;;  %v10090_v15 = vld [vmem:[%s13386_s1 + $0x300] sm:$0xff]  ;;  %v10173_v14 = vld [vmem:[%s13386_s1 + $0x598] sm:$0xff] }
  0x48   :  { %4412 = vmatpush.bf16.msra.mxu2 %v10080_v16  ;;  %v10098_v16 = vld [vmem:[%s13386_s1 + $0x340] sm:$0xff] }
  0x49   :  { %4425 = vmatpush.bf16.msra.mxu3 %v10088_v17  ;;  %v10106_v17 = vld [vmem:[%s13386_s1 + $0x380] sm:$0xff] }
  0x4a   :  { %4387 = vmatpush.bf16.msra.mxu0 %v10063_v18  ;;  %v10114_v18 = vld [vmem:[%s13386_s1 + $0x3c0] sm:$0xff] }
  0x4b   :  { %4400 = vmatpush.bf16.msra.mxu1 %v10071_v19  ;;  %v10129_v19 = vld [vmem:[%s13386_s1 + $0x438] sm:$0xff] }
  0x4c   :  { %4413 = vmatpush.bf16.msra.mxu2 %v10079_v20  ;;  %v10137_v20 = vld [vmem:[%s13386_s1 + $0x478] sm:$0xff] }
  0x4d   :  { %4426 = vmatpush.bf16.msra.mxu3 %v10087_v21  ;;  %v10145_v21 = vld [vmem:[%s13386_s1 + $0x4b8] sm:$0xff] }
  0x4e   :  { %4388 = vmatpush.bf16.msra.mxu0 %v10062_v22  ;;  %v10153_v22 = vld [vmem:[%s13386_s1 + $0x4f8] sm:$0xff] }
  0x4f   :  { %4401 = vmatpush.bf16.msra.mxu1 %v10070_v23  ;;  %v10128_v23 = vld [vmem:[%s13386_s1 + $0x430] sm:$0xff] }
  0x50   :  { %4414 = vmatpush.bf16.msra.mxu2 %v10078_v24  ;;  %v10136_v24 = vld [vmem:[%s13386_s1 + $0x470] sm:$0xff] }
  0x51   :  { %4427 = vmatpush.bf16.msra.mxu3 %v10086_v25  ;;  %v10144_v25 = vld [vmem:[%s13386_s1 + $0x4b0] sm:$0xff] }
  0x52   :  { %4389 = vmatpush.bf16.msra.mxu0 %v10061_v26  ;;  %v10152_v26 = vld [vmem:[%s13386_s1 + $0x4f0] sm:$0xff] }
  0x53   :  { %4402 = vmatpush.bf16.msra.mxu1 %v10069_v27  ;;  %v10127_v27 = vld [vmem:[%s13386_s1 + $0x428] sm:$0xff] }
  0x54   :  { %4415 = vmatpush.bf16.msra.mxu2 %v10077_v28  ;;  %v10135_v28 = vld [vmem:[%s13386_s1 + $0x468] sm:$0xff] }
  0x55   :  { %4428 = vmatpush.bf16.msra.mxu3 %v10085_v29  ;;  %v10143_v29 = vld [vmem:[%s13386_s1 + $0x4a8] sm:$0xff] }
  0x56   :  { %4390 = vmatpush.bf16.msra.mxu0 %v10060_v30  ;;  %v10151_v30 = vld [vmem:[%s13386_s1 + $0x4e8] sm:$0xff] }
  0x57   :  { %4403 = vmatpush.bf16.msra.mxu1 %v10068_v31  ;;  %v10126_v31 = vld [vmem:[%s13386_s1 + $0x420] sm:$0xff] }
  0x58   :  { %4416 = vmatpush.bf16.msra.mxu2 %v10076_v32  ;;  %v10134_v32 = vld [vmem:[%s13386_s1 + $0x460] sm:$0xff] }
  0x59   :  { %4429 = vmatpush.bf16.msra.mxu3 %v10084_v33  ;;  %v10142_v33 = vld [vmem:[%s13386_s1 + $0x4a0] sm:$0xff] }
  0x5a   :  { %4391 = vmatpush.bf16.msra.mxu0 %v10059_v34  ;;  %v10150_v34 = vld [vmem:[%s13386_s1 + $0x4e0] sm:$0xff] }
  0x5b   :  { %4404 = vmatpush.bf16.msra.mxu1 %v10067_v35  ;;  %v10125_v35 = vld [vmem:[%s13386_s1 + $0x418] sm:$0xff] }
  0x5c   :  { %4417 = vmatpush.bf16.msra.mxu2 %v10075_v36  ;;  %v10133_v36 = vld [vmem:[%s13386_s1 + $0x458] sm:$0xff] }
  0x5d   :  { %4430 = vmatpush.bf16.msra.mxu3 %v10083_v37  ;;  %v10141_v37 = vld [vmem:[%s13386_s1 + $0x498] sm:$0xff] }
  0x5e   :  { %4392 = vmatpush.bf16.msra.mxu0 %v10058_v38  ;;  %v10149_v38 = vld [vmem:[%s13386_s1 + $0x4d8] sm:$0xff] }
  0x5f   :  { %4405 = vmatpush.bf16.msra.mxu1 %v10066_v39  ;;  %v10124_v39 = vld [vmem:[%s13386_s1 + $0x410] sm:$0xff] }
  0x60   :  { %4418 = vmatpush.bf16.msra.mxu2 %v10074_v40  ;;  %v10132_v40 = vld [vmem:[%s13386_s1 + $0x450] sm:$0xff] }
  0x61   :  { %4431 = vmatpush.bf16.msra.mxu3 %v10082_v41  ;;  %4393 = vmatmul.bf16.vlgmr.msra.gmra.mxu0 %v1077_v46  ;;  %v10140_v41 = vld [vmem:[%s13386_s1 + $0x490] sm:$0xff]  ;;  %v10147_v46 = vld [vmem:[%s13386_s1 + $0x4c8] sm:$0xff] }
  0x62   :  { %4437 = vmatpush.bf16.msrb.mxu0 %v10097_v42  ;;  %4406 = vmatmul.bf16.vlgmr.msra.gmra.mxu1 %v1078_v48  ;;  %v10148_v42 = vld [vmem:[%s13386_s1 + $0x4d0] sm:$0xff]  ;;  %v10130_v48 = vld [vmem:[%s13386_s1 + $0x440] sm:$0xff] }
  0x63   :  { %4450 = vmatpush.bf16.msrb.mxu1 %v10105_v43  ;;  %4419 = vmatmul.bf16.vlgmr.msra.gmra.mxu2 %v1079_v47  ;;  %v10123_v43 = vld [vmem:[%s13386_s1 + $0x408] sm:$0xff]  ;;  %v10122_v47 = vld [vmem:[%s13386_s1 + $0x400] sm:$0xff] }
  0x64   :  { %4463 = vmatpush.bf16.msrb.mxu2 %v10113_v44  ;;  %4432 = vmatmul.bf16.vlgmr.msra.gmra.mxu3 %v1080_v49  ;;  %v10131_v44 = vld [vmem:[%s13386_s1 + $0x448] sm:$0xff]  ;;  %v10138_v49 = vld [vmem:[%s13386_s1 + $0x480] sm:$0xff] }
  0x65   :  { %4476 = vmatpush.bf16.msrb.mxu3 %v10121_v45  ;;  %v10139_v45 = vld [vmem:[%s13386_s1 + $0x488] sm:$0xff] }
  0x66   :  { %4438 = vmatpush.bf16.msrb.mxu0 %v10096_v50  ;;  %v10146_v50 = vld [vmem:[%s13386_s1 + $0x4c0] sm:$0xff] }
  0x67   :  { %4451 = vmatpush.bf16.msrb.mxu1 %v10104_v51  ;;  %v10161_v51 = vld [vmem:[%s13386_s1 + $0x538] sm:$0xff] }
  0x68   :  { %4464 = vmatpush.bf16.msrb.mxu2 %v10112_v52  ;;  %v10169_v52 = vld [vmem:[%s13386_s1 + $0x578] sm:$0xff] }
  0x69   :  { %4477 = vmatpush.bf16.msrb.mxu3 %v10120_v53  ;;  %v10177_v53 = vld [vmem:[%s13386_s1 + $0x5b8] sm:$0xff] }
  0x6a   :  { %4439 = vmatpush.bf16.msrb.mxu0 %v10095_v54  ;;  %v10185_v54 = vld [vmem:[%s13386_s1 + $0x5f8] sm:$0xff] }
  0x6b   :  { %4452 = vmatpush.bf16.msrb.mxu1 %v10103_v55  ;;  %v1087_v55 = vld [vmem:[#allocation1] sm:$0xff] }
  0x6c   :  { %4465 = vmatpush.bf16.msrb.mxu2 %v10111_v56  ;;  %v1089_v56 = vld [vmem:[#allocation1 + $0x12] sm:$0xff] }
  0x6d   :  { %4478 = vmatpush.bf16.msrb.mxu3 %v10119_v57  ;;  %v1088_v57 = vld [vmem:[#allocation1 + $0x9] sm:$0xff] }
  0x6e   :  { %4440 = vmatpush.bf16.msrb.mxu0 %v10094_v58  ;;  %v1090_v58 = vld [vmem:[#allocation1 + $0x1b] sm:$0xff] }
  0x6f   :  { %4453 = vmatpush.bf16.msrb.mxu1 %v10102_v59  ;;  %v10160_v59 = vld [vmem:[%s13386_s1 + $0x530] sm:$0xff] }
  0x70   :  { %4466 = vmatpush.bf16.msrb.mxu2 %v10110_v60  ;;  %v10168_v60 = vld [vmem:[%s13386_s1 + $0x570] sm:$0xff] }
  0x71   :  { %4479 = vmatpush.bf16.msrb.mxu3 %v10118_v61  ;;  %v10176_v61 = vld [vmem:[%s13386_s1 + $0x5b0] sm:$0xff] }
  0x72   :  { %4441 = vmatpush.bf16.msrb.mxu0 %v10093_v62  ;;  %v10184_v62 = vld [vmem:[%s13386_s1 + $0x5f0] sm:$0xff] }
  0x73   :  { %4454 = vmatpush.bf16.msrb.mxu1 %v10101_v63  ;;  %v10159_v63 = vld [vmem:[%s13386_s1 + $0x528] sm:$0xff] }
  0x74   :  { %4467 = vmatpush.bf16.msrb.mxu2 %v10109_v0  ;;  %v10167_v0 = vld [vmem:[%s13386_s1 + $0x568] sm:$0xff] }
  0x75   :  { %4480 = vmatpush.bf16.msrb.mxu3 %v10117_v1  ;;  %v10637_v1 = vld [vmem:[%s13387_s2] ss:$0 sm:$0xff]  ;;  %s7339_s2 = sshll.u32 %s10693_s30, 4  ;;  %s7340_s2 = int_to_ptr.vmem [resolvable:$true] %s7339_s2 }
  0x76   :  { %4442 = vmatpush.bf16.msrb.mxu0 %v10092_v2  ;;  %v10175_v2 = vld [vmem:[%s13386_s1 + $0x5a8] sm:$0xff] }
  0x77   :  { %4455 = vmatpush.bf16.msrb.mxu1 %v10100_v3  ;;  %v10183_v3 = vld [vmem:[%s13386_s1 + $0x5e8] sm:$0xff] }
  0x78   :  { %4468 = vmatpush.bf16.msrb.mxu2 %v10108_v4 }
  0x79   :  { %4481 = vmatpush.bf16.msrb.mxu3 %v10116_v5  ;;  %v10158_v5 = vld [vmem:[%s13386_s1 + $0x520] sm:$0xff] }
  0x7a   :  { %4443 = vmatpush.bf16.msrb.mxu0 %v10091_v6  ;;  %v10166_v6 = vld [vmem:[%s13386_s1 + $0x560] sm:$0xff] }
  0x7b   :  { %4456 = vmatpush.bf16.msrb.mxu1 %v10099_v7 }
  0x7c   :  { %4469 = vmatpush.bf16.msrb.mxu2 %v10107_v8 }
  0x7d   :  { %4482 = vmatpush.bf16.msrb.mxu3 %v10115_v9  ;;  %v10174_v9 = vld [vmem:[%s13386_s1 + $0x5a0] sm:$0xff] }
  0x7e   :  { %4444 = vmatpush.bf16.msrb.mxu0 %v10090_v15  ;;  %v10181_v15 = vld [vmem:[%s13386_s1 + $0x5d8] sm:$0xff] }
  0x7f   :  { %4457 = vmatpush.bf16.msrb.mxu1 %v10098_v16 }
  0x80   :  { %4470 = vmatpush.bf16.msrb.mxu2 %v10106_v17 }
  0x81   :  { %4483 = vmatpush.bf16.msrb.mxu3 %v10114_v18  ;;  %4445 = vmatmul.bf16.vlgmr.msrb.gmra.mxu0 %v1081_v10  ;;  %v10182_v10 = vld [vmem:[%s13386_s1 + $0x5e0] sm:$0xff] }
  0x82   :  { %4489 = vmatpush.bf16.msra.mxu0 %v10129_v19  ;;  %4458 = vmatmul.bf16.vlgmr.msrb.gmra.mxu1 %v1082_v12  ;;  %v10157_v12 = vld [vmem:[%s13386_s1 + $0x518] sm:$0xff] }
  0x83   :  { %4502 = vmatpush.bf16.msra.mxu1 %v10137_v20  ;;  %4471 = vmatmul.bf16.vlgmr.msrb.gmra.mxu2 %v1083_v11  ;;  %v10156_v20 = vld [vmem:[%s13386_s1 + $0x510] sm:$0xff] }
  0x84   :  { %4515 = vmatpush.bf16.msra.mxu2 %v10145_v21  ;;  %4484 = vmatmul.bf16.vlgmr.msrb.gmra.mxu3 %v1084_v13  ;;  %v10165_v13 = vld [vmem:[%s13386_s1 + $0x558] sm:$0xff]  ;;  %v10164_v21 = vld [vmem:[%s13386_s1 + $0x550] sm:$0xff] }
  0x85   :  { %4528 = vmatpush.bf16.msra.mxu3 %v10153_v22 }
  0x86   :  { %4490 = vmatpush.bf16.msra.mxu0 %v10128_v23 }
  0x87   :  { %4503 = vmatpush.bf16.msra.mxu1 %v10136_v24  ;;  %v10172_v24 = vld [vmem:[%s13386_s1 + $0x590] sm:$0xff] }
  0x88   :  { %4516 = vmatpush.bf16.msra.mxu2 %v10144_v25  ;;  %v10180_v25 = vld [vmem:[%s13386_s1 + $0x5d0] sm:$0xff] }
  0x89   :  { %4529 = vmatpush.bf16.msra.mxu3 %v10152_v26  ;;  %v10155_v26 = vld [vmem:[%s13386_s1 + $0x508] sm:$0xff] }
  0x8a   :  { %4491 = vmatpush.bf16.msra.mxu0 %v10127_v27  ;;  %v10163_v27 = vld [vmem:[%s13386_s1 + $0x548] sm:$0xff] }
  0x8b   :  { %4504 = vmatpush.bf16.msra.mxu1 %v10135_v28  ;;  %v10171_v28 = vld [vmem:[%s13386_s1 + $0x588] sm:$0xff] }
  0x8c   :  { %4517 = vmatpush.bf16.msra.mxu2 %v10143_v29  ;;  %v10179_v29 = vld [vmem:[%s13386_s1 + $0x5c8] sm:$0xff] }
  0x8d   :  { %4530 = vmatpush.bf16.msra.mxu3 %v10151_v30  ;;  %v1091_v30 = vld [vmem:[#allocation1 + $0x24] sm:$0xff] }
  0x8e   :  { %4492 = vmatpush.bf16.msra.mxu0 %v10126_v31  ;;  %v1093_v31 = vld [vmem:[#allocation1 + $0x36] sm:$0xff] }
  0x8f   :  { %4505 = vmatpush.bf16.msra.mxu1 %v10134_v32 }
  0x90   :  { %4518 = vmatpush.bf16.msra.mxu2 %v10142_v33  ;;  %v1092_v33 = vld [vmem:[#allocation1 + $0x2d] sm:$0xff] }
  0x91   :  { %4531 = vmatpush.bf16.msra.mxu3 %v10150_v34  ;;  %v1094_v34 = vld [vmem:[#allocation1 + $0x3f] sm:$0xff] }
  0x92   :  { %4493 = vmatpush.bf16.msra.mxu0 %v10125_v35 }
  0x93   :  { %4506 = vmatpush.bf16.msra.mxu1 %v10133_v36  ;;  %v32_v36 = vld [vmem:[%s13385_s0 + $0x18] sm:$0xff] }
  0x94   :  { %4519 = vmatpush.bf16.msra.mxu2 %v10141_v37  ;;  %1096 = vst [vmem:[#allocation1] ss:$9 sm:$0xff] %v32_v36  ;;  %v10154_v37 = vld [vmem:[%s13386_s1 + $0x500] sm:$0xff]  ;;  %v10247_v36 = vld [vmem:[%s13386_s1 + $0x7e8] sm:$0xff] }
  0x95   :  { %4532 = vmatpush.bf16.msra.mxu3 %v10149_v38  ;;  %v10162_v38 = vld [vmem:[%s13386_s1 + $0x540] sm:$0xff] }
  0x96   :  { %4494 = vmatpush.bf16.msra.mxu0 %v10124_v39  ;;  %v10170_v39 = vld [vmem:[%s13386_s1 + $0x580] sm:$0xff] }
  0x97   :  { %4507 = vmatpush.bf16.msra.mxu1 %v10132_v40  ;;  %v10178_v40 = vld [vmem:[%s13386_s1 + $0x5c0] sm:$0xff] }
  0x98   :  { %4520 = vmatpush.bf16.msra.mxu2 %v10140_v41  ;;  %v10193_v41 = vld [vmem:[%s13386_s1 + $0x638] sm:$0xff] }
  0x99   :  { %4533 = vmatpush.bf16.msra.mxu3 %v10148_v42  ;;  %v10201_v42 = vld [vmem:[%s13386_s1 + $0x678] sm:$0xff] }
  0x9a   :  { %4495 = vmatpush.bf16.msra.mxu0 %v10123_v43  ;;  %v10209_v43 = vld [vmem:[%s13386_s1 + $0x6b8] sm:$0xff] }
  0x9b   :  { %4508 = vmatpush.bf16.msra.mxu1 %v10131_v44  ;;  %v10217_v44 = vld [vmem:[%s13386_s1 + $0x6f8] sm:$0xff] }
  0x9c   :  { %4521 = vmatpush.bf16.msra.mxu2 %v10139_v45  ;;  %v10192_v45 = vld [vmem:[%s13386_s1 + $0x630] sm:$0xff] }
  0x9d   :  { %4534 = vmatpush.bf16.msra.mxu3 %v10147_v46  ;;  %v10200_v46 = vld [vmem:[%s13386_s1 + $0x670] sm:$0xff] }
  0x9e   :  { %4496 = vmatpush.bf16.msra.mxu0 %v10122_v47  ;;  %v4290_v4 = vpop.f32.mrf.mxu0  ;;  %v10208_v47 = vld [vmem:[%s13386_s1 + $0x6b0] sm:$0xff] }
  0x9f   :  { %4509 = vmatpush.bf16.msra.mxu1 %v10130_v48  ;;  %v4291_v7 = vadd.f32 %v10637_v1, %v4290_v4  ;;  %v4303_v8 = vpop.f32.mrf.mxu1  ;;  %v10216_v48 = vld [vmem:[%s13386_s1 + $0x6f0] sm:$0xff] }
  0xa0   :  { %4522 = vmatpush.bf16.msra.mxu2 %v10138_v49  ;;  %v10191_v49 = vld [vmem:[%s13386_s1 + $0x628] sm:$0xff] }
  0xa1   :  { %4535 = vmatpush.bf16.msra.mxu3 %v10146_v50  ;;  %4497 = vmatmul.bf16.vlgmr.msra.gmra.mxu0 %v1087_v55  ;;  %v4304_v11 = vadd.f32 %v4303_v8, %v4291_v7  ;;  %v10199_v50 = vld [vmem:[%s13386_s1 + $0x668] sm:$0xff]  ;;  %v10198_v55 = vld [vmem:[%s13386_s1 + $0x660] sm:$0xff] }
  0xa2   :  { %4541 = vmatpush.bf16.msrb.mxu0 %v10161_v51  ;;  %4510 = vmatmul.bf16.vlgmr.msra.gmra.mxu1 %v1088_v57  ;;  %v10207_v51 = vld [vmem:[%s13386_s1 + $0x6a8] sm:$0xff] }
  0xa3   :  { %4554 = vmatpush.bf16.msrb.mxu1 %v10169_v52  ;;  %4523 = vmatmul.bf16.vlgmr.msra.gmra.mxu2 %v1089_v56  ;;  %v10215_v52 = vld [vmem:[%s13386_s1 + $0x6e8] sm:$0xff] }
  0xa4   :  { %4567 = vmatpush.bf16.msrb.mxu2 %v10177_v53  ;;  %4536 = vmatmul.bf16.vlgmr.msra.gmra.mxu3 %v1090_v58  ;;  %v10206_v58 = vld [vmem:[%s13386_s1 + $0x6a0] sm:$0xff] }
  0xa5   :  { %4580 = vmatpush.bf16.msrb.mxu3 %v10185_v54  ;;  %v10190_v54 = vld [vmem:[%s13386_s1 + $0x620] sm:$0xff] }
  0xa6   :  { %4542 = vmatpush.bf16.msrb.mxu0 %v10160_v59  ;;  %v4316_v16 = vpop.f32.mrf.mxu2  ;;  %v4292_v19 = vpop.f32.mrf.mxu0  ;;  %v10214_v59 = vld [vmem:[%s13386_s1 + $0x6e0] sm:$0xff] }
  0xa7   :  { %4555 = vmatpush.bf16.msrb.mxu1 %v10168_v60  ;;  %v4317_v17 = vadd.f32 %v4316_v16, %v4304_v11  ;;  %v4329_v18 = vpop.f32.mrf.mxu3  ;;  %v4305_v23 = vpop.f32.mrf.mxu1  ;;  %v10187_v11 = vld [vmem:[%s13386_s1 + $0x608] sm:$0xff]  ;;  %v10202_v19 = vld [vmem:[%s13386_s1 + $0x680] sm:$0xff] }
  0xa8   :  { %4568 = vmatpush.bf16.msrb.mxu2 %v10176_v61  ;;  %v10189_v61 = vld [vmem:[%s13386_s1 + $0x618] sm:$0xff] }
  0xa9   :  { %4581 = vmatpush.bf16.msrb.mxu3 %v10184_v62  ;;  %v11298_v22 = vadd.f32 %v4329_v18, %v4317_v17  ;;  %v10197_v62 = vld [vmem:[%s13386_s1 + $0x658] sm:$0xff]  ;;  %v10186_v17 = vld [vmem:[%s13386_s1 + $0x600] sm:$0xff] }
  0xaa   :  { %4543 = vmatpush.bf16.msrb.mxu0 %v10159_v63  ;;  %v10205_v63 = vld [vmem:[%s13386_s1 + $0x698] sm:$0xff]  ;;  %v10194_v18 = vld [vmem:[%s13386_s1 + $0x640] sm:$0xff] }
  0xab   :  { %4556 = vmatpush.bf16.msrb.mxu1 %v10167_v0  ;;  %v10213_v0 = vld [vmem:[%s13386_s1 + $0x6d8] sm:$0xff] }
  0xac   :  { %4569 = vmatpush.bf16.msrb.mxu2 %v10175_v2  ;;  %v10241_v23 = vld [vmem:[%s13386_s1 + $0x7b8] sm:$0xff] }
  0xad   :  { %4582 = vmatpush.bf16.msrb.mxu3 %v10183_v3 }
  0xae   :  { %4544 = vmatpush.bf16.msrb.mxu0 %v10158_v5  ;;  %v4318_v32 = vpop.f32.mrf.mxu2  ;;  %v10188_v5 = vld [vmem:[%s13386_s1 + $0x610] sm:$0xff] }
  0xaf   :  { %4557 = vmatpush.bf16.msrb.mxu1 %v10166_v6  ;;  %v4331_v35 = vpop.f32.mrf.mxu3  ;;  %v10196_v6 = vld [vmem:[%s13386_s1 + $0x650] sm:$0xff] }
  0xb0   :  { %4570 = vmatpush.bf16.msrb.mxu2 %v10174_v9  ;;  %v10204_v9 = vld [vmem:[%s13386_s1 + $0x690] sm:$0xff]  ;;  %v10239_v35 = vld [vmem:[%s13386_s1 + $0x7a8] sm:$0xff] }
  0xb1   :  { %4583 = vmatpush.bf16.msrb.mxu3 %v10182_v10  ;;  %v10212_v10 = vld [vmem:[%s13386_s1 + $0x6d0] sm:$0xff] }
  0xb2   :  { %4545 = vmatpush.bf16.msrb.mxu0 %v10157_v12  ;;  %v10195_v12 = vld [vmem:[%s13386_s1 + $0x648] sm:$0xff]  ;;  %v10248_v32 = vld [vmem:[%s13386_s1 + $0x7f0] sm:$0xff] }
  0xb3   :  { %4558 = vmatpush.bf16.msrb.mxu1 %v10165_v13  ;;  %v10203_v13 = vld [vmem:[%s13386_s1 + $0x688] sm:$0xff] }
  0xb4   :  { %4571 = vmatpush.bf16.msrb.mxu2 %v10173_v14  ;;  %v10211_v14 = vld [vmem:[%s13386_s1 + $0x6c8] sm:$0xff] }
  0xb5   :  { %4584 = vmatpush.bf16.msrb.mxu3 %v10181_v15 }
  0xb6   :  { %4546 = vmatpush.bf16.msrb.mxu0 %v10156_v20  ;;  %v10210_v20 = vld [vmem:[%s13386_s1 + $0x6c0] sm:$0xff] }
  0xb7   :  { %4559 = vmatpush.bf16.msrb.mxu1 %v10164_v21  ;;  %v10225_v21 = vld [vmem:[%s13386_s1 + $0x738] sm:$0xff] }
  0xb8   :  { %4572 = vmatpush.bf16.msrb.mxu2 %v10172_v24  ;;  %v10249_v24 = vld [vmem:[%s13386_s1 + $0x7f8] sm:$0xff] }
  0xb9   :  { %4585 = vmatpush.bf16.msrb.mxu3 %v10180_v25  ;;  %v1097_v25 = vld [vmem:[#allocation1] sm:$0xff] }
  0xba   :  { %4547 = vmatpush.bf16.msrb.mxu0 %v10155_v26  ;;  %v1099_v26 = vld [vmem:[#allocation1 + $0x12] sm:$0xff] }
  0xbb   :  { %4560 = vmatpush.bf16.msrb.mxu1 %v10163_v27  ;;  %v1098_v27 = vld [vmem:[#allocation1 + $0x9] sm:$0xff] }
  0xbc   :  { %4573 = vmatpush.bf16.msrb.mxu2 %v10171_v28  ;;  %v1100_v28 = vld [vmem:[#allocation1 + $0x1b] sm:$0xff] }
  0xbd   :  { %4586 = vmatpush.bf16.msrb.mxu3 %v10179_v29  ;;  %v10224_v29 = vld [vmem:[%s13386_s1 + $0x730] sm:$0xff] }
  0xbe   :  { %4548 = vmatpush.bf16.msrb.mxu0 %v10154_v37  ;;  %v4342_v53 = vpop.f32.mrf.mxu0 }
  0xbf   :  { %4561 = vmatpush.bf16.msrb.mxu1 %v10162_v38  ;;  %v4343_v56 = vadd.f32 %v4342_v53, %v11298_v22  ;;  %v4355_v57 = vpop.f32.mrf.mxu1  ;;  %v10233_v22 = vld [vmem:[%s13386_s1 + $0x778] sm:$0xff] }
  0xc0   :  { %4574 = vmatpush.bf16.msrb.mxu2 %v10170_v39  ;;  %v10222_v39 = vld [vmem:[%s13386_s1 + $0x720] sm:$0xff] }
  0xc1   :  { %4587 = vmatpush.bf16.msrb.mxu3 %v10178_v40  ;;  %4549 = vmatmul.bf16.vlgmr.msrb.gmra.mxu0 %v1091_v30  ;;  %v4356_v60 = vadd.f32 %v4355_v57, %v4343_v56  ;;  %v10232_v30 = vld [vmem:[%s13386_s1 + $0x770] sm:$0xff]  ;;  %v10230_v40 = vld [vmem:[%s13386_s1 + $0x760] sm:$0xff] }
  0xc2   :  { %4593 = vmatpush.bf16.msra.mxu0 %v10193_v41  ;;  %4562 = vmatmul.bf16.vlgmr.msrb.gmra.mxu1 %v1092_v33  ;;  %v10223_v33 = vld [vmem:[%s13386_s1 + $0x728] sm:$0xff]  ;;  %v10236_v57 = vld [vmem:[%s13386_s1 + $0x790] sm:$0xff] }
  0xc3   :  { %4606 = vmatpush.bf16.msra.mxu1 %v10201_v42  ;;  %4575 = vmatmul.bf16.vlgmr.msrb.gmra.mxu2 %v1093_v31  ;;  %v10240_v31 = vld [vmem:[%s13386_s1 + $0x7b0] sm:$0xff]  ;;  %v10238_v42 = vld [vmem:[%s13386_s1 + $0x7a0] sm:$0xff] }
  0xc4   :  { %4619 = vmatpush.bf16.msra.mxu2 %v10209_v43  ;;  %4588 = vmatmul.bf16.vlgmr.msrb.gmra.mxu3 %v1094_v34  ;;  %v10231_v34 = vld [vmem:[%s13386_s1 + $0x768] sm:$0xff]  ;;  %v10246_v43 = vld [vmem:[%s13386_s1 + $0x7e0] sm:$0xff] }
  0xc5   :  { %4632 = vmatpush.bf16.msra.mxu3 %v10217_v44 }
  0xc6   :  { %4594 = vmatpush.bf16.msra.mxu0 %v10192_v45  ;;  %v4368_v1 = vpop.f32.mrf.mxu2  ;;  %v4344_v4 = vpop.f32.mrf.mxu0  ;;  %v10221_v45 = vld [vmem:[%s13386_s1 + $0x718] sm:$0xff] }
  0xc7   :  { %4607 = vmatpush.bf16.msra.mxu1 %v10200_v46  ;;  %v4369_v2 = vadd.f32 %v4368_v1, %v4356_v60  ;;  %v4381_v3 = vpop.f32.mrf.mxu3  ;;  %v4357_v8 = vpop.f32.mrf.mxu1  ;;  %v10229_v46 = vld [vmem:[%s13386_s1 + $0x758] sm:$0xff]  ;;  %v10227_v60 = vld [vmem:[%s13386_s1 + $0x748] sm:$0xff] }
  0xc8   :  { %4620 = vmatpush.bf16.msra.mxu2 %v10208_v47  ;;  %v10237_v47 = vld [vmem:[%s13386_s1 + $0x798] sm:$0xff]  ;;  %v10234_v8 = vld [vmem:[%s13386_s1 + $0x780] sm:$0xff] }
  0xc9   :  { %4633 = vmatpush.bf16.msra.mxu3 %v10216_v48  ;;  %v4382_v7 = vadd.f32 %v4381_v3, %v4369_v2  ;;  %v10245_v48 = vld [vmem:[%s13386_s1 + $0x7d8] sm:$0xff]  ;;  %v1102_v2 = vld [vmem:[#allocation1 + $0x2d] sm:$0xff] }
  0xca   :  { %4595 = vmatpush.bf16.msra.mxu0 %v10191_v49  ;;  %v1104_v3 = vld [vmem:[#allocation1 + $0x3f] sm:$0xff] }
  0xcb   :  { %4608 = vmatpush.bf16.msra.mxu1 %v10199_v50 }
  0xcc   :  { %4621 = vmatpush.bf16.msra.mxu2 %v10207_v51 }
  0xcd   :  { %4634 = vmatpush.bf16.msra.mxu3 %v10215_v52 }
  0xce   :  { %4596 = vmatpush.bf16.msra.mxu0 %v10190_v54  ;;  %v4370_v15 = vpop.f32.mrf.mxu2  ;;  %v10220_v54 = vld [vmem:[%s13386_s1 + $0x710] sm:$0xff] }
  0xcf   :  { %4609 = vmatpush.bf16.msra.mxu1 %v10198_v55  ;;  %v4383_v16 = vpop.f32.mrf.mxu3  ;;  %v10228_v55 = vld [vmem:[%s13386_s1 + $0x750] sm:$0xff] }
  0xd0   :  { %4622 = vmatpush.bf16.msra.mxu2 %v10206_v58  ;;  %v10244_v58 = vld [vmem:[%s13386_s1 + $0x7d0] sm:$0xff] }
  0xd1   :  { %4635 = vmatpush.bf16.msra.mxu3 %v10214_v59  ;;  %v10219_v59 = vld [vmem:[%s13386_s1 + $0x708] sm:$0xff]  ;;  %v10264_v15 = vld [vmem:[%s13386_s1 + $0x870] sm:$0xff] }
  0xd2   :  { %4597 = vmatpush.bf16.msra.mxu0 %v10189_v61  ;;  %v10235_v61 = vld [vmem:[%s13386_s1 + $0x788] sm:$0xff]  ;;  %v10272_v16 = vld [vmem:[%s13386_s1 + $0x8b0] sm:$0xff] }
  0xd3   :  { %4610 = vmatpush.bf16.msra.mxu1 %v10197_v62  ;;  %v10243_v62 = vld [vmem:[%s13386_s1 + $0x7c8] sm:$0xff] }
  0xd4   :  { %4623 = vmatpush.bf16.msra.mxu2 %v10205_v63  ;;  %v1101_v63 = vld [vmem:[#allocation1 + $0x24] sm:$0xff] }
  0xd5   :  { %4636 = vmatpush.bf16.msra.mxu3 %v10213_v0  ;;  %v1103_v0 = vld [vmem:[#allocation1 + $0x36] sm:$0xff] }
  0xd6   :  { %4598 = vmatpush.bf16.msra.mxu0 %v10188_v5  ;;  %v33_v5 = vld [vmem:[%s13385_s0 + $0x20] sm:$0xff] }
  0xd7   :  { %4611 = vmatpush.bf16.msra.mxu1 %v10196_v6  ;;  %1106 = vst [vmem:[#allocation1] ss:$9 sm:$0xff] %v33_v5  ;;  %v10218_v6 = vld [vmem:[%s13386_s1 + $0x700] sm:$0xff]  ;;  %v10311_v5 = vld [vmem:[%s13386_s1 + $0x9e8] sm:$0xff] }
  0xd8   :  { %4624 = vmatpush.bf16.msra.mxu2 %v10204_v9  ;;  %v10242_v9 = vld [vmem:[%s13386_s1 + $0x7c0] sm:$0xff] }
  0xd9   :  { %4637 = vmatpush.bf16.msra.mxu3 %v10212_v10  ;;  %v10257_v10 = vld [vmem:[%s13386_s1 + $0x838] sm:$0xff] }
  0xda   :  { %4599 = vmatpush.bf16.msra.mxu0 %v10187_v11  ;;  %v10265_v11 = vld [vmem:[%s13386_s1 + $0x878] sm:$0xff] }
  0xdb   :  { %4612 = vmatpush.bf16.msra.mxu1 %v10195_v12  ;;  %v10273_v12 = vld [vmem:[%s13386_s1 + $0x8b8] sm:$0xff] }
  0xdc   :  { %4625 = vmatpush.bf16.msra.mxu2 %v10203_v13  ;;  %v10281_v13 = vld [vmem:[%s13386_s1 + $0x8f8] sm:$0xff] }
  0xdd   :  { %4638 = vmatpush.bf16.msra.mxu3 %v10211_v14  ;;  %v10256_v14 = vld [vmem:[%s13386_s1 + $0x830] sm:$0xff] }
  0xde   :  { %4600 = vmatpush.bf16.msra.mxu0 %v10186_v17  ;;  %v4394_v37 = vpop.f32.mrf.mxu0  ;;  %v10280_v17 = vld [vmem:[%s13386_s1 + $0x8f0] sm:$0xff] }
  0xdf   :  { %4613 = vmatpush.bf16.msra.mxu1 %v10194_v18  ;;  %v4395_v38 = vadd.f32 %v4394_v37, %v4382_v7  ;;  %v4407_v41 = vpop.f32.mrf.mxu1  ;;  %v10226_v7 = vld [vmem:[%s13386_s1 + $0x740] sm:$0xff]  ;;  %v10255_v18 = vld [vmem:[%s13386_s1 + $0x828] sm:$0xff] }
  0xe0   :  { %4626 = vmatpush.bf16.msra.mxu2 %v10202_v19  ;;  %v10263_v19 = vld [vmem:[%s13386_s1 + $0x868] sm:$0xff] }
  0xe1   :  { %4639 = vmatpush.bf16.msra.mxu3 %v10210_v20  ;;  %4601 = vmatmul.bf16.vlgmr.msra.gmra.mxu0 %v1097_v25  ;;  %v4408_v44 = vadd.f32 %v4407_v41, %v4395_v38  ;;  %v10271_v20 = vld [vmem:[%s13386_s1 + $0x8a8] sm:$0xff]  ;;  %v10262_v25 = vld [vmem:[%s13386_s1 + $0x860] sm:$0xff] }
  0xe2   :  { %4645 = vmatpush.bf16.msrb.mxu0 %v10225_v21  ;;  %4614 = vmatmul.bf16.vlgmr.msra.gmra.mxu1 %v1098_v27  ;;  %v10279_v21 = vld [vmem:[%s13386_s1 + $0x8e8] sm:$0xff]  ;;  %v10270_v27 = vld [vmem:[%s13386_s1 + $0x8a0] sm:$0xff] }
  0xe3   :  { %4658 = vmatpush.bf16.msrb.mxu1 %v10233_v22  ;;  %4627 = vmatmul.bf16.vlgmr.msra.gmra.mxu2 %v1099_v26 }
  0xe4   :  { %4671 = vmatpush.bf16.msrb.mxu2 %v10241_v23  ;;  %4640 = vmatmul.bf16.vlgmr.msra.gmra.mxu3 %v1100_v28  ;;  %v10278_v28 = vld [vmem:[%s13386_s1 + $0x8e0] sm:$0xff] }
  0xe5   :  { %4684 = vmatpush.bf16.msrb.mxu3 %v10249_v24  ;;  %v10254_v24 = vld [vmem:[%s13386_s1 + $0x820] sm:$0xff] }
  0xe6   :  { %4646 = vmatpush.bf16.msrb.mxu0 %v10224_v29  ;;  %v4420_v49 = vpop.f32.mrf.mxu2  ;;  %v4396_v52 = vpop.f32.mrf.mxu0 }
  0xe7   :  { %4659 = vmatpush.bf16.msrb.mxu1 %v10232_v30  ;;  %v4421_v50 = vadd.f32 %v4420_v49, %v4408_v44  ;;  %v4433_v51 = vpop.f32.mrf.mxu3  ;;  %v4409_v56 = vpop.f32.mrf.mxu1  ;;  %v10253_v30 = vld [vmem:[%s13386_s1 + $0x818] sm:$0xff]  ;;  %v10251_v44 = vld [vmem:[%s13386_s1 + $0x808] sm:$0xff]  ;;  %v10266_v52 = vld [vmem:[%s13386_s1 + $0x880] sm:$0xff] }
  0xe8   :  { %4672 = vmatpush.bf16.msrb.mxu2 %v10240_v31  ;;  %v10261_v31 = vld [vmem:[%s13386_s1 + $0x858] sm:$0xff] }
  0xe9   :  { %4685 = vmatpush.bf16.msrb.mxu3 %v10248_v32  ;;  %v11490_v53 = vadd.f32 %v4433_v51, %v4421_v50  ;;  %v10269_v32 = vld [vmem:[%s13386_s1 + $0x898] sm:$0xff]  ;;  %v10250_v50 = vld [vmem:[%s13386_s1 + $0x800] sm:$0xff] }
  0xea   :  { %4647 = vmatpush.bf16.msrb.mxu0 %v10223_v33  ;;  %v10277_v33 = vld [vmem:[%s13386_s1 + $0x8d8] sm:$0xff]  ;;  %v10258_v51 = vld [vmem:[%s13386_s1 + $0x840] sm:$0xff] }
  0xeb   :  { %4660 = vmatpush.bf16.msrb.mxu1 %v10231_v34  ;;  %v10305_v56 = vld [vmem:[%s13386_s1 + $0x9b8] sm:$0xff] }
  0xec   :  { %4673 = vmatpush.bf16.msrb.mxu2 %v10239_v35 }
  0xed   :  { %4686 = vmatpush.bf16.msrb.mxu3 %v10247_v36 }
  0xee   :  { %4648 = vmatpush.bf16.msrb.mxu0 %v10222_v39  ;;  %v4422_v1 = vpop.f32.mrf.mxu2  ;;  %v10252_v39 = vld [vmem:[%s13386_s1 + $0x810] sm:$0xff] }
  0xef   :  { %4661 = vmatpush.bf16.msrb.mxu1 %v10230_v40  ;;  %v4435_v4 = vpop.f32.mrf.mxu3  ;;  %v10260_v40 = vld [vmem:[%s13386_s1 + $0x850] sm:$0xff] }
  0xf0   :  { %4674 = vmatpush.bf16.msrb.mxu2 %v10238_v42  ;;  %v10268_v42 = vld [vmem:[%s13386_s1 + $0x890] sm:$0xff]  ;;  %v10303_v4 = vld [vmem:[%s13386_s1 + $0x9a8] sm:$0xff] }
  0xf1   :  { %4687 = vmatpush.bf16.msrb.mxu3 %v10246_v43  ;;  %v10276_v43 = vld [vmem:[%s13386_s1 + $0x8d0] sm:$0xff] }
  0xf2   :  { %4649 = vmatpush.bf16.msrb.mxu0 %v10221_v45  ;;  %v10259_v45 = vld [vmem:[%s13386_s1 + $0x848] sm:$0xff]  ;;  %v10312_v1 = vld [vmem:[%s13386_s1 + $0x9f0] sm:$0xff] }
  0xf3   :  { %4662 = vmatpush.bf16.msrb.mxu1 %v10229_v46  ;;  %v10267_v46 = vld [vmem:[%s13386_s1 + $0x888] sm:$0xff] }
  0xf4   :  { %4675 = vmatpush.bf16.msrb.mxu2 %v10237_v47  ;;  %v10275_v47 = vld [vmem:[%s13386_s1 + $0x8c8] sm:$0xff] }
  0xf5   :  { %4688 = vmatpush.bf16.msrb.mxu3 %v10245_v48 }
  0xf6   :  { %4650 = vmatpush.bf16.msrb.mxu0 %v10220_v54  ;;  %v10289_v54 = vld [vmem:[%s13386_s1 + $0x938] sm:$0xff] }
  0xf7   :  { %4663 = vmatpush.bf16.msrb.mxu1 %v10228_v55  ;;  %v10297_v55 = vld [vmem:[%s13386_s1 + $0x978] sm:$0xff] }
  0xf8   :  { %4676 = vmatpush.bf16.msrb.mxu2 %v10236_v57  ;;  %v10313_v57 = vld [vmem:[%s13386_s1 + $0x9f8] sm:$0xff] }
  0xf9   :  { %4689 = vmatpush.bf16.msrb.mxu3 %v10244_v58  ;;  %v1107_v58 = vld [vmem:[#allocation1] sm:$0xff] }
  0xfa   :  { %4651 = vmatpush.bf16.msrb.mxu0 %v10219_v59  ;;  %v1109_v59 = vld [vmem:[#allocation1 + $0x12] sm:$0xff] }
  0xfb   :  { %4664 = vmatpush.bf16.msrb.mxu1 %v10227_v60  ;;  %v1108_v60 = vld [vmem:[#allocation1 + $0x9] sm:$0xff] }
  0xfc   :  { %4677 = vmatpush.bf16.msrb.mxu2 %v10235_v61  ;;  %v1110_v61 = vld [vmem:[#allocation1 + $0x1b] sm:$0xff] }
  0xfd   :  { %4690 = vmatpush.bf16.msrb.mxu3 %v10243_v62  ;;  %v10288_v62 = vld [vmem:[%s13386_s1 + $0x930] sm:$0xff] }
  0xfe   :  { %4652 = vmatpush.bf16.msrb.mxu0 %v10218_v6  ;;  %v4446_v22 = vpop.f32.mrf.mxu0 }
  0xff   :  { %4665 = vmatpush.bf16.msrb.mxu1 %v10226_v7  ;;  %v4447_v23 = vadd.f32 %v4446_v22, %v11490_v53  ;;  %v4459_v26 = vpop.f32.mrf.mxu1  ;;  %v10274_v53 = vld [vmem:[%s13386_s1 + $0x8c0] sm:$0xff] }
 0x100   :  { %4678 = vmatpush.bf16.msrb.mxu2 %v10234_v8  ;;  %v10286_v8 = vld [vmem:[%s13386_s1 + $0x920] sm:$0xff] }
 0x101   :  { %4691 = vmatpush.bf16.msrb.mxu3 %v10242_v9  ;;  %4653 = vmatmul.bf16.vlgmr.msrb.gmra.mxu0 %v1101_v63  ;;  %v4460_v29 = vadd.f32 %v4459_v26, %v4447_v23  ;;  %v10296_v63 = vld [vmem:[%s13386_s1 + $0x970] sm:$0xff]  ;;  %v10294_v9 = vld [vmem:[%s13386_s1 + $0x960] sm:$0xff] }
 0x102   :  { %4697 = vmatpush.bf16.msra.mxu0 %v10257_v10  ;;  %4666 = vmatmul.bf16.vlgmr.msrb.gmra.mxu1 %v1102_v2  ;;  %v10287_v2 = vld [vmem:[%s13386_s1 + $0x928] sm:$0xff]  ;;  %v10284_v23 = vld [vmem:[%s13386_s1 + $0x910] sm:$0xff] }
 0x103   :  { %4710 = vmatpush.bf16.msra.mxu1 %v10265_v11  ;;  %4679 = vmatmul.bf16.vlgmr.msrb.gmra.mxu2 %v1103_v0  ;;  %v10304_v0 = vld [vmem:[%s13386_s1 + $0x9b0] sm:$0xff]  ;;  %v10302_v11 = vld [vmem:[%s13386_s1 + $0x9a0] sm:$0xff] }
 0x104   :  { %4723 = vmatpush.bf16.msra.mxu2 %v10273_v12  ;;  %4692 = vmatmul.bf16.vlgmr.msrb.gmra.mxu3 %v1104_v3  ;;  %v10295_v3 = vld [vmem:[%s13386_s1 + $0x968] sm:$0xff]  ;;  %v10310_v12 = vld [vmem:[%s13386_s1 + $0x9e0] sm:$0xff]  ;;  %v10300_v26 = vld [vmem:[%s13386_s1 + $0x990] sm:$0xff] }
 0x105   :  { %4736 = vmatpush.bf16.msra.mxu3 %v10281_v13 }
 0x106   :  { %4698 = vmatpush.bf16.msra.mxu0 %v10256_v14  ;;  %v4472_v34 = vpop.f32.mrf.mxu2  ;;  %v4448_v37 = vpop.f32.mrf.mxu0  ;;  %v10285_v14 = vld [vmem:[%s13386_s1 + $0x918] sm:$0xff] }
 0x107   :  { %4711 = vmatpush.bf16.msra.mxu1 %v10264_v15  ;;  %v4473_v35 = vadd.f32 %v4472_v34, %v4460_v29  ;;  %v4485_v36 = vpop.f32.mrf.mxu3  ;;  %v4461_v41 = vpop.f32.mrf.mxu1  ;;  %v10293_v15 = vld [vmem:[%s13386_s1 + $0x958] sm:$0xff]  ;;  %v10291_v29 = vld [vmem:[%s13386_s1 + $0x948] sm:$0xff] }
 0x108   :  { %4724 = vmatpush.bf16.msra.mxu2 %v10272_v16  ;;  %v10301_v16 = vld [vmem:[%s13386_s1 + $0x998] sm:$0xff]  ;;  %v10298_v41 = vld [vmem:[%s13386_s1 + $0x980] sm:$0xff] }
 0x109   :  { %4737 = vmatpush.bf16.msra.mxu3 %v10280_v17  ;;  %v4486_v38 = vadd.f32 %v4485_v36, %v4473_v35  ;;  %v10309_v17 = vld [vmem:[%s13386_s1 + $0x9d8] sm:$0xff]  ;;  %v1112_v35 = vld [vmem:[#allocation1 + $0x2d] sm:$0xff] }
 0x10a   :  { %4699 = vmatpush.bf16.msra.mxu0 %v10255_v18  ;;  %v1114_v36 = vld [vmem:[#allocation1 + $0x3f] sm:$0xff] }
 0x10b   :  { %4712 = vmatpush.bf16.msra.mxu1 %v10263_v19 }
 0x10c   :  { %4725 = vmatpush.bf16.msra.mxu2 %v10271_v20 }
 0x10d   :  { %4738 = vmatpush.bf16.msra.mxu3 %v10279_v21 }
 0x10e   :  { %4700 = vmatpush.bf16.msra.mxu0 %v10254_v24  ;;  %v4474_v48 = vpop.f32.mrf.mxu2  ;;  %v10292_v24 = vld [vmem:[%s13386_s1 + $0x950] sm:$0xff] }
 0x10f   :  { %4713 = vmatpush.bf16.msra.mxu1 %v10262_v25  ;;  %v4487_v49 = vpop.f32.mrf.mxu3  ;;  %v10328_v48 = vld [vmem:[%s13386_s1 + $0xa70] sm:$0xff] }
 0x110   :  { %4726 = vmatpush.bf16.msra.mxu2 %v10270_v27  ;;  %v10308_v27 = vld [vmem:[%s13386_s1 + $0x9d0] sm:$0xff] }
 0x111   :  { %4739 = vmatpush.bf16.msra.mxu3 %v10278_v28  ;;  %v10283_v28 = vld [vmem:[%s13386_s1 + $0x908] sm:$0xff]  ;;  %v10336_v49 = vld [vmem:[%s13386_s1 + $0xab0] sm:$0xff] }
 0x112   :  { %4701 = vmatpush.bf16.msra.mxu0 %v10253_v30  ;;  %v10299_v30 = vld [vmem:[%s13386_s1 + $0x988] sm:$0xff] }
 0x113   :  { %4714 = vmatpush.bf16.msra.mxu1 %v10261_v31  ;;  %v10307_v31 = vld [vmem:[%s13386_s1 + $0x9c8] sm:$0xff] }
 0x114   :  { %4727 = vmatpush.bf16.msra.mxu2 %v10269_v32  ;;  %v1111_v32 = vld [vmem:[#allocation1 + $0x24] sm:$0xff] }
 0x115   :  { %4740 = vmatpush.bf16.msra.mxu3 %v10277_v33  ;;  %v1113_v33 = vld [vmem:[#allocation1 + $0x36] sm:$0xff] }
 0x116   :  { %4702 = vmatpush.bf16.msra.mxu0 %v10252_v39  ;;  %v10282_v39 = vld [vmem:[%s13386_s1 + $0x900] sm:$0xff] }
 0x117   :  { %4715 = vmatpush.bf16.msra.mxu1 %v10260_v40  ;;  %v10290_v40 = vld [vmem:[%s13386_s1 + $0x940] sm:$0xff] }
 0x118   :  { %4728 = vmatpush.bf16.msra.mxu2 %v10268_v42  ;;  %v10306_v42 = vld [vmem:[%s13386_s1 + $0x9c0] sm:$0xff] }
 0x119   :  { %4741 = vmatpush.bf16.msra.mxu3 %v10276_v43  ;;  %v10321_v43 = vld [vmem:[%s13386_s1 + $0xa38] sm:$0xff] }
 0x11a   :  { %4703 = vmatpush.bf16.msra.mxu0 %v10251_v44  ;;  %v10329_v44 = vld [vmem:[%s13386_s1 + $0xa78] sm:$0xff] }
 0x11b   :  { %4716 = vmatpush.bf16.msra.mxu1 %v10259_v45  ;;  %v10337_v45 = vld [vmem:[%s13386_s1 + $0xab8] sm:$0xff] }
 0x11c   :  { %4729 = vmatpush.bf16.msra.mxu2 %v10267_v46  ;;  %v10345_v46 = vld [vmem:[%s13386_s1 + $0xaf8] sm:$0xff] }
 0x11d   :  { %4742 = vmatpush.bf16.msra.mxu3 %v10275_v47  ;;  %v10320_v47 = vld [vmem:[%s13386_s1 + $0xa30] sm:$0xff] }
 0x11e   :  { %4704 = vmatpush.bf16.msra.mxu0 %v10250_v50  ;;  %v4498_v6 = vpop.f32.mrf.mxu0  ;;  %v10344_v50 = vld [vmem:[%s13386_s1 + $0xaf0] sm:$0xff] }
 0x11f   :  { %4717 = vmatpush.bf16.msra.mxu1 %v10258_v51  ;;  %v4499_v7 = vadd.f32 %v4498_v6, %v4486_v38  ;;  %v4511_v10 = vpop.f32.mrf.mxu1  ;;  %v34_v38 = vld [vmem:[%s13385_s0 + $0x28] sm:$0xff] }
 0x120   :  { %4730 = vmatpush.bf16.msra.mxu2 %v10266_v52  ;;  %1116 = vst [vmem:[#allocation1] ss:$9 sm:$0xff] %v34_v38  ;;  %v10319_v51 = vld [vmem:[%s13386_s1 + $0xa28] sm:$0xff] }
 0x121   :  { %4743 = vmatpush.bf16.msra.mxu3 %v10274_v53  ;;  %4705 = vmatmul.bf16.vlgmr.msra.gmra.mxu0 %v1107_v58  ;;  %v4512_v13 = vadd.f32 %v4511_v10, %v4499_v7  ;;  %v10327_v52 = vld [vmem:[%s13386_s1 + $0xa68] sm:$0xff]  ;;  %v10326_v58 = vld [vmem:[%s13386_s1 + $0xa60] sm:$0xff] }
 0x122   :  { %4749 = vmatpush.bf16.msrb.mxu0 %v10289_v54  ;;  %4718 = vmatmul.bf16.vlgmr.msra.gmra.mxu1 %v1108_v60  ;;  %v10335_v53 = vld [vmem:[%s13386_s1 + $0xaa8] sm:$0xff]  ;;  %v10334_v60 = vld [vmem:[%s13386_s1 + $0xaa0] sm:$0xff] }
 0x123   :  { %4762 = vmatpush.bf16.msrb.mxu1 %v10297_v55  ;;  %4731 = vmatmul.bf16.vlgmr.msra.gmra.mxu2 %v1109_v59  ;;  %v10343_v54 = vld [vmem:[%s13386_s1 + $0xae8] sm:$0xff] }
 0x124   :  { %4775 = vmatpush.bf16.msrb.mxu2 %v10305_v56  ;;  %4744 = vmatmul.bf16.vlgmr.msra.gmra.mxu3 %v1110_v61  ;;  %v10342_v61 = vld [vmem:[%s13386_s1 + $0xae0] sm:$0xff]  ;;  %v10375_v38 = vld [vmem:[%s13386_s1 + $0xbe8] sm:$0xff] }
 0x125   :  { %4788 = vmatpush.bf16.msrb.mxu3 %v10313_v57  ;;  %v10318_v57 = vld [vmem:[%s13386_s1 + $0xa20] sm:$0xff] }
 0x126   :  { %4750 = vmatpush.bf16.msrb.mxu0 %v10288_v62  ;;  %v4524_v18 = vpop.f32.mrf.mxu2  ;;  %v4500_v21 = vpop.f32.mrf.mxu0 }
 0x127   :  { %4763 = vmatpush.bf16.msrb.mxu1 %v10296_v63  ;;  %v4525_v19 = vadd.f32 %v4524_v18, %v4512_v13  ;;  %v4537_v20 = vpop.f32.mrf.mxu3  ;;  %v4513_v25 = vpop.f32.mrf.mxu1  ;;  %v10317_v63 = vld [vmem:[%s13386_s1 + $0xa18] sm:$0xff]  ;;  %v10315_v13 = vld [vmem:[%s13386_s1 + $0xa08] sm:$0xff]  ;;  %v10330_v21 = vld [vmem:[%s13386_s1 + $0xa80] sm:$0xff] }
 0x128   :  { %4776 = vmatpush.bf16.msrb.mxu2 %v10304_v0  ;;  %v10325_v0 = vld [vmem:[%s13386_s1 + $0xa58] sm:$0xff] }
 0x129   :  { %4789 = vmatpush.bf16.msrb.mxu3 %v10312_v1  ;;  %v11688_v22 = vadd.f32 %v4537_v20, %v4525_v19  ;;  %v10333_v1 = vld [vmem:[%s13386_s1 + $0xa98] sm:$0xff]  ;;  %v10314_v19 = vld [vmem:[%s13386_s1 + $0xa00] sm:$0xff] }
 0x12a   :  { %4751 = vmatpush.bf16.msrb.mxu0 %v10287_v2  ;;  %v10341_v2 = vld [vmem:[%s13386_s1 + $0xad8] sm:$0xff]  ;;  %v10322_v20 = vld [vmem:[%s13386_s1 + $0xa40] sm:$0xff] }
 0x12b   :  { %4764 = vmatpush.bf16.msrb.mxu1 %v10295_v3  ;;  %v10369_v25 = vld [vmem:[%s13386_s1 + $0xbb8] sm:$0xff] }
 0x12c   :  { %4777 = vmatpush.bf16.msrb.mxu2 %v10303_v4 }
 0x12d   :  { %4790 = vmatpush.bf16.msrb.mxu3 %v10311_v5 }
 0x12e   :  { %4752 = vmatpush.bf16.msrb.mxu0 %v10286_v8  ;;  %v4526_v34 = vpop.f32.mrf.mxu2  ;;  %v10316_v8 = vld [vmem:[%s13386_s1 + $0xa10] sm:$0xff] }
 0x12f   :  { %4765 = vmatpush.bf16.msrb.mxu1 %v10294_v9  ;;  %v4539_v37 = vpop.f32.mrf.mxu3  ;;  %v10324_v9 = vld [vmem:[%s13386_s1 + $0xa50] sm:$0xff] }
 0x130   :  { %4778 = vmatpush.bf16.msrb.mxu2 %v10302_v11  ;;  %v10332_v11 = vld [vmem:[%s13386_s1 + $0xa90] sm:$0xff]  ;;  %v10367_v37 = vld [vmem:[%s13386_s1 + $0xba8] sm:$0xff] }
 0x131   :  { %4791 = vmatpush.bf16.msrb.mxu3 %v10310_v12  ;;  %v10340_v12 = vld [vmem:[%s13386_s1 + $0xad0] sm:$0xff] }
 0x132   :  { %4753 = vmatpush.bf16.msrb.mxu0 %v10285_v14  ;;  %v10323_v14 = vld [vmem:[%s13386_s1 + $0xa48] sm:$0xff]  ;;  %v10376_v34 = vld [vmem:[%s13386_s1 + $0xbf0] sm:$0xff] }
 0x133   :  { %4766 = vmatpush.bf16.msrb.mxu1 %v10293_v15  ;;  %v10331_v15 = vld [vmem:[%s13386_s1 + $0xa88] sm:$0xff] }
 0x134   :  { %4779 = vmatpush.bf16.msrb.mxu2 %v10301_v16  ;;  %v10339_v16 = vld [vmem:[%s13386_s1 + $0xac8] sm:$0xff] }
 0x135   :  { %4792 = vmatpush.bf16.msrb.mxu3 %v10309_v17 }
 0x136   :  { %4754 = vmatpush.bf16.msrb.mxu0 %v10284_v23  ;;  %v10353_v23 = vld [vmem:[%s13386_s1 + $0xb38] sm:$0xff] }
 0x137   :  { %4767 = vmatpush.bf16.msrb.mxu1 %v10292_v24  ;;  %v10361_v24 = vld [vmem:[%s13386_s1 + $0xb78] sm:$0xff] }
 0x138   :  { %4780 = vmatpush.bf16.msrb.mxu2 %v10300_v26  ;;  %v10377_v26 = vld [vmem:[%s13386_s1 + $0xbf8] sm:$0xff] }
 0x139   :  { %4793 = vmatpush.bf16.msrb.mxu3 %v10308_v27  ;;  %v1117_v27 = vld [vmem:[#allocation1] sm:$0xff] }
 0x13a   :  { %4755 = vmatpush.bf16.msrb.mxu0 %v10283_v28  ;;  %v1119_v28 = vld [vmem:[#allocation1 + $0x12] sm:$0xff] }
 0x13b   :  { %4768 = vmatpush.bf16.msrb.mxu1 %v10291_v29  ;;  %v1118_v29 = vld [vmem:[#allocation1 + $0x9] sm:$0xff] }
 0x13c   :  { %4781 = vmatpush.bf16.msrb.mxu2 %v10299_v30  ;;  %v1120_v30 = vld [vmem:[#allocation1 + $0x1b] sm:$0xff] }
 0x13d   :  { %4794 = vmatpush.bf16.msrb.mxu3 %v10307_v31  ;;  %v10352_v31 = vld [vmem:[%s13386_s1 + $0xb30] sm:$0xff] }
 0x13e   :  { %4756 = vmatpush.bf16.msrb.mxu0 %v10282_v39  ;;  %v4550_v55 = vpop.f32.mrf.mxu0 }
 0x13f   :  { %4769 = vmatpush.bf16.msrb.mxu1 %v10290_v40  ;;  %v4551_v56 = vadd.f32 %v4550_v55, %v11688_v22  ;;  %v4563_v59 = vpop.f32.mrf.mxu1  ;;  %v10338_v22 = vld [vmem:[%s13386_s1 + $0xac0] sm:$0xff] }
 0x140   :  { %4782 = vmatpush.bf16.msrb.mxu2 %v10298_v41  ;;  %v10350_v41 = vld [vmem:[%s13386_s1 + $0xb20] sm:$0xff] }
 0x141   :  { %4795 = vmatpush.bf16.msrb.mxu3 %v10306_v42  ;;  %4757 = vmatmul.bf16.vlgmr.msrb.gmra.mxu0 %v1111_v32  ;;  %v4564_v62 = vadd.f32 %v4563_v59, %v4551_v56  ;;  %v10360_v32 = vld [vmem:[%s13386_s1 + $0xb70] sm:$0xff]  ;;  %v10358_v42 = vld [vmem:[%s13386_s1 + $0xb60] sm:$0xff] }
 0x142   :  { %4801 = vmatpush.bf16.msra.mxu0 %v10321_v43  ;;  %4770 = vmatmul.bf16.vlgmr.msrb.gmra.mxu1 %v1112_v35  ;;  %v10351_v35 = vld [vmem:[%s13386_s1 + $0xb28] sm:$0xff]  ;;  %v10348_v56 = vld [vmem:[%s13386_s1 + $0xb10] sm:$0xff] }
 0x143   :  { %4814 = vmatpush.bf16.msra.mxu1 %v10329_v44  ;;  %4783 = vmatmul.bf16.vlgmr.msrb.gmra.mxu2 %v1113_v33  ;;  %v10368_v33 = vld [vmem:[%s13386_s1 + $0xbb0] sm:$0xff]  ;;  %v10366_v44 = vld [vmem:[%s13386_s1 + $0xba0] sm:$0xff] }
 0x144   :  { %4827 = vmatpush.bf16.msra.mxu2 %v10337_v45  ;;  %4796 = vmatmul.bf16.vlgmr.msrb.gmra.mxu3 %v1114_v36  ;;  %v10359_v36 = vld [vmem:[%s13386_s1 + $0xb68] sm:$0xff]  ;;  %v10374_v45 = vld [vmem:[%s13386_s1 + $0xbe0] sm:$0xff]  ;;  %v10364_v59 = vld [vmem:[%s13386_s1 + $0xb90] sm:$0xff] }
 0x145   :  { %4840 = vmatpush.bf16.msra.mxu3 %v10345_v46 }
 0x146   :  { %4802 = vmatpush.bf16.msra.mxu0 %v10320_v47  ;;  %v4576_v3 = vpop.f32.mrf.mxu2  ;;  %v4552_v6 = vpop.f32.mrf.mxu0  ;;  %v10349_v47 = vld [vmem:[%s13386_s1 + $0xb18] sm:$0xff] }
 0x147   :  { %4815 = vmatpush.bf16.msra.mxu1 %v10328_v48  ;;  %v4577_v4 = vadd.f32 %v4576_v3, %v4564_v62  ;;  %v4589_v5 = vpop.f32.mrf.mxu3  ;;  %v4565_v10 = vpop.f32.mrf.mxu1  ;;  %v10357_v48 = vld [vmem:[%s13386_s1 + $0xb58] sm:$0xff]  ;;  %v10355_v62 = vld [vmem:[%s13386_s1 + $0xb48] sm:$0xff] }
 0x148   :  { %4828 = vmatpush.bf16.msra.mxu2 %v10336_v49  ;;  %v10365_v49 = vld [vmem:[%s13386_s1 + $0xb98] sm:$0xff]  ;;  %v10362_v10 = vld [vmem:[%s13386_s1 + $0xb80] sm:$0xff] }
 0x149   :  { %4841 = vmatpush.bf16.msra.mxu3 %v10344_v50  ;;  %v4590_v7 = vadd.f32 %v4589_v5, %v4577_v4  ;;  %v10373_v50 = vld [vmem:[%s13386_s1 + $0xbd8] sm:$0xff]  ;;  %v1122_v4 = vld [vmem:[#allocation1 + $0x2d] sm:$0xff] }
 0x14a   :  { %4803 = vmatpush.bf16.msra.mxu0 %v10319_v51  ;;  %v1124_v5 = vld [vmem:[#allocation1 + $0x3f] sm:$0xff] }
 0x14b   :  { %4816 = vmatpush.bf16.msra.mxu1 %v10327_v52 }
 0x14c   :  { %4829 = vmatpush.bf16.msra.mxu2 %v10335_v53 }
 0x14d   :  { %4842 = vmatpush.bf16.msra.mxu3 %v10343_v54 }
 0x14e   :  { %4804 = vmatpush.bf16.msra.mxu0 %v10318_v57  ;;  %v4578_v17 = vpop.f32.mrf.mxu2  ;;  %v10356_v57 = vld [vmem:[%s13386_s1 + $0xb50] sm:$0xff] }
 0x14f   :  { %4817 = vmatpush.bf16.msra.mxu1 %v10326_v58  ;;  %v4591_v18 = vpop.f32.mrf.mxu3  ;;  %v10392_v17 = vld [vmem:[%s13386_s1 + $0xc70] sm:$0xff] }
 0x150   :  { %4830 = vmatpush.bf16.msra.mxu2 %v10334_v60  ;;  %v10372_v60 = vld [vmem:[%s13386_s1 + $0xbd0] sm:$0xff] }
 0x151   :  { %4843 = vmatpush.bf16.msra.mxu3 %v10342_v61  ;;  %v10347_v61 = vld [vmem:[%s13386_s1 + $0xb08] sm:$0xff]  ;;  %v10400_v18 = vld [vmem:[%s13386_s1 + $0xcb0] sm:$0xff] }
 0x152   :  { %4805 = vmatpush.bf16.msra.mxu0 %v10317_v63  ;;  %v10363_v63 = vld [vmem:[%s13386_s1 + $0xb88] sm:$0xff] }
 0x153   :  { %4818 = vmatpush.bf16.msra.mxu1 %v10325_v0  ;;  %v10371_v0 = vld [vmem:[%s13386_s1 + $0xbc8] sm:$0xff] }
 0x154   :  { %4831 = vmatpush.bf16.msra.mxu2 %v10333_v1  ;;  %v1121_v1 = vld [vmem:[#allocation1 + $0x24] sm:$0xff] }
 0x155   :  { %4844 = vmatpush.bf16.msra.mxu3 %v10341_v2  ;;  %v1123_v2 = vld [vmem:[#allocation1 + $0x36] sm:$0xff] }
 0x156   :  { %4806 = vmatpush.bf16.msra.mxu0 %v10316_v8  ;;  %v10346_v8 = vld [vmem:[%s13386_s1 + $0xb00] sm:$0xff] }
 0x157   :  { %4819 = vmatpush.bf16.msra.mxu1 %v10324_v9  ;;  %v10354_v9 = vld [vmem:[%s13386_s1 + $0xb40] sm:$0xff] }
 0x158   :  { %4832 = vmatpush.bf16.msra.mxu2 %v10332_v11  ;;  %v10370_v11 = vld [vmem:[%s13386_s1 + $0xbc0] sm:$0xff] }
 0x159   :  { %4845 = vmatpush.bf16.msra.mxu3 %v10340_v12  ;;  %v10385_v12 = vld [vmem:[%s13386_s1 + $0xc38] sm:$0xff] }
 0x15a   :  { %4807 = vmatpush.bf16.msra.mxu0 %v10315_v13  ;;  %v10393_v13 = vld [vmem:[%s13386_s1 + $0xc78] sm:$0xff] }
 0x15b   :  { %4820 = vmatpush.bf16.msra.mxu1 %v10323_v14  ;;  %v10401_v14 = vld [vmem:[%s13386_s1 + $0xcb8] sm:$0xff] }
 0x15c   :  { %4833 = vmatpush.bf16.msra.mxu2 %v10331_v15  ;;  %v10409_v15 = vld [vmem:[%s13386_s1 + $0xcf8] sm:$0xff] }
 0x15d   :  { %4846 = vmatpush.bf16.msra.mxu3 %v10339_v16  ;;  %v10384_v16 = vld [vmem:[%s13386_s1 + $0xc30] sm:$0xff] }
 0x15e   :  { %4808 = vmatpush.bf16.msra.mxu0 %v10314_v19  ;;  %v4602_v39 = vpop.f32.mrf.mxu0  ;;  %v10408_v19 = vld [vmem:[%s13386_s1 + $0xcf0] sm:$0xff] }
 0x15f   :  { %4821 = vmatpush.bf16.msra.mxu1 %v10322_v20  ;;  %v4603_v40 = vadd.f32 %v4602_v39, %v4590_v7  ;;  %v4615_v43 = vpop.f32.mrf.mxu1  ;;  %v35_v7 = vld [vmem:[%s13385_s0 + $0x30] sm:$0xff]  ;;  %v10383_v20 = vld [vmem:[%s13386_s1 + $0xc28] sm:$0xff] }
 0x160   :  { %4834 = vmatpush.bf16.msra.mxu2 %v10330_v21  ;;  %1126 = vst [vmem:[#allocation1] ss:$9 sm:$0xff] %v35_v7  ;;  %v10391_v21 = vld [vmem:[%s13386_s1 + $0xc68] sm:$0xff] }
 0x161   :  { %4847 = vmatpush.bf16.msra.mxu3 %v10338_v22  ;;  %4809 = vmatmul.bf16.vlgmr.msra.gmra.mxu0 %v1117_v27  ;;  %v4616_v46 = vadd.f32 %v4615_v43, %v4603_v40  ;;  %v10399_v22 = vld [vmem:[%s13386_s1 + $0xca8] sm:$0xff]  ;;  %v10390_v27 = vld [vmem:[%s13386_s1 + $0xc60] sm:$0xff] }
 0x162   :  { %4853 = vmatpush.bf16.msrb.mxu0 %v10353_v23  ;;  %4822 = vmatmul.bf16.vlgmr.msra.gmra.mxu1 %v1118_v29  ;;  %v10407_v23 = vld [vmem:[%s13386_s1 + $0xce8] sm:$0xff]  ;;  %v10398_v29 = vld [vmem:[%s13386_s1 + $0xca0] sm:$0xff] }
 0x163   :  { %4866 = vmatpush.bf16.msrb.mxu1 %v10361_v24  ;;  %4835 = vmatmul.bf16.vlgmr.msra.gmra.mxu2 %v1119_v28  ;;  %v10439_v7 = vld [vmem:[%s13386_s1 + $0xde8] sm:$0xff] }
 0x164   :  { %4879 = vmatpush.bf16.msrb.mxu2 %v10369_v25  ;;  %4848 = vmatmul.bf16.vlgmr.msra.gmra.mxu3 %v1120_v30  ;;  %v10406_v30 = vld [vmem:[%s13386_s1 + $0xce0] sm:$0xff] }
 0x165   :  { %4892 = vmatpush.bf16.msrb.mxu3 %v10377_v26  ;;  %v10382_v26 = vld [vmem:[%s13386_s1 + $0xc20] sm:$0xff] }
 0x166   :  { %4854 = vmatpush.bf16.msrb.mxu0 %v10352_v31  ;;  %v4628_v51 = vpop.f32.mrf.mxu2  ;;  %v4604_v54 = vpop.f32.mrf.mxu0 }
 0x167   :  { %4867 = vmatpush.bf16.msrb.mxu1 %v10360_v32  ;;  %v4629_v52 = vadd.f32 %v4628_v51, %v4616_v46  ;;  %v4641_v53 = vpop.f32.mrf.mxu3  ;;  %v4617_v58 = vpop.f32.mrf.mxu1  ;;  %v10381_v32 = vld [vmem:[%s13386_s1 + $0xc18] sm:$0xff]  ;;  %v10379_v46 = vld [vmem:[%s13386_s1 + $0xc08] sm:$0xff]  ;;  %v10394_v54 = vld [vmem:[%s13386_s1 + $0xc80] sm:$0xff] }
 0x168   :  { %4880 = vmatpush.bf16.msrb.mxu2 %v10368_v33  ;;  %v10389_v33 = vld [vmem:[%s13386_s1 + $0xc58] sm:$0xff] }
 0x169   :  { %4893 = vmatpush.bf16.msrb.mxu3 %v10376_v34  ;;  %v11886_v55 = vadd.f32 %v4641_v53, %v4629_v52  ;;  %v10397_v34 = vld [vmem:[%s13386_s1 + $0xc98] sm:$0xff]  ;;  %v10378_v52 = vld [vmem:[%s13386_s1 + $0xc00] sm:$0xff] }
 0x16a   :  { %4855 = vmatpush.bf16.msrb.mxu0 %v10351_v35  ;;  %v10405_v35 = vld [vmem:[%s13386_s1 + $0xcd8] sm:$0xff]  ;;  %v10386_v53 = vld [vmem:[%s13386_s1 + $0xc40] sm:$0xff] }
 0x16b   :  { %4868 = vmatpush.bf16.msrb.mxu1 %v10359_v36  ;;  %v10433_v58 = vld [vmem:[%s13386_s1 + $0xdb8] sm:$0xff] }
 0x16c   :  { %4881 = vmatpush.bf16.msrb.mxu2 %v10367_v37 }
 0x16d   :  { %4894 = vmatpush.bf16.msrb.mxu3 %v10375_v38 }
 0x16e   :  { %4856 = vmatpush.bf16.msrb.mxu0 %v10350_v41  ;;  %v4630_v3 = vpop.f32.mrf.mxu2  ;;  %v10380_v41 = vld [vmem:[%s13386_s1 + $0xc10] sm:$0xff] }
 0x16f   :  { %4869 = vmatpush.bf16.msrb.mxu1 %v10358_v42  ;;  %v4643_v6 = vpop.f32.mrf.mxu3  ;;  %v10388_v42 = vld [vmem:[%s13386_s1 + $0xc50] sm:$0xff] }
 0x170   :  { %4882 = vmatpush.bf16.msrb.mxu2 %v10366_v44  ;;  %v10396_v44 = vld [vmem:[%s13386_s1 + $0xc90] sm:$0xff]  ;;  %v10431_v6 = vld [vmem:[%s13386_s1 + $0xda8] sm:$0xff] }
 0x171   :  { %4895 = vmatpush.bf16.msrb.mxu3 %v10374_v45  ;;  %v10404_v45 = vld [vmem:[%s13386_s1 + $0xcd0] sm:$0xff] }
 0x172   :  { %4857 = vmatpush.bf16.msrb.mxu0 %v10349_v47  ;;  %v10387_v47 = vld [vmem:[%s13386_s1 + $0xc48] sm:$0xff]  ;;  %v10440_v3 = vld [vmem:[%s13386_s1 + $0xdf0] sm:$0xff] }
 0x173   :  { %4870 = vmatpush.bf16.msrb.mxu1 %v10357_v48  ;;  %v10395_v48 = vld [vmem:[%s13386_s1 + $0xc88] sm:$0xff] }
 0x174   :  { %4883 = vmatpush.bf16.msrb.mxu2 %v10365_v49  ;;  %v10403_v49 = vld [vmem:[%s13386_s1 + $0xcc8] sm:$0xff] }
 0x175   :  { %4896 = vmatpush.bf16.msrb.mxu3 %v10373_v50 }
 0x176   :  { %4858 = vmatpush.bf16.msrb.mxu0 %v10348_v56  ;;  %v10417_v56 = vld [vmem:[%s13386_s1 + $0xd38] sm:$0xff] }
 0x177   :  { %4871 = vmatpush.bf16.msrb.mxu1 %v10356_v57  ;;  %v10425_v57 = vld [vmem:[%s13386_s1 + $0xd78] sm:$0xff] }
 0x178   :  { %4884 = vmatpush.bf16.msrb.mxu2 %v10364_v59  ;;  %v10441_v59 = vld [vmem:[%s13386_s1 + $0xdf8] sm:$0xff] }
 0x179   :  { %4897 = vmatpush.bf16.msrb.mxu3 %v10372_v60  ;;  %v1127_v60 = vld [vmem:[#allocation1] sm:$0xff] }
 0x17a   :  { %4859 = vmatpush.bf16.msrb.mxu0 %v10347_v61  ;;  %v1129_v61 = vld [vmem:[#allocation1 + $0x12] sm:$0xff] }
 0x17b   :  { %4872 = vmatpush.bf16.msrb.mxu1 %v10355_v62  ;;  %v1128_v62 = vld [vmem:[#allocation1 + $0x9] sm:$0xff] }
 0x17c   :  { %4885 = vmatpush.bf16.msrb.mxu2 %v10363_v63  ;;  %v1130_v63 = vld [vmem:[#allocation1 + $0x1b] sm:$0xff] }
 0x17d   :  { %4898 = vmatpush.bf16.msrb.mxu3 %v10371_v0  ;;  %v10416_v0 = vld [vmem:[%s13386_s1 + $0xd30] sm:$0xff] }
 0x17e   :  { %4860 = vmatpush.bf16.msrb.mxu0 %v10346_v8  ;;  %v4654_v24 = vpop.f32.mrf.mxu0 }
 0x17f   :  { %4873 = vmatpush.bf16.msrb.mxu1 %v10354_v9  ;;  %v4655_v25 = vadd.f32 %v4654_v24, %v11886_v55  ;;  %v4667_v28 = vpop.f32.mrf.mxu1  ;;  %v10402_v55 = vld [vmem:[%s13386_s1 + $0xcc0] sm:$0xff] }
 0x180   :  { %4886 = vmatpush.bf16.msrb.mxu2 %v10362_v10  ;;  %v10414_v10 = vld [vmem:[%s13386_s1 + $0xd20] sm:$0xff] }
 0x181   :  { %4899 = vmatpush.bf16.msrb.mxu3 %v10370_v11  ;;  %4861 = vmatmul.bf16.vlgmr.msrb.gmra.mxu0 %v1121_v1  ;;  %v4668_v31 = vadd.f32 %v4667_v28, %v4655_v25  ;;  %v10424_v1 = vld [vmem:[%s13386_s1 + $0xd70] sm:$0xff]  ;;  %v10422_v11 = vld [vmem:[%s13386_s1 + $0xd60] sm:$0xff] }
 0x182   :  { %4905 = vmatpush.bf16.msra.mxu0 %v10385_v12  ;;  %4874 = vmatmul.bf16.vlgmr.msrb.gmra.mxu1 %v1122_v4  ;;  %v10415_v4 = vld [vmem:[%s13386_s1 + $0xd28] sm:$0xff]  ;;  %v10412_v25 = vld [vmem:[%s13386_s1 + $0xd10] sm:$0xff] }
 0x183   :  { %4918 = vmatpush.bf16.msra.mxu1 %v10393_v13  ;;  %4887 = vmatmul.bf16.vlgmr.msrb.gmra.mxu2 %v1123_v2  ;;  %v10432_v2 = vld [vmem:[%s13386_s1 + $0xdb0] sm:$0xff]  ;;  %v10430_v13 = vld [vmem:[%s13386_s1 + $0xda0] sm:$0xff] }
 0x184   :  { %4931 = vmatpush.bf16.msra.mxu2 %v10401_v14  ;;  %4900 = vmatmul.bf16.vlgmr.msrb.gmra.mxu3 %v1124_v5  ;;  %v10423_v5 = vld [vmem:[%s13386_s1 + $0xd68] sm:$0xff]  ;;  %v10438_v14 = vld [vmem:[%s13386_s1 + $0xde0] sm:$0xff]  ;;  %v10428_v28 = vld [vmem:[%s13386_s1 + $0xd90] sm:$0xff] }
 0x185   :  { %4944 = vmatpush.bf16.msra.mxu3 %v10409_v15 }
 0x186   :  { %4906 = vmatpush.bf16.msra.mxu0 %v10384_v16  ;;  %v4680_v36 = vpop.f32.mrf.mxu2  ;;  %v4656_v39 = vpop.f32.mrf.mxu0  ;;  %v10413_v16 = vld [vmem:[%s13386_s1 + $0xd18] sm:$0xff] }
 0x187   :  { %4919 = vmatpush.bf16.msra.mxu1 %v10392_v17  ;;  %v4681_v37 = vadd.f32 %v4680_v36, %v4668_v31  ;;  %v4693_v38 = vpop.f32.mrf.mxu3  ;;  %v4669_v43 = vpop.f32.mrf.mxu1  ;;  %v10421_v17 = vld [vmem:[%s13386_s1 + $0xd58] sm:$0xff]  ;;  %v10419_v31 = vld [vmem:[%s13386_s1 + $0xd48] sm:$0xff] }
 0x188   :  { %4932 = vmatpush.bf16.msra.mxu2 %v10400_v18  ;;  %v10429_v18 = vld [vmem:[%s13386_s1 + $0xd98] sm:$0xff]  ;;  %v10426_v43 = vld [vmem:[%s13386_s1 + $0xd80] sm:$0xff] }
 0x189   :  { %4945 = vmatpush.bf16.msra.mxu3 %v10408_v19  ;;  %v4694_v40 = vadd.f32 %v4693_v38, %v4681_v37  ;;  %v10437_v19 = vld [vmem:[%s13386_s1 + $0xdd8] sm:$0xff]  ;;  %v1132_v37 = vld [vmem:[#allocation1 + $0x2d] sm:$0xff] }
 0x18a   :  { %4907 = vmatpush.bf16.msra.mxu0 %v10383_v20  ;;  %v1134_v38 = vld [vmem:[#allocation1 + $0x3f] sm:$0xff] }
 0x18b   :  { %4920 = vmatpush.bf16.msra.mxu1 %v10391_v21 }
 0x18c   :  { %4933 = vmatpush.bf16.msra.mxu2 %v10399_v22 }
 0x18d   :  { %4946 = vmatpush.bf16.msra.mxu3 %v10407_v23 }
 0x18e   :  { %4908 = vmatpush.bf16.msra.mxu0 %v10382_v26  ;;  %v4682_v50 = vpop.f32.mrf.mxu2  ;;  %v10420_v26 = vld [vmem:[%s13386_s1 + $0xd50] sm:$0xff] }
 0x18f   :  { %4921 = vmatpush.bf16.msra.mxu1 %v10390_v27  ;;  %v4695_v51 = vpop.f32.mrf.mxu3  ;;  %v10456_v50 = vld [vmem:[%s13386_s1 + $0xe70] sm:$0xff] }
 0x190   :  { %4934 = vmatpush.bf16.msra.mxu2 %v10398_v29  ;;  %v10436_v29 = vld [vmem:[%s13386_s1 + $0xdd0] sm:$0xff] }
 0x191   :  { %4947 = vmatpush.bf16.msra.mxu3 %v10406_v30  ;;  %v10411_v30 = vld [vmem:[%s13386_s1 + $0xd08] sm:$0xff]  ;;  %v10464_v51 = vld [vmem:[%s13386_s1 + $0xeb0] sm:$0xff] }
 0x192   :  { %4909 = vmatpush.bf16.msra.mxu0 %v10381_v32  ;;  %v10427_v32 = vld [vmem:[%s13386_s1 + $0xd88] sm:$0xff] }
 0x193   :  { %4922 = vmatpush.bf16.msra.mxu1 %v10389_v33  ;;  %v10435_v33 = vld [vmem:[%s13386_s1 + $0xdc8] sm:$0xff] }
 0x194   :  { %4935 = vmatpush.bf16.msra.mxu2 %v10397_v34  ;;  %v1131_v34 = vld [vmem:[#allocation1 + $0x24] sm:$0xff] }
 0x195   :  { %4948 = vmatpush.bf16.msra.mxu3 %v10405_v35  ;;  %v1133_v35 = vld [vmem:[#allocation1 + $0x36] sm:$0xff] }
 0x196   :  { %4910 = vmatpush.bf16.msra.mxu0 %v10380_v41  ;;  %v10410_v41 = vld [vmem:[%s13386_s1 + $0xd00] sm:$0xff] }
 0x197   :  { %4923 = vmatpush.bf16.msra.mxu1 %v10388_v42  ;;  %v10418_v42 = vld [vmem:[%s13386_s1 + $0xd40] sm:$0xff] }
 0x198   :  { %4936 = vmatpush.bf16.msra.mxu2 %v10396_v44  ;;  %v10434_v44 = vld [vmem:[%s13386_s1 + $0xdc0] sm:$0xff] }
 0x199   :  { %4949 = vmatpush.bf16.msra.mxu3 %v10404_v45  ;;  %v10449_v45 = vld [vmem:[%s13386_s1 + $0xe38] sm:$0xff] }
 0x19a   :  { %4911 = vmatpush.bf16.msra.mxu0 %v10379_v46  ;;  %v10457_v46 = vld [vmem:[%s13386_s1 + $0xe78] sm:$0xff] }
 0x19b   :  { %4924 = vmatpush.bf16.msra.mxu1 %v10387_v47  ;;  %v10465_v47 = vld [vmem:[%s13386_s1 + $0xeb8] sm:$0xff] }
 0x19c   :  { %4937 = vmatpush.bf16.msra.mxu2 %v10395_v48  ;;  %v10473_v48 = vld [vmem:[%s13386_s1 + $0xef8] sm:$0xff] }
 0x19d   :  { %4950 = vmatpush.bf16.msra.mxu3 %v10403_v49  ;;  %v10448_v49 = vld [vmem:[%s13386_s1 + $0xe30] sm:$0xff] }
 0x19e   :  { %4912 = vmatpush.bf16.msra.mxu0 %v10378_v52  ;;  %v4706_v8 = vpop.f32.mrf.mxu0  ;;  %v10472_v52 = vld [vmem:[%s13386_s1 + $0xef0] sm:$0xff] }
 0x19f   :  { %4925 = vmatpush.bf16.msra.mxu1 %v10386_v53  ;;  %v4707_v9 = vadd.f32 %v4706_v8, %v4694_v40  ;;  %v4719_v12 = vpop.f32.mrf.mxu1  ;;  %v36_v40 = vld [vmem:[%s13385_s0 + $0x38] sm:$0xff]  ;;  %v10447_v53 = vld [vmem:[%s13386_s1 + $0xe28] sm:$0xff]  ;;  %s10694_s0 = smov [#allocation4]  }
 0x1a0   :  { %4938 = vmatpush.bf16.msra.mxu2 %v10394_v54  ;;  %1136 = vst [vmem:[#allocation1] ss:$9 sm:$0xff] %v36_v40  ;;  %v10455_v54 = vld [vmem:[%s13386_s1 + $0xe68] sm:$0xff]  ;;  %s7350_s14 = sshll.u32 %s10694_s0, 4  ;;  %s7351_s14 = int_to_ptr.vmem [resolvable:$true] %s7350_s14 }
 0x1a1   :  { %4951 = vmatpush.bf16.msra.mxu3 %v10402_v55  ;;  %4913 = vmatmul.bf16.vlgmr.msra.gmra.mxu0 %v1127_v60  ;;  %v4720_v15 = vadd.f32 %v4719_v12, %v4707_v9  ;;  %v10463_v55 = vld [vmem:[%s13386_s1 + $0xea8] sm:$0xff]  ;;  %v10454_v60 = vld [vmem:[%s13386_s1 + $0xe60] sm:$0xff] }
 0x1a2   :  { %4957 = vmatpush.bf16.msrb.mxu0 %v10417_v56  ;;  %4926 = vmatmul.bf16.vlgmr.msra.gmra.mxu1 %v1128_v62  ;;  %v10471_v56 = vld [vmem:[%s13386_s1 + $0xee8] sm:$0xff]  ;;  %v10462_v62 = vld [vmem:[%s13386_s1 + $0xea0] sm:$0xff] }
 0x1a3   :  { %4970 = vmatpush.bf16.msrb.mxu1 %v10425_v57  ;;  %4939 = vmatmul.bf16.vlgmr.msra.gmra.mxu2 %v1129_v61  ;;  %v10503_v40 = vld [vmem:[%s13386_s1 + $0xfe8] sm:$0xff] }
 0x1a4   :  { %4983 = vmatpush.bf16.msrb.mxu2 %v10433_v58  ;;  %4952 = vmatmul.bf16.vlgmr.msra.gmra.mxu3 %v1130_v63  ;;  %v10470_v63 = vld [vmem:[%s13386_s1 + $0xee0] sm:$0xff] }
 0x1a5   :  { %4996 = vmatpush.bf16.msrb.mxu3 %v10441_v59  ;;  %v10446_v59 = vld [vmem:[%s13386_s1 + $0xe20] sm:$0xff] }
 0x1a6   :  { %4958 = vmatpush.bf16.msrb.mxu0 %v10416_v0  ;;  %v4732_v20 = vpop.f32.mrf.mxu2  ;;  %v4708_v23 = vpop.f32.mrf.mxu0 }
 0x1a7   :  { %4971 = vmatpush.bf16.msrb.mxu1 %v10424_v1  ;;  %v4733_v21 = vadd.f32 %v4732_v20, %v4720_v15  ;;  %v4745_v22 = vpop.f32.mrf.mxu3  ;;  %v4721_v27 = vpop.f32.mrf.mxu1  ;;  %v10445_v1 = vld [vmem:[%s13386_s1 + $0xe18] sm:$0xff]  ;;  %v10443_v15 = vld [vmem:[%s13386_s1 + $0xe08] sm:$0xff]  ;;  %v10458_v23 = vld [vmem:[%s13386_s1 + $0xe80] sm:$0xff] }
 0x1a8   :  { %4984 = vmatpush.bf16.msrb.mxu2 %v10432_v2  ;;  %v10453_v2 = vld [vmem:[%s13386_s1 + $0xe58] sm:$0xff] }
 0x1a9   :  { %4997 = vmatpush.bf16.msrb.mxu3 %v10440_v3  ;;  %v12084_v24 = vadd.f32 %v4745_v22, %v4733_v21  ;;  %v10461_v3 = vld [vmem:[%s13386_s1 + $0xe98] sm:$0xff]  ;;  %v10442_v21 = vld [vmem:[%s13386_s1 + $0xe00] sm:$0xff] }
 0x1aa   :  { %4959 = vmatpush.bf16.msrb.mxu0 %v10415_v4  ;;  %v10469_v4 = vld [vmem:[%s13386_s1 + $0xed8] sm:$0xff]  ;;  %v10450_v22 = vld [vmem:[%s13386_s1 + $0xe40] sm:$0xff] }
 0x1ab   :  { %4972 = vmatpush.bf16.msrb.mxu1 %v10423_v5  ;;  %v10497_v27 = vld [vmem:[%s13386_s1 + $0xfb8] sm:$0xff] }
 0x1ac   :  { %4985 = vmatpush.bf16.msrb.mxu2 %v10431_v6 }
 0x1ad   :  { %4998 = vmatpush.bf16.msrb.mxu3 %v10439_v7 }
 0x1ae   :  { %4960 = vmatpush.bf16.msrb.mxu0 %v10414_v10  ;;  %v4734_v36 = vpop.f32.mrf.mxu2  ;;  %v10444_v10 = vld [vmem:[%s13386_s1 + $0xe10] sm:$0xff] }
 0x1af   :  { %4973 = vmatpush.bf16.msrb.mxu1 %v10422_v11  ;;  %v4747_v39 = vpop.f32.mrf.mxu3  ;;  %v10452_v11 = vld [vmem:[%s13386_s1 + $0xe50] sm:$0xff] }
 0x1b0   :  { %4986 = vmatpush.bf16.msrb.mxu2 %v10430_v13  ;;  %v10460_v13 = vld [vmem:[%s13386_s1 + $0xe90] sm:$0xff]  ;;  %v10495_v39 = vld [vmem:[%s13386_s1 + $0xfa8] sm:$0xff] }
 0x1b1   :  { %4999 = vmatpush.bf16.msrb.mxu3 %v10438_v14  ;;  %v10468_v14 = vld [vmem:[%s13386_s1 + $0xed0] sm:$0xff] }
 0x1b2   :  { %4961 = vmatpush.bf16.msrb.mxu0 %v10413_v16  ;;  %v10451_v16 = vld [vmem:[%s13386_s1 + $0xe48] sm:$0xff]  ;;  %v10504_v36 = vld [vmem:[%s13386_s1 + $0xff0] sm:$0xff] }
 0x1b3   :  { %4974 = vmatpush.bf16.msrb.mxu1 %v10421_v17  ;;  %v10459_v17 = vld [vmem:[%s13386_s1 + $0xe88] sm:$0xff] }
 0x1b4   :  { %4987 = vmatpush.bf16.msrb.mxu2 %v10429_v18  ;;  %v10467_v18 = vld [vmem:[%s13386_s1 + $0xec8] sm:$0xff] }
 0x1b5   :  { %5000 = vmatpush.bf16.msrb.mxu3 %v10437_v19 }
 0x1b6   :  { %4962 = vmatpush.bf16.msrb.mxu0 %v10412_v25  ;;  %v10481_v25 = vld [vmem:[%s13386_s1 + $0xf38] sm:$0xff] }
 0x1b7   :  { %4975 = vmatpush.bf16.msrb.mxu1 %v10420_v26  ;;  %v10489_v26 = vld [vmem:[%s13386_s1 + $0xf78] sm:$0xff] }
 0x1b8   :  { %4988 = vmatpush.bf16.msrb.mxu2 %v10428_v28  ;;  %v10505_v28 = vld [vmem:[%s13386_s1 + $0xff8] sm:$0xff] }
 0x1b9   :  { %5001 = vmatpush.bf16.msrb.mxu3 %v10436_v29  ;;  %v1137_v29 = vld [vmem:[#allocation1] sm:$0xff] }
 0x1ba   :  { %4963 = vmatpush.bf16.msrb.mxu0 %v10411_v30  ;;  %v1139_v30 = vld [vmem:[#allocation1 + $0x12] sm:$0xff] }
 0x1bb   :  { %4976 = vmatpush.bf16.msrb.mxu1 %v10419_v31  ;;  %v1138_v31 = vld [vmem:[#allocation1 + $0x9] sm:$0xff] }
 0x1bc   :  { %4989 = vmatpush.bf16.msrb.mxu2 %v10427_v32  ;;  %v1140_v32 = vld [vmem:[#allocation1 + $0x1b] sm:$0xff] }
 0x1bd   :  { %5002 = vmatpush.bf16.msrb.mxu3 %v10435_v33  ;;  %v10480_v33 = vld [vmem:[%s13386_s1 + $0xf30] sm:$0xff] }
 0x1be   :  { %4964 = vmatpush.bf16.msrb.mxu0 %v10410_v41  ;;  %v4758_v57 = vpop.f32.mrf.mxu0 }
 0x1bf   :  { %4977 = vmatpush.bf16.msrb.mxu1 %v10418_v42  ;;  %v4759_v58 = vadd.f32 %v4758_v57, %v12084_v24  ;;  %v4771_v61 = vpop.f32.mrf.mxu1  ;;  %v10466_v24 = vld [vmem:[%s13386_s1 + $0xec0] sm:$0xff] }
 0x1c0   :  { %4990 = vmatpush.bf16.msrb.mxu2 %v10426_v43  ;;  %v10478_v43 = vld [vmem:[%s13386_s1 + $0xf20] sm:$0xff] }
 0x1c1   :  { %5003 = vmatpush.bf16.msrb.mxu3 %v10434_v44  ;;  %4965 = vmatmul.bf16.vlgmr.msrb.gmra.mxu0 %v1131_v34  ;;  %v4772_v0 = vadd.f32 %v4771_v61, %v4759_v58  ;;  %v10488_v34 = vld [vmem:[%s13386_s1 + $0xf70] sm:$0xff]  ;;  %v10486_v44 = vld [vmem:[%s13386_s1 + $0xf60] sm:$0xff] }
 0x1c2   :  { %5009 = vmatpush.bf16.msra.mxu0 %v10449_v45  ;;  %4978 = vmatmul.bf16.vlgmr.msrb.gmra.mxu1 %v1132_v37  ;;  %v10479_v37 = vld [vmem:[%s13386_s1 + $0xf28] sm:$0xff]  ;;  %v10476_v58 = vld [vmem:[%s13386_s1 + $0xf10] sm:$0xff] }
 0x1c3   :  { %5022 = vmatpush.bf16.msra.mxu1 %v10457_v46  ;;  %4991 = vmatmul.bf16.vlgmr.msrb.gmra.mxu2 %v1133_v35  ;;  %v10496_v35 = vld [vmem:[%s13386_s1 + $0xfb0] sm:$0xff]  ;;  %v10494_v46 = vld [vmem:[%s13386_s1 + $0xfa0] sm:$0xff] }
 0x1c4   :  { %5035 = vmatpush.bf16.msra.mxu2 %v10465_v47  ;;  %5004 = vmatmul.bf16.vlgmr.msrb.gmra.mxu3 %v1134_v38  ;;  %v10487_v38 = vld [vmem:[%s13386_s1 + $0xf68] sm:$0xff]  ;;  %v10502_v47 = vld [vmem:[%s13386_s1 + $0xfe0] sm:$0xff]  ;;  %v10492_v61 = vld [vmem:[%s13386_s1 + $0xf90] sm:$0xff] }
 0x1c5   :  { %5048 = vmatpush.bf16.msra.mxu3 %v10473_v48 }
 0x1c6   :  { %5010 = vmatpush.bf16.msra.mxu0 %v10448_v49  ;;  %v4784_v5 = vpop.f32.mrf.mxu2  ;;  %v4760_v8 = vpop.f32.mrf.mxu0  ;;  %v10477_v49 = vld [vmem:[%s13386_s1 + $0xf18] sm:$0xff] }
 0x1c7   :  { %5023 = vmatpush.bf16.msra.mxu1 %v10456_v50  ;;  %v4785_v6 = vadd.f32 %v4784_v5, %v4772_v0  ;;  %v4797_v7 = vpop.f32.mrf.mxu3  ;;  %v4773_v12 = vpop.f32.mrf.mxu1  ;;  %v10485_v50 = vld [vmem:[%s13386_s1 + $0xf58] sm:$0xff]  ;;  %v10483_v0 = vld [vmem:[%s13386_s1 + $0xf48] sm:$0xff]  ;;  %v10474_v5 = vld [vmem:[%s13386_s1 + $0xf00] sm:$0xff] }
 0x1c8   :  { %5036 = vmatpush.bf16.msra.mxu2 %v10464_v51  ;;  %v10493_v51 = vld [vmem:[%s13386_s1 + $0xf98] sm:$0xff]  ;;  %v10498_v8 = vld [vmem:[%s13386_s1 + $0xfc0] sm:$0xff] }
 0x1c9   :  { %5049 = vmatpush.bf16.msra.mxu3 %v10472_v52  ;;  %v4798_v9 = vadd.f32 %v4797_v7, %v4785_v6  ;;  %v10501_v52 = vld [vmem:[%s13386_s1 + $0xfd8] sm:$0xff]  ;;  %v10482_v6 = vld [vmem:[%s13386_s1 + $0xf40] sm:$0xff] }
 0x1ca   :  { %5011 = vmatpush.bf16.msra.mxu0 %v10447_v53  ;;  %v10490_v7 = vld [vmem:[%s13386_s1 + $0xf80] sm:$0xff] }
 0x1cb   :  { %5024 = vmatpush.bf16.msra.mxu1 %v10455_v54  ;;  %v1144_v12 = vld [vmem:[#allocation1 + $0x3f] sm:$0xff] }
 0x1cc   :  { %5037 = vmatpush.bf16.msra.mxu2 %v10463_v55 }
 0x1cd   :  { %5050 = vmatpush.bf16.msra.mxu3 %v10471_v56 }
 0x1ce   :  { %5012 = vmatpush.bf16.msra.mxu0 %v10446_v59  ;;  %v4786_v19 = vpop.f32.mrf.mxu2  ;;  %v10484_v59 = vld [vmem:[%s13386_s1 + $0xf50] sm:$0xff] }
 0x1cf   :  { %5025 = vmatpush.bf16.msra.mxu1 %v10454_v60  ;;  %v4799_v20 = vpop.f32.mrf.mxu3 }
 0x1d0   :  { %5038 = vmatpush.bf16.msra.mxu2 %v10462_v62  ;;  %v10500_v62 = vld [vmem:[%s13386_s1 + $0xfd0] sm:$0xff] }
 0x1d1   :  { %5051 = vmatpush.bf16.msra.mxu3 %v10470_v63  ;;  %v10475_v63 = vld [vmem:[%s13386_s1 + $0xf08] sm:$0xff] }
 0x1d2   :  { %5013 = vmatpush.bf16.msra.mxu0 %v10445_v1  ;;  %v10491_v1 = vld [vmem:[%s13386_s1 + $0xf88] sm:$0xff] }
 0x1d3   :  { %5026 = vmatpush.bf16.msra.mxu1 %v10453_v2  ;;  %v10499_v2 = vld [vmem:[%s13386_s1 + $0xfc8] sm:$0xff] }
 0x1d4   :  { %5039 = vmatpush.bf16.msra.mxu2 %v10461_v3 }
 0x1d5   :  { %5052 = vmatpush.bf16.msra.mxu3 %v10469_v4 }
 0x1d6   :  { %5014 = vmatpush.bf16.msra.mxu0 %v10444_v10  ;;  %v1142_v10 = vld [vmem:[#allocation1 + $0x2d] sm:$0xff] }
 0x1d7   :  { %5027 = vmatpush.bf16.msra.mxu1 %v10452_v11  ;;  %v1143_v11 = vld [vmem:[#allocation1 + $0x36] sm:$0xff] }
 0x1d8   :  { %5040 = vmatpush.bf16.msra.mxu2 %v10460_v13 }
 0x1d9   :  { %5053 = vmatpush.bf16.msra.mxu3 %v10468_v14 }
 0x1da   :  { %5015 = vmatpush.bf16.msra.mxu0 %v10443_v15 }
 0x1db   :  { %5028 = vmatpush.bf16.msra.mxu1 %v10451_v16 }
 0x1dc   :  { %5041 = vmatpush.bf16.msra.mxu2 %v10459_v17 }
 0x1dd   :  { %5054 = vmatpush.bf16.msra.mxu3 %v10467_v18 }
 0x1de   :  { %5016 = vmatpush.bf16.msra.mxu0 %v10442_v21  ;;  %v4810_v41 = vpop.f32.mrf.mxu0 }
 0x1df   :  { %5029 = vmatpush.bf16.msra.mxu1 %v10450_v22  ;;  %v4811_v42 = vadd.f32 %v4810_v41, %v4798_v9  ;;  %v4823_v45 = vpop.f32.mrf.mxu1  ;;  %v1141_v9 = vld [vmem:[#allocation1 + $0x24] sm:$0xff] }
 0x1e0   :  { %5042 = vmatpush.bf16.msra.mxu2 %v10458_v23 }
 0x1e1   :  { %5055 = vmatpush.bf16.msra.mxu3 %v10466_v24  ;;  %5017 = vmatmul.bf16.vlgmr.msra.gmra.mxu0 %v1137_v29  ;;  %v4824_v48 = vadd.f32 %v4823_v45, %v4811_v42 }
 0x1e2   :  { %5061 = vmatpush.bf16.msrb.mxu0 %v10481_v25  ;;  %5030 = vmatmul.bf16.vlgmr.msra.gmra.mxu1 %v1138_v31 }
 0x1e3   :  { %5074 = vmatpush.bf16.msrb.mxu1 %v10489_v26  ;;  %5043 = vmatmul.bf16.vlgmr.msra.gmra.mxu2 %v1139_v30 }
 0x1e4   :  { %5087 = vmatpush.bf16.msrb.mxu2 %v10497_v27  ;;  %5056 = vmatmul.bf16.vlgmr.msra.gmra.mxu3 %v1140_v32 }
 0x1e5   :  { %5100 = vmatpush.bf16.msrb.mxu3 %v10505_v28 }
 0x1e6   :  { %5062 = vmatpush.bf16.msrb.mxu0 %v10480_v33  ;;  %v4836_v53 = vpop.f32.mrf.mxu2  ;;  %v4812_v56 = vpop.f32.mrf.mxu0 }
 0x1e7   :  { %5075 = vmatpush.bf16.msrb.mxu1 %v10488_v34  ;;  %v4837_v54 = vadd.f32 %v4836_v53, %v4824_v48  ;;  %v4849_v55 = vpop.f32.mrf.mxu3  ;;  %v4825_v60 = vpop.f32.mrf.mxu1 }
 0x1e8   :  { %5088 = vmatpush.bf16.msrb.mxu2 %v10496_v35  ;;  %v9684_v60 = vld [vmem:[%s13389_s4 + $0x208] sm:$0xf] }
 0x1e9   :  { %5101 = vmatpush.bf16.msrb.mxu3 %v10504_v36  ;;  %v4850_v57 = vadd.f32 %v4849_v55, %v4837_v54 }
 0x1ea   :  { %5063 = vmatpush.bf16.msrb.mxu0 %v10479_v37 }
 0x1eb   :  { %5076 = vmatpush.bf16.msrb.mxu1 %v10487_v38 }
 0x1ec   :  { %5089 = vmatpush.bf16.msrb.mxu2 %v10495_v39 }
 0x1ed   :  { %5102 = vmatpush.bf16.msrb.mxu3 %v10503_v40 }
 0x1ee   :  { %5064 = vmatpush.bf16.msrb.mxu0 %v10478_v43  ;;  %v4838_v3 = vpop.f32.mrf.mxu2 }
 0x1ef   :  { %5077 = vmatpush.bf16.msrb.mxu1 %v10486_v44  ;;  %v4851_v4 = vpop.f32.mrf.mxu3  ;;  %v9686_v3 = vld [vmem:[%s13389_s4 + $0x308] sm:$0xf0] }
 0x1f0   :  { %5090 = vmatpush.bf16.msrb.mxu2 %v10494_v46  ;;  %v9676_v4 = vld [vmem:[%s13389_s4 + $0x200] sm:$0xf] }
 0x1f1   :  { %5103 = vmatpush.bf16.msrb.mxu3 %v10502_v47 }
 0x1f2   :  { %5065 = vmatpush.bf16.msrb.mxu0 %v10477_v49 }
 0x1f3   :  { %5078 = vmatpush.bf16.msrb.mxu1 %v10485_v50 }
 0x1f4   :  { %5091 = vmatpush.bf16.msrb.mxu2 %v10493_v51 }
 0x1f5   :  { %5104 = vmatpush.bf16.msrb.mxu3 %v10501_v52 }
 0x1f6   :  { %5066 = vmatpush.bf16.msrb.mxu0 %v10476_v58 }
 0x1f7   :  { %5079 = vmatpush.bf16.msrb.mxu1 %v10484_v59 }
 0x1f8   :  { %5092 = vmatpush.bf16.msrb.mxu2 %v10492_v61  ;;  %v10603_v61 = vld [vmem:[%s13389_s4 + $0x304] sm:$0xf0] }
 0x1f9   :  { %5105 = vmatpush.bf16.msrb.mxu3 %v10500_v62  ;;  %v10571_v62 = vld [vmem:[%s13389_s4 + $0x20c] sm:$0xf] }
 0x1fa   :  { %5067 = vmatpush.bf16.msrb.mxu0 %v10475_v63 }
 0x1fb   :  { %5080 = vmatpush.bf16.msrb.mxu1 %v10483_v0 }
 0x1fc   :  { %5093 = vmatpush.bf16.msrb.mxu2 %v10491_v1 }
 0x1fd   :  { %5106 = vmatpush.bf16.msrb.mxu3 %v10499_v2  ;;  %v9685_v2 = vor.u32 %v10603_v61, %v9684_v60  ;;  %v5120_v60 = vld [vmem:[%s13388_s3] sm:$0x3] }
 0x1fe   :  { %5068 = vmatpush.bf16.msrb.mxu0 %v10474_v5  ;;  %v4862_v13 = vpop.f32.mrf.mxu0  ;;  %v10602_v5 = vld [vmem:[%s13389_s4 + $0x2fc] sm:$0xf0] }
 0x1ff   :  { %5081 = vmatpush.bf16.msrb.mxu1 %v10482_v6  ;;  %v4863_v14 = vadd.f32 %v4862_v13, %v4850_v57  ;;  %v4875_v15 = vpop.f32.mrf.mxu1  ;;  %v9689_v6 = vor.u32 %v10571_v62, %v9686_v3  ;;  %v10539_v13 = vld [vmem:[%s13389_s4 + $0x104] sm:$0xf0]  ;;  %v9708_v3 = vld [vmem:[%s13389_s4 + $0x220] sm:$0xf] }
 0x200   :  { %5094 = vmatpush.bf16.msrb.mxu2 %v10490_v7  ;;  %v9677_v7 = vor.u32 %v10602_v5, %v9676_v4  ;;  %v10606_v5 = vld [vmem:[%s13389_s4 + $0x31c] sm:$0xf0] }
 0x201   :  { %5107 = vmatpush.bf16.msrb.mxu3 %v10498_v8  ;;  %5069 = vmatmul.bf16.vlgmr.msrb.gmra.mxu0 %v1141_v9  ;;  %v4876_v16 = vadd.f32 %v4875_v15, %v4863_v14  ;;  %v10570_v8 = vld [vmem:[%s13389_s4 + $0x204] sm:$0xf]  ;;  %v10507_v14 = vld [vmem:[%s13389_s4 + $0xc] sm:$0xf] }
 0x202   :  { %5082 = vmatmul.bf16.vlgmr.msrb.gmra.mxu1 %v1142_v10  ;;  %v9678_v9 = vld [vmem:[%s13389_s4 + $0x300] sm:$0xf0]  ;;  %v9428_v10 = vld [vmem:[%s13389_s4 + $0x8] sm:$0xf]  ;;  %v9430_v15 = vld [vmem:[%s13389_s4 + $0x108] sm:$0xf0]  ;;  %6053 = vmatpush.bf16.msra.mxu0 %v9677_v7 }
 0x203   :  { %5095 = vmatmul.bf16.vlgmr.msrb.gmra.mxu2 %v1143_v11  ;;  %v9710_v7 = vld [vmem:[%s13389_s4 + $0x320] sm:$0xf0] }
 0x204   :  { %5108 = vmatmul.bf16.vlgmr.msrb.gmra.mxu3 %v1144_v12  ;;  %6079 = vmatpush.bf16.msra.mxu2 %v9685_v2  ;;  %v9681_v12 = vor.u32 %v10570_v8, %v9678_v9  ;;  %v9718_v2 = vld [vmem:[%s13389_s4 + $0x328] sm:$0xf0] }
 0x205   :  { %6092 = vmatpush.bf16.msra.mxu3 %v9689_v6  ;;  %v10574_v6 = vld [vmem:[%s13389_s4 + $0x224] sm:$0xf] }
 0x206   :  { %v4888_v17 = vpop.f32.mrf.mxu2  ;;  %v4864_v20 = vpop.f32.mrf.mxu0  ;;  %6066 = vmatpush.bf16.msra.mxu1 %v9681_v12  ;;  %v10543_v12 = vld [vmem:[%s13389_s4 + $0x124] sm:$0xf0] }
 0x207   :  { %v4889_v18 = vadd.f32 %v4888_v17, %v4876_v16  ;;  %v4901_v19 = vpop.f32.mrf.mxu3  ;;  %v4877_v22 = vpop.f32.mrf.mxu1  ;;  %v9429_v16 = vor.u32 %v10539_v13, %v9428_v10  ;;  %v9433_v17 = vor.u32 %v10507_v14, %v9430_v15  ;;  %v9709_v13 = vor.u32 %v10606_v5, %v9708_v3  ;;  %v10511_v15 = vld [vmem:[%s13389_s4 + $0x2c] sm:$0xf]  ;;  %v10546_v3 = vld [vmem:[%s13389_s4 + $0x13c] sm:$0xf0]  ;;  %v9486_v5 = vld [vmem:[%s13389_s4 + $0x140] sm:$0xf0] }
 0x208   :  { %v9713_v14 = vor.u32 %v10574_v6, %v9710_v7 }
 0x209   :  { %v4902_v21 = vadd.f32 %v4901_v19, %v4889_v18  ;;  %6080 = vmatpush.bf16.msra.mxu2 %v9429_v16  ;;  %6093 = vmatpush.bf16.msra.mxu3 %v9433_v17  ;;  %v9462_v16 = vld [vmem:[%s13389_s4 + $0x128] sm:$0xf0]  ;;  %v9452_v17 = vld [vmem:[%s13389_s4 + $0x20] sm:$0xf] }
 0x20e   :  { %v4890_v23 = vpop.f32.mrf.mxu2 }
 0x20f   :  { %v4903_v24 = vpop.f32.mrf.mxu3 }
 0x21e   :  { %v4914_v25 = vpop.f32.mrf.mxu0 }
 0x21f   :  { %v4915_v26 = vadd.f32 %v4914_v25, %v4902_v21  ;;  %v4927_v27 = vpop.f32.mrf.mxu1 }
 0x221   :  { %v4928_v28 = vadd.f32 %v4927_v27, %v4915_v26 }
 0x226   :  { %v4940_v29 = vpop.f32.mrf.mxu2  ;;  %v4916_v32 = vpop.f32.mrf.mxu0 }
 0x227   :  { %v4941_v30 = vadd.f32 %v4940_v29, %v4928_v28  ;;  %v4953_v31 = vpop.f32.mrf.mxu3  ;;  %v4929_v34 = vpop.f32.mrf.mxu1  ;;  %v10506_v32 = vld [vmem:[%s13389_s4 + $0x4] sm:$0xf] }
 0x228   :  { %v9422_v34 = vld [vmem:[%s13389_s4 + $0x100] sm:$0xf0] }
 0x229   :  { %v4954_v33 = vadd.f32 %v4953_v31, %v4941_v30  ;;  %v9420_v30 = vld [vmem:[%s13389_s4] sm:$0xf] }
 0x22a   :  { %v10538_v31 = vld [vmem:[%s13389_s4 + $0xfc] sm:$0xf0] }
 0x22e   :  { %v4942_v35 = vpop.f32.mrf.mxu2 }
 0x22f   :  { %v4955_v36 = vpop.f32.mrf.mxu3  ;;  %v9425_v35 = vor.u32 %v10506_v32, %v9422_v34  ;;  %v10576_v32 = vld [vmem:[%s13389_s4 + $0x234] sm:$0xf] }
 0x230   :  { %v9700_v36 = vld [vmem:[%s13389_s4 + $0x218] sm:$0xf] }
 0x231   :  { %6067 = vmatpush.bf16.msra.mxu1 %v9425_v35 }
 0x23e   :  { %v4966_v37 = vpop.f32.mrf.mxu0 }
 0x23f   :  { %v4979_v38 = vpop.f32.mrf.mxu1  ;;  %v4967_v48 = vadd.f32 %v4966_v37, %v4954_v33  ;;  %v9421_v33 = vor.u32 %v10538_v31, %v9420_v30  ;;  %v10605_v37 = vld [vmem:[%s13389_s4 + $0x314] sm:$0xf0]  ;;  %v9724_v30 = vld [vmem:[%s13389_s4 + $0x230] sm:$0xf] }
 0x240   :  { %v10608_v31 = vld [vmem:[%s13389_s4 + $0x32c] sm:$0xf0] }
 0x241   :  { %v4980_v52 = vadd.f32 %v4979_v38, %v4967_v48  ;;  %6054 = vmatpush.bf16.msra.mxu0 %v9421_v33  ;;  %v10573_v38 = vld [vmem:[%s13389_s4 + $0x21c] sm:$0xf]  ;;  %v9726_v33 = vld [vmem:[%s13389_s4 + $0x330] sm:$0xf0] }
 0x246   :  { %v4992_v39 = vpop.f32.mrf.mxu2  ;;  %v4968_v41 = vpop.f32.mrf.mxu0 }
 0x247   :  { %v5005_v40 = vpop.f32.mrf.mxu3  ;;  %v4981_v42 = vpop.f32.mrf.mxu1  ;;  %v4993_v53 = vadd.f32 %v4992_v39, %v4980_v52  ;;  %v9701_v39 = vor.u32 %v10605_v37, %v9700_v36  ;;  %v9692_v41 = vld [vmem:[%s13389_s4 + $0x210] sm:$0xf]  ;;  %v9476_v36 = vld [vmem:[%s13389_s4 + $0x38] sm:$0xf] }
 0x248   :  { %v10604_v42 = vld [vmem:[%s13389_s4 + $0x30c] sm:$0xf0]  ;;  %v10545_v37 = vld [vmem:[%s13389_s4 + $0x134] sm:$0xf0] }
 0x249   :  { %v5006_v56 = vadd.f32 %v5005_v40, %v4993_v53  ;;  %v9702_v40 = vld [vmem:[%s13389_s4 + $0x318] sm:$0xf0]  ;;  %6131 = vmatpush.bf16.msrb.mxu2 %v9701_v39  ;;  %v9729_v39 = vor.u32 %v10576_v32, %v9726_v33 }
 0x24e   :  { %v4994_v43 = vpop.f32.mrf.mxu2 }
 0x24f   :  { %v5007_v44 = vpop.f32.mrf.mxu3  ;;  %v9705_v43 = vor.u32 %v10573_v38, %v9702_v40  ;;  %v9725_v38 = vor.u32 %v10608_v31, %v9724_v30  ;;  %v10513_v40 = vld [vmem:[%s13389_s4 + $0x3c] sm:$0xf]  ;;  %v9502_v30 = vld [vmem:[%s13389_s4 + $0x150] sm:$0xf0] }
 0x250   :  { %v9693_v44 = vor.u32 %v10604_v42, %v9692_v41  ;;  %v9478_v41 = vld [vmem:[%s13389_s4 + $0x138] sm:$0xf0]  ;;  %v9468_v42 = vld [vmem:[%s13389_s4 + $0x30] sm:$0xf] }
 0x251   :  { %6144 = vmatpush.bf16.msrb.mxu3 %v9705_v43  ;;  %v10544_v43 = vld [vmem:[%s13389_s4 + $0x12c] sm:$0xf0] }
 0x252   :  { %6105 = vmatpush.bf16.msrb.mxu0 %v9693_v44  ;;  %v10512_v44 = vld [vmem:[%s13389_s4 + $0x34] sm:$0xf] }
 0x25e   :  { %v5018_v45 = vpop.f32.mrf.mxu0 }
 0x25f   :  { %v5031_v46 = vpop.f32.mrf.mxu1  ;;  %v5019_v57 = vadd.f32 %v5018_v45, %v5006_v56  ;;  %v10572_v45 = vld [vmem:[%s13389_s4 + $0x214] sm:$0xf] }
 0x260   :  { %v10508_v56 = vld [vmem:[%s13389_s4 + $0x14] sm:$0xf] }
 0x261   :  { %v5032_v58 = vadd.f32 %v5031_v46, %v5019_v57  ;;  %v9694_v46 = vld [vmem:[%s13389_s4 + $0x310] sm:$0xf0] }
 0x262   :  { %v9697_v48 = vor.u32 %v10572_v45, %v9694_v46  ;;  %v9470_v45 = vld [vmem:[%s13389_s4 + $0x130] sm:$0xf0]  ;;  %v9477_v46 = vor.u32 %v10545_v37, %v9476_v36  ;;  %v10615_v36 = vld [vmem:[%s13389_s4 + $0x364] sm:$0xf0]  ;;  %v10583_v37 = vld [vmem:[%s13389_s4 + $0x26c] sm:$0xf] }
 0x264   :  { %6118 = vmatpush.bf16.msrb.mxu1 %v9697_v48  ;;  %v9469_v48 = vor.u32 %v10544_v43, %v9468_v42  ;;  %v9774_v42 = vld [vmem:[%s13389_s4 + $0x360] sm:$0xf0] }
 0x266   :  { %v5044_v47 = vpop.f32.mrf.mxu2  ;;  %v5020_v50 = vpop.f32.mrf.mxu0 }
 0x267   :  { %v5057_v49 = vpop.f32.mrf.mxu3  ;;  %v5033_v51 = vpop.f32.mrf.mxu1  ;;  %v5045_v59 = vadd.f32 %v5044_v47, %v5032_v58  ;;  %v9444_v47 = vld [vmem:[%s13389_s4 + $0x18] sm:$0xf]  ;;  %v10509_v50 = vld [vmem:[%s13389_s4 + $0x1c] sm:$0xf]  ;;  %v9438_v58 = vld [vmem:[%s13389_s4 + $0x110] sm:$0xf0] }
 0x268   :  { %v9446_v51 = vld [vmem:[%s13389_s4 + $0x118] sm:$0xf0] }
 0x269   :  { %v5058_v63 = vadd.f32 %v5057_v49, %v5045_v59  ;;  %v10541_v49 = vld [vmem:[%s13389_s4 + $0x114] sm:$0xf0]  ;;  %v9449_v53 = vor.u32 %v10509_v50, %v9446_v51  ;;  %v9441_v59 = vor.u32 %v10508_v56, %v9438_v58  ;;  %v9748_v50 = vld [vmem:[%s13389_s4 + $0x248] sm:$0xf]  ;;  %v10578_v56 = vld [vmem:[%s13389_s4 + $0x244] sm:$0xf] }
 0x26a   :  { %v9445_v52 = vor.u32 %v10541_v49, %v9444_v47  ;;  %v9481_v47 = vor.u32 %v10513_v40, %v9478_v41  ;;  %v9473_v49 = vor.u32 %v10512_v44, %v9470_v45  ;;  %v10611_v51 = vld [vmem:[%s13389_s4 + $0x344] sm:$0xf0]  ;;  %v10614_v40 = vld [vmem:[%s13389_s4 + $0x35c] sm:$0xf0]  ;;  %v10582_v41 = vld [vmem:[%s13389_s4 + $0x264] sm:$0xf] }
 0x26b   :  { %6145 = vmatpush.bf16.msrb.mxu3 %v9449_v53  ;;  %6119 = vmatpush.bf16.msrb.mxu1 %v9441_v59  ;;  %v9750_v53 = vld [vmem:[%s13389_s4 + $0x348] sm:$0xf0]  ;;  %v9749_v58 = vor.u32 %v10611_v51, %v9748_v50  ;;  %v9524_v45 = vld [vmem:[%s13389_s4 + $0x68] sm:$0xf]  ;;  %v9516_v51 = vld [vmem:[%s13389_s4 + $0x60] sm:$0xf] }
 0x26c   :  { %6132 = vmatpush.bf16.msrb.mxu2 %v9445_v52  ;;  %v10579_v52 = vld [vmem:[%s13389_s4 + $0x24c] sm:$0xf] }
 0x26d   :  { %v9753_v59 = vor.u32 %v10579_v52, %v9750_v53  ;;  %v9526_v50 = vld [vmem:[%s13389_s4 + $0x168] sm:$0xf0]  ;;  %v10550_v52 = vld [vmem:[%s13389_s4 + $0x15c] sm:$0xf0]  ;;  %v10518_v53 = vld [vmem:[%s13389_s4 + $0x64] sm:$0xf] }
 0x26e   :  { %v5046_v54 = vpop.f32.mrf.mxu2 }
 0x26f   :  { %v5059_v55 = vpop.f32.mrf.mxu3  ;;  %v9436_v54 = vld [vmem:[%s13389_s4 + $0x10] sm:$0xf] }
 0x270   :  { %v10540_v55 = vld [vmem:[%s13389_s4 + $0x10c] sm:$0xf0] }
 0x271   :  { %v9437_v57 = vor.u32 %v10540_v55, %v9436_v54  ;;  %v9740_v54 = vld [vmem:[%s13389_s4 + $0x240] sm:$0xf] }
 0x272   :  { %v10610_v55 = vld [vmem:[%s13389_s4 + $0x33c] sm:$0xf0] }
 0x273   :  { %6106 = vmatpush.bf16.msrb.mxu0 %v9437_v57  ;;  %v9742_v57 = vld [vmem:[%s13389_s4 + $0x340] sm:$0xf0] }
 0x27e   :  { %v5070_v0 = vpop.f32.mrf.mxu0 }
 0x27f   :  { %v5083_v1 = vpop.f32.mrf.mxu1  ;;  %v5071_v11 = vadd.f32 %v5070_v0, %v5058_v63  ;;  %v9716_v63 = vld [vmem:[%s13389_s4 + $0x228] sm:$0xf] }
 0x280   :  { %v10607_v0 = vld [vmem:[%s13389_s4 + $0x324] sm:$0xf0] }
 0x281   :  { %v5084_v18 = vadd.f32 %v5083_v1, %v5071_v11  ;;  %v10575_v1 = vld [vmem:[%s13389_s4 + $0x22c] sm:$0xf]  ;;  %v9717_v9 = vor.u32 %v10607_v0, %v9716_v63  ;;  %v9460_v11 = vld [vmem:[%s13389_s4 + $0x28] sm:$0xf]  ;;  %v9745_v63 = vor.u32 %v10578_v56, %v9742_v57  ;;  %v9517_v57 = vor.u32 %v10550_v52, %v9516_v51  ;;  %v9822_v51 = vld [vmem:[%s13389_s4 + $0x390] sm:$0xf0] }
 0x282   :  { %v9721_v10 = vor.u32 %v10575_v1, %v9718_v2  ;;  %v10515_v0 = vld [vmem:[%s13389_s4 + $0x4c] sm:$0xf]  ;;  %v9484_v2 = vld [vmem:[%s13389_s4 + $0x40] sm:$0xf] }
 0x283   :  { %v9494_v1 = vld [vmem:[%s13389_s4 + $0x148] sm:$0xf0] }
 0x284   :  { %v9497_v7 = vor.u32 %v10515_v0, %v9494_v1  ;;  %v10616_v0 = vld [vmem:[%s13389_s4 + $0x36c] sm:$0xf0]  ;;  %v10584_v1 = vld [vmem:[%s13389_s4 + $0x274] sm:$0xf] }
 0x286   :  { %v5096_v19 = vpop.f32.mrf.mxu2  ;;  %v5072_v22 = vpop.f32.mrf.mxu0 }
 0x287   :  { %v5109_v20 = vpop.f32.mrf.mxu3  ;;  %v5097_v21 = vadd.f32 %v5096_v19, %v5084_v18  ;;  %v5085_v23 = vpop.f32.mrf.mxu1  ;;  %v10542_v18 = vld [vmem:[%s13389_s4 + $0x11c] sm:$0xf0]  ;;  %v10510_v19 = vld [vmem:[%s13389_s4 + $0x24] sm:$0xf]  ;;  %v9461_v22 = vor.u32 %v10543_v12, %v9460_v11  ;;  %v9764_v11 = vld [vmem:[%s13389_s4 + $0x258] sm:$0xf] }
 0x288   :  { %v9465_v23 = vor.u32 %v10511_v15, %v9462_v16  ;;  %v10613_v12 = vld [vmem:[%s13389_s4 + $0x354] sm:$0xf0]  ;;  %v9756_v15 = vld [vmem:[%s13389_s4 + $0x250] sm:$0xf] }
 0x289   :  { %v5110_v24 = vadd.f32 %v5109_v20, %v5097_v21  ;;  %v9454_v20 = vld [vmem:[%s13389_s4 + $0x120] sm:$0xf0]  ;;  %v10612_v16 = vld [vmem:[%s13389_s4 + $0x34c] sm:$0xf0] }
 0x28b   :  { %v5121_v25 = vmul.f32 0.5, %v5110_v24  ;;  %5114 = vst.msk [vmem:[#allocation2] sm:$0x3] %vm5113_vm0, %v5110_v24 }
 0x28c   :  { %7344 = dma.vmem_to_hbm [thread:$0]  %s7340_s2, 32, %s7342_s11, [#allocation3]  }
 0x28d   :  { %v5122_v26 = vmul.f32 1.442695, %v5121_v25  ;;  %v9457_v25 = vor.u32 %v10510_v19, %v9454_v20  ;;  %v9765_v19 = vor.u32 %v10613_v12, %v9764_v11  ;;  %v9542_v11 = vld [vmem:[%s13389_s4 + $0x178] sm:$0xf0]  ;;  %v9532_v12 = vld [vmem:[%s13389_s4 + $0x70] sm:$0xf] }
 0x28e   :  { %v5098_v27 = vpop.f32.mrf.mxu2 }
 0x28f   :  { %v5111_v28 = vpop.f32.mrf.mxu3  ;;  %10638 = vpow2.f32 %v5122_v26  ;;  %v9732_v26 = vld [vmem:[%s13389_s4 + $0x238] sm:$0xf] }
 0x290   :  { %v10609_v27 = vld [vmem:[%s13389_s4 + $0x334] sm:$0xf0]  ;;  %v10577_v28 = vld [vmem:[%s13389_s4 + $0x23c] sm:$0xf] }
 0x291   :  { %v9733_v34 = vor.u32 %v10609_v27, %v9732_v26  ;;  %v9510_v26 = vld [vmem:[%s13389_s4 + $0x158] sm:$0xf0]  ;;  %v9500_v27 = vld [vmem:[%s13389_s4 + $0x50] sm:$0xf] }
 0x295   :  { %v10639_v29 = vpop.eup %10638 }
 0x296   :  { %5125 = vrot.lane.b32.xlu0 %v10639_v29, %s10692_s20  ;;  %v9734_v29 = vld [vmem:[%s13389_s4 + $0x338] sm:$0xf0] }
 0x297   :  { %v9737_v35 = vor.u32 %v10577_v28, %v9734_v29  ;;  %v10548_v28 = vld [vmem:[%s13389_s4 + $0x14c] sm:$0xf0]  ;;  %v10516_v29 = vld [vmem:[%s13389_s4 + $0x54] sm:$0xf] }
 0x298   :  { %v9501_v33 = vor.u32 %v10548_v28, %v9500_v27  ;;  %v9806_v27 = vld [vmem:[%s13389_s4 + $0x380] sm:$0xf0] }
 0x29e   :  { %5116 = vrot.lane.b32.xlu0 %v5110_v24, %s10692_s20 }
 0x308   :  { %v5126_v61 = vpop.permute.xlu0 %5125 }
 0x309   :  { %v5128_v62 = vmul.f32 %v5126_v61, %v5120_v60  ;;  %v9492_v60 = vld [vmem:[%s13389_s4 + $0x48] sm:$0xf] }
 0x30a   :  { %v10547_v61 = vld [vmem:[%s13389_s4 + $0x144] sm:$0xf0] }
 0x30b   :  { %v5129_v4 = vadd.f32 %v5128_v62, %v5110_v24  ;;  %v9453_v24 = vor.u32 %v10542_v18, %v9452_v17  ;;  %v9741_v62 = vor.u32 %v10610_v55, %v9740_v54  ;;  %v9493_v6 = vor.u32 %v10547_v61, %v9492_v60  ;;  %v10580_v17 = vld [vmem:[%s13389_s4 + $0x254] sm:$0xf]  ;;  %v9518_v54 = vld [vmem:[%s13389_s4 + $0x160] sm:$0xf0]  ;;  %v10617_v60 = vld [vmem:[%s13389_s4 + $0x374] sm:$0xf0] }
 0x30c   :  { %v9758_v18 = vld [vmem:[%s13389_s4 + $0x350] sm:$0xf0]  ;;  %v10585_v61 = vld [vmem:[%s13389_s4 + $0x27c] sm:$0xf] }
 0x30d   :  { %v12442_v8 = vpack.c.bf16 %v5129_v4, %v5129_v4  ;;  %v10514_v4 = vld [vmem:[%s13389_s4 + $0x44] sm:$0xf] }
 0x30f   :  { %9930 = vmatmul.msk.bf16.vlgmr.msra.gmra.mxu0 %vm6043_vm1, %v12442_v8  ;;  %9931 = vmatmul.msk.bf16.vlgmr.msra.gmra.mxu1 %vm6043_vm1, %v12442_v8 }
 0x310   :  { %9932 = vmatmul.msk.bf16.vlgmr.msra.gmra.mxu2 %vm6043_vm1, %v12442_v8  ;;  %9933 = vmatmul.msk.bf16.vlgmr.msra.gmra.mxu3 %vm6043_vm1, %v12442_v8  ;;  %v5117_v21 = vpop.permute.xlu0 %5116 }
 0x311   :  { %5119 = vst.msk [vmem:[#allocation4] sm:$0x3] %vm5113_vm0, %v5117_v21  ;;  %6183 = vmatpush.bf16.msra.mxu2 %v9717_v9  ;;  %6196 = vmatpush.bf16.msra.mxu3 %v9721_v10  ;;  %v9485_v9 = vor.u32 %v10546_v3, %v9484_v2  ;;  %v9489_v10 = vor.u32 %v10514_v4, %v9486_v5  ;;  %v9508_v21 = vld [vmem:[%s13389_s4 + $0x58] sm:$0xf]  ;;  %v9790_v2 = vld [vmem:[%s13389_s4 + $0x370] sm:$0xf0] }
 0x312   :  { %6157 = vmatpush.bf16.msra.mxu0 %v9709_v13  ;;  %6170 = vmatpush.bf16.msra.mxu1 %v9713_v14  ;;  %v10581_v13 = vld [vmem:[%s13389_s4 + $0x25c] sm:$0xf]  ;;  %v9540_v5 = vld [vmem:[%s13389_s4 + $0x78] sm:$0xf]  ;;  %vm7211_vm0 = vcmask 1043456  }
 0x313   :  { %v9766_v14 = vld [vmem:[%s13389_s4 + $0x358] sm:$0xf0]  ;;  %7355 = dma.vmem_to_hbm [thread:$0]  %s7351_s14, 32, %s7353_s17, [#allocation5]  }
 0x314   :  { %v9769_v20 = vor.u32 %v10581_v13, %v9766_v14  ;;  %v10552_v13 = vld [vmem:[%s13389_s4 + $0x16c] sm:$0xf0]  ;;  %v10520_v14 = vld [vmem:[%s13389_s4 + $0x74] sm:$0xf] }
 0x315   :  { %6184 = vmatpush.bf16.msra.mxu2 %v9461_v22  ;;  %6197 = vmatpush.bf16.msra.mxu3 %v9465_v23  ;;  %v10549_v22 = vld [vmem:[%s13389_s4 + $0x154] sm:$0xf0]  ;;  %v9757_v23 = vor.u32 %v10612_v16, %v9756_v15  ;;  %v9534_v15 = vld [vmem:[%s13389_s4 + $0x170] sm:$0xf0] }
 0x316   :  { %6158 = vmatpush.bf16.msra.mxu0 %v9453_v24  ;;  %6171 = vmatpush.bf16.msra.mxu1 %v9457_v25  ;;  %v9761_v24 = vor.u32 %v10580_v17, %v9758_v18  ;;  %v10517_v25 = vld [vmem:[%s13389_s4 + $0x5c] sm:$0xf]  ;;  %v9509_v31 = vor.u32 %v10549_v22, %v9508_v21  ;;  %v9533_v18 = vor.u32 %v10552_v13, %v9532_v12  ;;  %v10619_v21 = vld [vmem:[%s13389_s4 + $0x384] sm:$0xf0]  ;;  %v10587_v22 = vld [vmem:[%s13389_s4 + $0x28c] sm:$0xf] }
 0x317   :  { %v9513_v32 = vor.u32 %v10517_v25, %v9510_v26  ;;  %v10618_v25 = vld [vmem:[%s13389_s4 + $0x37c] sm:$0xf0]  ;;  %v10586_v26 = vld [vmem:[%s13389_s4 + $0x284] sm:$0xf] }
 0x318   :  { %v10590_v12 = vld [vmem:[%s13389_s4 + $0x2a4] sm:$0xf] }
 0x319   :  { %v9838_v13 = vld [vmem:[%s13389_s4 + $0x3a0] sm:$0xf0] }
 0x31f   :  { %9934 = vmatmul.msk.bf16.vlgmr.msrb.gmra.mxu0 %vm6043_vm1, %v12442_v8  ;;  %9935 = vmatmul.msk.bf16.vlgmr.msrb.gmra.mxu1 %vm6043_vm1, %v12442_v8 }
 0x320   :  { %9936 = vmatmul.msk.bf16.vlgmr.msrb.gmra.mxu2 %vm6043_vm1, %v12442_v8  ;;  %9937 = vmatmul.msk.bf16.vlgmr.msrb.gmra.mxu3 %vm6043_vm1, %v12442_v8 }
 0x321   :  { %6235 = vmatpush.bf16.msrb.mxu2 %v9733_v34  ;;  %6248 = vmatpush.bf16.msrb.mxu3 %v9737_v35  ;;  %v9505_v34 = vor.u32 %v10516_v29, %v9502_v30  ;;  %v9780_v35 = vld [vmem:[%s13389_s4 + $0x268] sm:$0xf] }
 0x322   :  { %6209 = vmatpush.bf16.msrb.mxu0 %v9725_v38  ;;  %6222 = vmatpush.bf16.msrb.mxu1 %v9729_v39  ;;  %v9782_v38 = vld [vmem:[%s13389_s4 + $0x368] sm:$0xf0]  ;;  %v9772_v39 = vld [vmem:[%s13389_s4 + $0x260] sm:$0xf]  ;;  %v9781_v43 = vor.u32 %v10615_v36, %v9780_v35  ;;  %v9556_v30 = vld [vmem:[%s13389_s4 + $0x88] sm:$0xf] }
 0x323   :  { %v9785_v44 = vor.u32 %v10583_v37, %v9782_v38  ;;  %v9558_v35 = vld [vmem:[%s13389_s4 + $0x188] sm:$0xf0]  ;;  %v9548_v36 = vld [vmem:[%s13389_s4 + $0x80] sm:$0xf]  ;;  %v10522_v38 = vld [vmem:[%s13389_s4 + $0x84] sm:$0xf] }
 0x324   :  { %v10554_v37 = vld [vmem:[%s13389_s4 + $0x17c] sm:$0xf0] }
 0x325   :  { %6236 = vmatpush.bf16.msrb.mxu2 %v9477_v46  ;;  %6249 = vmatpush.bf16.msrb.mxu3 %v9481_v47  ;;  %v10551_v46 = vld [vmem:[%s13389_s4 + $0x164] sm:$0xf0]  ;;  %v9773_v47 = vor.u32 %v10614_v40, %v9772_v39  ;;  %v9550_v39 = vld [vmem:[%s13389_s4 + $0x180] sm:$0xf0] }
 0x326   :  { %6210 = vmatpush.bf16.msrb.mxu0 %v9469_v48  ;;  %6223 = vmatpush.bf16.msrb.mxu1 %v9473_v49  ;;  %v9777_v48 = vor.u32 %v10582_v41, %v9774_v42  ;;  %v10519_v49 = vld [vmem:[%s13389_s4 + $0x6c] sm:$0xf]  ;;  %v9525_v55 = vor.u32 %v10551_v46, %v9524_v45  ;;  %v9549_v42 = vor.u32 %v10554_v37, %v9548_v36  ;;  %v10621_v45 = vld [vmem:[%s13389_s4 + $0x394] sm:$0xf0]  ;;  %v10589_v46 = vld [vmem:[%s13389_s4 + $0x29c] sm:$0xf] }
 0x327   :  { %v9529_v56 = vor.u32 %v10519_v49, %v9526_v50  ;;  %v10620_v49 = vld [vmem:[%s13389_s4 + $0x38c] sm:$0xf0]  ;;  %v10588_v50 = vld [vmem:[%s13389_s4 + $0x294] sm:$0xf] }
 0x32f   :  { %9938 = vmatmul.msk.bf16.vlgmr.msra.gmra.mxu0 %vm6043_vm1, %v12442_v8  ;;  %9939 = vmatmul.msk.bf16.vlgmr.msra.gmra.mxu1 %vm6043_vm1, %v12442_v8 }
 0x330   :  { %9940 = vmatmul.msk.bf16.vlgmr.msra.gmra.mxu2 %vm6043_vm1, %v12442_v8  ;;  %9941 = vmatmul.msk.bf16.vlgmr.msra.gmra.mxu3 %vm6043_vm1, %v12442_v8 }
 0x331   :  { %6287 = vmatpush.bf16.msra.mxu2 %v9749_v58  ;;  %6300 = vmatpush.bf16.msra.mxu3 %v9753_v59  ;;  %v9521_v58 = vor.u32 %v10518_v53, %v9518_v54  ;;  %v9796_v59 = vld [vmem:[%s13389_s4 + $0x278] sm:$0xf] }
 0x332   :  { %6261 = vmatpush.bf16.msra.mxu0 %v9741_v62  ;;  %6274 = vmatpush.bf16.msra.mxu1 %v9745_v63  ;;  %v9798_v62 = vld [vmem:[%s13389_s4 + $0x378] sm:$0xf0]  ;;  %v9788_v63 = vld [vmem:[%s13389_s4 + $0x270] sm:$0xf]  ;;  %v9797_v3 = vor.u32 %v10617_v60, %v9796_v59  ;;  %v9572_v54 = vld [vmem:[%s13389_s4 + $0x98] sm:$0xf] }
 0x333   :  { %v9801_v4 = vor.u32 %v10585_v61, %v9798_v62  ;;  %v9574_v59 = vld [vmem:[%s13389_s4 + $0x198] sm:$0xf0]  ;;  %v9564_v60 = vld [vmem:[%s13389_s4 + $0x90] sm:$0xf]  ;;  %v10524_v62 = vld [vmem:[%s13389_s4 + $0x94] sm:$0xf] }
 0x334   :  { %v10556_v61 = vld [vmem:[%s13389_s4 + $0x18c] sm:$0xf0] }
 0x335   :  { %6288 = vmatpush.bf16.msra.mxu2 %v9493_v6  ;;  %6301 = vmatpush.bf16.msra.mxu3 %v9497_v7  ;;  %v10553_v6 = vld [vmem:[%s13389_s4 + $0x174] sm:$0xf0]  ;;  %v9789_v7 = vor.u32 %v10616_v0, %v9788_v63  ;;  %v9566_v63 = vld [vmem:[%s13389_s4 + $0x190] sm:$0xf0] }
 0x336   :  { %6262 = vmatpush.bf16.msra.mxu0 %v9485_v9  ;;  %6275 = vmatpush.bf16.msra.mxu1 %v9489_v10  ;;  %v9793_v9 = vor.u32 %v10584_v1, %v9790_v2  ;;  %v10521_v10 = vld [vmem:[%s13389_s4 + $0x7c] sm:$0xf]  ;;  %v9541_v16 = vor.u32 %v10553_v6, %v9540_v5  ;;  %v9565_v2 = vor.u32 %v10556_v61, %v9564_v60  ;;  %v9844_v5 = vld [vmem:[%s13389_s4 + $0x2a8] sm:$0xf]  ;;  %v9854_v60 = vld [vmem:[%s13389_s4 + $0x3b0] sm:$0xf0] }
 0x337   :  { %v9545_v17 = vor.u32 %v10521_v10, %v9542_v11  ;;  %v10623_v6 = vld [vmem:[%s13389_s4 + $0x3a4] sm:$0xf0]  ;;  %v9836_v10 = vld [vmem:[%s13389_s4 + $0x2a0] sm:$0xf] }
 0x338   :  { %v10622_v11 = vld [vmem:[%s13389_s4 + $0x39c] sm:$0xf0] }
 0x33f   :  { %9942 = vmatmul.msk.bf16.vlgmr.msrb.gmra.mxu0 %vm6043_vm1, %v12442_v8  ;;  %9943 = vmatmul.msk.bf16.vlgmr.msrb.gmra.mxu1 %vm6043_vm1, %v12442_v8 }
 0x340   :  { %9944 = vmatmul.msk.bf16.vlgmr.msrb.gmra.mxu2 %vm6043_vm1, %v12442_v8  ;;  %9945 = vmatmul.msk.bf16.vlgmr.msrb.gmra.mxu3 %vm6043_vm1, %v12442_v8 }
 0x341   :  { %6339 = vmatpush.bf16.msrb.mxu2 %v9765_v19  ;;  %6352 = vmatpush.bf16.msrb.mxu3 %v9769_v20  ;;  %v9537_v19 = vor.u32 %v10520_v14, %v9534_v15  ;;  %v9812_v20 = vld [vmem:[%s13389_s4 + $0x288] sm:$0xf] }
 0x342   :  { %6313 = vmatpush.bf16.msrb.mxu0 %v9757_v23  ;;  %6326 = vmatpush.bf16.msrb.mxu1 %v9761_v24  ;;  %v9814_v23 = vld [vmem:[%s13389_s4 + $0x388] sm:$0xf0]  ;;  %v9804_v24 = vld [vmem:[%s13389_s4 + $0x280] sm:$0xf]  ;;  %v9813_v28 = vor.u32 %v10619_v21, %v9812_v20  ;;  %v9837_v20 = vor.u32 %v10622_v11, %v9836_v10  ;;  %v9841_v21 = vor.u32 %v10590_v12, %v9838_v13  ;;  %v9596_v12 = vld [vmem:[%s13389_s4 + $0xb0] sm:$0xf] }
 0x343   :  { %v9817_v29 = vor.u32 %v10587_v22, %v9814_v23  ;;  %v10559_v22 = vld [vmem:[%s13389_s4 + $0x1a4] sm:$0xf0]  ;;  %v10527_v23 = vld [vmem:[%s13389_s4 + $0xac] sm:$0xf]  ;;  %v10560_v13 = vld [vmem:[%s13389_s4 + $0x1ac] sm:$0xf0] }
 0x345   :  { %6340 = vmatpush.bf16.msrb.mxu2 %v9509_v31  ;;  %6353 = vmatpush.bf16.msrb.mxu3 %v9513_v32  ;;  %v10555_v31 = vld [vmem:[%s13389_s4 + $0x184] sm:$0xf0]  ;;  %v9805_v32 = vor.u32 %v10618_v25, %v9804_v24  ;;  %v9590_v24 = vld [vmem:[%s13389_s4 + $0x1a8] sm:$0xf0]  ;;  %v9580_v25 = vld [vmem:[%s13389_s4 + $0xa0] sm:$0xf] }
 0x346   :  { %6314 = vmatpush.bf16.msrb.mxu0 %v9501_v33  ;;  %6327 = vmatpush.bf16.msrb.mxu1 %v9505_v34  ;;  %v9809_v33 = vor.u32 %v10586_v26, %v9806_v27  ;;  %v10523_v34 = vld [vmem:[%s13389_s4 + $0x8c] sm:$0xf]  ;;  %v9557_v40 = vor.u32 %v10555_v31, %v9556_v30  ;;  %v10558_v26 = vld [vmem:[%s13389_s4 + $0x19c] sm:$0xf0]  ;;  %v10526_v27 = vld [vmem:[%s13389_s4 + $0xa4] sm:$0xf] }
 0x347   :  { %v9561_v41 = vor.u32 %v10523_v34, %v9558_v35 }
 0x34f   :  { %9946 = vmatmul.msk.bf16.vlgmr.msra.gmra.mxu0 %vm6043_vm1, %v12442_v8  ;;  %9947 = vmatmul.msk.bf16.vlgmr.msra.gmra.mxu1 %vm6043_vm1, %v12442_v8 }
 0x350   :  { %9948 = vmatmul.msk.bf16.vlgmr.msra.gmra.mxu2 %vm6043_vm1, %v12442_v8  ;;  %9949 = vmatmul.msk.bf16.vlgmr.msra.gmra.mxu3 %vm6043_vm1, %v12442_v8 }
 0x351   :  { %6391 = vmatpush.bf16.msra.mxu2 %v9781_v43  ;;  %6404 = vmatpush.bf16.msra.mxu3 %v9785_v44  ;;  %v9553_v43 = vor.u32 %v10522_v38, %v9550_v39  ;;  %v9828_v44 = vld [vmem:[%s13389_s4 + $0x298] sm:$0xf] }
 0x352   :  { %6365 = vmatpush.bf16.msra.mxu0 %v9773_v47  ;;  %6378 = vmatpush.bf16.msra.mxu1 %v9777_v48  ;;  %v9830_v47 = vld [vmem:[%s13389_s4 + $0x398] sm:$0xf0]  ;;  %v9820_v48 = vld [vmem:[%s13389_s4 + $0x290] sm:$0xf]  ;;  %v9829_v52 = vor.u32 %v10621_v45, %v9828_v44 }
 0x353   :  { %v9833_v53 = vor.u32 %v10589_v46, %v9830_v47 }
 0x355   :  { %6392 = vmatpush.bf16.msra.mxu2 %v9525_v55  ;;  %6405 = vmatpush.bf16.msra.mxu3 %v9529_v56  ;;  %v10557_v55 = vld [vmem:[%s13389_s4 + $0x194] sm:$0xf0]  ;;  %v9821_v56 = vor.u32 %v10620_v49, %v9820_v48 }
 0x356   :  { %6366 = vmatpush.bf16.msra.mxu0 %v9517_v57  ;;  %6379 = vmatpush.bf16.msra.mxu1 %v9521_v58  ;;  %v9825_v57 = vor.u32 %v10588_v50, %v9822_v51  ;;  %v10525_v58 = vld [vmem:[%s13389_s4 + $0x9c] sm:$0xf]  ;;  %v9573_v0 = vor.u32 %v10557_v55, %v9572_v54  ;;  %v9860_v51 = vld [vmem:[%s13389_s4 + $0x2b8] sm:$0xf]  ;;  %v9852_v55 = vld [vmem:[%s13389_s4 + $0x2b0] sm:$0xf] }
 0x357   :  { %v9577_v1 = vor.u32 %v10525_v58, %v9574_v59  ;;  %v9862_v54 = vld [vmem:[%s13389_s4 + $0x3b8] sm:$0xf0]  ;;  %v10624_v58 = vld [vmem:[%s13389_s4 + $0x3ac] sm:$0xf0]  ;;  %v10592_v59 = vld [vmem:[%s13389_s4 + $0x2b4] sm:$0xf] }
 0x358   :  { %v9853_v10 = vor.u32 %v10624_v58, %v9852_v55  ;;  %v9857_v11 = vor.u32 %v10592_v59, %v9854_v60  ;;  %v10594_v58 = vld [vmem:[%s13389_s4 + $0x2c4] sm:$0xf] }
 0x359   :  { %v9870_v59 = vld [vmem:[%s13389_s4 + $0x3c0] sm:$0xf0] }
 0x35f   :  { %9950 = vmatmul.msk.bf16.vlgmr.msrb.gmra.mxu0 %vm6043_vm1, %v12442_v8  ;;  %9951 = vmatmul.msk.bf16.vlgmr.msrb.gmra.mxu1 %vm6043_vm1, %v12442_v8 }
 0x360   :  { %9952 = vmatmul.msk.bf16.vlgmr.msrb.gmra.mxu2 %vm6043_vm1, %v12442_v8  ;;  %9953 = vmatmul.msk.bf16.vlgmr.msrb.gmra.mxu3 %vm6043_vm1, %v12442_v8 }
 0x361   :  { %6443 = vmatpush.bf16.msrb.mxu2 %v9797_v3  ;;  %6456 = vmatpush.bf16.msrb.mxu3 %v9801_v4  ;;  %v9569_v3 = vor.u32 %v10524_v62, %v9566_v63  ;;  %v12872_v4 = vld [vmem:[%s13390_s5] sm:$0xff] }
 0x362   :  { %6417 = vmatpush.bf16.msrb.mxu0 %v9789_v7  ;;  %6430 = vmatpush.bf16.msrb.mxu1 %v9793_v9  ;;  %v10591_v7 = vld [vmem:[%s13389_s4 + $0x2ac] sm:$0xf]  ;;  %v5277_v30 = vperm.slane %v12872_v4, 2  ;;  %v5278_v39 = vperm.slane %v12872_v4, 3  ;;  %v5280_v44 = vperm.slane %v12872_v4, 5  ;;  %v5281_v45 = vperm.slane %v12872_v4, 6 }
 0x363   :  { %v9846_v9 = vld [vmem:[%s13389_s4 + $0x3a8] sm:$0xf0]  ;;  %v5282_v46 = vperm.slane %v12872_v4, 7 }
 0x365   :  { %6444 = vmatpush.bf16.msrb.mxu2 %v9541_v16  ;;  %6457 = vmatpush.bf16.msrb.mxu3 %v9545_v17  ;;  %v5275_v16 = vperm.slane %v12872_v4, 0  ;;  %v9845_v17 = vor.u32 %v10623_v6, %v9844_v5  ;;  %v10561_v6 = vld [vmem:[%s13389_s4 + $0x1b4] sm:$0xf0] }
 0x366   :  { %6418 = vmatpush.bf16.msrb.mxu0 %v9533_v18  ;;  %6431 = vmatpush.bf16.msrb.mxu1 %v9537_v19  ;;  %v9849_v18 = vor.u32 %v10591_v7, %v9846_v9  ;;  %v9588_v19 = vld [vmem:[%s13389_s4 + $0xa8] sm:$0xf]  ;;  %v10529_v7 = vld [vmem:[%s13389_s4 + $0xbc] sm:$0xf] }
 0x367   :  { %v9589_v31 = vor.u32 %v10559_v22, %v9588_v19  ;;  %v9606_v9 = vld [vmem:[%s13389_s4 + $0x1b8] sm:$0xf0] }
 0x36f   :  { %9954 = vmatmul.msk.bf16.vlgmr.msra.gmra.mxu0 %vm6043_vm1, %v12442_v8  ;;  %9955 = vmatmul.msk.bf16.vlgmr.msra.gmra.mxu1 %vm6043_vm1, %v12442_v8 }
 0x370   :  { %9956 = vmatmul.msk.bf16.vlgmr.msra.gmra.mxu2 %vm6043_vm1, %v12442_v8  ;;  %9957 = vmatmul.msk.bf16.vlgmr.msra.gmra.mxu3 %vm6043_vm1, %v12442_v8 }
 0x371   :  { %6495 = vmatpush.bf16.msra.mxu2 %v9813_v28  ;;  %6508 = vmatpush.bf16.msra.mxu3 %v9817_v29  ;;  %v5276_v28 = vperm.slane %v12872_v4, 1  ;;  %v9582_v29 = vld [vmem:[%s13389_s4 + $0x1a0] sm:$0xf0] }
 0x372   :  { %6469 = vmatpush.bf16.msra.mxu0 %v9805_v32  ;;  %6482 = vmatpush.bf16.msra.mxu1 %v9809_v33  ;;  %v9593_v32 = vor.u32 %v10527_v23, %v9590_v24  ;;  %v9581_v33 = vor.u32 %v10558_v26, %v9580_v25  ;;  %v9585_v34 = vor.u32 %v10526_v27, %v9582_v29 }
 0x373   :  { %v9609_v24 = vor.u32 %v10529_v7, %v9606_v9  ;;  %v9597_v26 = vor.u32 %v10560_v13, %v9596_v12  ;;  %v10531_v12 = vld [vmem:[%s13389_s4 + $0xcc] sm:$0xf] }
 0x374   :  { %v9622_v13 = vld [vmem:[%s13389_s4 + $0x1c8] sm:$0xf0] }
 0x375   :  { %6496 = vmatpush.bf16.msra.mxu2 %v9557_v40  ;;  %6509 = vmatpush.bf16.msra.mxu3 %v9561_v41 }
 0x376   :  { %6470 = vmatpush.bf16.msra.mxu0 %v9549_v42  ;;  %6483 = vmatpush.bf16.msra.mxu1 %v9553_v43  ;;  %v5279_v43 = vperm.slane %v12872_v4, 4 }
 0x37f   :  { %9958 = vmatmul.msk.bf16.vlgmr.msrb.gmra.mxu0 %vm6043_vm1, %v12442_v8  ;;  %9959 = vmatmul.msk.bf16.vlgmr.msrb.gmra.mxu1 %vm6043_vm1, %v12442_v8 }
 0x380   :  { %9960 = vmatmul.msk.bf16.vlgmr.msrb.gmra.mxu2 %vm6043_vm1, %v12442_v8  ;;  %9961 = vmatmul.msk.bf16.vlgmr.msrb.gmra.mxu3 %vm6043_vm1, %v12442_v8 }
 0x381   :  { %6547 = vmatpush.bf16.msrb.mxu2 %v9829_v52  ;;  %6560 = vmatpush.bf16.msrb.mxu3 %v9833_v53  ;;  %v10625_v52 = vld [vmem:[%s13389_s4 + $0x3b4] sm:$0xf0]  ;;  %v10593_v53 = vld [vmem:[%s13389_s4 + $0x2bc] sm:$0xf] }
 0x382   :  { %6521 = vmatpush.bf16.msrb.mxu0 %v9821_v56  ;;  %6534 = vmatpush.bf16.msrb.mxu1 %v9825_v57  ;;  %v9865_v5 = vor.u32 %v10593_v53, %v9862_v54 }
 0x385   :  { %6548 = vmatpush.bf16.msrb.mxu2 %v9573_v0  ;;  %6561 = vmatpush.bf16.msrb.mxu3 %v9577_v1  ;;  %v9604_v0 = vld [vmem:[%s13389_s4 + $0xb8] sm:$0xf] }
 0x386   :  { %6522 = vmatpush.bf16.msrb.mxu0 %v9565_v2  ;;  %6535 = vmatpush.bf16.msrb.mxu1 %v9569_v3  ;;  %v9861_v3 = vor.u32 %v10625_v52, %v9860_v51  ;;  %v9605_v23 = vor.u32 %v10561_v6, %v9604_v0  ;;  %v9868_v51 = vld [vmem:[%s13389_s4 + $0x2c0] sm:$0xf]  ;;  %v10563_v6 = vld [vmem:[%s13389_s4 + $0x1c4] sm:$0xf0] }
 0x387   :  { %v10626_v52 = vld [vmem:[%s13389_s4 + $0x3bc] sm:$0xf0] }
 0x38c   :  { %v6056_v14 = vpop.f32.mrf.mxu0  ;;  %v6069_v15 = vpop.f32.mrf.mxu1 }
 0x38d   :  { %v6057_v35 = vadd.f32 %v6056_v14, %v5275_v16  ;;  %v6070_v38 = vadd.f32 %v6069_v15, %v5276_v28  ;;  %v10528_v14 = vld [vmem:[%s13389_s4 + $0xb4] sm:$0xf] }
 0x38f   :  { %9962 = vmatmul.msk.bf16.vlgmr.msra.gmra.mxu0 %vm6043_vm1, %v12442_v8  ;;  %9963 = vmatmul.msk.bf16.vlgmr.msra.gmra.mxu1 %vm6043_vm1, %v12442_v8  ;;  %vm6879_vm2 = vcmp.ge.f32.partialorder %v6057_v35, 0.0  ;;  %v6943_v47 = vmul.f32 0.01, %v6057_v35  ;;  %vm6880_vm3 = vcmp.ge.f32.partialorder %v6070_v38, 0.0  ;;  %v6944_v48 = vmul.f32 0.01, %v6070_v38 }
 0x390   :  { %9964 = vmatmul.msk.bf16.vlgmr.msra.gmra.mxu2 %vm6043_vm1, %v12442_v8  ;;  %9965 = vmatmul.msk.bf16.vlgmr.msra.gmra.mxu3 %vm6043_vm1, %v12442_v8 }
 0x391   :  { %6599 = vmatpush.bf16.msra.mxu2 %v9845_v17  ;;  %6612 = vmatpush.bf16.msra.mxu3 %v9849_v18  ;;  %v7007_v15 = vsel %vm6879_vm2, %v6057_v35, %v6943_v47  ;;  %v9598_v17 = vld [vmem:[%s13389_s4 + $0x1b0] sm:$0xf0]  ;;  %v7008_v18 = vsel %vm6880_vm3, %v6070_v38, %v6944_v48  ;;  %v9876_v47 = vld [vmem:[%s13389_s4 + $0x2c8] sm:$0xf] }
 0x392   :  { %6573 = vmatpush.bf16.msra.mxu0 %v9837_v20  ;;  %6586 = vmatpush.bf16.msra.mxu1 %v9841_v21  ;;  %v9601_v27 = vor.u32 %v10528_v14, %v9598_v17  ;;  %v7071_v28 = vpack.c.bf16 %v7008_v18, %v7007_v15  ;;  %v10627_v48 = vld [vmem:[%s13389_s4 + $0x3c4] sm:$0xf0]  ;;  %v9612_v14 = vld [vmem:[%s13389_s4 + $0xc0] sm:$0xf]  ;;  %v10530_v17 = vld [vmem:[%s13389_s4 + $0xc4] sm:$0xf] }
 0x393   :  { %v6082_v36 = vpop.f32.mrf.mxu2  ;;  %v6095_v37 = vpop.f32.mrf.mxu3  ;;  %v9614_v18 = vld [vmem:[%s13389_s4 + $0x1c0] sm:$0xf0] }
 0x394   :  { %v6058_v40 = vpop.f32.mrf.mxu0  ;;  %v6071_v41 = vpop.f32.mrf.mxu1  ;;  %v6083_v42 = vadd.f32 %v6082_v36, %v5277_v30  ;;  %v6096_v49 = vadd.f32 %v6095_v37, %v5278_v39  ;;  %v7135_v39 = vrot.slane %v7071_v28, 3 }
 0x395   :  { %6600 = vmatpush.bf16.msra.mxu2 %v9589_v31  ;;  %6613 = vmatpush.bf16.msra.mxu3 %v9593_v32 }
 0x396   :  { %6574 = vmatpush.bf16.msra.mxu0 %v9581_v33  ;;  %6587 = vmatpush.bf16.msra.mxu1 %v9585_v34  ;;  %v6945_v50 = vmul.f32 0.01, %v6083_v42  ;;  %vm6881_vm4 = vcmp.ge.f32.partialorder %v6083_v42, 0.0  ;;  %vm6882_vm5 = vcmp.ge.f32.partialorder %v6096_v49, 0.0  ;;  %v6946_v61 = vmul.f32 0.01, %v6096_v49 }
 0x397   :  { %v7194_v60 = vsel %vm7191_vm8, %v7071_v28, %v7135_v39 }
 0x398   :  { %v7009_v19 = vsel %vm6881_vm4, %v6083_v42, %v6945_v50  ;;  %v7010_v20 = vsel %vm6882_vm5, %v6096_v49, %v6946_v61  ;;  %v10595_v49 = vld [vmem:[%s13389_s4 + $0x2cc] sm:$0xf] }
 0x399   :  { %v7072_v29 = vpack.c.bf16 %v7010_v20, %v7009_v19  ;;  %v9878_v50 = vld [vmem:[%s13389_s4 + $0x3c8] sm:$0xf0] }
 0x39b   :  { %v6084_v56 = vpop.f32.mrf.mxu2  ;;  %v6097_v57 = vpop.f32.mrf.mxu3  ;;  %v7136_v40 = vrot.slane %v7072_v29, 6  ;;  %v7137_v41 = vrot.slane %v7072_v29, 1 }
 0x39c   :  { %v6108_v62 = vpop.f32.mrf.mxu0  ;;  %v6121_v63 = vpop.f32.mrf.mxu1 }
 0x39d   :  { %v6109_v1 = vadd.f32 %v6108_v62, %v5279_v43  ;;  %v6122_v2 = vadd.f32 %v6121_v63, %v5280_v44  ;;  %v7198_v53 = vsel %vm7195_vm9, %v7136_v40, %v7137_v41  ;;  %v9892_v40 = vld [vmem:[%s13389_s4 + $0x2d8] sm:$0xf] }
 0x39e   :  { %v7200_v7 = vsel %vm7199_vm10, %v7194_v60, %v7198_v53  ;;  %v10629_v41 = vld [vmem:[%s13389_s4 + $0x3d4] sm:$0xf0]  ;;  %v9638_v60 = vld [vmem:[%s13389_s4 + $0x1d8] sm:$0xf0] }
 0x39f   :  { %vm6883_vm6 = vcmp.ge.f32.partialorder %v6109_v1, 0.0  ;;  %v6947_v16 = vmul.f32 0.01, %v6109_v1  ;;  %vm6884_vm7 = vcmp.ge.f32.partialorder %v6122_v2, 0.0  ;;  %9966 = vmatmul.msk.bf16.vlgmr.msrb.gmra.mxu0 %vm6043_vm1, %v12442_v8  ;;  %9967 = vmatmul.msk.bf16.vlgmr.msrb.gmra.mxu1 %vm6043_vm1, %v12442_v8  ;;  %v6948_v21 = vmul.f32 0.01, %v6122_v2 }
 0x3a0   :  { %9968 = vmatmul.msk.bf16.vlgmr.msrb.gmra.mxu2 %vm6043_vm1, %v12442_v8  ;;  %9969 = vmatmul.msk.bf16.vlgmr.msrb.gmra.mxu3 %vm6043_vm1, %v12442_v8  ;;  %v9636_v53 = vld [vmem:[%s13389_s4 + $0xd8] sm:$0xf] }
 0x3a1   :  { %v7011_v22 = vsel %vm6883_vm6, %v6109_v1, %v6947_v16  ;;  %6651 = vmatpush.bf16.msrb.mxu2 %v9861_v3  ;;  %6664 = vmatpush.bf16.msrb.mxu3 %v9865_v5  ;;  %v7012_v25 = vsel %vm6884_vm7, %v6122_v2, %v6948_v21  ;;  %v9877_v2 = vor.u32 %v10627_v48, %v9876_v47  ;;  %v9620_v5 = vld [vmem:[%s13389_s4 + $0xc8] sm:$0xf]  ;;  %v10562_v16 = vld [vmem:[%s13389_s4 + $0x1bc] sm:$0xf0]  ;;  %v10628_v47 = vld [vmem:[%s13389_s4 + $0x3cc] sm:$0xf0] }
 0x3a2   :  { %6625 = vmatpush.bf16.msrb.mxu0 %v9853_v10  ;;  %6638 = vmatpush.bf16.msrb.mxu1 %v9857_v11  ;;  %v7073_v32 = vpack.c.bf16 %v7012_v25, %v7011_v22  ;;  %v9881_v3 = vor.u32 %v10595_v49, %v9878_v50  ;;  %v9869_v10 = vor.u32 %v10626_v52, %v9868_v51  ;;  %v10596_v48 = vld [vmem:[%s13389_s4 + $0x2d4] sm:$0xf] }
 0x3a3   :  { %v6134_v30 = vpop.f32.mrf.mxu2  ;;  %v6147_v31 = vpop.f32.mrf.mxu3  ;;  %v9873_v11 = vor.u32 %v10594_v58, %v9870_v59  ;;  %v9621_v22 = vor.u32 %v10563_v6, %v9620_v5  ;;  %v9617_v25 = vor.u32 %v10530_v17, %v9614_v18  ;;  %v9886_v49 = vld [vmem:[%s13389_s4 + $0x3d0] sm:$0xf0]  ;;  %v10533_v59 = vld [vmem:[%s13389_s4 + $0xdc] sm:$0xf] }
 0x3a4   :  { %v6135_v33 = vadd.f32 %v6134_v30, %v5281_v45  ;;  %v6148_v34 = vadd.f32 %v6147_v31, %v5282_v46  ;;  %v6110_v35 = vpop.f32.mrf.mxu0  ;;  %v6123_v36 = vpop.f32.mrf.mxu1  ;;  %v7138_v4 = vrot.slane %v7073_v32, 4  ;;  %v7139_v42 = vrot.slane %v7073_v32, 7  ;;  %v13005_v45 = vld [vmem:[%s13390_s5 + $0x8] sm:$0xff] }
 0x3a5   :  { %6652 = vmatpush.bf16.msrb.mxu2 %v9605_v23  ;;  %6665 = vmatpush.bf16.msrb.mxu3 %v9609_v24  ;;  %v5283_v61 = vperm.slane %v13005_v45, 0  ;;  %v5284_v19 = vperm.slane %v13005_v45, 1  ;;  %v5285_v20 = vperm.slane %v13005_v45, 2  ;;  %v5286_v21 = vperm.slane %v13005_v45, 3 }
 0x3a6   :  { %vm6885_vm13 = vcmp.ge.f32.partialorder %v6135_v33, 0.0  ;;  %v6949_v37 = vmul.f32 0.01, %v6135_v33  ;;  %vm6886_vm14 = vcmp.ge.f32.partialorder %v6148_v34, 0.0  ;;  %v6950_v38 = vmul.f32 0.01, %v6148_v34  ;;  %6626 = vmatpush.bf16.msrb.mxu0 %v9597_v26  ;;  %6639 = vmatpush.bf16.msrb.mxu1 %v9601_v27 }
 0x3a7   :  { %v7204_v0 = vsel %vm7201_vm11, %v7138_v4, %v7139_v42  ;;  %v9625_v23 = vor.u32 %v10531_v12, %v9622_v13  ;;  %v9613_v24 = vor.u32 %v10562_v16, %v9612_v14  ;;  %v5287_v35 = vperm.slane %v13005_v45, 4  ;;  %v10597_v4 = vld [vmem:[%s13389_s4 + $0x2dc] sm:$0xf] }
 0x3a8   :  { %v7013_v43 = vsel %vm6885_vm13, %v6135_v33, %v6949_v37  ;;  %v7014_v44 = vsel %vm6886_vm14, %v6148_v34, %v6950_v38  ;;  %v5288_v36 = vperm.slane %v13005_v45, 5  ;;  %v5289_v37 = vperm.slane %v13005_v45, 6  ;;  %v9894_v42 = vld [vmem:[%s13389_s4 + $0x3d8] sm:$0xf0] }
 0x3a9   :  { %v7074_v46 = vpack.c.bf16 %v7014_v44, %v7013_v43  ;;  %v9884_v43 = vld [vmem:[%s13389_s4 + $0x2d0] sm:$0xf]  ;;  %v9897_v58 = vor.u32 %v10597_v4, %v9894_v42  ;;  %v9641_v13 = vor.u32 %v10533_v59, %v9638_v60 }
 0x3ab   :  { %v7140_v54 = vrot.slane %v7074_v46, 2  ;;  %v7141_v55 = vrot.slane %v7074_v46, 5  ;;  %v6136_v56 = vpop.f32.mrf.mxu2  ;;  %v6149_v57 = vpop.f32.mrf.mxu3 }
 0x3ac   :  { %v6160_v62 = vpop.f32.mrf.mxu0  ;;  %v6173_v63 = vpop.f32.mrf.mxu1  ;;  %v9893_v57 = vor.u32 %v10629_v41, %v9892_v40  ;;  %v9910_v40 = vld [vmem:[%s13389_s4 + $0x3e8] sm:$0xf0]  ;;  %v9900_v41 = vld [vmem:[%s13389_s4 + $0x2e0] sm:$0xf] }
 0x3ad   :  { %v7208_v1 = vsel %vm7205_vm12, %v7140_v54, %v7141_v55  ;;  %v6161_v26 = vadd.f32 %v6160_v62, %v5283_v61  ;;  %v6174_v29 = vadd.f32 %v6173_v63, %v5284_v19  ;;  %v10565_v54 = vld [vmem:[%s13389_s4 + $0x1d4] sm:$0xf0]  ;;  %v9628_v61 = vld [vmem:[%s13389_s4 + $0xd0] sm:$0xf]  ;;  %v9885_v63 = vor.u32 %v10628_v47, %v9884_v43  ;;  %v10630_v43 = vld [vmem:[%s13389_s4 + $0x3dc] sm:$0xf0] }
 0x3ae   :  { %v7210_v9 = vsel %vm7209_vm15, %v7204_v0, %v7208_v1  ;;  %v9889_v0 = vor.u32 %v10596_v48, %v9886_v49  ;;  %v10564_v1 = vld [vmem:[%s13389_s4 + $0x1cc] sm:$0xf0]  ;;  %v9637_v12 = vor.u32 %v10565_v54, %v9636_v53  ;;  %v9901_v60 = vor.u32 %v10630_v43, %v9900_v41 }
 0x3af   :  { %v7212_v15 = vsel %vm7211_vm0, %v7200_v7, %v7210_v9  ;;  %9970 = vmatmul.msk.bf16.vlgmr.msra.gmra.mxu0 %vm6043_vm1, %v12442_v8  ;;  %9971 = vmatmul.msk.bf16.vlgmr.msra.gmra.mxu1 %vm6043_vm1, %v12442_v8  ;;  %v6951_v34 = vmul.f32 0.01, %v6161_v26  ;;  %vm6887_vm2 = vcmp.ge.f32.partialorder %v6161_v26, 0.0  ;;  %vm6888_vm3 = vcmp.ge.f32.partialorder %v6174_v29, 0.0 }
 0x3b0   :  { %7326 = vst [vmem:[%s13393_s8] sm:$0xff] %v7212_v15  ;;  %9972 = vmatmul.msk.bf16.vlgmr.msra.gmra.mxu2 %vm6043_vm1, %v12442_v8  ;;  %9973 = vmatmul.msk.bf16.vlgmr.msra.gmra.mxu3 %vm6043_vm1, %v12442_v8  ;;  %v6952_v38 = vmul.f32 0.01, %v6174_v29  ;;  %v9629_v14 = vor.u32 %v10564_v1, %v9628_v61 }
 0x3b1   :  { %6703 = vmatpush.bf16.msra.mxu2 %v9877_v2  ;;  %6716 = vmatpush.bf16.msra.mxu3 %v9881_v3  ;;  %v7015_v62 = vsel %vm6887_vm2, %v6161_v26, %v6951_v34  ;;  %v10532_v2 = vld [vmem:[%s13389_s4 + $0xd4] sm:$0xf] }
 0x3b2   :  { %6677 = vmatpush.bf16.msra.mxu0 %v9869_v10  ;;  %6690 = vmatpush.bf16.msra.mxu1 %v9873_v11  ;;  %v9630_v3 = vld [vmem:[%s13389_s4 + $0x1d0] sm:$0xf0]  ;;  %v7016_v7 = vsel %vm6888_vm3, %v6174_v29, %v6952_v38  ;;  %v5290_v11 = vperm.slane %v13005_v45, 7 }
 0x3b3   :  { %v6186_v27 = vpop.f32.mrf.mxu2  ;;  %v6199_v28 = vpop.f32.mrf.mxu3  ;;  %v9633_v17 = vor.u32 %v10532_v2, %v9630_v3  ;;  %v10566_v3 = vld [vmem:[%s13389_s4 + $0x1dc] sm:$0xf0] }
 0x3b4   :  { %v6187_v30 = vadd.f32 %v6186_v27, %v5285_v20  ;;  %v6162_v31 = vpop.f32.mrf.mxu0  ;;  %v6175_v32 = vpop.f32.mrf.mxu1  ;;  %v6200_v33 = vadd.f32 %v6199_v28, %v5286_v21  ;;  %v7075_v20 = vpack.c.bf16 %v7016_v7, %v7015_v62  ;;  %v10535_v62 = vld [vmem:[%s13389_s4 + $0xec] sm:$0xf] }
 0x3b5   :  { %6704 = vmatpush.bf16.msra.mxu2 %v9621_v22  ;;  %6717 = vmatpush.bf16.msra.mxu3 %v9625_v23  ;;  %v13146_v32 = vld [vmem:[%s13390_s5 + $0x10] sm:$0xff] }
 0x3b6   :  { %6678 = vmatpush.bf16.msra.mxu0 %v9613_v24  ;;  %6691 = vmatpush.bf16.msra.mxu1 %v9617_v25  ;;  %v6953_v39 = vmul.f32 0.01, %v6187_v30  ;;  %vm6889_vm4 = vcmp.ge.f32.partialorder %v6187_v30, 0.0  ;;  %vm6890_vm5 = vcmp.ge.f32.partialorder %v6200_v33, 0.0  ;;  %v6954_v50 = vmul.f32 0.01, %v6200_v33 }
 0x3b7   :  { %v7142_v28 = vrot.slane %v7075_v20, 3  ;;  %v5291_v53 = vperm.slane %v13146_v32, 0 }
 0x3b8   :  { %v7017_v9 = vsel %vm6889_vm4, %v6187_v30, %v6953_v39  ;;  %v7018_v10 = vsel %vm6890_vm5, %v6200_v33, %v6954_v50  ;;  %v10599_v39 = vld [vmem:[%s13389_s4 + $0x2ec] sm:$0xf] }
 0x3b9   :  { %v7076_v21 = vpack.c.bf16 %v7018_v10, %v7017_v9  ;;  %v5292_v9 = vperm.slane %v13146_v32, 1  ;;  %v5293_v10 = vperm.slane %v13146_v32, 2 }
 0x3bb   :  { %v6188_v44 = vpop.f32.mrf.mxu2  ;;  %v6201_v46 = vpop.f32.mrf.mxu3  ;;  %v7143_v29 = vrot.slane %v7076_v21, 6  ;;  %v7144_v30 = vrot.slane %v7076_v21, 1 }
 0x3bc   :  { %v6212_v51 = vpop.f32.mrf.mxu0  ;;  %v6225_v52 = vpop.f32.mrf.mxu1  ;;  %v10598_v44 = vld [vmem:[%s13389_s4 + $0x2e4] sm:$0xf] }
 0x3bd   :  { %v6213_v55 = vadd.f32 %v6212_v51, %v5287_v35  ;;  %v6226_v56 = vadd.f32 %v6225_v52, %v5288_v36  ;;  %v9908_v36 = vld [vmem:[%s13389_s4 + $0x2e8] sm:$0xf]  ;;  %v9902_v46 = vld [vmem:[%s13389_s4 + $0x3e0] sm:$0xf0]  ;;  %v7218_v47 = vsel %vm7195_vm9, %v7143_v29, %v7144_v30  ;;  %v7215_v52 = vsel %vm7191_vm8, %v7075_v20, %v7142_v28  ;;  %v9924_v30 = vld [vmem:[%s13389_s4 + $0x2f8] sm:$0xf] }
 0x3be   :  { %v9905_v61 = vor.u32 %v10598_v44, %v9902_v46  ;;  %v7219_v1 = vsel %vm7199_vm10, %v7215_v52, %v7218_v47 }
 0x3bf   :  { %vm6891_vm6 = vcmp.ge.f32.partialorder %v6213_v55, 0.0  ;;  %v6955_v5 = vmul.f32 0.01, %v6213_v55  ;;  %vm6892_vm7 = vcmp.ge.f32.partialorder %v6226_v56, 0.0  ;;  %v6956_v6 = vmul.f32 0.01, %v6226_v56  ;;  %9974 = vmatmul.msk.bf16.vlgmr.msrb.gmra.mxu0 %vm6043_vm1, %v12442_v8  ;;  %9975 = vmatmul.msk.bf16.vlgmr.msrb.gmra.mxu1 %vm6043_vm1, %v12442_v8 }
 0x3c0   :  { %9976 = vmatmul.msk.bf16.vlgmr.msrb.gmra.mxu2 %vm6043_vm1, %v12442_v8  ;;  %9977 = vmatmul.msk.bf16.vlgmr.msrb.gmra.mxu3 %vm6043_vm1, %v12442_v8 }
 0x3c1   :  { %6755 = vmatpush.bf16.msrb.mxu2 %v9893_v57  ;;  %6768 = vmatpush.bf16.msrb.mxu3 %v9897_v58  ;;  %v7019_v15 = vsel %vm6891_vm6, %v6213_v55, %v6955_v5  ;;  %v7020_v16 = vsel %vm6892_vm7, %v6226_v56, %v6956_v6  ;;  %v9913_v55 = vor.u32 %v10599_v39, %v9910_v40  ;;  %v9652_v56 = vld [vmem:[%s13389_s4 + $0xe8] sm:$0xf]  ;;  %v10534_v5 = vld [vmem:[%s13389_s4 + $0xe4] sm:$0xf]  ;;  %v9918_v39 = vld [vmem:[%s13389_s4 + $0x3f0] sm:$0xf0] }
 0x3c2   :  { %6729 = vmatpush.bf16.msrb.mxu0 %v9885_v63  ;;  %6742 = vmatpush.bf16.msrb.mxu1 %v9889_v0  ;;  %v7077_v25 = vpack.c.bf16 %v7020_v16, %v7019_v15  ;;  %v10567_v57 = vld [vmem:[%s13389_s4 + $0x1e4] sm:$0xf0]  ;;  %v9654_v63 = vld [vmem:[%s13389_s4 + $0x1e8] sm:$0xf0]  ;;  %v9644_v0 = vld [vmem:[%s13389_s4 + $0xe0] sm:$0xf] }
 0x3c3   :  { %v6238_v18 = vpop.f32.mrf.mxu2  ;;  %v6251_v19 = vpop.f32.mrf.mxu3  ;;  %v9646_v6 = vld [vmem:[%s13389_s4 + $0x1e0] sm:$0xf0] }
 0x3c4   :  { %v6239_v22 = vadd.f32 %v6238_v18, %v5289_v37  ;;  %v6252_v23 = vadd.f32 %v6251_v19, %v5290_v11  ;;  %v6214_v24 = vpop.f32.mrf.mxu0  ;;  %v6227_v45 = vpop.f32.mrf.mxu1  ;;  %v7145_v33 = vrot.slane %v7077_v25, 4  ;;  %v7146_v34 = vrot.slane %v7077_v25, 7  ;;  %v10631_v37 = vld [vmem:[%s13389_s4 + $0x3e4] sm:$0xf0] }
 0x3c5   :  { %6756 = vmatpush.bf16.msrb.mxu2 %v9637_v12  ;;  %6769 = vmatpush.bf16.msrb.mxu3 %v9641_v13  ;;  %v9909_v54 = vor.u32 %v10631_v37, %v9908_v36  ;;  %v9653_v11 = vor.u32 %v10567_v57, %v9652_v56  ;;  %v9657_v12 = vor.u32 %v10535_v62, %v9654_v63  ;;  %v5294_v19 = vperm.slane %v13146_v32, 3  ;;  %v10632_v37 = vld [vmem:[%s13389_s4 + $0x3ec] sm:$0xf0] }
 0x3c6   :  { %vm6893_vm13 = vcmp.ge.f32.partialorder %v6239_v22, 0.0  ;;  %v6957_v26 = vmul.f32 0.01, %v6239_v22  ;;  %vm6894_vm14 = vcmp.ge.f32.partialorder %v6252_v23, 0.0  ;;  %6730 = vmatpush.bf16.msrb.mxu0 %v9629_v14  ;;  %6743 = vmatpush.bf16.msrb.mxu1 %v9633_v17  ;;  %v6958_v27 = vmul.f32 0.01, %v6252_v23 }
 0x3c7   :  { %v7222_v58 = vsel %vm7201_vm11, %v7145_v33, %v7146_v34  ;;  %v9645_v13 = vor.u32 %v10566_v3, %v9644_v0  ;;  %v9649_v14 = vor.u32 %v10534_v5, %v9646_v6  ;;  %v5296_v24 = vperm.slane %v13146_v32, 5  ;;  %v10601_v33 = vld [vmem:[%s13389_s4 + $0x2fc] sm:$0xf]  ;;  %v9916_v34 = vld [vmem:[%s13389_s4 + $0x2f0] sm:$0xf] }
 0x3c8   :  { %v7021_v31 = vsel %vm6893_vm13, %v6239_v22, %v6957_v26  ;;  %v7022_v35 = vsel %vm6894_vm14, %v6252_v23, %v6958_v27  ;;  %v5295_v23 = vperm.slane %v13146_v32, 4  ;;  %v5297_v45 = vperm.slane %v13146_v32, 6 }
 0x3c9   :  { %v7078_v38 = vpack.c.bf16 %v7022_v35, %v7021_v31  ;;  %v5298_v25 = vperm.slane %v13146_v32, 7  ;;  %v10633_v31 = vld [vmem:[%s13389_s4 + $0x3f4] sm:$0xf0]  ;;  %v9926_v32 = vld [vmem:[%s13389_s4 + $0x3f8] sm:$0xf0] }
 0x3ca   :  { %v9925_v46 = vor.u32 %v10633_v31, %v9924_v30  ;;  %v9929_v47 = vor.u32 %v10601_v33, %v9926_v32 }
 0x3cb   :  { %v6240_v4 = vpop.f32.mrf.mxu2  ;;  %v6253_v42 = vpop.f32.mrf.mxu3  ;;  %v7147_v48 = vrot.slane %v7078_v38, 2  ;;  %v7148_v49 = vrot.slane %v7078_v38, 5  ;;  %v10600_v38 = vld [vmem:[%s13389_s4 + $0x2f4] sm:$0xf] }
 0x3cc   :  { %v6264_v50 = vpop.f32.mrf.mxu0  ;;  %v6277_v51 = vpop.f32.mrf.mxu1  ;;  %v9668_v42 = vld [vmem:[%s13389_s4 + $0xf8] sm:$0xf]  ;;  %v9921_v52 = vor.u32 %v10600_v38, %v9918_v39 }
 0x3cd   :  { %v7225_v59 = vsel %vm7205_vm12, %v7147_v48, %v7148_v49  ;;  %v6265_v15 = vadd.f32 %v6264_v50, %v5291_v53  ;;  %v13217_v18 = vadd.f32 %v6277_v51, %v5292_v9  ;;  %v10569_v48 = vld [vmem:[%s13389_s4 + $0x1f4] sm:$0xf0]  ;;  %v10537_v49 = vld [vmem:[%s13389_s4 + $0xfc] sm:$0xf]  ;;  %v9917_v51 = vor.u32 %v10632_v37, %v9916_v34  ;;  %v9660_v53 = vld [vmem:[%s13389_s4 + $0xf0] sm:$0xf] }
 0x3ce   :  { %v7226_v2 = vsel %vm7209_vm15, %v7222_v58, %v7225_v59  ;;  %v9670_v50 = vld [vmem:[%s13389_s4 + $0x1f8] sm:$0xf0]  ;;  %v9662_v58 = vld [vmem:[%s13389_s4 + $0x1f0] sm:$0xf0]  ;;  %v9669_v62 = vor.u32 %v10569_v48, %v9668_v42 }
 0x3cf   :  { %9978 = vmatmul.msk.bf16.vlgmr.msra.gmra.mxu0 %vm6043_vm1, %v12442_v8  ;;  %9979 = vmatmul.msk.bf16.vlgmr.msra.gmra.mxu1 %vm6043_vm1, %v12442_v8  ;;  %v7227_v7 = vsel %vm7211_vm0, %v7219_v1, %v7226_v2  ;;  %vm6895_vm2 = vcmp.ge.f32.partialorder %v6265_v15, 0.0  ;;  %v6959_v26 = vmul.f32 0.01, %v6265_v15  ;;  %vm6896_vm3 = vcmp.ge.f32.partialorder %v13217_v18, 0.0  ;;  %v5262_v38 = vld [vmem:[%s13390_s5 + $0x18] sm:$0xff] }
 0x3d0   :  { %9980 = vmatmul.msk.bf16.vlgmr.msra.gmra.mxu2 %vm6043_vm1, %v12442_v8  ;;  %9981 = vmatmul.msk.bf16.vlgmr.msra.gmra.mxu3 %vm6043_vm1, %v12442_v8  ;;  %7327 = vst [vmem:[%s13393_s8 + $0x8] sm:$0xff] %v7227_v7  ;;  %v6960_v27 = vmul.f32 0.01, %v13217_v18  ;;  %v9673_v63 = vor.u32 %v10537_v49, %v9670_v50  ;;  %v5301_v42 = vperm.slane %v5262_v38, 2  ;;  %v5303_v49 = vperm.slane %v5262_v38, 4 }
 0x3d1   :  { %6807 = vmatpush.bf16.msra.mxu2 %v9909_v54  ;;  %6820 = vmatpush.bf16.msra.mxu3 %v9913_v55  ;;  %v10568_v54 = vld [vmem:[%s13389_s4 + $0x1ec] sm:$0xf0]  ;;  %v10536_v55 = vld [vmem:[%s13389_s4 + $0xf4] sm:$0xf]  ;;  %v7023_v59 = vsel %vm6895_vm2, %v6265_v15, %v6959_v26  ;;  %v5304_v50 = vperm.slane %v5262_v38, 5 }
 0x3d2   :  { %6781 = vmatpush.bf16.msra.mxu0 %v9901_v60  ;;  %6794 = vmatpush.bf16.msra.mxu1 %v9905_v61  ;;  %v7024_v0 = vsel %vm6896_vm3, %v13217_v18, %v6960_v27  ;;  %v9661_v1 = vor.u32 %v10568_v54, %v9660_v53  ;;  %v9665_v2 = vor.u32 %v10536_v55, %v9662_v58 }
 0x3d3   :  { %v6290_v16 = vpop.f32.mrf.mxu2  ;;  %v6303_v17 = vpop.f32.mrf.mxu3 }
 0x3d4   :  { %v6266_v20 = vpop.f32.mrf.mxu0  ;;  %v6279_v21 = vpop.f32.mrf.mxu1  ;;  %v6291_v22 = vadd.f32 %v6290_v16, %v5293_v10  ;;  %v6304_v28 = vadd.f32 %v6303_v17, %v5294_v19 }
 0x3d5   :  { %6808 = vmatpush.bf16.msra.mxu2 %v9653_v11  ;;  %6821 = vmatpush.bf16.msra.mxu3 %v9657_v12 }
 0x3d6   :  { %6782 = vmatpush.bf16.msra.mxu0 %v9645_v13  ;;  %6795 = vmatpush.bf16.msra.mxu1 %v9649_v14  ;;  %v6961_v29 = vmul.f32 0.01, %v6291_v22  ;;  %vm6897_vm4 = vcmp.ge.f32.partialorder %v6291_v22, 0.0  ;;  %vm6898_vm5 = vcmp.ge.f32.partialorder %v6304_v28, 0.0  ;;  %v6962_v40 = vmul.f32 0.01, %v6304_v28 }
 0x3d7   :  { %v7079_v14 = vpack.c.bf16 %v7024_v0, %v7023_v59 }
 0x3d8   :  { %v7025_v60 = vsel %vm6897_vm4, %v6291_v22, %v6961_v29  ;;  %v7026_v61 = vsel %vm6898_vm5, %v6304_v28, %v6962_v40 }
 0x3d9   :  { %v7080_v9 = vpack.c.bf16 %v7026_v61, %v7025_v60  ;;  %v7149_v22 = vrot.slane %v7079_v14, 3 }
 0x3db   :  { %v6292_v35 = vpop.f32.mrf.mxu2  ;;  %v6305_v36 = vpop.f32.mrf.mxu3  ;;  %v7150_v18 = vrot.slane %v7080_v9, 6  ;;  %v7151_v19 = vrot.slane %v7080_v9, 1  ;;  %v7230_v33 = vsel %vm7191_vm8, %v7079_v14, %v7149_v22 }
 0x3dc   :  { %v6316_v41 = vpop.f32.mrf.mxu0  ;;  %v6329_v4 = vpop.f32.mrf.mxu1 }
 0x3dd   :  { %v6317_v43 = vadd.f32 %v6316_v41, %v5295_v23  ;;  %v6330_v44 = vadd.f32 %v6329_v4, %v5296_v24  ;;  %v7233_v27 = vsel %vm7195_vm9, %v7150_v18, %v7151_v19 }
 0x3de   :  { %v7234_v35 = vsel %vm7199_vm10, %v7230_v33, %v7233_v27 }
 0x3df   :  { %v6963_v56 = vmul.f32 0.01, %v6317_v43  ;;  %v6964_v57 = vmul.f32 0.01, %v6330_v44  ;;  %9982 = vmatmul.msk.bf16.vlgmr.msrb.gmra.mxu0 %vm6043_vm1, %v12442_v8  ;;  %9983 = vmatmul.msk.bf16.vlgmr.msrb.gmra.mxu1 %vm6043_vm1, %v12442_v8  ;;  %vm6899_vm6 = vcmp.ge.f32.partialorder %v6317_v43, 0.0  ;;  %vm6900_vm7 = vcmp.ge.f32.partialorder %v6330_v44, 0.0 }
 0x3e0   :  { %9984 = vmatmul.msk.bf16.vlgmr.msrb.gmra.mxu2 %vm6043_vm1, %v12442_v8  ;;  %9985 = vmatmul.msk.bf16.vlgmr.msrb.gmra.mxu3 %vm6043_vm1, %v12442_v8 }
 0x3e1   :  { %6859 = vmatpush.bf16.msrb.mxu2 %v9925_v46  ;;  %6872 = vmatpush.bf16.msrb.mxu3 %v9929_v47  ;;  %v7027_v3 = vsel %vm6899_vm6, %v6317_v43, %v6963_v56  ;;  %v7028_v5 = vsel %vm6900_vm7, %v6330_v44, %v6964_v57  ;;  %v5302_v43 = vperm.slane %v5262_v38, 3  ;;  %v5299_v44 = vperm.slane %v5262_v38, 0 }
 0x3e2   :  { %6833 = vmatpush.bf16.msrb.mxu0 %v9917_v51  ;;  %6846 = vmatpush.bf16.msrb.mxu1 %v9921_v52  ;;  %v7081_v15 = vpack.c.bf16 %v7028_v5, %v7027_v3  ;;  %v5300_v46 = vperm.slane %v5262_v38, 1 }
 0x3e3   :  { %v6342_v6 = vpop.f32.mrf.mxu2  ;;  %v6355_v7 = vpop.f32.mrf.mxu3 }
 0x3e4   :  { %v6343_v10 = vadd.f32 %v6342_v6, %v5297_v45  ;;  %v6356_v11 = vadd.f32 %v6355_v7, %v5298_v25  ;;  %v6318_v12 = vpop.f32.mrf.mxu0  ;;  %v6331_v13 = vpop.f32.mrf.mxu1  ;;  %v7152_v23 = vrot.slane %v7081_v15, 4  ;;  %v7153_v24 = vrot.slane %v7081_v15, 7 }
 0x3e5   :  { %6860 = vmatpush.bf16.msrb.mxu2 %v9669_v62  ;;  %6873 = vmatpush.bf16.msrb.mxu3 %v9673_v63 }
 0x3e6   :  { %vm6901_vm13 = vcmp.ge.f32.partialorder %v6343_v10, 0.0  ;;  %v6965_v16 = vmul.f32 0.01, %v6343_v10  ;;  %vm6902_vm14 = vcmp.ge.f32.partialorder %v6356_v11, 0.0  ;;  %6834 = vmatpush.bf16.msrb.mxu0 %v9661_v1  ;;  %6847 = vmatpush.bf16.msrb.mxu1 %v9665_v2  ;;  %v6966_v17 = vmul.f32 0.01, %v6356_v11 }
 0x3e7   :  { %v7237_v32 = vsel %vm7201_vm11, %v7152_v23, %v7153_v24  ;;  %v5305_v1 = vperm.slane %v5262_v38, 6  ;;  %v5306_v2 = vperm.slane %v5262_v38, 7 }
 0x3e8   :  { %v7029_v20 = vsel %vm6901_vm13, %v6343_v10, %v6965_v16  ;;  %v7030_v21 = vsel %vm6902_vm14, %v6356_v11, %v6966_v17 }
 0x3e9   :  { %v7082_v45 = vpack.c.bf16 %v7030_v21, %v7029_v20 }
 0x3eb   :  { %v6344_v25 = vpop.f32.mrf.mxu2  ;;  %v6357_v26 = vpop.f32.mrf.mxu3  ;;  %v7154_v28 = vrot.slane %v7082_v45, 2  ;;  %v7155_v29 = vrot.slane %v7082_v45, 5 }
 0x3ec   :  { %v6368_v30 = vpop.f32.mrf.mxu0  ;;  %v6381_v31 = vpop.f32.mrf.mxu1 }
 0x3ed   :  { %v7240_v34 = vsel %vm7205_vm12, %v7154_v28, %v7155_v29  ;;  %v6369_v51 = vadd.f32 %v6368_v30, %v5299_v44  ;;  %v6382_v52 = vadd.f32 %v6381_v31, %v5300_v46 }
 0x3ee   :  { %v7241_v36 = vsel %vm7209_vm15, %v7237_v32, %v7240_v34 }
 0x3ef   :  { %9986 = vmatmul.msk.bf16.vlgmr.msra.gmra.mxu0 %vm6043_vm1, %v12442_v8  ;;  %9987 = vmatmul.msk.bf16.vlgmr.msra.gmra.mxu1 %vm6043_vm1, %v12442_v8  ;;  %v7242_v37 = vsel %vm7211_vm0, %v7234_v35, %v7241_v36  ;;  %v6967_v61 = vmul.f32 0.01, %v6369_v51  ;;  %v6968_v62 = vmul.f32 0.01, %v6382_v52  ;;  %vm6903_vm4 = vcmp.ge.f32.partialorder %v6369_v51, 0.0 }
 0x3f0   :  { %9988 = vmatmul.msk.bf16.vlgmr.msra.gmra.mxu2 %vm6043_vm1, %v12442_v8  ;;  %9989 = vmatmul.msk.bf16.vlgmr.msra.gmra.mxu3 %vm6043_vm1, %v12442_v8  ;;  %7328 = vst [vmem:[%s13393_s8 + $0x10] sm:$0xff] %v7242_v37  ;;  %vm6904_vm5 = vcmp.ge.f32.partialorder %v6382_v52, 0.0 }
 0x3f1   :  { %v7031_v6 = vsel %vm6903_vm4, %v6369_v51, %v6967_v61  ;;  %v7032_v7 = vsel %vm6904_vm5, %v6382_v52, %v6968_v62 }
 0x3f2   :  { %v7083_v18 = vpack.c.bf16 %v7032_v7, %v7031_v6 }
 0x3f3   :  { %v6394_v39 = vpop.f32.mrf.mxu2  ;;  %v6407_v40 = vpop.f32.mrf.mxu3 }
 0x3f4   :  { %v6370_v41 = vpop.f32.mrf.mxu0  ;;  %v6383_v4 = vpop.f32.mrf.mxu1  ;;  %v6395_v47 = vadd.f32 %v6394_v39, %v5301_v42  ;;  %v6408_v48 = vadd.f32 %v6407_v40, %v5302_v43  ;;  %v7156_v45 = vrot.slane %v7083_v18, 3 }
 0x3f5   :  { %v5263_v41 = vld [vmem:[%s13390_s5 + $0x20] sm:$0xff] }
 0x3f6   :  { %v6969_v57 = vmul.f32 0.01, %v6395_v47  ;;  %v6970_v58 = vmul.f32 0.01, %v6408_v48  ;;  %vm6905_vm2 = vcmp.ge.f32.partialorder %v6395_v47, 0.0  ;;  %vm6906_vm3 = vcmp.ge.f32.partialorder %v6408_v48, 0.0 }
 0x3f7   :  { %v7245_v35 = vsel %vm7191_vm8, %v7083_v18, %v7156_v45  ;;  %v5309_v46 = vperm.slane %v5263_v41, 2  ;;  %v5311_v52 = vperm.slane %v5263_v41, 4  ;;  %v5314_v6 = vperm.slane %v5263_v41, 7 }
 0x3f8   :  { %v7033_v3 = vsel %vm6905_vm2, %v6395_v47, %v6969_v57  ;;  %v7034_v5 = vsel %vm6906_vm3, %v6408_v48, %v6970_v58  ;;  %v5310_v47 = vperm.slane %v5263_v41, 3  ;;  %v5307_v48 = vperm.slane %v5263_v41, 0 }
 0x3f9   :  { %v7084_v13 = vpack.c.bf16 %v7034_v5, %v7033_v3  ;;  %v5313_v5 = vperm.slane %v5263_v41, 6 }
 0x3fb   :  { %v6396_v53 = vpop.f32.mrf.mxu2  ;;  %v6409_v54 = vpop.f32.mrf.mxu3  ;;  %v7157_v21 = vrot.slane %v7084_v13, 6  ;;  %v7158_v22 = vrot.slane %v7084_v13, 1 }
 0x3fc   :  { %v6420_v55 = vpop.f32.mrf.mxu0  ;;  %v6433_v56 = vpop.f32.mrf.mxu1  ;;  %v5312_v53 = vperm.slane %v5263_v41, 5 }
 0x3fd   :  { %v6421_v59 = vadd.f32 %v6420_v55, %v5303_v49  ;;  %v6434_v60 = vadd.f32 %v6433_v56, %v5304_v50  ;;  %v7248_v30 = vsel %vm7195_vm9, %v7157_v21, %v7158_v22  ;;  %v5308_v49 = vperm.slane %v5263_v41, 1 }
 0x3fe   :  { %v7249_v38 = vsel %vm7199_vm10, %v7245_v35, %v7248_v30 }
 0x3ff   :  { %v6971_v63 = vmul.f32 0.01, %v6421_v59  ;;  %v6972_v0 = vmul.f32 0.01, %v6434_v60  ;;  %9990 = vmatmul.msk.bf16.vlgmr.msrb.gmra.mxu0 %vm6043_vm1, %v12442_v8  ;;  %9991 = vmatmul.msk.bf16.vlgmr.msrb.gmra.mxu1 %vm6043_vm1, %v12442_v8  ;;  %vm6907_vm6 = vcmp.ge.f32.partialorder %v6421_v59, 0.0  ;;  %vm6908_vm7 = vcmp.ge.f32.partialorder %v6434_v60, 0.0 }
 0x400   :  { %9992 = vmatmul.msk.bf16.vlgmr.msrb.gmra.mxu2 %vm6043_vm1, %v12442_v8  ;;  %9993 = vmatmul.msk.bf16.vlgmr.msrb.gmra.mxu3 %vm6043_vm1, %v12442_v8 }
 0x401   :  { %v7035_v9 = vsel %vm6907_vm6, %v6421_v59, %v6971_v63  ;;  %v7036_v10 = vsel %vm6908_vm7, %v6434_v60, %v6972_v0 }
 0x402   :  { %v7085_v19 = vpack.c.bf16 %v7036_v10, %v7035_v9 }
 0x403   :  { %v6446_v11 = vpop.f32.mrf.mxu2  ;;  %v6459_v12 = vpop.f32.mrf.mxu3 }
 0x404   :  { %v6447_v14 = vadd.f32 %v6446_v11, %v5305_v1  ;;  %v6460_v15 = vadd.f32 %v6459_v12, %v5306_v2  ;;  %v6422_v16 = vpop.f32.mrf.mxu0  ;;  %v6435_v17 = vpop.f32.mrf.mxu1  ;;  %v7159_v25 = vrot.slane %v7085_v19, 4  ;;  %v7160_v26 = vrot.slane %v7085_v19, 7 }
 0x406   :  { %vm6909_vm13 = vcmp.ge.f32.partialorder %v6447_v14, 0.0  ;;  %v6973_v20 = vmul.f32 0.01, %v6447_v14  ;;  %vm6910_vm1 = vcmp.ge.f32.partialorder %v6460_v15, 0.0  ;;  %v6974_v8 = vmul.f32 0.01, %v6460_v15 }
 0x407   :  { %v7252_v36 = vsel %vm7201_vm11, %v7159_v25, %v7160_v26 }
 0x408   :  { %v7037_v23 = vsel %vm6909_vm13, %v6447_v14, %v6973_v20  ;;  %v7038_v24 = vsel %vm6910_vm1, %v6460_v15, %v6974_v8 }
 0x409   :  { %v7086_v27 = vpack.c.bf16 %v7038_v24, %v7037_v23 }
 0x40b   :  { %v6448_v28 = vpop.f32.mrf.mxu2  ;;  %v6461_v29 = vpop.f32.mrf.mxu3  ;;  %v7161_v31 = vrot.slane %v7086_v27, 2  ;;  %v7162_v33 = vrot.slane %v7086_v27, 5 }
 0x40c   :  { %v6472_v32 = vpop.f32.mrf.mxu0  ;;  %v6485_v34 = vpop.f32.mrf.mxu1 }
 0x40d   :  { %v7255_v37 = vsel %vm7205_vm12, %v7161_v31, %v7162_v33  ;;  %v6473_v54 = vadd.f32 %v6472_v32, %v5307_v48  ;;  %v6486_v55 = vadd.f32 %v6485_v34, %v5308_v49 }
 0x40e   :  { %v7256_v39 = vsel %vm7209_vm15, %v7252_v36, %v7255_v37 }
 0x40f   :  { %v7257_v40 = vsel %vm7211_vm0, %v7249_v38, %v7256_v39  ;;  %v6975_v0 = vmul.f32 0.01, %v6473_v54  ;;  %v6976_v1 = vmul.f32 0.01, %v6486_v55  ;;  %vm6911_vm3 = vcmp.ge.f32.partialorder %v6473_v54, 0.0 }
 0x410   :  { %7329 = vst [vmem:[%s13393_s8 + $0x18] sm:$0xff] %v7257_v40  ;;  %vm6912_vm4 = vcmp.ge.f32.partialorder %v6486_v55, 0.0 }
 0x411   :  { %v7039_v10 = vsel %vm6911_vm3, %v6473_v54, %v6975_v0  ;;  %v7040_v11 = vsel %vm6912_vm4, %v6486_v55, %v6976_v1 }
 0x412   :  { %v7087_v8 = vpack.c.bf16 %v7040_v11, %v7039_v10 }
 0x413   :  { %v6498_v4 = vpop.f32.mrf.mxu2  ;;  %v6511_v42 = vpop.f32.mrf.mxu3 }
 0x414   :  { %v6474_v43 = vpop.f32.mrf.mxu0  ;;  %v6487_v44 = vpop.f32.mrf.mxu1  ;;  %v6499_v50 = vadd.f32 %v6498_v4, %v5309_v46  ;;  %v6512_v51 = vadd.f32 %v6511_v42, %v5310_v47  ;;  %v7163_v27 = vrot.slane %v7087_v8, 3 }
 0x415   :  { %v5264_v43 = vld [vmem:[%s13390_s5 + $0x28] sm:$0xff] }
 0x416   :  { %v6977_v60 = vmul.f32 0.01, %v6499_v50  ;;  %v6978_v61 = vmul.f32 0.01, %v6512_v51  ;;  %vm6913_vm14 = vcmp.ge.f32.partialorder %v6499_v50, 0.0  ;;  %vm6914_vm2 = vcmp.ge.f32.partialorder %v6512_v51, 0.0 }
 0x417   :  { %v7260_v38 = vsel %vm7191_vm8, %v7087_v8, %v7163_v27  ;;  %v5317_v49 = vperm.slane %v5264_v43, 2  ;;  %v5319_v55 = vperm.slane %v5264_v43, 4  ;;  %v5322_v10 = vperm.slane %v5264_v43, 7 }
 0x418   :  { %v7041_v7 = vsel %vm6913_vm14, %v6499_v50, %v6977_v60  ;;  %v7042_v9 = vsel %vm6914_vm2, %v6512_v51, %v6978_v61  ;;  %v5318_v50 = vperm.slane %v5264_v43, 3  ;;  %v5315_v51 = vperm.slane %v5264_v43, 0 }
 0x419   :  { %v7088_v16 = vpack.c.bf16 %v7042_v9, %v7041_v7  ;;  %v5321_v9 = vperm.slane %v5264_v43, 6 }
 0x41b   :  { %v6500_v56 = vpop.f32.mrf.mxu2  ;;  %v6513_v57 = vpop.f32.mrf.mxu3  ;;  %v7164_v24 = vrot.slane %v7088_v16, 6  ;;  %v7165_v45 = vrot.slane %v7088_v16, 1 }
 0x41c   :  { %v6524_v58 = vpop.f32.mrf.mxu0  ;;  %v6537_v59 = vpop.f32.mrf.mxu1  ;;  %v5320_v56 = vperm.slane %v5264_v43, 5 }
 0x41d   :  { %v6525_v62 = vadd.f32 %v6524_v58, %v5311_v52  ;;  %v6538_v63 = vadd.f32 %v6537_v59, %v5312_v53  ;;  %v7263_v32 = vsel %vm7195_vm9, %v7164_v24, %v7165_v45  ;;  %v5316_v52 = vperm.slane %v5264_v43, 1 }
 0x41e   :  { %v7264_v41 = vsel %vm7199_vm10, %v7260_v38, %v7263_v32 }
 0x41f   :  { %v6979_v2 = vmul.f32 0.01, %v6525_v62  ;;  %v6980_v3 = vmul.f32 0.01, %v6538_v63  ;;  %vm6915_vm5 = vcmp.ge.f32.partialorder %v6525_v62, 0.0  ;;  %vm6916_vm6 = vcmp.ge.f32.partialorder %v6538_v63, 0.0 }
 0x421   :  { %v7043_v12 = vsel %vm6915_vm5, %v6525_v62, %v6979_v2  ;;  %v7044_v13 = vsel %vm6916_vm6, %v6538_v63, %v6980_v3 }
 0x422   :  { %v7089_v21 = vpack.c.bf16 %v7044_v13, %v7043_v12 }
 0x423   :  { %v6550_v14 = vpop.f32.mrf.mxu2  ;;  %v6563_v15 = vpop.f32.mrf.mxu3 }
 0x424   :  { %v6551_v17 = vadd.f32 %v6550_v14, %v5313_v5  ;;  %v6564_v18 = vadd.f32 %v6563_v15, %v5314_v6  ;;  %v6526_v19 = vpop.f32.mrf.mxu0  ;;  %v6539_v20 = vpop.f32.mrf.mxu1  ;;  %v7166_v28 = vrot.slane %v7089_v21, 4  ;;  %v7167_v29 = vrot.slane %v7089_v21, 7 }
 0x426   :  { %vm6917_vm7 = vcmp.ge.f32.partialorder %v6551_v17, 0.0  ;;  %v6981_v22 = vmul.f32 0.01, %v6551_v17  ;;  %vm6918_vm13 = vcmp.ge.f32.partialorder %v6564_v18, 0.0  ;;  %v6982_v23 = vmul.f32 0.01, %v6564_v18 }
 0x427   :  { %v7267_v39 = vsel %vm7201_vm11, %v7166_v28, %v7167_v29 }
 0x428   :  { %v7045_v25 = vsel %vm6917_vm7, %v6551_v17, %v6981_v22  ;;  %v7046_v26 = vsel %vm6918_vm13, %v6564_v18, %v6982_v23 }
 0x429   :  { %v7090_v30 = vpack.c.bf16 %v7046_v26, %v7045_v25 }
 0x42b   :  { %v6552_v31 = vpop.f32.mrf.mxu2  ;;  %v6565_v33 = vpop.f32.mrf.mxu3  ;;  %v7168_v34 = vrot.slane %v7090_v30, 2  ;;  %v7169_v35 = vrot.slane %v7090_v30, 5 }
 0x42c   :  { %v6576_v36 = vpop.f32.mrf.mxu0  ;;  %v6589_v37 = vpop.f32.mrf.mxu1 }
 0x42d   :  { %v7270_v40 = vsel %vm7205_vm12, %v7168_v34, %v7169_v35  ;;  %v6577_v57 = vadd.f32 %v6576_v36, %v5315_v51  ;;  %v6590_v58 = vadd.f32 %v6589_v37, %v5316_v52 }
 0x42e   :  { %v7271_v4 = vsel %vm7209_vm15, %v7267_v39, %v7270_v40 }
 0x42f   :  { %v7272_v42 = vsel %vm7211_vm0, %v7264_v41, %v7271_v4  ;;  %v6983_v3 = vmul.f32 0.01, %v6577_v57  ;;  %v6984_v5 = vmul.f32 0.01, %v6590_v58  ;;  %vm6919_vm2 = vcmp.ge.f32.partialorder %v6577_v57, 0.0 }
 0x430   :  { %7330 = vst [vmem:[%s13393_s8 + $0x20] sm:$0xff] %v7272_v42  ;;  %vm6920_vm3 = vcmp.ge.f32.partialorder %v6590_v58, 0.0 }
 0x431   :  { %v7047_v13 = vsel %vm6919_vm2, %v6577_v57, %v6983_v3  ;;  %v7048_v14 = vsel %vm6920_vm3, %v6590_v58, %v6984_v5 }
 0x432   :  { %v7091_v23 = vpack.c.bf16 %v7048_v14, %v7047_v13 }
 0x433   :  { %v6602_v44 = vpop.f32.mrf.mxu2  ;;  %v6615_v46 = vpop.f32.mrf.mxu3 }
 0x434   :  { %v6578_v47 = vpop.f32.mrf.mxu0  ;;  %v6591_v48 = vpop.f32.mrf.mxu1  ;;  %v6603_v53 = vadd.f32 %v6602_v44, %v5317_v49  ;;  %v6616_v54 = vadd.f32 %v6615_v46, %v5318_v50  ;;  %v7170_v30 = vrot.slane %v7091_v23, 3 }
 0x435   :  { %v5265_v47 = vld [vmem:[%s13390_s5 + $0x30] sm:$0xff] }
 0x436   :  { %v6985_v63 = vmul.f32 0.01, %v6603_v53  ;;  %v6986_v0 = vmul.f32 0.01, %v6616_v54  ;;  %vm6921_vm1 = vcmp.ge.f32.partialorder %v6603_v53, 0.0  ;;  %vm6922_vm14 = vcmp.ge.f32.partialorder %v6616_v54, 0.0 }
 0x437   :  { %v7275_v41 = vsel %vm7191_vm8, %v7091_v23, %v7170_v30  ;;  %v5325_v52 = vperm.slane %v5265_v47, 2  ;;  %v5327_v58 = vperm.slane %v5265_v47, 4  ;;  %v5330_v13 = vperm.slane %v5265_v47, 7 }
 0x438   :  { %v7049_v11 = vsel %vm6921_vm1, %v6603_v53, %v6985_v63  ;;  %v7050_v12 = vsel %vm6922_vm14, %v6616_v54, %v6986_v0  ;;  %v5326_v53 = vperm.slane %v5265_v47, 3  ;;  %v5323_v54 = vperm.slane %v5265_v47, 0 }
 0x439   :  { %v7092_v19 = vpack.c.bf16 %v7050_v12, %v7049_v11  ;;  %v5329_v12 = vperm.slane %v5265_v47, 6 }
 0x43b   :  { %v6604_v59 = vpop.f32.mrf.mxu2  ;;  %v6617_v60 = vpop.f32.mrf.mxu3  ;;  %v7171_v26 = vrot.slane %v7092_v19, 6  ;;  %v7172_v27 = vrot.slane %v7092_v19, 1 }
 0x43c   :  { %v6628_v61 = vpop.f32.mrf.mxu0  ;;  %v6641_v62 = vpop.f32.mrf.mxu1  ;;  %v5328_v59 = vperm.slane %v5265_v47, 5 }
 0x43d   :  { %v6629_v1 = vadd.f32 %v6628_v61, %v5319_v55  ;;  %v6642_v2 = vadd.f32 %v6641_v62, %v5320_v56  ;;  %v7278_v36 = vsel %vm7195_vm9, %v7171_v26, %v7172_v27  ;;  %v5324_v55 = vperm.slane %v5265_v47, 1 }
 0x43e   :  { %v7279_v43 = vsel %vm7199_vm10, %v7275_v41, %v7278_v36 }
 0x43f   :  { %v6987_v6 = vmul.f32 0.01, %v6629_v1  ;;  %v6988_v7 = vmul.f32 0.01, %v6642_v2  ;;  %vm6923_vm4 = vcmp.ge.f32.partialorder %v6629_v1, 0.0  ;;  %vm6924_vm5 = vcmp.ge.f32.partialorder %v6642_v2, 0.0 }
 0x441   :  { %v7051_v15 = vsel %vm6923_vm4, %v6629_v1, %v6987_v6  ;;  %v7052_v16 = vsel %vm6924_vm5, %v6642_v2, %v6988_v7 }
 0x442   :  { %v7093_v24 = vpack.c.bf16 %v7052_v16, %v7051_v15 }
 0x443   :  { %v6654_v17 = vpop.f32.mrf.mxu2  ;;  %v6667_v18 = vpop.f32.mrf.mxu3 }
 0x444   :  { %v6655_v20 = vadd.f32 %v6654_v17, %v5321_v9  ;;  %v6668_v8 = vadd.f32 %v6667_v18, %v5322_v10  ;;  %v6630_v21 = vpop.f32.mrf.mxu0  ;;  %v6643_v22 = vpop.f32.mrf.mxu1  ;;  %v7173_v31 = vrot.slane %v7093_v24, 4  ;;  %v7174_v33 = vrot.slane %v7093_v24, 7 }
 0x446   :  { %vm6925_vm6 = vcmp.ge.f32.partialorder %v6655_v20, 0.0  ;;  %v6989_v45 = vmul.f32 0.01, %v6655_v20  ;;  %vm6926_vm7 = vcmp.ge.f32.partialorder %v6668_v8, 0.0  ;;  %v6990_v25 = vmul.f32 0.01, %v6668_v8 }
 0x447   :  { %v7282_v4 = vsel %vm7201_vm11, %v7173_v31, %v7174_v33 }
 0x448   :  { %v7053_v28 = vsel %vm6925_vm6, %v6655_v20, %v6989_v45  ;;  %v7054_v29 = vsel %vm6926_vm7, %v6668_v8, %v6990_v25 }
 0x449   :  { %v7094_v32 = vpack.c.bf16 %v7054_v29, %v7053_v28 }
 0x44b   :  { %v6656_v34 = vpop.f32.mrf.mxu2  ;;  %v6669_v35 = vpop.f32.mrf.mxu3  ;;  %v7175_v37 = vrot.slane %v7094_v32, 2  ;;  %v7176_v38 = vrot.slane %v7094_v32, 5 }
 0x44c   :  { %v6680_v39 = vpop.f32.mrf.mxu0  ;;  %v6693_v40 = vpop.f32.mrf.mxu1 }
 0x44d   :  { %v7285_v42 = vsel %vm7205_vm12, %v7175_v37, %v7176_v38  ;;  %v6681_v60 = vadd.f32 %v6680_v39, %v5323_v54  ;;  %v6694_v61 = vadd.f32 %v6693_v40, %v5324_v55 }
 0x44e   :  { %v7286_v44 = vsel %vm7209_vm15, %v7282_v4, %v7285_v42 }
 0x44f   :  { %v7287_v46 = vsel %vm7211_vm0, %v7279_v43, %v7286_v44  ;;  %v6991_v7 = vmul.f32 0.01, %v6681_v60  ;;  %v6992_v9 = vmul.f32 0.01, %v6694_v61  ;;  %vm6927_vm14 = vcmp.ge.f32.partialorder %v6681_v60, 0.0 }
 0x450   :  { %7331 = vst [vmem:[%s13393_s8 + $0x28] sm:$0xff] %v7287_v46  ;;  %vm6928_vm2 = vcmp.ge.f32.partialorder %v6694_v61, 0.0 }
 0x451   :  { %v7055_v16 = vsel %vm6927_vm14, %v6681_v60, %v6991_v7  ;;  %v7056_v17 = vsel %vm6928_vm2, %v6694_v61, %v6992_v9 }
 0x452   :  { %v7095_v25 = vpack.c.bf16 %v7056_v17, %v7055_v16 }
 0x453   :  { %v6706_v48 = vpop.f32.mrf.mxu2  ;;  %v6719_v49 = vpop.f32.mrf.mxu3 }
 0x454   :  { %v6682_v50 = vpop.f32.mrf.mxu0  ;;  %v6695_v51 = vpop.f32.mrf.mxu1  ;;  %v6707_v56 = vadd.f32 %v6706_v48, %v5325_v52  ;;  %v6720_v57 = vadd.f32 %v6719_v49, %v5326_v53  ;;  %v7177_v32 = vrot.slane %v7095_v25, 3 }
 0x455   :  { %v5266_v50 = vld [vmem:[%s13390_s5 + $0x38] sm:$0xff] }
 0x456   :  { %v6993_v2 = vmul.f32 0.01, %v6707_v56  ;;  %v6994_v3 = vmul.f32 0.01, %v6720_v57  ;;  %vm6929_vm13 = vcmp.ge.f32.partialorder %v6707_v56, 0.0  ;;  %vm6930_vm1 = vcmp.ge.f32.partialorder %v6720_v57, 0.0 }
 0x457   :  { %v7290_v43 = vsel %vm7191_vm8, %v7095_v25, %v7177_v32  ;;  %v5333_v55 = vperm.slane %v5266_v50, 2  ;;  %v5335_v61 = vperm.slane %v5266_v50, 4  ;;  %v5338_v16 = vperm.slane %v5266_v50, 7 }
 0x458   :  { %v7057_v14 = vsel %vm6929_vm13, %v6707_v56, %v6993_v2  ;;  %v7058_v15 = vsel %vm6930_vm1, %v6720_v57, %v6994_v3  ;;  %v5334_v56 = vperm.slane %v5266_v50, 3  ;;  %v5331_v57 = vperm.slane %v5266_v50, 0 }
 0x459   :  { %v7096_v21 = vpack.c.bf16 %v7058_v15, %v7057_v14  ;;  %v5337_v15 = vperm.slane %v5266_v50, 6 }
 0x45b   :  { %v6708_v62 = vpop.f32.mrf.mxu2  ;;  %v6721_v63 = vpop.f32.mrf.mxu3  ;;  %v7178_v29 = vrot.slane %v7096_v21, 6  ;;  %v7179_v30 = vrot.slane %v7096_v21, 1 }
 0x45c   :  { %v6732_v0 = vpop.f32.mrf.mxu0  ;;  %v6745_v1 = vpop.f32.mrf.mxu1  ;;  %v5336_v62 = vperm.slane %v5266_v50, 5 }
 0x45d   :  { %v6733_v5 = vadd.f32 %v6732_v0, %v5327_v58  ;;  %v6746_v6 = vadd.f32 %v6745_v1, %v5328_v59  ;;  %v7293_v39 = vsel %vm7195_vm9, %v7178_v29, %v7179_v30  ;;  %v5332_v58 = vperm.slane %v5266_v50, 1 }
 0x45e   :  { %v7294_v47 = vsel %vm7199_vm10, %v7290_v43, %v7293_v39 }
 0x45f   :  { %v6995_v10 = vmul.f32 0.01, %v6733_v5  ;;  %v6996_v11 = vmul.f32 0.01, %v6746_v6  ;;  %vm6931_vm3 = vcmp.ge.f32.partialorder %v6733_v5, 0.0  ;;  %vm6932_vm4 = vcmp.ge.f32.partialorder %v6746_v6, 0.0 }
 0x461   :  { %v7059_v18 = vsel %vm6931_vm3, %v6733_v5, %v6995_v10  ;;  %v7060_v19 = vsel %vm6932_vm4, %v6746_v6, %v6996_v11 }
 0x462   :  { %v7097_v26 = vpack.c.bf16 %v7060_v19, %v7059_v18 }
 0x463   :  { %v6758_v20 = vpop.f32.mrf.mxu2  ;;  %v6771_v8 = vpop.f32.mrf.mxu3 }
 0x464   :  { %v6759_v22 = vadd.f32 %v6758_v20, %v5329_v12  ;;  %v6772_v23 = vadd.f32 %v6771_v8, %v5330_v13  ;;  %v6734_v24 = vpop.f32.mrf.mxu0  ;;  %v6747_v45 = vpop.f32.mrf.mxu1  ;;  %v7180_v34 = vrot.slane %v7097_v26, 4  ;;  %v7181_v35 = vrot.slane %v7097_v26, 7 }
 0x466   :  { %vm6933_vm5 = vcmp.ge.f32.partialorder %v6759_v22, 0.0  ;;  %v6997_v27 = vmul.f32 0.01, %v6759_v22  ;;  %vm6934_vm6 = vcmp.ge.f32.partialorder %v6772_v23, 0.0  ;;  %v6998_v28 = vmul.f32 0.01, %v6772_v23 }
 0x467   :  { %v7297_v44 = vsel %vm7201_vm11, %v7180_v34, %v7181_v35 }
 0x468   :  { %v7061_v31 = vsel %vm6933_vm5, %v6759_v22, %v6997_v27  ;;  %v7062_v33 = vsel %vm6934_vm6, %v6772_v23, %v6998_v28 }
 0x469   :  { %v7098_v36 = vpack.c.bf16 %v7062_v33, %v7061_v31 }
 0x46b   :  { %v6760_v37 = vpop.f32.mrf.mxu2  ;;  %v6773_v38 = vpop.f32.mrf.mxu3  ;;  %v7182_v40 = vrot.slane %v7098_v36, 2  ;;  %v7183_v41 = vrot.slane %v7098_v36, 5 }
 0x46c   :  { %v6784_v4 = vpop.f32.mrf.mxu0  ;;  %v6797_v42 = vpop.f32.mrf.mxu1 }
 0x46d   :  { %v7300_v46 = vsel %vm7205_vm12, %v7182_v40, %v7183_v41  ;;  %v6785_v63 = vadd.f32 %v6784_v4, %v5331_v57  ;;  %v6798_v0 = vadd.f32 %v6797_v42, %v5332_v58 }
 0x46e   :  { %v7301_v48 = vsel %vm7209_vm15, %v7297_v44, %v7300_v46 }
 0x46f   :  { %v7302_v49 = vsel %vm7211_vm0, %v7294_v47, %v7301_v48  ;;  %v6999_v11 = vmul.f32 0.01, %v6785_v63  ;;  %v7000_v12 = vmul.f32 0.01, %v6798_v0  ;;  %vm6935_vm1 = vcmp.ge.f32.partialorder %v6785_v63, 0.0 }
 0x470   :  { %7332 = vst [vmem:[%s13393_s8 + $0x30] sm:$0xff] %v7302_v49  ;;  %vm6936_vm14 = vcmp.ge.f32.partialorder %v6798_v0, 0.0 }
 0x471   :  { %v7063_v19 = vsel %vm6935_vm1, %v6785_v63, %v6999_v11  ;;  %v7064_v20 = vsel %vm6936_vm14, %v6798_v0, %v7000_v12 }
 0x472   :  { %v7099_v28 = vpack.c.bf16 %v7064_v20, %v7063_v19 }
 0x473   :  { %v6810_v51 = vpop.f32.mrf.mxu2  ;;  %v6823_v52 = vpop.f32.mrf.mxu3 }
 0x474   :  { %v6786_v53 = vpop.f32.mrf.mxu0  ;;  %v6799_v54 = vpop.f32.mrf.mxu1  ;;  %v6811_v59 = vadd.f32 %v6810_v51, %v5333_v55  ;;  %v6824_v60 = vadd.f32 %v6823_v52, %v5334_v56  ;;  %v7184_v36 = vrot.slane %v7099_v28, 3 }
 0x476   :  { %v7001_v6 = vmul.f32 0.01, %v6811_v59  ;;  %v7002_v7 = vmul.f32 0.01, %v6824_v60  ;;  %vm6937_vm7 = vcmp.ge.f32.partialorder %v6811_v59, 0.0  ;;  %vm6938_vm13 = vcmp.ge.f32.partialorder %v6824_v60, 0.0 }
 0x477   :  { %v7305_v44 = vsel %vm7191_vm8, %v7099_v28, %v7184_v36 }
 0x478   :  { %v7065_v17 = vsel %vm6937_vm7, %v6811_v59, %v7001_v6  ;;  %v7066_v18 = vsel %vm6938_vm13, %v6824_v60, %v7002_v7 }
 0x479   :  { %v7100_v24 = vpack.c.bf16 %v7066_v18, %v7065_v17 }
 0x47b   :  { %v6812_v1 = vpop.f32.mrf.mxu2  ;;  %v6825_v2 = vpop.f32.mrf.mxu3  ;;  %v7185_v33 = vrot.slane %v7100_v24, 6  ;;  %v7186_v32 = vrot.slane %v7100_v24, 1 }
 0x47c   :  { %v6836_v3 = vpop.f32.mrf.mxu0  ;;  %v6849_v5 = vpop.f32.mrf.mxu1 }
 0x47d   :  { %v6837_v9 = vadd.f32 %v6836_v3, %v5335_v61  ;;  %v6850_v10 = vadd.f32 %v6849_v5, %v5336_v62  ;;  %v7308_v4 = vsel %vm7195_vm9, %v7185_v33, %v7186_v32 }
 0x47e   :  { %v7309_v48 = vsel %vm7199_vm10, %v7305_v44, %v7308_v4 }
 0x47f   :  { %v7003_v13 = vmul.f32 0.01, %v6837_v9  ;;  %v7004_v14 = vmul.f32 0.01, %v6850_v10  ;;  %vm6939_vm2 = vcmp.ge.f32.partialorder %v6837_v9, 0.0  ;;  %vm6940_vm3 = vcmp.ge.f32.partialorder %v6850_v10, 0.0 }
 0x481   :  { %v7067_v8 = vsel %vm6939_vm2, %v6837_v9, %v7003_v13  ;;  %v7068_v21 = vsel %vm6940_vm3, %v6850_v10, %v7004_v14 }
 0x482   :  { %v7101_v29 = vpack.c.bf16 %v7068_v21, %v7067_v8 }
 0x483   :  { %v6862_v22 = vpop.f32.mrf.mxu2  ;;  %v6875_v23 = vpop.f32.mrf.mxu3 }
 0x484   :  { %v6863_v45 = vadd.f32 %v6862_v22, %v5337_v15  ;;  %v6876_v25 = vadd.f32 %v6875_v23, %v5338_v16  ;;  %v6838_v26 = vpop.f32.mrf.mxu0  ;;  %v6851_v27 = vpop.f32.mrf.mxu1  ;;  %v7187_v37 = vrot.slane %v7101_v29, 4  ;;  %v7188_v38 = vrot.slane %v7101_v29, 7 }
 0x486   :  { %vm6941_vm4 = vcmp.ge.f32.partialorder %v6863_v45, 0.0  ;;  %v7005_v30 = vmul.f32 0.01, %v6863_v45  ;;  %vm6942_vm5 = vcmp.ge.f32.partialorder %v6876_v25, 0.0  ;;  %v7006_v31 = vmul.f32 0.01, %v6876_v25 }
 0x487   :  { %v7312_v46 = vsel %vm7201_vm11, %v7187_v37, %v7188_v38 }
 0x488   :  { %v7069_v34 = vsel %vm6941_vm4, %v6863_v45, %v7005_v30  ;;  %v7070_v35 = vsel %vm6942_vm5, %v6876_v25, %v7006_v31 }
 0x489   :  { %v7102_v39 = vpack.c.bf16 %v7070_v35, %v7069_v34 }
 0x48b   :  { %v6864_v40 = vpop.f32.mrf.mxu2  ;;  %v6877_v41 = vpop.f32.mrf.mxu3  ;;  %v7189_v42 = vrot.slane %v7102_v39, 2  ;;  %v7190_v43 = vrot.slane %v7102_v39, 5 }
 0x48d   :  { %v7315_v47 = vsel %vm7205_vm12, %v7189_v42, %v7190_v43 }
 0x48e   :  { %v7316_v49 = vsel %vm7209_vm15, %v7312_v46, %v7315_v47 }
 0x48f   :  { %v7317_v50 = vsel %vm7211_vm0, %v7309_v48, %v7316_v49 }
 0x490   :  { %7333 = vst [vmem:[%s13393_s8 + $0x38] sm:$0xff] %v7317_v50 }
 0x491   :  { %10688 = dma.done.wait [#allocation3], 32  }
 0x492   :  { %10689 = vsyncadd [#allocation3], 4294967264 }
 0x493   :  { %10690 = dma.done.wait [#allocation5], 32  }
 0x494   :  { %10691 = vsyncadd [#allocation5], 4294967264 }
 0x495   :  { %7368 = vsyncpa [#allocation3], 1 }
 0x496   :  { %7369 = vsyncpa [#allocation5], 1 }

</bundles_post_ra>
